<compile_context>
chip_gen: v7x
topology: tpu7x:2x2x1
jax: 0.10.0
libtpu: 0.0.40
codegen_flags: <defaults>
</compile_context>

<pallas_src>
import functools

import jax
import jax.numpy as jnp
from jax.experimental import pallas as pl
from jax.experimental.pallas import tpu as pltpu

EPS = 1e-5
PAD_COL = 16   # bf16 sublane-tile aligned column where the interior starts


def _conv3x3_bf16(xpad_ref, w9, H, W, Cin):
    """3x3 / stride-1 conv over the zero-padded bf16 image held in xpad_ref.

    xpad_ref: (H+2, W + 2*PAD_COL, Cin) bf16 scratch; logical padded pixel
              (yp, xp) lives at [yp, xp + PAD_COL - 1]; the 1-px halo is zero.
    w9:       (9*Cin, Cout) bf16, (dy, dx, cin) major->minor contraction order.
    returns   (H*W, Cout) f32 (fp32 accumulation inside the MXU).
    """
    col0 = PAD_COL - 1
    taps = [xpad_ref[dy:dy + H, col0 + dx:col0 + dx + W, :]
            for dy in range(3) for dx in range(3)]          # 9 x (H, W, Cin)
    patch = jnp.concatenate(taps, axis=-1).reshape(H * W, 9 * Cin)  # bf16
    # Single MXU contraction over K = 9*Cin: no per-tap VALU accumulation.
    return jnp.dot(patch, w9, preferred_element_type=jnp.float32)


def basic_block_kernel(x_ref, w1_ref, w2_ref, bn_ref, o_ref,
                       out1_ref, xpad_ref, stat_ref, *, H, W):
    # grid = (phase, sample); phase is the outer (slow) axis.
    p = pl.program_id(0)
    i = pl.program_id(1)
    N, _, C = o_ref.shape
    inv_cnt = 1.0 / float(N * H * W)

    @pl.when(jnp.logical_and(p == 0, i == 0))
    def _init():
        stat_ref[...] = jnp.zeros_like(stat_ref)   # BN partial sums / coeffs
        xpad_ref[...] = jnp.zeros_like(xpad_ref)   # zero halo, set once

    @pl.when(p == 0)
    def _phase0_conv1():
        # place sample i (cast to bf16) into the padded scratch interior
        xpad_ref[1:H + 1, PAD_COL:PAD_COL + W, :] = \
            x_ref[0].astype(jnp.bfloat16)
        acc1 = _conv3x3_bf16(xpad_ref, w1_ref[...], H, W, C)    # (H*W, C) f32
        out1_ref[i] = acc1.astype(jnp.bfloat16)
        # single-pass BN1 statistics (sum, sum of squares) from the fp32 acc
        stat_ref[0:1, :] = stat_ref[0:1, :] + jnp.sum(acc1, axis=0,
                                                      keepdims=True)
        stat_ref[1:2, :] = stat_ref[1:2, :] + jnp.sum(acc1 * acc1, axis=0,
                                                      keepdims=True)

    @pl.when(p == 1)
    def _phase1_bn1_relu_conv2():
        @pl.when(i == 0)
        def _finalize_bn1():
            mean = stat_ref[0:1, :] * inv_cnt
            var = stat_ref[1:2, :] * inv_cnt - mean * mean
            scale = bn_ref[0:1, :] * jax.lax.rsqrt(var + EPS)
            stat_ref[4:5, :] = scale
            stat_ref[5:6, :] = bn_ref[1:2, :] - mean * scale

        a = jnp.maximum(out1_ref[i].astype(jnp.float32) * stat_ref[4:5, :]
                        + stat_ref[5:6, :], 0.0)                # relu(bn1(.))
        xpad_ref[1:H + 1, PAD_COL:PAD_COL + W, :] = \
            a.astype(jnp.bfloat16).reshape(H, W, C)
        acc2 = _conv3x3_bf16(xpad_ref, w2_ref[...], H, W, C)    # (H*W, C) f32
        # park raw conv2 directly in the VMEM-resident output block
        o_ref[i] = acc2
        stat_ref[2:3, :] = stat_ref[2:3, :] + jnp.sum(acc2, axis=0,
                                                      keepdims=True)
        stat_ref[3:4, :] = stat_ref[3:4, :] + jnp.sum(acc2 * acc2, axis=0,
                                                      keepdims=True)

    @pl.when(p == 2)
    def _phase2_bn2_add_relu():
        @pl.when(i == 0)
        def _finalize_bn2():
            mean = stat_ref[2:3, :] * inv_cnt
            var = stat_ref[3:4, :] * inv_cnt - mean * mean
            scale = bn_ref[2:3, :] * jax.lax.rsqrt(var + EPS)
            stat_ref[6:7, :] = scale
            stat_ref[7:8, :] = bn_ref[3:4, :] - mean * scale

        y = o_ref[i] * stat_ref[6:7, :] + stat_ref[7:8, :]      # bn2, (H*W, C)
        y = y + x_ref[0].reshape(H * W, C)                      # residual (f32)
        o_ref[i] = jnp.maximum(y, 0.0)


def basic_block_forward(x_nchw, params):
    """x_nchw: (N, C, H, W) float32 -> (N, C, H, W) float32."""
    w1, g1, b1, w2, g2, b2 = params
    N, C, H, W = x_nchw.shape
    assert w1.shape == (3, 3, C, C) and w2.shape == (3, 3, C, C), \
        "stride=1 / downsample=None BasicBlock requires inplanes == planes"
    assert W % 8 == 0, \
        "W must be a multiple of 8 so (H,W,C)<->(H*W,C) reshapes are free"

    # one transpose into NHWC (channels on the lane axis), one back at the end
    x = jnp.transpose(x_nchw, (0, 2, 3, 1))
    # (3,3,Cin,Cout) -> (9*Cin, Cout), (dy,dx,cin)-major, bf16 for the MXU
    w1s = w1.reshape(9 * C, C).astype(jnp.bfloat16)
    w2s = w2.reshape(9 * C, C).astype(jnp.bfloat16)
    bnp = jnp.concatenate([g1, b1, g2, b2], axis=0).astype(jnp.float32)  # (4,C)

    # shape-dependent VMEM budget for the resident set (+25% headroom)
    resident = (N * H * W * C * 4                        # output (f32, resident)
                + N * H * W * C * 2                      # out1 scratch (bf16)
                + (H + 2) * (W + 2 * PAD_COL) * C * 2    # padded image (bf16)
                + 8 * C * 4                              # BN stats / coeffs
                + 2 * H * W * C * 4                      # x block, double buf
                + 2 * 2 * 9 * C * C * 2                  # weight slabs
                + 2 * 4 * C * 4)                         # bn affine
    vmem_limit = min(max(int(resident * 1.25), 32 * 1024 * 1024),
                     100 * 1024 * 1024)
    # TODO(synk): for v7x (64 MiB VMEM) and layer-1-sized blocks, tile H into
    # row strips with a 1-row halo instead of relying on the limit alone.

    out_flat = pl.pallas_call(
        functools.partial(basic_block_kernel, H=H, W=W),
        out_shape=jax.ShapeDtypeStruct((N, H * W, C), jnp.float32),
        grid=(3, N),                       # (phase, sample), phase outermost
        in_specs=[
            # x is only read in phases 0 and 2: pin its sample index to 0
            # during phase 1 so the block is not re-fetched N times for nothing
            pl.BlockSpec((1, H, W, C),
                         lambda p, i: (jnp.where(p == 1, 0, i), 0, 0, 0)),
            pl.BlockSpec((9 * C, C), lambda p, i: (0, 0)),          # w1 resident
            pl.BlockSpec((9 * C, C), lambda p, i: (0, 0)),          # w2 resident
            pl.BlockSpec((4, C), lambda p, i: (0, 0)),              # bn affine
        ],
        # constant index map => output block stays in VMEM for the whole grid
        # and is written back to HBM exactly once at the end
        out_specs=pl.BlockSpec((N, H * W, C), lambda p, i: (0, 0, 0)),
        scratch_shapes=[
            pltpu.VMEM((N, H * W, C), jnp.bfloat16),                 # raw conv1
            pltpu.VMEM((H + 2, W + 2 * PAD_COL, C), jnp.bfloat16),   # padded img
            pltpu.VMEM((8, C), jnp.float32),                         # BN stats
        ],
        compiler_params=pltpu.CompilerParams(
            # Both axes carry state (global training-mode BN statistics).
            # TODO(synk): shard the sample axis across v7x's two TensorCores
            # with a CMEM/VMEM_SHARED cross-core partial-sum reduction.
            dimension_semantics=("arbitrary", "arbitrary"),
            vmem_limit_bytes=vmem_limit,
        ),
    )(x, w1s, w2s, bnp)

    out_nhwc = out_flat.reshape(N, H, W, C)
    return jnp.transpose(out_nhwc, (0, 3, 1, 2))


def basic_block_reference(x_nchw, params):
    """Pure-JAX/XLA fp32 reference of the same forward pass."""
    w1, g1, b1, w2, g2, b2 = params
    x = jnp.transpose(x_nchw, (0, 2, 3, 1))

    def conv(z, w):
        return jax.lax.conv_general_dilated(
            z, w, window_strides=(1, 1), padding=((1, 1), (1, 1)),
            dimension_numbers=("NHWC", "HWIO", "NHWC"))

    def bn(z, g, b):
        m = jnp.mean(z, axis=(0, 1, 2), keepdims=True)
        v = jnp.mean(jnp.square(z - m), axis=(0, 1, 2), keepdims=True)
        return (z - m) * jax.lax.rsqrt(v + EPS) * g.reshape(1, 1, 1, -1) \
               + b.reshape(1, 1, 1, -1)

    o = jax.nn.relu(bn(conv(x, w1), g1, b1))
    o = bn(conv(o, w2), g2, b2)
    o = jax.nn.relu(o + x)
    return jnp.transpose(o, (0, 3, 1, 2))


def init_params(key, inplanes, planes):
    k1, k2, k3, k4, k5, k6 = jax.random.split(key, 6)
    fan1 = 3 * 3 * inplanes
    w1 = jax.random.normal(k1, (3, 3, inplanes, planes), jnp.float32) * (2.0 / fan1) ** 0.5
    fan2 = 3 * 3 * planes
    w2 = jax.random.normal(k2, (3, 3, planes, planes), jnp.float32) * (2.0 / fan2) ** 0.5
    g1 = 1.0 + 0.1 * jax.random.normal(k3, (1, planes), jnp.float32)
    b1 = 0.1 * jax.random.normal(k4, (1, planes), jnp.float32)
    g2 = 1.0 + 0.1 * jax.random.normal(k5, (1, planes), jnp.float32)
    b2 = 0.1 * jax.random.normal(k6, (1, planes), jnp.float32)
    return (w1, g1, b1, w2, g2, b2)


if __name__ == "__main__":
    key = jax.random.PRNGKey(0)
    kx, kp = jax.random.split(key)

    N, C, H, W = 2, 4, 16, 16          # inplanes == planes == 4, stride=1
    x = jax.random.normal(kx, (N, C, H, W), jnp.float32)
    params = init_params(kp, C, C)

    out = jax.block_until_ready(jax.jit(basic_block_forward)(x, params))

    assert out.shape == (N, C, H, W)
    assert bool(jnp.all(out >= 0.0))   # final ReLU

    ref = jax.block_until_ready(basic_block_reference(x, params))
    err = float(jnp.max(jnp.abs(out - ref)))
    assert err < 0.1, f"max abs err vs fp32 reference = {err}"

    print("KERNEL_OK")
</pallas_src>

<mosaic_0001>
module attributes {stable_mosaic.version = 11 : i64} {
  func.func @basic_block_kernel(%arg0: i32, %arg1: i32, %arg2: memref<1x16x16x4xf32, #tpu.memory_space<vmem>>, %arg3: memref<36x4xbf16, #tpu.memory_space<vmem>>, %arg4: memref<36x4xbf16, #tpu.memory_space<vmem>>, %arg5: memref<4x4xf32, #tpu.memory_space<vmem>>, %arg6: memref<2x256x4xf32, #tpu.memory_space<vmem>>, %arg7: memref<2x256x4xbf16, #tpu.memory_space<vmem>>, %arg8: memref<18x48x4xbf16, #tpu.memory_space<vmem>>, %arg9: memref<8x4xf32, #tpu.memory_space<vmem>>) attributes {dimension_semantics = [#tpu.dimension_semantics<arbitrary>, #tpu.dimension_semantics<arbitrary>], iteration_bounds = array<i64: 3, 2>, scalar_prefetch = 0 : i64, scratch_operands = 3 : i64, tpu.core_type = #tpu.core_type<tc>, window_params = [{transform_indices = @transform_0, window_bounds = array<i64: 1, 16, 16, 4>}, {pipeline_mode = #tpu.pipeline_mode<synchronous>, transform_indices = @transform_1, window_bounds = array<i64: 36, 4>}, {pipeline_mode = #tpu.pipeline_mode<synchronous>, transform_indices = @transform_2, window_bounds = array<i64: 36, 4>}, {pipeline_mode = #tpu.pipeline_mode<synchronous>, transform_indices = @transform_3, window_bounds = array<i64: 4, 4>}, {pipeline_mode = #tpu.pipeline_mode<synchronous>, transform_indices = @transform_4, window_bounds = array<i64: 2, 256, 4>}]} {
    %c0_i32 = arith.constant 0 : i32
    %0 = arith.cmpi eq, %arg0, %c0_i32 : i32
    %c0_i32_0 = arith.constant 0 : i32
    %1 = arith.cmpi eq, %arg1, %c0_i32_0 : i32
    %2 = arith.andi %0, %1 : i1
    %3 = arith.extui %2 : i1 to i32
    %c0_i32_1 = arith.constant 0 : i32
    %4 = arith.cmpi ne, %3, %c0_i32_1 : i32
    scf.if %4 {
      %cst = arith.constant 0.000000e+00 : f32
      %14 = vector.broadcast %cst : f32 to vector<8x4xf32>
      %c0 = arith.constant 0 : index
      %c0_6 = arith.constant 0 : index
      %15 = vector.load %arg9[%c0, %c0_6] : memref<8x4xf32, #tpu.memory_space<vmem>>, vector<8x4xf32>
      tpu.vector_store %arg9[%c0, %c0_6], %14 {strides = array<i32>} : memref<8x4xf32, #tpu.memory_space<vmem>>, vector<8x4xf32>,
      %cst_7 = arith.constant 0.000000e+00 : bf16
      %16 = vector.broadcast %cst_7 : bf16 to vector<18x48x4xbf16>
      %c0_8 = arith.constant 0 : index
      %c0_9 = arith.constant 0 : index
      %c0_10 = arith.constant 0 : index
      %17 = vector.load %arg8[%c0_8, %c0_9, %c0_10] : memref<18x48x4xbf16, #tpu.memory_space<vmem>>, vector<18x48x4xbf16>
      tpu.vector_store %arg8[%c0_8, %c0_9, %c0_10], %16 {strides = array<i32>} : memref<18x48x4xbf16, #tpu.memory_space<vmem>>, vector<18x48x4xbf16>,
    } else {
    }
    %c0_i32_2 = arith.constant 0 : i32
    %5 = arith.cmpi eq, %arg0, %c0_i32_2 : i32
    %6 = arith.extui %5 : i1 to i32
    %c0_i32_3 = arith.constant 0 : i32
    %7 = arith.cmpi ne, %6, %c0_i32_3 : i32
    scf.if %7 {
      %c0 = arith.constant 0 : index
      %c0_6 = arith.constant 0 : index
      %c0_7 = arith.constant 0 : index
      %c0_8 = arith.constant 0 : index
      %14 = vector.load %arg2[%c0, %c0_6, %c0_7, %c0_8] : memref<1x16x16x4xf32, #tpu.memory_space<vmem>>, vector<1x16x16x4xf32>
      %15 = vector.shape_cast %14 : vector<1x16x16x4xf32> to vector<16x16x4xf32>
      %16 = arith.truncf %15 : vector<16x16x4xf32> to vector<16x16x4xbf16>
      %c1 = arith.constant 1 : index
      %c16 = arith.constant 16 : index
      %c0_9 = arith.constant 0 : index
      %17 = vector.load %arg8[%c1, %c16, %c0_9] : memref<18x48x4xbf16, #tpu.memory_space<vmem>>, vector<16x16x4xbf16>
      tpu.vector_store %arg8[%c1, %c16, %c0_9], %16 {strides = array<i32>} : memref<18x48x4xbf16, #tpu.memory_space<vmem>>, vector<16x16x4xbf16>,
      %c0_10 = arith.constant 0 : index
      %c0_11 = arith.constant 0 : index
      %18 = vector.load %arg3[%c0_10, %c0_11] : memref<36x4xbf16, #tpu.memory_space<vmem>>, vector<36x4xbf16>
      %c0_12 = arith.constant 0 : index
      %c15 = arith.constant 15 : index
      %c0_13 = arith.constant 0 : index
      %19 = vector.load %arg8[%c0_12, %c15, %c0_13] : memref<18x48x4xbf16, #tpu.memory_space<vmem>>, vector<16x16x4xbf16>
      %c0_14 = arith.constant 0 : index
      %c16_15 = arith.constant 16 : index
      %c0_16 = arith.constant 0 : index
      %20 = vector.load %arg8[%c0_14, %c16_15, %c0_16] : memref<18x48x4xbf16, #tpu.memory_space<vmem>>, vector<16x16x4xbf16>
      %c0_17 = arith.constant 0 : index
      %c17 = arith.constant 17 : index
      %c0_18 = arith.constant 0 : index
      %21 = vector.load %arg8[%c0_17, %c17, %c0_18] : memref<18x48x4xbf16, #tpu.memory_space<vmem>>, vector<16x16x4xbf16>
      %c1_19 = arith.constant 1 : index
      %c15_20 = arith.constant 15 : index
      %c0_21 = arith.constant 0 : index
      %22 = vector.load %arg8[%c1_19, %c15_20, %c0_21] : memref<18x48x4xbf16, #tpu.memory_space<vmem>>, vector<16x16x4xbf16>
      %c1_22 = arith.constant 1 : index
      %c16_23 = arith.constant 16 : index
      %c0_24 = arith.constant 0 : index
      %23 = vector.load %arg8[%c1_22, %c16_23, %c0_24] : memref<18x48x4xbf16, #tpu.memory_space<vmem>>, vector<16x16x4xbf16>
      %c1_25 = arith.constant 1 : index
      %c17_26 = arith.constant 17 : index
      %c0_27 = arith.constant 0 : index
      %24 = vector.load %arg8[%c1_25, %c17_26, %c0_27] : memref<18x48x4xbf16, #tpu.memory_space<vmem>>, vector<16x16x4xbf16>
      %c2 = arith.constant 2 : index
      %c15_28 = arith.constant 15 : index
      %c0_29 = arith.constant 0 : index
      %25 = vector.load %arg8[%c2, %c15_28, %c0_29] : memref<18x48x4xbf16, #tpu.memory_space<vmem>>, vector<16x16x4xbf16>
      %c2_30 = arith.constant 2 : index
      %c16_31 = arith.constant 16 : index
      %c0_32 = arith.constant 0 : index
      %26 = vector.load %arg8[%c2_30, %c16_31, %c0_32] : memref<18x48x4xbf16, #tpu.memory_space<vmem>>, vector<16x16x4xbf16>
      %c2_33 = arith.constant 2 : index
      %c17_34 = arith.constant 17 : index
      %c0_35 = arith.constant 0 : index
      %27 = vector.load %arg8[%c2_33, %c17_34, %c0_35] : memref<18x48x4xbf16, #tpu.memory_space<vmem>>, vector<16x16x4xbf16>
      %28 = tpu.concatenate %19, %20, %21, %22, %23, %24, %25, %26, %27 in 2 : vector<16x16x4xbf16>, vector<16x16x4xbf16>, vector<16x16x4xbf16>, vector<16x16x4xbf16>, vector<16x16x4xbf16>, vector<16x16x4xbf16>, vector<16x16x4xbf16>, vector<16x16x4xbf16>, vector<16x16x4xbf16> -> vector<16x16x36xbf16>
      %29 = vector.shape_cast %28 : vector<16x16x36xbf16> to vector<256x36xbf16>
      %cst = arith.constant dense<0.000000e+00> : vector<256x4xf32>
      %30 = tpu.matmul %29, %18, %cst {dimension_numbers = #tpu.dot_dimension_numbers<[1], [0], [0], [1], [0, 0, 1, 1], [], []>} : vector<256x36xbf16>, vector<36x4xbf16>, vector<256x4xf32> -> vector<256x4xf32>
      %31 = arith.truncf %30 : vector<256x4xf32> to vector<256x4xbf16>
      %32 = arith.index_cast %arg1 : i32 to index
      %c0_36 = arith.constant 0 : index
      %c0_37 = arith.constant 0 : index
      %33 = vector.load %arg7[%32, %c0_36, %c0_37] : memref<2x256x4xbf16, #tpu.memory_space<vmem>>, vector<1x256x4xbf16>
      %34 = vector.shape_cast %33 : vector<1x256x4xbf16> to vector<256x4xbf16>
      %35 = vector.shape_cast %31 : vector<256x4xbf16> to vector<1x256x4xbf16>
      tpu.vector_store %arg7[%32, %c0_36, %c0_37], %35 {strides = array<i32>} : memref<2x256x4xbf16, #tpu.memory_space<vmem>>, vector<1x256x4xbf16>,
      %c0_38 = arith.constant 0 : index
      %c0_39 = arith.constant 0 : index
      %36 = vector.load %arg9[%c0_38, %c0_39] : memref<8x4xf32, #tpu.memory_space<vmem>>, vector<1x4xf32>
      %cst_40 = arith.constant dense<0.000000e+00> : vector<4xf32>
      %37 = vector.multi_reduction <add>, %30, %cst_40 [0] : vector<256x4xf32> to vector<4xf32>
      %38 = vector.shape_cast %37 : vector<4xf32> to vector<1x4xf32>
      %39 = arith.addf %36, %38 : vector<1x4xf32>
      %c0_41 = arith.constant 0 : index
      %c0_42 = arith.constant 0 : index
      %40 = vector.load %arg9[%c0_41, %c0_42] : memref<8x4xf32, #tpu.memory_space<vmem>>, vector<1x4xf32>
      tpu.vector_store %arg9[%c0_41, %c0_42], %39 {strides = array<i32>} : memref<8x4xf32, #tpu.memory_space<vmem>>, vector<1x4xf32>,
      %c1_43 = arith.constant 1 : index
      %c0_44 = arith.constant 0 : index
      %41 = vector.load %arg9[%c1_43, %c0_44] : memref<8x4xf32, #tpu.memory_space<vmem>>, vector<1x4xf32>
      %42 = arith.mulf %30, %30 : vector<256x4xf32>
      %cst_45 = arith.constant dense<0.000000e+00> : vector<4xf32>
      %43 = vector.multi_reduction <add>, %42, %cst_45 [0] : vector<256x4xf32> to vector<4xf32>
      %44 = vector.shape_cast %43 : vector<4xf32> to vector<1x4xf32>
      %45 = arith.addf %41, %44 : vector<1x4xf32>
      %c1_46 = arith.constant 1 : index
      %c0_47 = arith.constant 0 : index
      %46 = vector.load %arg9[%c1_46, %c0_47] : memref<8x4xf32, #tpu.memory_space<vmem>>, vector<1x4xf32>
      tpu.vector_store %arg9[%c1_46, %c0_47], %45 {strides = array<i32>} : memref<8x4xf32, #tpu.memory_space<vmem>>, vector<1x4xf32>,
    } else {
    }
    %c1_i32 = arith.constant 1 : i32
    %8 = arith.cmpi eq, %arg0, %c1_i32 : i32
    %9 = arith.extui %8 : i1 to i32
    %c0_i32_4 = arith.constant 0 : i32
    %10 = arith.cmpi ne, %9, %c0_i32_4 : i32
    scf.if %10 {
      %c0_i32_6 = arith.constant 0 : i32
      %14 = arith.cmpi eq, %arg1, %c0_i32_6 : i32
      %15 = arith.extui %14 : i1 to i32
      %c0_i32_7 = arith.constant 0 : i32
      %16 = arith.cmpi ne, %15, %c0_i32_7 : i32
      scf.if %16 {
        %c0_50 = arith.constant 0 : index
        %c0_51 = arith.constant 0 : index
        %60 = vector.load %arg9[%c0_50, %c0_51] : memref<8x4xf32, #tpu.memory_space<vmem>>, vector<1x4xf32>
        %cst_52 = arith.constant 0.001953125 : f32
        %61 = vector.broadcast %cst_52 : f32 to vector<1x4xf32>
        %62 = arith.mulf %60, %61 : vector<1x4xf32>
        %c1_53 = arith.constant 1 : index
        %c0_54 = arith.constant 0 : index
        %63 = vector.load %arg9[%c1_53, %c0_54] : memref<8x4xf32, #tpu.memory_space<vmem>>, vector<1x4xf32>
        %cst_55 = arith.constant 0.001953125 : f32
        %64 = vector.broadcast %cst_55 : f32 to vector<1x4xf32>
        %65 = arith.mulf %63, %64 : vector<1x4xf32>
        %66 = arith.mulf %62, %62 : vector<1x4xf32>
        %67 = arith.subf %65, %66 : vector<1x4xf32>
        %c0_56 = arith.constant 0 : index
        %c0_57 = arith.constant 0 : index
        %68 = vector.load %arg5[%c0_56, %c0_57] : memref<4x4xf32, #tpu.memory_space<vmem>>, vector<1x4xf32>
        %cst_58 = arith.constant 9.99999974E-6 : f32
        %69 = vector.broadcast %cst_58 : f32 to vector<1x4xf32>
        %70 = arith.addf %67, %69 : vector<1x4xf32>
        %71 = math.rsqrt %70 : vector<1x4xf32>
        %72 = arith.mulf %68, %71 : vector<1x4xf32>
        %c4_59 = arith.constant 4 : index
        %c0_60 = arith.constant 0 : index
        %73 = vector.load %arg9[%c4_59, %c0_60] : memref<8x4xf32, #tpu.memory_space<vmem>>, vector<1x4xf32>
        tpu.vector_store %arg9[%c4_59, %c0_60], %72 {strides = array<i32>} : memref<8x4xf32, #tpu.memory_space<vmem>>, vector<1x4xf32>,
        %c1_61 = arith.constant 1 : index
        %c0_62 = arith.constant 0 : index
        %74 = vector.load %arg5[%c1_61, %c0_62] : memref<4x4xf32, #tpu.memory_space<vmem>>, vector<1x4xf32>
        %75 = arith.mulf %62, %72 : vector<1x4xf32>
        %76 = arith.subf %74, %75 : vector<1x4xf32>
        %c5_63 = arith.constant 5 : index
        %c0_64 = arith.constant 0 : index
        %77 = vector.load %arg9[%c5_63, %c0_64] : memref<8x4xf32, #tpu.memory_space<vmem>>, vector<1x4xf32>
        tpu.vector_store %arg9[%c5_63, %c0_64], %76 {strides = array<i32>} : memref<8x4xf32, #tpu.memory_space<vmem>>, vector<1x4xf32>,
      } else {
      }
      %17 = arith.index_cast %arg1 : i32 to index
      %c0 = arith.constant 0 : index
      %c0_8 = arith.constant 0 : index
      %18 = vector.load %arg7[%17, %c0, %c0_8] : memref<2x256x4xbf16, #tpu.memory_space<vmem>>, vector<1x256x4xbf16>
      %19 = vector.shape_cast %18 : vector<1x256x4xbf16> to vector<256x4xbf16>
      %20 = arith.extf %19 : vector<256x4xbf16> to vector<256x4xf32>
      %c4 = arith.constant 4 : index
      %c0_9 = arith.constant 0 : index
      %21 = vector.load %arg9[%c4, %c0_9] : memref<8x4xf32, #tpu.memory_space<vmem>>, vector<1x4xf32>
      %22 = vector.broadcast %21 : vector<1x4xf32> to vector<256x4xf32>
      %23 = arith.mulf %20, %22 : vector<256x4xf32>
      %c5 = arith.constant 5 : index
      %c0_10 = arith.constant 0 : index
      %24 = vector.load %arg9[%c5, %c0_10] : memref<8x4xf32, #tpu.memory_space<vmem>>, vector<1x4xf32>
      %25 = vector.broadcast %24 : vector<1x4xf32> to vector<256x4xf32>
      %26 = arith.addf %23, %25 : vector<256x4xf32>
      %cst = arith.constant 0.000000e+00 : f32
      %27 = vector.broadcast %cst : f32 to vector<256x4xf32>
      %28 = arith.maximumf %26, %27 : vector<256x4xf32>
      %29 = arith.truncf %28 : vector<256x4xf32> to vector<256x4xbf16>
      %30 = vector.shape_cast %29 : vector<256x4xbf16> to vector<16x16x4xbf16>
      %c1 = arith.constant 1 : index
      %c16 = arith.constant 16 : index
      %c0_11 = arith.constant 0 : index
      %31 = vector.load %arg8[%c1, %c16, %c0_11] : memref<18x48x4xbf16, #tpu.memory_space<vmem>>, vector<16x16x4xbf16>
      tpu.vector_store %arg8[%c1, %c16, %c0_11], %30 {strides = array<i32>} : memref<18x48x4xbf16, #tpu.memory_space<vmem>>, vector<16x16x4xbf16>,
      %c0_12 = arith.constant 0 : index
      %c0_13 = arith.constant 0 : index
      %32 = vector.load %arg4[%c0_12, %c0_13] : memref<36x4xbf16, #tpu.memory_space<vmem>>, vector<36x4xbf16>
      %c0_14 = arith.constant 0 : index
      %c15 = arith.constant 15 : index
      %c0_15 = arith.constant 0 : index
      %33 = vector.load %arg8[%c0_14, %c15, %c0_15] : memref<18x48x4xbf16, #tpu.memory_space<vmem>>, vector<16x16x4xbf16>
      %c0_16 = arith.constant 0 : index
      %c16_17 = arith.constant 16 : index
      %c0_18 = arith.constant 0 : index
      %34 = vector.load %arg8[%c0_16, %c16_17, %c0_18] : memref<18x48x4xbf16, #tpu.memory_space<vmem>>, vector<16x16x4xbf16>
      %c0_19 = arith.constant 0 : index
      %c17 = arith.constant 17 : index
      %c0_20 = arith.constant 0 : index
      %35 = vector.load %arg8[%c0_19, %c17, %c0_20] : memref<18x48x4xbf16, #tpu.memory_space<vmem>>, vector<16x16x4xbf16>
      %c1_21 = arith.constant 1 : index
      %c15_22 = arith.constant 15 : index
      %c0_23 = arith.constant 0 : index
      %36 = vector.load %arg8[%c1_21, %c15_22, %c0_23] : memref<18x48x4xbf16, #tpu.memory_space<vmem>>, vector<16x16x4xbf16>
      %c1_24 = arith.constant 1 : index
      %c16_25 = arith.constant 16 : index
      %c0_26 = arith.constant 0 : index
      %37 = vector.load %arg8[%c1_24, %c16_25, %c0_26] : memref<18x48x4xbf16, #tpu.memory_space<vmem>>, vector<16x16x4xbf16>
      %c1_27 = arith.constant 1 : index
      %c17_28 = arith.constant 17 : index
      %c0_29 = arith.constant 0 : index
      %38 = vector.load %arg8[%c1_27, %c17_28, %c0_29] : memref<18x48x4xbf16, #tpu.memory_space<vmem>>, vector<16x16x4xbf16>
      %c2 = arith.constant 2 : index
      %c15_30 = arith.constant 15 : index
      %c0_31 = arith.constant 0 : index
      %39 = vector.load %arg8[%c2, %c15_30, %c0_31] : memref<18x48x4xbf16, #tpu.memory_space<vmem>>, vector<16x16x4xbf16>
      %c2_32 = arith.constant 2 : index
      %c16_33 = arith.constant 16 : index
      %c0_34 = arith.constant 0 : index
      %40 = vector.load %arg8[%c2_32, %c16_33, %c0_34] : memref<18x48x4xbf16, #tpu.memory_space<vmem>>, vector<16x16x4xbf16>
      %c2_35 = arith.constant 2 : index
      %c17_36 = arith.constant 17 : index
      %c0_37 = arith.constant 0 : index
      %41 = vector.load %arg8[%c2_35, %c17_36, %c0_37] : memref<18x48x4xbf16, #tpu.memory_space<vmem>>, vector<16x16x4xbf16>
      %42 = tpu.concatenate %33, %34, %35, %36, %37, %38, %39, %40, %41 in 2 : vector<16x16x4xbf16>, vector<16x16x4xbf16>, vector<16x16x4xbf16>, vector<16x16x4xbf16>, vector<16x16x4xbf16>, vector<16x16x4xbf16>, vector<16x16x4xbf16>, vector<16x16x4xbf16>, vector<16x16x4xbf16> -> vector<16x16x36xbf16>
      %43 = vector.shape_cast %42 : vector<16x16x36xbf16> to vector<256x36xbf16>
      %cst_38 = arith.constant dense<0.000000e+00> : vector<256x4xf32>
      %44 = tpu.matmul %43, %32, %cst_38 {dimension_numbers = #tpu.dot_dimension_numbers<[1], [0], [0], [1], [0, 0, 1, 1], [], []>} : vector<256x36xbf16>, vector<36x4xbf16>, vector<256x4xf32> -> vector<256x4xf32>
      %45 = arith.index_cast %arg1 : i32 to index
      %c0_39 = arith.constant 0 : index
      %c0_40 = arith.constant 0 : index
      %46 = vector.load %arg6[%45, %c0_39, %c0_40] : memref<2x256x4xf32, #tpu.memory_space<vmem>>, vector<1x256x4xf32>
      %47 = vector.shape_cast %46 : vector<1x256x4xf32> to vector<256x4xf32>
      %48 = vector.shape_cast %44 : vector<256x4xf32> to vector<1x256x4xf32>
      tpu.vector_store %arg6[%45, %c0_39, %c0_40], %48 {strides = array<i32>} : memref<2x256x4xf32, #tpu.memory_space<vmem>>, vector<1x256x4xf32>,
      %c2_41 = arith.constant 2 : index
      %c0_42 = arith.constant 0 : index
      %49 = vector.load %arg9[%c2_41, %c0_42] : memref<8x4xf32, #tpu.memory_space<vmem>>, vector<1x4xf32>
      %cst_43 = arith.constant dense<0.000000e+00> : vector<4xf32>
      %50 = vector.multi_reduction <add>, %44, %cst_43 [0] : vector<256x4xf32> to vector<4xf32>
      %51 = vector.shape_cast %50 : vector<4xf32> to vector<1x4xf32>
      %52 = arith.addf %49, %51 : vector<1x4xf32>
      %c2_44 = arith.constant 2 : index
      %c0_45 = arith.constant 0 : index
      %53 = vector.load %arg9[%c2_44, %c0_45] : memref<8x4xf32, #tpu.memory_space<vmem>>, vector<1x4xf32>
      tpu.vector_store %arg9[%c2_44, %c0_45], %52 {strides = array<i32>} : memref<8x4xf32, #tpu.memory_space<vmem>>, vector<1x4xf32>,
      %c3 = arith.constant 3 : index
      %c0_46 = arith.constant 0 : index
      %54 = vector.load %arg9[%c3, %c0_46] : memref<8x4xf32, #tpu.memory_space<vmem>>, vector<1x4xf32>
      %55 = arith.mulf %44, %44 : vector<256x4xf32>
      %cst_47 = arith.constant dense<0.000000e+00> : vector<4xf32>
      %56 = vector.multi_reduction <add>, %55, %cst_47 [0] : vector<256x4xf32> to vector<4xf32>
      %57 = vector.shape_cast %56 : vector<4xf32> to vector<1x4xf32>
      %58 = arith.addf %54, %57 : vector<1x4xf32>
      %c3_48 = arith.constant 3 : index
      %c0_49 = arith.constant 0 : index
      %59 = vector.load %arg9[%c3_48, %c0_49] : memref<8x4xf32, #tpu.memory_space<vmem>>, vector<1x4xf32>
      tpu.vector_store %arg9[%c3_48, %c0_49], %58 {strides = array<i32>} : memref<8x4xf32, #tpu.memory_space<vmem>>, vector<1x4xf32>,
    } else {
    }
    %c2_i32 = arith.constant 2 : i32
    %11 = arith.cmpi eq, %arg0, %c2_i32 : i32
    %12 = arith.extui %11 : i1 to i32
    %c0_i32_5 = arith.constant 0 : i32
    %13 = arith.cmpi ne, %12, %c0_i32_5 : i32
    scf.if %13 {
      %c0_i32_6 = arith.constant 0 : i32
      %14 = arith.cmpi eq, %arg1, %c0_i32_6 : i32
      %15 = arith.extui %14 : i1 to i32
      %c0_i32_7 = arith.constant 0 : i32
      %16 = arith.cmpi ne, %15, %c0_i32_7 : i32
      scf.if %16 {
        %c2 = arith.constant 2 : index
        %c0_17 = arith.constant 0 : index
        %36 = vector.load %arg9[%c2, %c0_17] : memref<8x4xf32, #tpu.memory_space<vmem>>, vector<1x4xf32>
        %cst_18 = arith.constant 0.001953125 : f32
        %37 = vector.broadcast %cst_18 : f32 to vector<1x4xf32>
        %38 = arith.mulf %36, %37 : vector<1x4xf32>
        %c3 = arith.constant 3 : index
        %c0_19 = arith.constant 0 : index
        %39 = vector.load %arg9[%c3, %c0_19] : memref<8x4xf32, #tpu.memory_space<vmem>>, vector<1x4xf32>
        %cst_20 = arith.constant 0.001953125 : f32
        %40 = vector.broadcast %cst_20 : f32 to vector<1x4xf32>
        %41 = arith.mulf %39, %40 : vector<1x4xf32>
        %42 = arith.mulf %38, %38 : vector<1x4xf32>
        %43 = arith.subf %41, %42 : vector<1x4xf32>
        %c2_21 = arith.constant 2 : index
        %c0_22 = arith.constant 0 : index
        %44 = vector.load %arg5[%c2_21, %c0_22] : memref<4x4xf32, #tpu.memory_space<vmem>>, vector<1x4xf32>
        %cst_23 = arith.constant 9.99999974E-6 : f32
        %45 = vector.broadcast %cst_23 : f32 to vector<1x4xf32>
        %46 = arith.addf %43, %45 : vector<1x4xf32>
        %47 = math.rsqrt %46 : vector<1x4xf32>
        %48 = arith.mulf %44, %47 : vector<1x4xf32>
        %c6_24 = arith.constant 6 : index
        %c0_25 = arith.constant 0 : index
        %49 = vector.load %arg9[%c6_24, %c0_25] : memref<8x4xf32, #tpu.memory_space<vmem>>, vector<1x4xf32>
        tpu.vector_store %arg9[%c6_24, %c0_25], %48 {strides = array<i32>} : memref<8x4xf32, #tpu.memory_space<vmem>>, vector<1x4xf32>,
        %c3_26 = arith.constant 3 : index
        %c0_27 = arith.constant 0 : index
        %50 = vector.load %arg5[%c3_26, %c0_27] : memref<4x4xf32, #tpu.memory_space<vmem>>, vector<1x4xf32>
        %51 = arith.mulf %38, %48 : vector<1x4xf32>
        %52 = arith.subf %50, %51 : vector<1x4xf32>
        %c7_28 = arith.constant 7 : index
        %c0_29 = arith.constant 0 : index
        %53 = vector.load %arg9[%c7_28, %c0_29] : memref<8x4xf32, #tpu.memory_space<vmem>>, vector<1x4xf32>
        tpu.vector_store %arg9[%c7_28, %c0_29], %52 {strides = array<i32>} : memref<8x4xf32, #tpu.memory_space<vmem>>, vector<1x4xf32>,
      } else {
      }
      %17 = arith.index_cast %arg1 : i32 to index
      %c0 = arith.constant 0 : index
      %c0_8 = arith.constant 0 : index
      %18 = vector.load %arg6[%17, %c0, %c0_8] : memref<2x256x4xf32, #tpu.memory_space<vmem>>, vector<1x256x4xf32>
      %19 = vector.shape_cast %18 : vector<1x256x4xf32> to vector<256x4xf32>
      %c6 = arith.constant 6 : index
      %c0_9 = arith.constant 0 : index
      %20 = vector.load %arg9[%c6, %c0_9] : memref<8x4xf32, #tpu.memory_space<vmem>>, vector<1x4xf32>
      %21 = vector.broadcast %20 : vector<1x4xf32> to vector<256x4xf32>
      %22 = arith.mulf %19, %21 : vector<256x4xf32>
      %c7 = arith.constant 7 : index
      %c0_10 = arith.constant 0 : index
      %23 = vector.load %arg9[%c7, %c0_10] : memref<8x4xf32, #tpu.memory_space<vmem>>, vector<1x4xf32>
      %24 = vector.broadcast %23 : vector<1x4xf32> to vector<256x4xf32>
      %25 = arith.addf %22, %24 : vector<256x4xf32>
      %c0_11 = arith.constant 0 : index
      %c0_12 = arith.constant 0 : index
      %c0_13 = arith.constant 0 : index
      %c0_14 = arith.constant 0 : index
      %26 = vector.load %arg2[%c0_11, %c0_12, %c0_13, %c0_14] : memref<1x16x16x4xf32, #tpu.memory_space<vmem>>, vector<1x16x16x4xf32>
      %27 = vector.shape_cast %26 : vector<1x16x16x4xf32> to vector<16x16x4xf32>
      %28 = vector.shape_cast %27 : vector<16x16x4xf32> to vector<256x4xf32>
      %29 = arith.addf %25, %28 : vector<256x4xf32>
      %cst = arith.constant 0.000000e+00 : f32
      %30 = vector.broadcast %cst : f32 to vector<256x4xf32>
      %31 = arith.maximumf %29, %30 : vector<256x4xf32>
      %32 = arith.index_cast %arg1 : i32 to index
      %c0_15 = arith.constant 0 : index
      %c0_16 = arith.constant 0 : index
      %33 = vector.load %arg6[%32, %c0_15, %c0_16] : memref<2x256x4xf32, #tpu.memory_space<vmem>>, vector<1x256x4xf32>
      %34 = vector.shape_cast %33 : vector<1x256x4xf32> to vector<256x4xf32>
      %35 = vector.shape_cast %31 : vector<256x4xf32> to vector<1x256x4xf32>
      tpu.vector_store %arg6[%32, %c0_15, %c0_16], %35 {strides = array<i32>} : memref<2x256x4xf32, #tpu.memory_space<vmem>>, vector<1x256x4xf32>,
    } else {
    }
    return
  }
  func.func @transform_0(%arg0: i32, %arg1: i32) -> (i32, i32, i32, i32) {
    %c1_i32 = arith.constant 1 : i32
    %0 = arith.cmpi eq, %arg0, %c1_i32 : i32
    %c0_i32 = arith.constant 0 : i32
    %1 = arith.select %0, %c0_i32, %arg1 : i32
    %c0_i32_0 = arith.constant 0 : i32
    %c0_i32_1 = arith.constant 0 : i32
    %c0_i32_2 = arith.constant 0 : i32
    %c0_i32_3 = arith.constant 0 : i32
    return %1, %c0_i32_0, %c0_i32_1, %c0_i32_2 : i32, i32, i32, i32
  }
  func.func @transform_1(%arg0: i32, %arg1: i32) -> (i32, i32) {
    %c0_i32 = arith.constant 0 : i32
    %c0_i32_0 = arith.constant 0 : i32
    %c0_i32_1 = arith.constant 0 : i32
    return %c0_i32, %c0_i32_0 : i32, i32
  }
  func.func @transform_2(%arg0: i32, %arg1: i32) -> (i32, i32) {
    %c0_i32 = arith.constant 0 : i32
    %c0_i32_0 = arith.constant 0 : i32
    %c0_i32_1 = arith.constant 0 : i32
    return %c0_i32, %c0_i32_0 : i32, i32
  }
  func.func @transform_3(%arg0: i32, %arg1: i32) -> (i32, i32) {
    %c0_i32 = arith.constant 0 : i32
    %c0_i32_0 = arith.constant 0 : i32
    %c0_i32_1 = arith.constant 0 : i32
    return %c0_i32, %c0_i32_0 : i32, i32
  }
  func.func @transform_4(%arg0: i32, %arg1: i32) -> (i32, i32, i32) {
    %c0_i32 = arith.constant 0 : i32
    %c0_i32_0 = arith.constant 0 : i32
    %c0_i32_1 = arith.constant 0 : i32
    %c0_i32_2 = arith.constant 0 : i32
    return %c0_i32, %c0_i32_0, %c0_i32_1 : i32, i32, i32
  }
}

</mosaic_0001>

<bundles_post_ra>
// kernel: basic_block_forward.1
= control target key start
LH: loop header
LB: loop body
LE: loop exit
PB: predicated region body
PF: predicated region fallthrough
CT: control target
= control target key end

     0   :  { %s6295_s15 = smov 0   ;;  %s6297_s16 = smov 0   ;;  %s9583_s0 = inlined_call_operand.vmem [shape: f32[2,16,16,4], index: 0, kind: input, shape index: {}]   ;;  %s9584_s1 = inlined_call_operand.vmem [shape: bf16[36,4], index: 1, kind: input, shape index: {}]   ;;  %s9585_s2 = inlined_call_operand.vmem [shape: bf16[36,4], index: 2, kind: input, shape index: {}]   ;;  %s9586_s3 = inlined_call_operand.vmem [shape: f32[4,4], index: 3, kind: input, shape index: {}]   ;;  %s9587_s4 = inlined_call_operand.vmem [shape: f32[2,256,4], index: 4, kind: output, shape index: {}]  }
   0x1   :  { %s6299_s17 = smov 0   ;;  %s6301_s18 = smov 0  }
   0x2   :  { %s6303_s19 = smov 0  }
   0x3 LB: > { %s23_s20 = sadd.s32 1, %s6242_s17  ;;  %s26_s21 = sadd.s32 1, %s6246_s18  ;;  %s6250_s19 = sphi %s6303_s19, %s14_s19   ;;  %s6246_s18 = sphi %s6301_s18, %s9719_s18   ;;  %s6242_s17 = sphi %s6299_s17, %s9718_s17   ;;  %s6238_s16 = sphi %s6297_s16, %s9717_s16   ;;  %s6234_s15 = sphi %s6295_s15, %s9716_s15  }
   0x4   : > { %p24_p0 = scmp.ge.s32.totalorder %s23_s20, 2  ;;  %p5680_p1 = scmp.ge.s32.totalorder %s6250_s19, 1 }
   0x5   : > { %p177_p2 = scmp.lt.s32.totalorder %s6250_s19, 7 }
   0x6   : > { %s9721_s20 = smov (%p24_p0, %s23_s20), 0  ;;  %s9723_s21 = smov (!%p24_p0, %s26_s21), %s6246_s18 }
   0x7   : > { %p178_p3 = pnand %p5680_p1, %p177_p2  ;;  %p28_p4 = scmp.ge.s32.totalorder %s9723_s21, 3 }
   0x8   : > { %p200_p5 = scmp.eq.s32.totalorder (!%p178_p3), %s6238_s16, 1  ;;  %p210_p6 = scmp.eq.s32.totalorder (!%p178_p3), %s6238_s16, 0 }
   0x9   : > { %s9725_s21 = smov (%p28_p4, %s9723_s21), 0  ;;  %181 = sbr.rel (%p178_p3) target bundleno = 1860 (0x744), region = 36 }
   0xa   : > { %p211_p7 = scmp.eq.s32.totalorder (!%p178_p3), %s6234_s15, 0 }
   0xc   : > { %p212_p8 = pnand (!%p178_p3), %p211_p7, %p210_p6 }
  0x10   : > { %s201_s22 = scalar_select %p200_p5, 0, %s6234_s15 }
  0x11   : > { %215 = sbr.rel (%p212_p8) target bundleno = 46 (0x2e), region = 40  ;;  %vm216_vm0 = vcmask (!%p212_p8), 31744   ;;  %v6252_v0 = vmov (!%p212_p8), 0.0   ;;  %v6253_v1 = vmov (!%p212_p8), 0  }
  0x12   : > { %p202_p9 = scmp.lt.s32.totalorder %s201_s22, 1  ;;  %217 = vst.msk [vmem:[#allocation4] sm:$0xff] (!%p212_p8), %vm216_vm0, %v6252_v0  ;;  %218 = vst.msk [vmem:[#allocation3] sm:$0xff] (!%p212_p8), %vm216_vm0, %v6253_v1 }
  0x13   : > { %219 = vst.msk [vmem:[#allocation3 + $0x8] sm:$0xff] (!%p212_p8), %vm216_vm0, %v6253_v1  ;;  %220 = vst.msk [vmem:[#allocation3 + $0x10] sm:$0xff] (!%p212_p8), %vm216_vm0, %v6253_v1 }
  0x14   : > { %s9727_s22 = smov (!%p202_p9, %s201_s22), 1  ;;  %221 = vst.msk [vmem:[#allocation3 + $0x18] sm:$0xff] (!%p212_p8), %vm216_vm0, %v6253_v1  ;;  %222 = vst.msk [vmem:[#allocation3 + $0x20] sm:$0xff] (!%p212_p8), %vm216_vm0, %v6253_v1 }
  0x15   : > { %s5738_s23 = sshll.u32 %s9727_s22, 8  ;;  %223 = vst.msk [vmem:[#allocation3 + $0x28] sm:$0xff] (!%p212_p8), %vm216_vm0, %v6253_v1  ;;  %224 = vst.msk [vmem:[#allocation3 + $0x30] sm:$0xff] (!%p212_p8), %vm216_vm0, %v6253_v1 }
  0x16   : > { %s6336_s26 = scalar_lea.vmem %s9583_s0, %s5738_s23  ;;  %225 = vst.msk [vmem:[#allocation3 + $0x38] sm:$0xff] (!%p212_p8), %vm216_vm0, %v6253_v1  ;;  %226 = vst.msk [vmem:[#allocation3 + $0x40] sm:$0xff] (!%p212_p8), %vm216_vm0, %v6253_v1 }
  0x17   : > { %227 = vst.msk [vmem:[#allocation3 + $0x48] sm:$0xff] (!%p212_p8), %vm216_vm0, %v6253_v1  ;;  %228 = vst.msk [vmem:[#allocation3 + $0x50] sm:$0xff] (!%p212_p8), %vm216_vm0, %v6253_v1 }
  0x18   : > { %229 = vst.msk [vmem:[#allocation3 + $0x58] sm:$0xff] %vm216_vm0, %v6253_v1  ;;  %230 = vst.msk [vmem:[#allocation3 + $0x60] sm:$0xff] %vm216_vm0, %v6253_v1 }
  0x19   : > { %231 = vst.msk [vmem:[#allocation3 + $0x68] sm:$0xff] %vm216_vm0, %v6253_v1  ;;  %232 = vst.msk [vmem:[#allocation3 + $0x70] sm:$0xff] %vm216_vm0, %v6253_v1 }
  0x1a   : > { %233 = vst.msk [vmem:[#allocation3 + $0x78] sm:$0xff] %vm216_vm0, %v6253_v1  ;;  %234 = vst.msk [vmem:[#allocation3 + $0x80] sm:$0xff] %vm216_vm0, %v6253_v1 }
  0x1b   : > { %235 = vst.msk [vmem:[#allocation3 + $0x88] sm:$0xff] %vm216_vm0, %v6253_v1  ;;  %236 = vst.msk [vmem:[#allocation3 + $0x90] sm:$0xff] %vm216_vm0, %v6253_v1 }
  0x1c   : > { %237 = vst.msk [vmem:[#allocation3 + $0x98] sm:$0xff] %vm216_vm0, %v6253_v1  ;;  %238 = vst.msk [vmem:[#allocation3 + $0xa0] sm:$0xff] %vm216_vm0, %v6253_v1 }
  0x1d   : > { %239 = vst.msk [vmem:[#allocation3 + $0xa8] sm:$0xff] %vm216_vm0, %v6253_v1  ;;  %240 = vst.msk [vmem:[#allocation3 + $0xb0] sm:$0xff] %vm216_vm0, %v6253_v1 }
  0x1e   : > { %241 = vst.msk [vmem:[#allocation3 + $0xb8] sm:$0xff] %vm216_vm0, %v6253_v1  ;;  %242 = vst.msk [vmem:[#allocation3 + $0xc0] sm:$0xff] %vm216_vm0, %v6253_v1 }
  0x1f   : > { %243 = vst.msk [vmem:[#allocation3 + $0xc8] sm:$0xff] %vm216_vm0, %v6253_v1  ;;  %244 = vst.msk [vmem:[#allocation3 + $0xd0] sm:$0xff] %vm216_vm0, %v6253_v1 }
  0x20   : > { %245 = vst.msk [vmem:[#allocation3 + $0xd8] sm:$0xff] %vm216_vm0, %v6253_v1  ;;  %246 = vst.msk [vmem:[#allocation3 + $0xe0] sm:$0xff] %vm216_vm0, %v6253_v1 }
  0x21   : > { %247 = vst.msk [vmem:[#allocation3 + $0xe8] sm:$0xff] %vm216_vm0, %v6253_v1  ;;  %248 = vst.msk [vmem:[#allocation3 + $0xf0] sm:$0xff] %vm216_vm0, %v6253_v1 }
  0x22   : > { %249 = vst.msk [vmem:[#allocation3 + $0xf8] sm:$0xff] %vm216_vm0, %v6253_v1  ;;  %250 = vst.msk [vmem:[#allocation3 + $0x100] sm:$0xff] %vm216_vm0, %v6253_v1 }
  0x23   : > { %251 = vst.msk [vmem:[#allocation3 + $0x108] sm:$0xff] %vm216_vm0, %v6253_v1  ;;  %252 = vst.msk [vmem:[#allocation3 + $0x110] sm:$0xff] %vm216_vm0, %v6253_v1 }
  0x24   : > { %253 = vst.msk [vmem:[#allocation3 + $0x118] sm:$0xff] %vm216_vm0, %v6253_v1  ;;  %254 = vst.msk [vmem:[#allocation3 + $0x120] sm:$0xff] %vm216_vm0, %v6253_v1 }
  0x25   : > { %255 = vst.msk [vmem:[#allocation3 + $0x128] sm:$0xff] %vm216_vm0, %v6253_v1  ;;  %256 = vst.msk [vmem:[#allocation3 + $0x130] sm:$0xff] %vm216_vm0, %v6253_v1 }
  0x26   : > { %257 = vst.msk [vmem:[#allocation3 + $0x138] sm:$0xff] %vm216_vm0, %v6253_v1  ;;  %258 = vst.msk [vmem:[#allocation3 + $0x140] sm:$0xff] %vm216_vm0, %v6253_v1 }
  0x27   : > { %259 = vst.msk [vmem:[#allocation3 + $0x148] sm:$0xff] %vm216_vm0, %v6253_v1  ;;  %260 = vst.msk [vmem:[#allocation3 + $0x150] sm:$0xff] %vm216_vm0, %v6253_v1 }
  0x28   : > { %261 = vst.msk [vmem:[#allocation3 + $0x158] sm:$0xff] %vm216_vm0, %v6253_v1  ;;  %262 = vst.msk [vmem:[#allocation3 + $0x160] sm:$0xff] %vm216_vm0, %v6253_v1 }
  0x29   : > { %263 = vst.msk [vmem:[#allocation3 + $0x168] sm:$0xff] %vm216_vm0, %v6253_v1  ;;  %264 = vst.msk [vmem:[#allocation3 + $0x170] sm:$0xff] %vm216_vm0, %v6253_v1 }
  0x2a   : > { %265 = vst.msk [vmem:[#allocation3 + $0x178] sm:$0xff] %vm216_vm0, %v6253_v1  ;;  %266 = vst.msk [vmem:[#allocation3 + $0x180] sm:$0xff] %vm216_vm0, %v6253_v1 }
  0x2b   : > { %267 = vst.msk [vmem:[#allocation3 + $0x188] sm:$0xff] %vm216_vm0, %v6253_v1  ;;  %268 = vst.msk [vmem:[#allocation3 + $0x190] sm:$0xff] %vm216_vm0, %v6253_v1 }
  0x2c   : > { %269 = vst.msk [vmem:[#allocation3 + $0x198] sm:$0xff] %vm216_vm0, %v6253_v1  ;;  %270 = vst.msk [vmem:[#allocation3 + $0x1a0] sm:$0xff] %vm216_vm0, %v6253_v1 }
  0x2d   : > { %271 = vst.msk [vmem:[#allocation3 + $0x1a8] sm:$0xff] %vm216_vm0, %v6253_v1 }
  0x2e PF: > { %p5683_p10 = scmp.ne.s32.totalorder %s6238_s16, 0 }
  0x30   : > { %274 = sbr.rel (%p5683_p10) target bundleno = 893 (0x37d), region = 44 }
  0x37   : > { %v6394_v2 = vld [vmem:[#allocation3 + $0x8] sm:$0xff]  ;;  %v277_v3 = vld [vmem:[%s6336_s26 + $0x10] sm:$0xff]  ;;  %v278_v4 = vld [vmem:[%s6336_s26 + $0x18] sm:$0xff]  ;;  %vm324_vm1 = vcmask 31744   ;;  %s6254_s27 = smov 4   ;;  %vm699_vm2 = vcmask 1046528  }
  0x38   : > { %v492_v5 = vshll.u32 %v6394_v2, 16  ;;  %v495_v6 = vshrl.u32 %v6394_v2, 16  ;;  %v279_v7 = vld [vmem:[%s6336_s26 + $0x20] sm:$0xff]  ;;  %v280_v8 = vld [vmem:[%s6336_s26 + $0x28] sm:$0xff]  ;;  %v308_v9 = vpack.c.bf16 %v278_v4, %v277_v3  ;;  %v285_v13 = vld [vmem:[%s6336_s26 + $0x50] sm:$0xff]  ;;  %s6255_s28 = smov 8  }
  0x39   : > { %v275_v10 = vld [vmem:[%s6336_s26] sm:$0xff]  ;;  %v309_v11 = vpack.c.bf16 %v280_v8, %v279_v7  ;;  %v276_v12 = vld [vmem:[%s6336_s26 + $0x8] sm:$0xff]  ;;  %v286_v14 = vld [vmem:[%s6336_s26 + $0x58] sm:$0xff]  ;;  %s6256_s29 = smov 12   ;;  %s6257_s30 = smov 16   ;;  %vm2372_vm3 = vcmask 1041408  }
  0x3a   : > { %v6406_v15 = vrot.slane %v492_v5, 1  ;;  %326 = vst.msk [vmem:[#allocation3 + $0x38] sm:$0xff] %vm324_vm1, %v308_v9  ;;  %v307_v16 = vpack.c.bf16 %v276_v12, %v275_v10  ;;  %v287_v17 = vld [vmem:[%s6336_s26 + $0x60] sm:$0xff]  ;;  %v288_v18 = vld [vmem:[%s6336_s26 + $0x68] sm:$0xff]  ;;  %v312_v19 = vpack.c.bf16 %v286_v14, %v285_v13  ;;  %v281_v20 = vld [vmem:[%s6336_s26 + $0x30] sm:$0xff]  ;;  %s6258_s5 = smov 20  }
  0x3b   : > { %327 = vst.msk [vmem:[#allocation3 + $0x50] sm:$0xff] %vm324_vm1, %v309_v11  ;;  %v313_v21 = vpack.c.bf16 %v288_v18, %v287_v17  ;;  %v282_v22 = vld [vmem:[%s6336_s26 + $0x38] sm:$0xff]  ;;  %v283_v23 = vld [vmem:[%s6336_s26 + $0x40] sm:$0xff]  ;;  %v284_v24 = vld [vmem:[%s6336_s26 + $0x48] sm:$0xff]  ;;  %s6259_s6 = smov 24   ;;  %s6260_s9 = smov 28  }
  0x3c   : > { %v497_v25 = vor.u32 %v495_v6, %v6406_v15  ;;  %325 = vst.msk [vmem:[#allocation3 + $0x20] sm:$0xff] %vm324_vm1, %v307_v16  ;;  %330 = vst.msk [vmem:[#allocation3 + $0x98] sm:$0xff] %vm324_vm1, %v312_v19  ;;  %v310_v26 = vpack.c.bf16 %v282_v22, %v281_v20  ;;  %v311_v27 = vpack.c.bf16 %v284_v24, %v283_v23  ;;  %v289_v28 = vld [vmem:[%s6336_s26 + $0x70] sm:$0xff]  ;;  %v290_v29 = vld [vmem:[%s6336_s26 + $0x78] sm:$0xff]  ;;  %s6261_s14 = smov 32   ;;  %vm1692_vm4 = vcmask 64512  }
  0x3d   : > { %v291_v30 = vld [vmem:[%s6336_s26 + $0x80] sm:$0xff]  ;;  %331 = vst.msk [vmem:[#allocation3 + $0xb0] sm:$0xff] %vm324_vm1, %v313_v21  ;;  %v292_v31 = vld [vmem:[%s6336_s26 + $0x88] sm:$0xff]  ;;  %v314_v32 = vpack.c.bf16 %v290_v29, %v289_v28  ;;  %v293_v33 = vld [vmem:[%s6336_s26 + $0x90] sm:$0xff]  ;;  %vm1822_vm5 = vcmask 130048   ;;  %vm1757_vm6 = vcmask 97280  }
  0x3e   : > { %v294_v34 = vld [vmem:[%s6336_s26 + $0x98] sm:$0xff]  ;;  %605 = vrot.lane.b32.xlu0 %v497_v25, %s6254_s27  ;;  %328 = vst.msk [vmem:[#allocation3 + $0x68] sm:$0xff] %vm324_vm1, %v310_v26  ;;  %329 = vst.msk [vmem:[#allocation3 + $0x80] sm:$0xff] %vm324_vm1, %v311_v27  ;;  %v315_v35 = vpack.c.bf16 %v292_v31, %v291_v30  ;;  %v295_v37 = vld [vmem:[%s6336_s26 + $0xa0] sm:$0xff]  ;;  %vm1887_vm7 = vcmask 162816   ;;  %vm1952_vm8 = vcmask 195584  }
  0x3f   : > { %v316_v36 = vpack.c.bf16 %v294_v34, %v293_v33  ;;  %v296_v38 = vld [vmem:[%s6336_s26 + $0xa8] sm:$0xff]  ;;  %v297_v39 = vld [vmem:[%s6336_s26 + $0xb0] sm:$0xff]  ;;  %332 = vst.msk [vmem:[#allocation3 + $0xc8] sm:$0xff] %vm324_vm1, %v314_v32  ;;  %v298_v41 = vld [vmem:[%s6336_s26 + $0xb8] sm:$0xff]  ;;  %vm2017_vm9 = vcmask 228352   ;;  %vm2082_vm10 = vcmask 261120  }
  0x40   : > { %v317_v40 = vpack.c.bf16 %v296_v38, %v295_v37  ;;  %v299_v42 = vld [vmem:[%s6336_s26 + $0xc0] sm:$0xff]  ;;  %v300_v43 = vld [vmem:[%s6336_s26 + $0xc8] sm:$0xff]  ;;  %333 = vst.msk [vmem:[#allocation3 + $0xe0] sm:$0xff] %vm324_vm1, %v315_v35  ;;  %v318_v44 = vpack.c.bf16 %v298_v41, %v297_v39  ;;  %v301_v46 = vld [vmem:[%s6336_s26 + $0xd0] sm:$0xff]  ;;  %vm2147_vm11 = vsmask.f32 256 }
  0x41   : > { %334 = vst.msk [vmem:[#allocation3 + $0xf8] sm:$0xff] %vm324_vm1, %v316_v36  ;;  %v319_v45 = vpack.c.bf16 %v300_v43, %v299_v42  ;;  %v302_v47 = vld [vmem:[%s6336_s26 + $0xd8] sm:$0xff]  ;;  %v303_v48 = vld [vmem:[%s6336_s26 + $0xe0] sm:$0xff]  ;;  %v304_v51 = vld [vmem:[%s6336_s26 + $0xe8] sm:$0xff]  ;;  %vm2323_vm12 = vcmask 293888   ;;  %s5739_s22 = sshll.u32 %s6234_s15, 7 }
  0x42   : > { %v6441_v49 = vld [vmem:[#allocation3 + $0x38] sm:$0xff]  ;;  %335 = vst.msk [vmem:[#allocation3 + $0x110] sm:$0xff] %vm324_vm1, %v317_v40  ;;  %v320_v50 = vpack.c.bf16 %v302_v47, %v301_v46  ;;  %v6445_v52 = vld [vmem:[#allocation3 + $0x50] sm:$0xff]  ;;  %336 = vst.msk [vmem:[#allocation3 + $0x128] sm:$0xff] %vm324_vm1, %v318_v44  ;;  %v321_v54 = vpack.c.bf16 %v304_v51, %v303_v48  ;;  %s7622_s23 = scalar_lea.vmem [#allocation2], %s5739_s22  ;;  %vm2643_vm13 = vcmask 24576  }
  0x43   : > { %v506_v53 = vshll.u32 %v6441_v49, 16  ;;  %337 = vst.msk [vmem:[#allocation3 + $0x140] sm:$0xff] %vm324_vm1, %v319_v45  ;;  %v513_v55 = vshll.u32 %v6445_v52, 16  ;;  %v6451_v56 = vld [vmem:[#allocation3 + $0x20] sm:$0xff]  ;;  %v6453_v57 = vld [vmem:[#allocation3 + $0x98] sm:$0xff]  ;;  %v509_v16 = vshrl.u32 %v6441_v49, 16 }
  0x44   : > { %338 = vst.msk [vmem:[#allocation3 + $0x158] sm:$0xff] %vm324_vm1, %v320_v50  ;;  %v499_v59 = vshll.u32 %v6451_v56, 16  ;;  %v6459_v60 = vld [vmem:[#allocation3 + $0xb0] sm:$0xff]  ;;  %v534_v61 = vshll.u32 %v6453_v57, 16  ;;  %339 = vst.msk [vmem:[#allocation3 + $0x170] sm:$0xff] %vm324_vm1, %v321_v54  ;;  %v502_v13 = vshrl.u32 %v6451_v56, 16 }
  0x45   : > { %v6456_v58 = vrot.slane %v506_v53, 1  ;;  %v6463_v62 = vrot.slane %v513_v55, 1  ;;  %v541_v63 = vshll.u32 %v6459_v60, 16  ;;  %v6466_v0 = vld [vmem:[#allocation3 + $0x68] sm:$0xff]  ;;  %v6468_v1 = vld [vmem:[#allocation3 + $0x80] sm:$0xff]  ;;  %v516_v17 = vshrl.u32 %v6445_v52, 16 }
  0x46   : > { %v6470_v3 = vrot.slane %v499_v59, 1  ;;  %v6472_v4 = vrot.slane %v534_v61, 1  ;;  %v520_v5 = vshll.u32 %v6466_v0, 16  ;;  %v527_v6 = vshll.u32 %v6468_v1, 16  ;;  %v6507_v20 = vld [vmem:[#allocation3 + $0xc8] sm:$0xff] }
  0x47   : > { %v6478_v7 = vpack.i.bf16 %v6463_v62, %v6456_v58  ;;  %v543_v8 = vrot.slane %v541_v63, 1  ;;  %v6504_v18 = vor.u32 %v509_v16, %v6456_v58  ;;  %v530_v19 = vshrl.u32 %v6468_v1, 16  ;;  %v6509_v21 = vld [vmem:[#allocation3 + $0xe0] sm:$0xff] }
  0x48   : > { %v5929_v9 = vpack.i.bf16 %v6470_v3, %v6406_v15  ;;  %v6482_v10 = vrot.slane %v520_v5, 1  ;;  %v6484_v11 = vrot.slane %v527_v6, 1  ;;  %v6498_v15 = vor.u32 %v502_v13, %v6470_v3  ;;  %v6536_v33 = vld [vmem:[#allocation3 + $0xf8] sm:$0xff] }
  0x49   : > { %5935 = vrot.lane.b32.xlu1 %v6478_v7, %s6254_s27  ;;  %v5944_v12 = vpack.i.bf16 %v543_v8, %v6472_v4  ;;  %v6514_v22 = vor.u32 %v516_v17, %v6463_v62  ;;  %v523_v23 = vshrl.u32 %v6466_v0, 16  ;;  %v537_v25 = vshrl.u32 %v6453_v57, 16  ;;  %v6538_v34 = vld [vmem:[#allocation3 + $0x110] sm:$0xff]  ;;  %v6545_v39 = vld [vmem:[#allocation3 + $0x128] sm:$0xff] }
  0x4a   : > { %5930 = vrot.lane.b32.xlu0 %v5929_v9, %s6254_s27  ;;  %v6493_v14 = vpack.i.bf16 %v6484_v11, %v6482_v10  ;;  %v6520_v24 = vor.u32 %v530_v19, %v6484_v11  ;;  %v548_v26 = vshll.u32 %v6507_v20, 16  ;;  %v555_v27 = vshll.u32 %v6509_v21, 16  ;;  %v6550_v42 = vld [vmem:[#allocation3 + $0x140] sm:$0xff] }
  0x4b   : > { %v6528_v28 = vor.u32 %v523_v23, %v6482_v10  ;;  %v544_v29 = vshrl.u32 %v6459_v60, 16  ;;  %v6534_v30 = vor.u32 %v537_v25, %v6472_v4  ;;  %v551_v36 = vshrl.u32 %v6507_v20, 16  ;;  %v6561_v61 = vld [vmem:[#allocation3 + $0x158] sm:$0xff]  ;;  %v6563_v63 = vld [vmem:[#allocation3 + $0x170] sm:$0xff] }
  0x4c   : > { %v550_v31 = vrot.slane %v548_v26, 1  ;;  %v557_v32 = vrot.slane %v555_v27, 1  ;;  %v562_v37 = vshll.u32 %v6536_v33, 16  ;;  %v569_v38 = vshll.u32 %v6538_v34, 16 }
  0x4d   : > { %5945 = vrot.lane.b32.xlu1 %v5944_v12, %s6254_s27  ;;  %v546_v35 = vor.u32 %v544_v29, %v543_v8  ;;  %v558_v41 = vshrl.u32 %v6509_v21, 16  ;;  %v576_v43 = vshll.u32 %v6545_v39, 16  ;;  %v583_v47 = vshll.u32 %v6550_v42, 16 }
  0x4e   : > { %5940 = vrot.lane.b32.xlu0 %v6493_v14, %s6254_s27  ;;  %v5949_v40 = vpack.i.bf16 %v557_v32, %v550_v31  ;;  %v553_v44 = vor.u32 %v551_v36, %v550_v31  ;;  %v564_v45 = vrot.slane %v562_v37, 1  ;;  %v571_v46 = vrot.slane %v569_v38, 1  ;;  %v379_v38 = vld [vmem:[#allocation3 + $0x28] sm:$0x1] }
  0x4f   : > { %v560_v48 = vor.u32 %v558_v41, %v557_v32  ;;  %v565_v50 = vshrl.u32 %v6536_v33, 16  ;;  %v5969_v51 = vpack.i.bf16 %v6456_v58, %v6470_v3  ;;  %v578_v54 = vrot.slane %v576_v43, 1  ;;  %v378_v32 = vld [vmem:[#allocation3 + $0x10] sm:$0x1]  ;;  %v6049_v58 = vld [vmem:[%s9584_s1] sm:$0xff]  }
  0x50   : > { %v5954_v53 = vpack.i.bf16 %v571_v46, %v564_v45  ;;  %v585_v55 = vrot.slane %v583_v47, 1  ;;  %v572_v59 = vshrl.u32 %v6538_v34, 16  ;;  %v579_v8 = vshrl.u32 %v6545_v39, 16  ;;  %v443_v3 = vld [vmem:[#allocation3 + $0x30] sm:$0x80]  ;;  %5779 = vmatprep.subr.bf16.mxu0 %v6049_v58  ;;  %5855 = vmatprep.subr.bf16.mxu1 %v6049_v58 }
  0x51   : > { %609 = vrot.lane.b32.xlu1 %v6498_v15, %s6254_s27  ;;  %v567_v5 = vor.u32 %v565_v50, %v564_v45  ;;  %v590_v9 = vshll.u32 %v6561_v61, 16  ;;  %v597_v12 = vshll.u32 %v6563_v63, 16  ;;  %v586_v16 = vshrl.u32 %v6550_v42, 16  ;;  %v380_v45 = vld [vmem:[#allocation3 + $0x40] sm:$0x1]  ;;  %5780 = vmatpush3.bf16.msra.mxu0 %v6049_v58 }
  0x52   : > { %613 = vrot.lane.b32.xlu0 %v6504_v18, %s6254_s27  ;;  %v574_v6 = vor.u32 %v572_v59, %v571_v46  ;;  %v5959_v13 = vpack.i.bf16 %v585_v55, %v578_v54  ;;  %v581_v17 = vor.u32 %v579_v8, %v578_v54  ;;  %v593_v26 = vshrl.u32 %v6561_v61, 16  ;;  %v383_v8 = vld [vmem:[#allocation3 + $0x88] sm:$0x1]  ;;  %5858 = vmatpush3.bf16.msra.mxu1 %v6049_v58 }
  0x53   : > { %v592_v19 = vrot.slane %v590_v9, 1  ;;  %v599_v23 = vrot.slane %v597_v12, 1  ;;  %v588_v25 = vor.u32 %v586_v16, %v585_v55  ;;  %v600_v29 = vshrl.u32 %v6563_v63, 16  ;;  %v382_v55 = vld [vmem:[#allocation3 + $0x70] sm:$0x1] }
  0x54   : > { %v700_v36 = vrot.slane %v6394_v2, 1  ;;  %v701_v37 = vrot.slane %v378_v32, 1  ;;  %v6586_v41 = vrot.slane %v6451_v56, 1  ;;  %v6593_v2 = vrot.slane %v6441_v49, 1  ;;  %v384_v16 = vld [vmem:[#allocation3 + $0xa0] sm:$0x1] }
  0x55   : > { %617 = vrot.lane.b32.xlu1 %v6514_v22, %s6254_s27  ;;  %v5964_v27 = vpack.i.bf16 %v599_v23, %v592_v19  ;;  %v595_v31 = vor.u32 %v593_v26, %v592_v19  ;;  %v707_v47 = vrot.slane %v380_v45, 1  ;;  %v6601_v50 = vrot.slane %v6445_v52, 1 }
  0x56   : > { %625 = vrot.lane.b32.xlu0 %v6520_v24, %s6254_s27  ;;  %v702_v43 = vsel %vm699_vm2, %v700_v36, %v701_v37  ;;  %v6609_v59 = vrot.slane %v6466_v0, 1  ;;  %v6617_v9 = vrot.slane %v6468_v1, 1  ;;  %v721_v26 = vrot.slane %v6459_v60, 1  ;;  %v387_v37 = vld [vmem:[#allocation3 + $0xe8] sm:$0x1] }
  0x57   : > { %v724_v32 = vrot.slane %v6507_v20, 1  ;;  %v727_v60 = vrot.slane %v6509_v21, 1  ;;  %v730_v20 = vrot.slane %v6536_v33, 1  ;;  %v733_v21 = vrot.slane %v6538_v34, 1 }
  0x58   : > { %v736_v33 = vrot.slane %v6545_v39, 1  ;;  %v739_v34 = vrot.slane %v6550_v42, 1  ;;  %v742_v39 = vrot.slane %v6561_v61, 1  ;;  %v745_v42 = vrot.slane %v6563_v63, 1  ;;  %v394_v61 = vld [vmem:[#allocation3 + $0x18] sm:$0x80] }
  0x59   : > { %621 = vrot.lane.b32.xlu1 %v6528_v28, %s6254_s27 }
  0x5a   : > { %629 = vrot.lane.b32.xlu0 %v6534_v30, %s6254_s27 }
  0x5d   : > { %633 = vrot.lane.b32.xlu1 %v546_v35, %s6254_s27  ;;  %v602_v35 = vor.u32 %v600_v29, %v599_v23  ;;  %v719_v23 = vrot.slane %v384_v16, 1 }
  0x5e   : > { %5950 = vrot.lane.b32.xlu0 %v5949_v40, %s6254_s27  ;;  %v5979_v40 = vpack.i.bf16 %v6482_v10, %v6463_v62  ;;  %v447_v10 = vld [vmem:[#allocation3 + $0x60] sm:$0x80] }
  0x61   : > { %637 = vrot.lane.b32.xlu1 %v553_v44, %s6254_s27  ;;  %v704_v44 = vrot.slane %v379_v38, 1 }
  0x62   : > { %641 = vrot.lane.b32.xlu0 %v560_v48, %s6254_s27  ;;  %v381_v48 = vld [vmem:[#allocation3 + $0x58] sm:$0x1] }
  0x63   : > { %v705_v46 = vsel %vm699_vm2, %v6586_v41, %v704_v44  ;;  %v710_v54 = vrot.slane %v381_v48, 1  ;;  %v388_v44 = vld [vmem:[#allocation3 + $0x100] sm:$0x1] }
  0x65   : > { %5955 = vrot.lane.b32.xlu1 %v5954_v53, %s6254_s27  ;;  %v708_v53 = vsel %vm699_vm2, %v6593_v2, %v707_v47  ;;  %v389_v47 = vld [vmem:[#allocation3 + $0x118] sm:$0x1] }
  0x66   : > { %645 = vrot.lane.b32.xlu0 %v567_v5, %s6254_s27  ;;  %v711_v5 = vsel %vm699_vm2, %v6601_v50, %v710_v54  ;;  %v390_v54 = vld [vmem:[#allocation3 + $0x130] sm:$0x1] }
  0x69   : > { %649 = vrot.lane.b32.xlu1 %v574_v6, %s6254_s27  ;;  %v713_v6 = vrot.slane %v382_v55, 1 }
  0x6a   : > { %5960 = vrot.lane.b32.xlu0 %v5959_v13, %s6254_s27  ;;  %v716_v13 = vrot.slane %v383_v8, 1 }
  0x6b   : > { %v714_v12 = vsel %vm699_vm2, %v6609_v59, %v713_v6  ;;  %v391_v6 = vld [vmem:[#allocation3 + $0x148] sm:$0x1] }
  0x6c   : > { %v717_v19 = vsel %vm699_vm2, %v6617_v9, %v716_v13  ;;  %v392_v13 = vld [vmem:[#allocation3 + $0x160] sm:$0x1] }
  0x6d   : > { %653 = vrot.lane.b32.xlu1 %v581_v17, %s6254_s27  ;;  %v6625_v17 = vrot.slane %v6453_v57, 1 }
  0x6e   : > { %657 = vrot.lane.b32.xlu0 %v588_v25, %s6254_s27  ;;  %v385_v25 = vld [vmem:[#allocation3 + $0xb8] sm:$0x1] }
  0x6f   : > { %v722_v29 = vrot.slane %v385_v25, 1 }
  0x71   : > { %5965 = vrot.lane.b32.xlu1 %v5964_v27, %s6254_s27  ;;  %v720_v27 = vsel %vm699_vm2, %v6625_v17, %v719_v23  ;;  %v393_v23 = vld [vmem:[#allocation3 + $0x178] sm:$0x1] }
  0x72   : > { %661 = vrot.lane.b32.xlu0 %v595_v31, %s6254_s27  ;;  %v386_v31 = vld [vmem:[#allocation3 + $0xd0] sm:$0x1] }
  0x75   : > { %665 = vrot.lane.b32.xlu1 %v602_v35, %s6254_s27  ;;  %v723_v35 = vsel %vm699_vm2, %v721_v26, %v722_v29 }
  0x76   : > { %748 = vrot.lane.b32.xlu0 %v700_v36, %s6255_s28  ;;  %v725_v36 = vrot.slane %v386_v31, 1  ;;  %v396_v31 = vld [vmem:[#allocation3 + $0x30] sm:$0x80] }
  0x78   : > { %v726_v38 = vsel %vm699_vm2, %v724_v32, %v725_v36 }
  0x79   : > { %750 = vrot.lane.b32.xlu1 %v702_v43, %s6255_s28  ;;  %v728_v43 = vrot.slane %v387_v37, 1  ;;  %v400_v37 = vld [vmem:[#allocation3 + $0x60] sm:$0x80] }
  0x7a   : > { %752 = vrot.lane.b32.xlu0 %v6586_v41, %s6255_s28 }
  0x7b   : > { %v729_v45 = vsel %vm699_vm2, %v727_v60, %v728_v43  ;;  %v402_v43 = vld [vmem:[#allocation3 + $0x78] sm:$0x80] }
  0x7d   : > { %754 = vrot.lane.b32.xlu1 %v705_v46, %s6255_s28  ;;  %v731_v46 = vrot.slane %v388_v44, 1 }
  0x7e   : > { %756 = vrot.lane.b32.xlu0 %v6593_v2, %s6255_s28 }
  0x7f   : > { %v732_v48 = vsel %vm699_vm2, %v730_v20, %v731_v46 }
  0x81   : > { %758 = vrot.lane.b32.xlu1 %v708_v53, %s6255_s28  ;;  %v734_v53 = vrot.slane %v389_v47, 1 }
  0x82   : > { %760 = vrot.lane.b32.xlu0 %v6601_v50, %s6255_s28 }
  0x83   : > { %v735_v55 = vsel %vm699_vm2, %v733_v21, %v734_v53 }
  0x85   : > { %762 = vrot.lane.b32.xlu1 %v711_v5, %s6255_s28  ;;  %v737_v5 = vrot.slane %v390_v54, 1 }
  0x86   : > { %764 = vrot.lane.b32.xlu0 %v6609_v59, %s6255_s28 }
  0x87   : > { %v738_v8 = vsel %vm699_vm2, %v736_v33, %v737_v5 }
  0x89   : > { %766 = vrot.lane.b32.xlu1 %v714_v12, %s6255_s28  ;;  %v740_v12 = vrot.slane %v391_v6, 1 }
  0x8a   : > { %768 = vrot.lane.b32.xlu0 %v6617_v9, %s6255_s28 }
  0x8b   : > { %v741_v16 = vsel %vm699_vm2, %v739_v34, %v740_v12 }
  0x8d   : > { %770 = vrot.lane.b32.xlu1 %v717_v19, %s6255_s28  ;;  %v743_v19 = vrot.slane %v392_v13, 1  ;;  %v475_v13 = vld [vmem:[#allocation3 + $0x40] sm:$0x1] }
  0x8e   : > { %772 = vrot.lane.b32.xlu0 %v6625_v17, %s6255_s28 }
  0x8f   : > { %v744_v25 = vsel %vm699_vm2, %v742_v39, %v743_v19 }
  0x91   : > { %774 = vrot.lane.b32.xlu1 %v720_v27, %s6255_s28 }
  0x92   : > { %776 = vrot.lane.b32.xlu0 %v721_v26, %s6255_s28  ;;  %v746_v26 = vrot.slane %v393_v23, 1  ;;  %v6051_v23 = vld [vmem:[%s9584_s1 + $0x10] ss:$0 sps:$4 sm:$0x33]  }
  0x94   : > { %v747_v27 = vsel %vm699_vm2, %v745_v42, %v746_v26 }
  0x95   : > { %778 = vrot.lane.b32.xlu1 %v723_v35, %s6255_s28 }
  0x96   : > { %780 = vrot.lane.b32.xlu0 %v724_v32, %s6255_s28  ;;  %v398_v32 = vld [vmem:[#allocation3 + $0x48] sm:$0x80] }
  0x99   : > { %782 = vrot.lane.b32.xlu1 %v726_v38, %s6255_s28 }
  0x9a   : > { %784 = vrot.lane.b32.xlu0 %v727_v60, %s6255_s28 }
  0x9d   : > { %786 = vrot.lane.b32.xlu1 %v729_v45, %s6255_s28 }
  0x9e   : > { %788 = vrot.lane.b32.xlu0 %v730_v20, %s6255_s28  ;;  %v426_v20 = vld [vmem:[#allocation3 + $0x28] sm:$0x1] }
  0x9f   : > { %v1101_v46 = vrot.slane %v426_v20, 1 }
  0xa1   : > { %790 = vrot.lane.b32.xlu1 %v732_v48, %s6255_s28  ;;  %v1102_v53 = vsel %vm699_vm2, %v6586_v41, %v1101_v46 }
  0xa2   : > { %792 = vrot.lane.b32.xlu0 %v733_v21, %s6255_s28  ;;  %v427_v21 = vld [vmem:[#allocation3 + $0x40] sm:$0x1] }
  0xa3   : > { %v1104_v54 = vrot.slane %v427_v21, 1 }
  0xa5   : > { %794 = vrot.lane.b32.xlu1 %v735_v55, %s6255_s28  ;;  %v1105_v5 = vsel %vm699_vm2, %v6593_v2, %v1104_v54 }
  0xa6   : > { %796 = vrot.lane.b32.xlu0 %v736_v33, %s6255_s28 }
  0xa9   : > { %798 = vrot.lane.b32.xlu1 %v738_v8, %s6255_s28 }
  0xaa   : > { %800 = vrot.lane.b32.xlu0 %v739_v34, %s6255_s28 }
  0xad   : > { %802 = vrot.lane.b32.xlu1 %v741_v16, %s6255_s28  ;;  %v476_v16 = vld [vmem:[#allocation3 + $0x58] sm:$0x1] }
  0xae   : > { %804 = vrot.lane.b32.xlu0 %v742_v39, %s6255_s28 }
  0xb0   : > { %v6672_v29 = vpop.permute.xlu0 %605 }
  0xb1   : > { %806 = vrot.lane.b32.xlu1 %v744_v25, %s6255_s28  ;;  %v1504_v25 = vrot.slane %v476_v16, 1  ;;  %v477_v16 = vld [vmem:[#allocation3 + $0x70] sm:$0x1] }
  0xb2   : > { %808 = vrot.lane.b32.xlu0 %v745_v42, %s6255_s28  ;;  %v445_v42 = vld [vmem:[#allocation3 + $0x48] sm:$0x80] }
  0xb5   : > { %810 = vrot.lane.b32.xlu1 %v747_v27, %s6255_s28  ;;  %v2374_v27 = vsel %vm2372_vm3, %v6051_v23, 0 }
  0xb6   : > { %844 = vrot.lane.b32.xlu0 %v394_v61, %s6256_s29 }
  0xb9   : > { %846 = vrot.lane.b32.xlu1 %v6451_v56, %s6256_s29 }
  0xba   : > { %848 = vrot.lane.b32.xlu0 %v396_v31, %s6256_s29  ;;  %v1505_v31 = vsel %vm699_vm2, %v6601_v50, %v1504_v25 }
  0xbb   : > { %v6677_v63 = vpop.permute.xlu1 %5935 }
  0xbc   : > { %v6679_v35 = vpop.permute.xlu0 %5930 }
  0xbd   : > { %850 = vrot.lane.b32.xlu1 %v6441_v49, %s6256_s29 }
  0xbe   : > { %852 = vrot.lane.b32.xlu0 %v398_v32, %s6256_s29 }
  0xbf   : > { %v6684_v36 = vpop.permute.xlu1 %5945 }
  0xc0   : > { %v6686_v60 = vpop.permute.xlu0 %5940 }
  0xc1   : > { %854 = vrot.lane.b32.xlu1 %v6445_v52, %s6256_s29 }
  0xc2   : > { %856 = vrot.lane.b32.xlu0 %v400_v37, %s6256_s29 }
  0xc3   : > { %v6691_v38 = vpop.permute.xlu1 %609 }
  0xc4   : > { %v6693_v44 = vpop.permute.xlu0 %613 }
  0xc5   : > { %858 = vrot.lane.b32.xlu1 %v6466_v0, %s6256_s29 }
  0xc6   : > { %860 = vrot.lane.b32.xlu0 %v402_v43, %s6256_s29  ;;  %v428_v43 = vld [vmem:[#allocation3 + $0x58] sm:$0x1] }
  0xc7   : > { %v6698_v45 = vpop.permute.xlu1 %617  ;;  %v1107_v46 = vrot.slane %v428_v43, 1 }
  0xc8   : > { %v6700_v47 = vpop.permute.xlu0 %625 }
  0xc9   : > { %862 = vrot.lane.b32.xlu1 %v6468_v1, %s6256_s29  ;;  %v1108_v54 = vsel %vm699_vm2, %v6601_v50, %v1107_v46 }
  0xca   : > { %1022 = vrot.lane.b32.xlu0 %v6498_v15, %s6257_s30 }
  0xcb   : > { %v6706_v48 = vpop.permute.xlu1 %621 }
  0xcc   : > { %v6710_v33 = vpop.permute.xlu0 %629 }
  0xcd   : > { %1026 = vrot.lane.b32.xlu1 %v6504_v18, %s6257_s30 }
  0xce   : > { %1150 = vrot.lane.b32.xlu0 %v1102_v53, %s6258_s5  ;;  %v429_v53 = vld [vmem:[#allocation3 + $0x70] sm:$0x1] }
  0xcf   : > { %v6715_v55 = vpop.permute.xlu1 %633 }
  0xd0   : > { %v6719_v15 = vpop.permute.xlu0 %5950 }
  0xd1   : > { %9596 = vst [vmem:[#allocation5_spill] sm:$0xff] %v6719_v15  ;;  %5970 = vrot.lane.b32.xlu1 %v5969_v51, %s6257_s30  ;;  %v1501_v51 = vrot.slane %v475_v13, 1  ;;  %v481_v15 = vld [vmem:[#allocation3 + $0xd0] sm:$0x1] }
  0xd2   : > { %1154 = vrot.lane.b32.xlu0 %v1105_v5, %s6258_s5  ;;  %v1110_v5 = vrot.slane %v429_v53, 1 }
  0xd3   : > { %v6726_v6 = vpop.permute.xlu1 %637  ;;  %v1502_v39 = vsel %vm699_vm2, %v6593_v2, %v1501_v51 }
  0xd4   : > { %9597 = vst [vmem:[#allocation6_spill] sm:$0xff] %v6726_v6  ;;  %v6728_v34 = vpop.permute.xlu0 %641  ;;  %v1111_v58 = vsel %vm699_vm2, %v6609_v59, %v1110_v5  ;;  %v430_v5 = vld [vmem:[#allocation3 + $0x88] sm:$0x1]  ;;  %v1519_v6 = vrot.slane %v481_v15, 1 }
  0xd5   : > { %9598 = vst [vmem:[#allocation7_spill] sm:$0xff] %v6728_v34  ;;  %1246 = vrot.lane.b32.xlu1 %v6441_v49, %s6259_s6  ;;  %v6973_v34 = vld [vmem:[#allocation3 + $0xe0] sm:$0xff] }
  0xd6   : > { %1148 = vrot.lane.b32.xlu0 %v6586_v41, %s6258_s5 }
  0xd7   : > { %v6734_v8 = vpop.permute.xlu1 %5955 }
  0xd8   : > { %9599 = vst [vmem:[#allocation8_spill] sm:$0xff] %v6734_v8  ;;  %v6736_v12 = vpop.permute.xlu0 %645 }
  0xd9   : > { %9600 = vst [vmem:[#allocation9_spill] sm:$0xff] %v6736_v12  ;;  %1250 = vrot.lane.b32.xlu1 %v6445_v52, %s6259_s6  ;;  %v6050_v52 = vld [vmem:[%s9584_s1 + $0x8] sm:$0xff]   ;;  %v408_v12 = vld [vmem:[#allocation3 + $0xc0] sm:$0x80] }
  0xda   : > { %1422 = vrot.lane.b32.xlu0 %v6504_v18, %s6260_s9  ;;  %5781 = vmatprep.subr.bf16.mxu0 %v6050_v52 }
  0xdb   : > { %v6745_v49 = vpop.permute.xlu1 %649  ;;  %5856 = vmatprep.subr.bf16.mxu1 %v6050_v52  ;;  %5782 = vmatpush3.bf16.msra.mxu0 %v6050_v52 }
  0xdc   : > { %9601 = vst [vmem:[#allocation10_spill] sm:$0xff] %v6745_v49  ;;  %v6747_v41 = vpop.permute.xlu0 %5960  ;;  %5859 = vmatpush3.bf16.msra.mxu1 %v6050_v52  ;;  %5867 = vmatprep.subr.msk.bf16.mxu0 %vm2372_vm3, %v6051_v23 }
  0xdd   : > { %9602 = vst [vmem:[#allocation11_spill] sm:$0xff] %v6747_v41  ;;  %1152 = vrot.lane.b32.xlu1 %v6593_v2, %s6258_s5  ;;  %5868 = vmatprep.subr.msk.bf16.mxu1 %vm2372_vm3, %v6051_v23 }
  0xde   : > { %1244 = vrot.lane.b32.xlu0 %v443_v3, %s6259_s6 }
  0xdf   : > { %v6755_v18 = vpop.permute.xlu1 %653  ;;  %5784 = vmatpush3.bf16.msra.mxu0 %v2374_v27 }
  0xe0   : > { %9603 = vst [vmem:[#allocation12_spill] sm:$0xff] %v6755_v18  ;;  %v6759_v19 = vpop.permute.xlu0 %657  ;;  %5860 = vmatpush3.bf16.msra.mxu1 %v2374_v27  ;;  %v432_v18 = vld [vmem:[#allocation3 + $0xb8] sm:$0x1] }
  0xe1   : > { %9604 = vst [vmem:[#allocation13_spill] sm:$0xff] %v6759_v19  ;;  %1426 = vrot.lane.b32.xlu1 %v6514_v22, %s6260_s9 }
  0xe2   : > { %1550 = vrot.lane.b32.xlu0 %v1502_v39, %s6261_s14 }
  0xe3   : > { %v6767_v26 = vpop.permute.xlu1 %5965 }
  0xe4   : > { %9605 = vst [vmem:[#allocation14_spill] sm:$0xff] %v6767_v26  ;;  %v6769_v61 = vpop.permute.xlu0 %661 }
  0xe5   : > { %9606 = vst [vmem:[#allocation15_spill] sm:$0xff] %v6769_v61  ;;  %1248 = vrot.lane.b32.xlu1 %v445_v42, %s6259_s6 }
  0xe6   : > { %5975 = vrot.lane.b32.xlu0 %v6478_v7, %s6260_s9 }
  0xe7   : > { %v6776_v32 = vpop.permute.xlu1 %665 }
  0xe8   : > { %9607 = vst [vmem:[#allocation16_spill] sm:$0xff] %v6776_v32  ;;  %v6778_v37 = vpop.permute.xlu0 %748 }
  0xe9   : > { %1554 = vrot.lane.b32.xlu1 %v1505_v31, %s6261_s14 }
  0xea   : > { %1548 = vrot.lane.b32.xlu0 %v6593_v2, %s6261_s14 }
  0xeb   : > { %v6783_v20 = vpop.permute.xlu1 %750 }
  0xec   : > { %v6785_v21 = vpop.permute.xlu0 %752 }
  0xed   : > { %1552 = vrot.lane.b32.xlu1 %v6601_v50, %s6261_s14 }
  0xee   : > { %1030 = vrot.lane.b32.xlu0 %v6514_v22, %s6257_s30 }
  0xef   : > { %v6791_v7 = vpop.permute.xlu1 %754 }
  0xf0   : > { %v6795_v13 = vpop.permute.xlu0 %756 }
  0xf1   : > { %1034 = vrot.lane.b32.xlu1 %v6528_v28, %s6257_s30 }
  0xf2   : > { %1158 = vrot.lane.b32.xlu0 %v1108_v54, %s6258_s5 }
  0xf3   : > { %v6800_v2 = vpop.permute.xlu1 %758 }
  0xf4   : > { %v6804_v3 = vpop.permute.xlu0 %760 }
  0xf5   : > { %5980 = vrot.lane.b32.xlu1 %v5979_v40, %s6257_s30  ;;  %v1507_v40 = vrot.slane %v477_v16, 1 }
  0xf6   : > { %1162 = vrot.lane.b32.xlu0 %v1111_v58, %s6258_s5 }
  0xf7   : > { %v6811_v22 = vpop.permute.xlu1 %762 }
  0xf8   : > { %v6813_v51 = vpop.permute.xlu0 %764 }
  0xf9   : > { %1254 = vrot.lane.b32.xlu1 %v6466_v0, %s6259_s6 }
  0xfa   : > { %1156 = vrot.lane.b32.xlu0 %v6601_v50, %s6258_s5  ;;  %v1508_v50 = vsel %vm699_vm2, %v6609_v59, %v1507_v40  ;;  %v431_v40 = vld [vmem:[#allocation3 + $0xa0] sm:$0x1] }
  0xfb   : > { %v6819_v52 = vpop.permute.xlu1 %766 }
  0xfc   : > { %v6821_v39 = vpop.permute.xlu0 %768 }
  0xfd   : > { %1258 = vrot.lane.b32.xlu1 %v6468_v1, %s6259_s6  ;;  %v478_v1 = vld [vmem:[#allocation3 + $0x88] sm:$0x1] }
  0xfe   : > { %1430 = vrot.lane.b32.xlu0 %v6528_v28, %s6260_s9  ;;  %v449_v28 = vld [vmem:[#allocation3 + $0x78] sm:$0x80]  ;;  %v1510_v25 = vrot.slane %v478_v1, 1  ;;  %v404_v1 = vld [vmem:[#allocation3 + $0x90] sm:$0x80] }
  0xff   : > { %v6827_v62 = vpop.permute.xlu1 %770 }
 0x100   : > { %v6829_v23 = vpop.permute.xlu0 %772  ;;  %v1511_v43 = vsel %vm699_vm2, %v6617_v9, %v1510_v25 }
 0x101   : > { %1160 = vrot.lane.b32.xlu1 %v6609_v59, %s6258_s5 }
 0x102   : > { %1252 = vrot.lane.b32.xlu0 %v447_v10, %s6259_s6 }
 0x103   : > { %v6834_v0 = vpop.permute.xlu1 %774 }
 0x104   : > { %v6838_v42 = vpop.permute.xlu0 %776 }
 0x105   : > { %9608 = vst [vmem:[#allocation17_spill] sm:$0xff] %v6838_v42  ;;  %1434 = vrot.lane.b32.xlu1 %v6520_v24, %s6260_s9 }
 0x106   : > { %1558 = vrot.lane.b32.xlu0 %v1508_v50, %s6261_s14 }
 0x107   : > { %v6843_v27 = vpop.permute.xlu1 %778 }
 0x108   : > { %9609 = vst [vmem:[#allocation18_spill] sm:$0xff] %v6843_v27  ;;  %v6845_v31 = vpop.permute.xlu0 %780  ;;  %v348_v27 = vld [vmem:[#allocation3 + $0x18] sm:$0x80] }
 0x109   : > { %9610 = vst [vmem:[#allocation19_spill] sm:$0xff] %v6845_v31  ;;  %1256 = vrot.lane.b32.xlu1 %v449_v28, %s6259_s6  ;;  %v1116_v28 = vrot.slane %v431_v40, 1  ;;  %v346_v31 = vld [vmem:[#allocation3] sm:$0x80] }
 0x10a   : > { %5985 = vrot.lane.b32.xlu0 %v6493_v14, %s6260_s9  ;;  %v1113_v14 = vrot.slane %v430_v5, 1 }
 0x10b   : > { %v6852_v46 = vpop.permute.xlu1 %782 }
 0x10c   : > { %9611 = vst [vmem:[#allocation20_spill] sm:$0xff] %v6852_v46  ;;  %v6854_v53 = vpop.permute.xlu0 %784 }
 0x10d   : > { %9612 = vst [vmem:[#allocation21_spill] sm:$0xff] %v6854_v53  ;;  %1562 = vrot.lane.b32.xlu1 %v1511_v43, %s6261_s14  ;;  %v5989_v43 = vpack.i.bf16 %v6472_v4, %v6484_v11  ;;  %v454_v4 = vld [vmem:[#allocation3 + $0xb0] sm:$0xff] }
 0x10e   : > { %1556 = vrot.lane.b32.xlu0 %v6609_v59, %s6261_s14  ;;  %v1114_v59 = vsel %vm699_vm2, %v6617_v9, %v1113_v14  ;;  %v1344_v11 = vshll.u32 %v454_v4, 16 }
 0x10f   : > { %v6859_v54 = vpop.permute.xlu1 %786 }
 0x110   : > { %9613 = vst [vmem:[#allocation22_spill] sm:$0xff] %v6859_v54  ;;  %v6861_v58 = vpop.permute.xlu0 %788 }
 0x111   : > { %9614 = vst [vmem:[#allocation23_spill] sm:$0xff] %v6861_v58  ;;  %1560 = vrot.lane.b32.xlu1 %v6617_v9, %s6261_s14  ;;  %v433_v58 = vld [vmem:[#allocation3 + $0xd0] sm:$0x1] }
 0x112   : > { %866 = vrot.lane.b32.xlu0 %v6453_v57, %s6256_s29  ;;  %v452_v57 = vld [vmem:[#allocation3 + $0x98] sm:$0xff] }
 0x113   : > { %v6867_v16 = vpop.permute.xlu1 %790  ;;  %v1340_v32 = vshrl.u32 %v452_v57, 16 }
 0x114   : > { %9615 = vst [vmem:[#allocation24_spill] sm:$0xff] %v6867_v16  ;;  %v6869_v10 = vpop.permute.xlu0 %792 }
 0x115   : > { %9616 = vst [vmem:[#allocation25_spill] sm:$0xff] %v6869_v10  ;;  %1038 = vrot.lane.b32.xlu1 %v6520_v24, %s6257_s30  ;;  %v1337_v24 = vshll.u32 %v452_v57, 16 }
 0x116   : > { %1042 = vrot.lane.b32.xlu0 %v6534_v30, %s6257_s30  ;;  %v1117_v30 = vsel %vm699_vm2, %v6625_v17, %v1116_v28 }
 0x117   : > { %v6877_v50 = vpop.permute.xlu1 %794  ;;  %v1339_v40 = vrot.slane %v1337_v24, 1  ;;  %v1347_v24 = vshrl.u32 %v454_v4, 16 }
 0x118   : > { %9617 = vst [vmem:[#allocation26_spill] sm:$0xff] %v6877_v50  ;;  %v6879_v25 = vpop.permute.xlu0 %796  ;;  %v1119_v50 = vrot.slane %v432_v18, 1 }
 0x119   : > { %9618 = vst [vmem:[#allocation27_spill] sm:$0xff] %v6879_v25  ;;  %1166 = vrot.lane.b32.xlu1 %v1114_v59, %s6258_s5 }
 0x11a   : > { %864 = vrot.lane.b32.xlu0 %v404_v1, %s6256_s29  ;;  %v1342_v1 = vor.u32 %v1340_v32, %v1339_v40 }
 0x11b   : > { %v6885_v5 = vpop.permute.xlu1 %798 }
 0x11c   : > { %9619 = vst [vmem:[#allocation28_spill] sm:$0xff] %v6885_v5  ;;  %v6889_v14 = vpop.permute.xlu0 %800  ;;  %v409_v5 = vld [vmem:[#allocation3 + $0xc8] sm:$0xff] }
 0x11d   : > { %9620 = vst [vmem:[#allocation29_spill] sm:$0xff] %v6889_v14  ;;  %5990 = vrot.lane.b32.xlu1 %v5989_v43, %s6257_s30  ;;  %v479_v43 = vld [vmem:[#allocation3 + $0xa0] sm:$0x1]  ;;  %v6955_v16 = vrot.slane %v409_v5, 1 }
 0x11e   : > { %1170 = vrot.lane.b32.xlu0 %v1117_v30, %s6258_s5  ;;  %v6904_v30 = vrot.slane %v1344_v11, 1  ;;  %v1513_v19 = vrot.slane %v479_v43, 1 }
 0x11f   : > { %v6893_v59 = vpop.permute.xlu1 %802 }
 0x120   : > { %9621 = vst [vmem:[#allocation30_spill] sm:$0xff] %v6893_v59  ;;  %v6895_v61 = vpop.permute.xlu0 %804  ;;  %v451_v59 = vld [vmem:[#allocation3 + $0x90] sm:$0x80]  ;;  %v5994_v43 = vpack.i.bf16 %v6904_v30, %v1339_v40 }
 0x121   : > { %9622 = vst [vmem:[#allocation31_spill] sm:$0xff] %v6895_v61  ;;  %1262 = vrot.lane.b32.xlu1 %v452_v57, %s6259_s6  ;;  %v1512_v61 = vrot.slane %v452_v57, 1  ;;  %v1515_v57 = vrot.slane %v454_v4, 1 }
 0x122   : > { %1164 = vrot.lane.b32.xlu0 %v6617_v9, %s6258_s5  ;;  %v1349_v9 = vor.u32 %v1347_v24, %v6904_v30 }
 0x123   : > { %v6900_v28 = vpop.permute.xlu1 %806  ;;  %v1514_v11 = vsel %vm699_vm2, %v1512_v61, %v1513_v19 }
 0x124   : > { %9623 = vst [vmem:[#allocation32_spill] sm:$0xff] %v6900_v28  ;;  %v6902_v26 = vpop.permute.xlu0 %808 }
 0x125   : > { %9624 = vst [vmem:[#allocation33_spill] sm:$0xff] %v6902_v26  ;;  %1266 = vrot.lane.b32.xlu1 %v454_v4, %s6259_s6  ;;  %v480_v26 = vld [vmem:[#allocation3 + $0xb8] sm:$0x1] }
 0x126   : > { %1438 = vrot.lane.b32.xlu0 %v1342_v1, %s6260_s9 }
 0x127   : > { %v6908_v14 = vpop.permute.xlu1 %810 }
 0x128   : > { %9625 = vst [vmem:[#allocation34_spill] sm:$0xff] %v6908_v14  ;;  %v6910_v25 = vpop.permute.xlu0 %844  ;;  %v453_v14 = vld [vmem:[#allocation3 + $0xa8] sm:$0x80] }
 0x129   : > { %1168 = vrot.lane.b32.xlu1 %v6625_v17, %s6258_s5  ;;  %v1516_v17 = vrot.slane %v480_v26, 1  ;;  %v958_v26 = vshll.u32 %v409_v5, 16 }
 0x12a   : > { %1260 = vrot.lane.b32.xlu0 %v451_v59, %s6259_s6 }
 0x12b   : > { %v6916_v32 = vpop.permute.xlu1 %846  ;;  %v1517_v19 = vsel %vm699_vm2, %v1515_v57, %v1516_v17 }
 0x12c   : > { %v6919_v1 = vpop.permute.xlu0 %848 }
 0x12d   : > { %1442 = vrot.lane.b32.xlu1 %v1349_v9, %s6260_s9 }
 0x12e   : > { %1566 = vrot.lane.b32.xlu0 %v1514_v11, %s6261_s14 }
 0x12f   : > { %v6924_v28 = vpop.permute.xlu1 %850 }
 0x130   : > { %v6926_v24 = vpop.permute.xlu0 %852 }
 0x131   : > { %1264 = vrot.lane.b32.xlu1 %v453_v14, %s6259_s6  ;;  %v6943_v14 = vrot.slane %v958_v26, 1  ;;  %v1120_v26 = vsel %vm699_vm2, %v1515_v57, %v1119_v50 }
 0x132   : > { %5995 = vrot.lane.b32.xlu0 %v5994_v43, %s6260_s9  ;;  %v961_v43 = vshrl.u32 %v409_v5, 16 }
 0x133   : > { %v6931_v59 = vpop.permute.xlu1 %854  ;;  %v5999_v18 = vpack.i.bf16 %v6943_v14, %v6904_v30  ;;  %v1358_v30 = vshll.u32 %v6973_v34, 16 }
 0x134   : > { %v6933_v41 = vpop.permute.xlu0 %856 }
 0x135   : > { %1570 = vrot.lane.b32.xlu1 %v1517_v19, %s6261_s14  ;;  %v406_v19 = vld [vmem:[#allocation3 + $0xa8] sm:$0x80] }
 0x136   : > { %1564 = vrot.lane.b32.xlu0 %v1512_v61, %s6261_s14  ;;  %v963_v61 = vor.u32 %v961_v43, %v6943_v14 }
 0x137   : > { %v6937_v40 = vpop.permute.xlu1 %858 }
 0x138   : > { %v6939_v11 = vpop.permute.xlu0 %860 }
 0x139   : > { %870 = vrot.lane.b32.xlu1 %v454_v4, %s6256_s29 }
 0x13a   : > { %1568 = vrot.lane.b32.xlu0 %v1515_v57, %s6261_s14 }
 0x13b   : > { %v6945_v17 = vpop.permute.xlu1 %862 }
 0x13c   : > { %v1023_v10 = vpop.permute.xlu0 %1022 }
 0x13d   : > { %874 = vrot.lane.b32.xlu1 %v409_v5, %s6256_s29 }
 0x13e   : > { %1046 = vrot.lane.b32.xlu0 %v1349_v9, %s6257_s30  ;;  %v1122_v9 = vrot.slane %v433_v58, 1 }
 0x13f   : > { %v6950_v49 = vpop.permute.xlu1 %1026 }
 0x140   : > { %v1151_v4 = vpop.permute.xlu0 %1150 }
 0x141   : > { %868 = vrot.lane.b32.xlu1 %v406_v19, %s6256_s29  ;;  %v1123_v19 = vsel %vm699_vm2, %v6955_v16, %v1122_v9  ;;  %v5932_v9 = vunpack.i.l.bf16 %v6679_v35 }
 0x142   : > { %1050 = vrot.lane.b32.xlu0 %v963_v61, %s6257_s30 }
 0x143   : > { %v6957_v8 = vpop.permute.xlu1 %5970 }
 0x144   : > { %v6959_v53 = vpop.permute.xlu0 %1154 }
 0x145   : > { %1174 = vrot.lane.b32.xlu1 %v1120_v26, %s6258_s5 }
 0x146   : > { %872 = vrot.lane.b32.xlu0 %v408_v12, %s6256_s29  ;;  %v6052_v12 = vld [vmem:[#allocation3 + $0x8] sm:$0xff] }
 0x147   : > { %v1247_v43 = vpop.permute.xlu1 %1246  ;;  %v1616_v26 = vsel %vm324_vm1, %v6052_v12, %v6672_v29  ;;  %v6986_v12 = vrot.slane %v1358_v30, 1 }
 0x148   : > { %v6967_v50 = vpop.permute.xlu0 %1148 }
 0x149   : > { %6000 = vrot.lane.b32.xlu1 %v5999_v18, %s6257_s30  ;;  %v1696_v18 = vsel %vm1692_vm4, %v1616_v26, %v6783_v20  ;;  %v5972_v26 = vunpack.i.l.bf16 %v6957_v8 }
 0x14a   : > { %1178 = vrot.lane.b32.xlu0 %v1123_v19, %s6258_s5 }
 0x14b   : > { %v6971_v58 = vpop.permute.xlu1 %1250 }
 0x14c   : > { %v1423_v54 = vpop.permute.xlu0 %1422 }
 0x14d   : > { %1270 = vrot.lane.b32.xlu1 %v409_v5, %s6259_s6  ;;  %v1761_v5 = vsel %vm1757_vm6, %v1696_v18, %v6916_v32  ;;  %v5933_v32 = vunpack.i.h.bf16 %v6679_v35  ;;  %v1614_v18 = vsel %vm324_vm1, %v346_v31, %v5932_v9  ;;  %v1520_v9 = vsel %vm699_vm2, %v6955_v16, %v1519_v6 }
 0x14e   : > { %1172 = vrot.lane.b32.xlu0 %v1515_v57, %s6258_s5  ;;  %v1826_v29 = vsel %vm1822_vm5, %v1761_v5, %v1023_v10  ;;  %v1361_v57 = vshrl.u32 %v6973_v34, 16  ;;  %v455_v5 = vld [vmem:[#allocation3 + $0xc0] sm:$0x80]  ;;  %v1694_v42 = vsel %vm1692_vm4, %v1614_v18, %v6778_v37 }
 0x14f   : > { %v1153_v19 = vpop.permute.xlu1 %1152  ;;  %v1891_v20 = vsel %vm1887_vm7, %v1826_v29, %v1151_v4  ;;  %v1759_v35 = vsel %vm1757_vm6, %v1694_v42, %v6910_v25  ;;  %v7020_v42 = vrot.slane %v6973_v34, 1 }
 0x150   : > { %v1245_v46 = vpop.permute.xlu0 %1244  ;;  %v1956_v10 = vsel %vm1952_vm8, %v1891_v20, %v1247_v43  ;;  %v7009_v15 = vor.u32 %v1361_v57, %v6986_v12  ;;  %v1824_v43 = vsel %vm1822_vm5, %v1759_v35, %v5972_v26  ;;  %v482_v57 = vld [vmem:[#allocation3 + $0xe8] sm:$0x1] }
 0x151   : > { %1274 = vrot.lane.b32.xlu1 %v6973_v34, %s6259_s6  ;;  %v2021_v4 = vsel %vm2017_vm9, %v1956_v10, %v1423_v54  ;;  %v5973_v54 = vunpack.i.h.bf16 %v6957_v8  ;;  %v1889_v6 = vsel %vm1887_vm7, %v1824_v43, %v6967_v50  ;;  %v1522_v10 = vrot.slane %v482_v57, 1 }
 0x152   : > { %1446 = vrot.lane.b32.xlu0 %v963_v61, %s6260_s9  ;;  %v1621_v61 = vsel %vm324_vm1, %v6451_v56, %v6691_v38  ;;  %v1619_v56 = vsel %vm324_vm1, %v348_v27, %v5933_v32  ;;  %v6004_v27 = vpack.i.bf16 %v6986_v12, %v6943_v14 }
 0x153   : > { %v1427_v30 = vpop.permute.xlu1 %1426  ;;  %v1700_v37 = vsel %vm1692_vm4, %v1621_v61, %v6791_v7  ;;  %v1698_v8 = vsel %vm1692_vm4, %v1619_v56, %v6785_v21  ;;  %v1954_v21 = vsel %vm1952_vm8, %v1889_v6, %v1245_v46 }
 0x154   : > { %v1551_v29 = vpop.permute.xlu0 %1550  ;;  %v1765_v38 = vsel %vm1757_vm6, %v1700_v37, %v6924_v28  ;;  %v1763_v28 = vsel %vm1757_vm6, %v1698_v8, %v6919_v1  ;;  %v457_v1 = vld [vmem:[#allocation3 + $0xd8] sm:$0x80] }
 0x155   : > { %v2086_v31 = vsel %vm2082_vm10, %v2021_v4, %v1551_v29  ;;  %1176 = vrot.lane.b32.xlu1 %v6955_v16, %s6258_s5  ;;  %v1830_v7 = vsel %vm1822_vm5, %v1765_v38, %v6950_v49  ;;  %v1828_v14 = vsel %vm1822_vm5, %v1763_v28, %v5973_v54  ;;  %v306_v28 = vld [vmem:[%s6336_s26 + $0xf8] sm:$0xff] }
 0x156   : > { %1268 = vrot.lane.b32.xlu0 %v455_v5, %s6259_s6  ;;  %v2151_v20 = vshrl.u32 %v2086_v31, 16  ;;  %v1895_v32 = vsel %vm1887_vm7, %v1830_v7, %v6959_v53  ;;  %v1893_v53 = vsel %vm1887_vm7, %v1828_v14, %v1153_v19  ;;  %v2154_v43 = vshll.u32 %v2086_v31, 16 }
 0x157   : > { %v1249_v25 = vpop.permute.xlu1 %1248  ;;  %v1960_v49 = vsel %vm1952_vm8, %v1895_v32, %v6971_v58  ;;  %v1523_v19 = vsel %vm699_vm2, %v7020_v42, %v1522_v10 }
 0x158   : > { %v5976_v26 = vpop.permute.xlu0 %5975  ;;  %v2025_v5 = vsel %vm2017_vm9, %v1960_v49, %v1427_v30  ;;  %v2153_v61 = vrot.slane %v2151_v20, 7  ;;  %v1958_v35 = vsel %vm1952_vm8, %v1893_v53, %v1249_v25 }
 0x159   : > { %v5977_v18 = vunpack.i.l.bf16 %v5976_v26  ;;  %1450 = vrot.lane.b32.xlu1 %v7009_v15, %s6260_s9  ;;  %v5978_v50 = vunpack.i.h.bf16 %v5976_v26 }
 0x15a   : > { %1574 = vrot.lane.b32.xlu0 %v1520_v9, %s6261_s14  ;;  %v7054_v9 = vld [vmem:[#allocation3 + $0xf8] sm:$0xff]  ;;  %v2156_v57 = vor.u32 %v2154_v43, %v2153_v61  ;;  %v412_v43 = vld [vmem:[#allocation3 + $0xf0] sm:$0x80] }
 0x15b   : > { %v2019_v4 = vsel %vm2017_vm9, %v1954_v21, %v5977_v18  ;;  %v1555_v29 = vpop.permute.xlu1 %1554  ;;  %v2023_v25 = vsel %vm2017_vm9, %v1958_v35, %v5978_v50  ;;  %v972_v6 = vshll.u32 %v7054_v9, 16  ;;  %v975_v53 = vshrl.u32 %v7054_v9, 16  ;;  %v434_v50 = vld [vmem:[#allocation3 + $0xe8] sm:$0x1] }
 0x15c   : > { %v1549_v58 = vpop.permute.xlu0 %1548  ;;  %v2090_v46 = vsel %vm2082_vm10, %v2025_v5, %v1555_v29  ;;  %v410_v29 = vld [vmem:[#allocation3 + $0xd8] sm:$0x80]  ;;  %v1125_v61 = vrot.slane %v434_v50, 1 }
 0x15d   : > { %v2084_v37 = vsel %vm2082_vm10, %v2019_v4, %v1549_v58  ;;  %v2161_v54 = vshrl.u32 %v2090_v46, 16  ;;  %1272 = vrot.lane.b32.xlu1 %v457_v1, %s6259_s6  ;;  %v2164_v20 = vshll.u32 %v2090_v46, 16  ;;  %v435_v46 = vld [vmem:[#allocation3 + $0x100] sm:$0x1] }
 0x15e   : > { %v2148_v56 = vshrl.u32 %v2084_v37, 16  ;;  %6005 = vrot.lane.b32.xlu0 %v6004_v27, %s6260_s9  ;;  %v305_v27 = vld [vmem:[%s6336_s26 + $0xf0] sm:$0xff]  ;;  %v1126_v37 = vsel %vm699_vm2, %v7020_v42, %v1125_v61 }
 0x15f   : > { %v2163_v30 = vrot.slane %v2161_v54, 7  ;;  %v1553_v38 = vpop.permute.xlu1 %1552  ;;  %v322_v18 = vpack.c.bf16 %v306_v28, %v305_v27  ;;  %v7094_v54 = vrot.slane %v7054_v9, 1 }
 0x160   : > { %v2150_v8 = vrot.slane %v2148_v56, 7  ;;  %v1031_v7 = vpop.permute.xlu0 %1030  ;;  %v2088_v31 = vsel %vm2082_vm10, %v2023_v25, %v1553_v38  ;;  %v1128_v56 = vrot.slane %v435_v46, 1  ;;  %v6053_v38 = vld [vmem:[#allocation3 + $0x38] sm:$0xff] }
 0x161   : > { %v2158_v26 = vshrl.u32 %v2088_v31, 16  ;;  %1578 = vrot.lane.b32.xlu1 %v1523_v19, %s6261_s14  ;;  %v2166_v49 = vor.u32 %v2164_v20, %v2163_v30  ;;  %340 = vst.msk [vmem:[#allocation3 + $0x188] sm:$0xff] %vm324_vm1, %v322_v18  ;;  %v1626_v25 = vsel %vm324_vm1, %v6053_v38, %v6693_v44  ;;  %v5938_v44 = vunpack.i.h.bf16 %v6677_v63  ;;  %v352_v18 = vld [vmem:[#allocation3 + $0x48] sm:$0x80] }
 0x162   : > { %1572 = vrot.lane.b32.xlu0 %v6955_v16, %s6261_s14  ;;  %v2157_v32 = vsel %vm2147_vm11, %v2150_v8, %v2156_v57  ;;  %v7074_v16 = vrot.slane %v972_v6, 1  ;;  %v5937_v57 = vunpack.i.l.bf16 %v6677_v63  ;;  %v1704_v8 = vsel %vm1692_vm4, %v1626_v25, %v6800_v2 }
 0x163   : > { %v2160_v21 = vrot.slane %v2158_v26, 7  ;;  %5785 = vmatprep.mubr.msk.bf16.mxu0 %vm2323_vm12, %v2157_v32  ;;  %v7065_v14 = vpop.permute.xlu1 %1034  ;;  %v1129_v20 = vsel %vm699_vm2, %v7094_v54, %v1128_v56  ;;  %v350_v26 = vld [vmem:[#allocation3 + $0x30] sm:$0x80]  ;;  %v1769_v27 = vsel %vm1757_vm6, %v1704_v8, %v6931_v59 }
 0x164   : > { %v1159_v1 = vpop.permute.xlu0 %1158  ;;  %v6009_v30 = vpack.i.bf16 %v7074_v16, %v6986_v12  ;;  %v1834_v28 = vsel %vm1822_vm5, %v1769_v27, %v1031_v7  ;;  %v1624_v2 = vsel %vm324_vm1, %v350_v26, %v5937_v57  ;;  %v7117_v59 = vld [vmem:[#allocation3 + $0x110] sm:$0xff] }
 0x165   : > { %878 = vrot.lane.b32.xlu1 %v6973_v34, %s6256_s29  ;;  %v2167_v10 = vsel %vm2147_vm11, %v2160_v21, %v2166_v49  ;;  %v7086_v34 = vor.u32 %v975_v53, %v7074_v16  ;;  %v1899_v32 = vsel %vm1887_vm7, %v1834_v28, %v1159_v1  ;;  %v1702_v7 = vsel %vm1692_vm4, %v1624_v2, %v6795_v13  ;;  %v6054_v53 = vld [vmem:[#allocation3 + $0x50] sm:$0xff] }
 0x166   : > { %1576 = vrot.lane.b32.xlu0 %v7020_v42, %s6261_s14  ;;  %5786 = vmatmul.mubr.msk.bf16.vlgmr.msra.gmra.mrb[0].mxu0 %vm2323_vm12, %v2167_v10  ;;  %v1372_v1 = vshll.u32 %v7117_v59, 16  ;;  %v1631_v50 = vsel %vm324_vm1, %v6054_v53, %v6698_v45  ;;  %v459_v27 = vld [vmem:[#allocation3 + $0xf0] sm:$0x80] }
 0x167   : > { %v7077_v5 = vpop.permute.xlu1 %5980  ;;  %v1708_v13 = vsel %vm1692_vm4, %v1631_v50, %v6811_v22 }
 0x168   : > { %v7079_v4 = vpop.permute.xlu0 %1162  ;;  %v5982_v6 = vunpack.i.l.bf16 %v7077_v5  ;;  %v5983_v46 = vunpack.i.h.bf16 %v7077_v5  ;;  %v1375_v5 = vshrl.u32 %v7117_v59, 16 }
 0x169   : > { %882 = vrot.lane.b32.xlu1 %v7054_v9, %s6256_s29 }
 0x16a   : > { %1054 = vrot.lane.b32.xlu0 %v7009_v15, %s6257_s30 }
 0x16b   : > { %v1255_v35 = vpop.permute.xlu1 %1254 }
 0x16c   : > { %v1157_v58 = vpop.permute.xlu0 %1156  ;;  %v1964_v49 = vsel %vm1952_vm8, %v1899_v32, %v1255_v35  ;;  %v1629_v35 = vsel %vm324_vm1, %v352_v18, %v5938_v44 }
 0x16d   : > { %876 = vrot.lane.b32.xlu1 %v410_v29, %s6256_s29  ;;  %v1767_v29 = vsel %vm1757_vm6, %v1702_v7, %v6926_v24  ;;  %v1706_v45 = vsel %vm1692_vm4, %v1629_v35, %v6804_v3  ;;  %v1773_v24 = vsel %vm1757_vm6, %v1708_v13, %v6937_v40 }
 0x16e   : > { %1058 = vrot.lane.b32.xlu0 %v7086_v34, %s6257_s30  ;;  %v1838_v56 = vsel %vm1822_vm5, %v1773_v24, %v7065_v14 }
 0x16f   : > { %v1259_v15 = vpop.permute.xlu1 %1258  ;;  %v1903_v3 = vsel %vm1887_vm7, %v1838_v56, %v7079_v4 }
 0x170   : > { %v1431_v19 = vpop.permute.xlu0 %1430  ;;  %v1968_v14 = vsel %vm1952_vm8, %v1903_v3, %v1259_v15 }
 0x171   : > { %1182 = vrot.lane.b32.xlu1 %v1126_v37, %s6258_s5  ;;  %v2029_v10 = vsel %vm2017_vm9, %v1964_v49, %v1431_v19  ;;  %v1832_v37 = vsel %vm1822_vm5, %v1767_v29, %v5982_v6 }
 0x172   : > { %880 = vrot.lane.b32.xlu0 %v412_v43, %s6256_s29  ;;  %v1897_v38 = vsel %vm1887_vm7, %v1832_v37, %v1157_v58  ;;  %v461_v37 = vld [vmem:[#allocation3 + $0x108] sm:$0x80] }
 0x173   : > { %v1161_v31 = vpop.permute.xlu1 %1160 }
 0x174   : > { %v1253_v12 = vpop.permute.xlu0 %1252 }
 0x175   : > { %6010 = vrot.lane.b32.xlu1 %v6009_v30, %s6257_s30  ;;  %v7143_v30 = vrot.slane %v1372_v1, 1  ;;  %v1962_v25 = vsel %vm1952_vm8, %v1897_v38, %v1253_v12 }
 0x176   : > { %1186 = vrot.lane.b32.xlu0 %v1129_v20, %s6258_s5 }
 0x177   : > { %v1435_v21 = vpop.permute.xlu1 %1434 }
 0x178   : > { %v1559_v63 = vpop.permute.xlu0 %1558  ;;  %v2033_v4 = vsel %vm2017_vm9, %v1968_v14, %v1435_v21 }
 0x179   : > { %v2094_v61 = vsel %vm2082_vm10, %v2029_v10, %v1559_v63  ;;  %1278 = vrot.lane.b32.xlu1 %v7054_v9, %s6259_s6  ;;  %v483_v9 = vld [vmem:[#allocation3 + $0x100] sm:$0x1]  ;;  %v484_v10 = vld [vmem:[#allocation3 + $0x118] sm:$0x1] }
 0x17a   : > { %1180 = vrot.lane.b32.xlu0 %v7020_v42, %s6258_s5  ;;  %v2171_v19 = vshrl.u32 %v2094_v61, 16  ;;  %v1771_v42 = vsel %vm1757_vm6, %v1706_v45, %v6933_v41  ;;  %v1525_v8 = vrot.slane %v483_v9, 1  ;;  %v1528_v45 = vrot.slane %v484_v10, 1 }
 0x17b   : > { %v1257_v43 = vpop.permute.xlu1 %1256  ;;  %v1836_v57 = vsel %vm1822_vm5, %v1771_v42, %v5983_v46  ;;  %v6014_v46 = vpack.i.bf16 %v7143_v30, %v7074_v16  ;;  %v5943_v10 = vunpack.i.h.bf16 %v6686_v60 }
 0x17c   : > { %v5986_v22 = vpop.permute.xlu0 %5985  ;;  %v1901_v41 = vsel %vm1887_vm7, %v1836_v57, %v1161_v31  ;;  %v2173_v28 = vrot.slane %v2171_v19, 7  ;;  %v2174_v31 = vshll.u32 %v2094_v61, 16  ;;  %v1526_v7 = vsel %vm699_vm2, %v7094_v54, %v1525_v8  ;;  %v436_v8 = vld [vmem:[#allocation3 + $0x118] sm:$0x1] }
 0x17d   : > { %v5987_v40 = vunpack.i.l.bf16 %v5986_v22  ;;  %1282 = vrot.lane.b32.xlu1 %v7117_v59, %s6259_s6  ;;  %v5988_v20 = vunpack.i.h.bf16 %v5986_v22  ;;  %v1966_v15 = vsel %vm1952_vm8, %v1901_v41, %v1257_v43  ;;  %v7176_v61 = vrot.slane %v7117_v59, 1 }
 0x17e   : > { %1454 = vrot.lane.b32.xlu0 %v7086_v34, %s6260_s9  ;;  %v1377_v34 = vor.u32 %v1375_v5, %v7143_v30  ;;  %v2176_v63 = vor.u32 %v2174_v31, %v2173_v28  ;;  %v7191_v5 = vld [vmem:[#allocation3 + $0x128] sm:$0xff] }
 0x17f   : > { %v2027_v58 = vsel %vm2017_vm9, %v1962_v25, %v5987_v40  ;;  %v1563_v26 = vpop.permute.xlu1 %1562  ;;  %v2031_v21 = vsel %vm2017_vm9, %v1966_v15, %v5988_v20  ;;  %v1529_v16 = vsel %vm699_vm2, %v7176_v61, %v1528_v45  ;;  %v986_v3 = vshll.u32 %v7191_v5, 16 }
 0x180   : > { %v1557_v44 = vpop.permute.xlu0 %1556  ;;  %v2098_v12 = vsel %vm2082_vm10, %v2033_v4, %v1563_v26  ;;  %v989_v25 = vshrl.u32 %v7191_v5, 16  ;;  %v414_v4 = vld [vmem:[#allocation3 + $0x108] sm:$0x80]  ;;  %v437_v26 = vld [vmem:[#allocation3 + $0x130] sm:$0x1] }
 0x181   : > { %v2092_v32 = vsel %vm2082_vm10, %v2027_v58, %v1557_v44  ;;  %v2181_v6 = vshrl.u32 %v2098_v12, 16  ;;  %1184 = vrot.lane.b32.xlu1 %v7094_v54, %s6258_s5  ;;  %v2184_v29 = vshll.u32 %v2098_v12, 16  ;;  %v7207_v14 = vrot.slane %v986_v3, 1  ;;  %v7264_v3 = vld [vmem:[#allocation3 + $0x140] sm:$0xff] }
 0x182   : > { %v2168_v2 = vshrl.u32 %v2092_v32, 16  ;;  %1276 = vrot.lane.b32.xlu0 %v459_v27, %s6259_s6  ;;  %v6055_v27 = vld [vmem:[#allocation3 + $0x68] sm:$0xff]  ;;  %v5942_v44 = vunpack.i.l.bf16 %v6686_v60  ;;  %v7227_v32 = vrot.slane %v7191_v5, 1  ;;  %v1134_v31 = vrot.slane %v437_v26, 1 }
 0x183   : > { %v2183_v18 = vrot.slane %v2181_v6, 7  ;;  %v1561_v49 = vpop.permute.xlu1 %1560  ;;  %v1636_v28 = vsel %vm324_vm1, %v6055_v27, %v6706_v48 }
 0x184   : > { %v2170_v1 = vrot.slane %v2168_v2, 7  ;;  %v7171_v53 = vpop.permute.xlu0 %866  ;;  %v2096_v50 = vsel %vm2082_vm10, %v2031_v21, %v1561_v49  ;;  %v1712_v12 = vsel %vm1692_vm4, %v1636_v28, %v6819_v52  ;;  %v354_v2 = vld [vmem:[#allocation3 + $0x60] sm:$0x80]  ;;  %v6019_v21 = vpack.i.bf16 %v7207_v14, %v7143_v30  ;;  %v356_v30 = vld [vmem:[#allocation3 + $0x78] sm:$0x80] }
 0x185   : > { %v2178_v35 = vshrl.u32 %v2096_v50, 16  ;;  %1458 = vrot.lane.b32.xlu1 %v1377_v34, %s6260_s9  ;;  %v2186_v24 = vor.u32 %v2184_v29, %v2183_v18  ;;  %v1777_v48 = vsel %vm1757_vm6, %v1712_v12, %v6945_v17  ;;  %v1135_v50 = vsel %vm699_vm2, %v7227_v32, %v1134_v31  ;;  %v485_v28 = vld [vmem:[#allocation3 + $0x130] sm:$0x1] }
 0x186   : > { %1582 = vrot.lane.b32.xlu0 %v1526_v7, %s6261_s14  ;;  %v2177_v13 = vsel %vm2147_vm11, %v2170_v1, %v2176_v63  ;;  %v1634_v63 = vsel %vm324_vm1, %v354_v2, %v5942_v44  ;;  %v463_v2 = vld [vmem:[#allocation3 + $0x120] sm:$0x80] }
 0x187   : > { %v2180_v43 = vrot.slane %v2178_v35, 7  ;;  %5789 = vmatprep.mubr.msk.bf16.mxu0 %vm2323_vm12, %v2177_v13  ;;  %v1039_v9 = vpop.permute.xlu1 %1038  ;;  %v1710_v29 = vsel %vm1692_vm4, %v1634_v63, %v6813_v51 }
 0x188   : > { %v7183_v56 = vpop.permute.xlu0 %1042  ;;  %v1842_v49 = vsel %vm1822_vm5, %v1777_v48, %v1039_v9  ;;  %v1775_v60 = vsel %vm1757_vm6, %v1710_v29, %v6939_v11  ;;  %v1531_v48 = vrot.slane %v485_v28, 1 }
 0x189   : > { %1280 = vrot.lane.b32.xlu1 %v461_v37, %s6259_s6  ;;  %v2187_v19 = vsel %vm2147_vm11, %v2180_v43, %v2186_v24  ;;  %v1639_v43 = vsel %vm324_vm1, %v356_v30, %v5943_v10  ;;  %v486_v30 = vld [vmem:[#allocation3 + $0x148] sm:$0x1] }
 0x18a   : > { %6015 = vrot.lane.b32.xlu0 %v6014_v46, %s6260_s9  ;;  %5790 = vmatmul.mubr.msk.bf16.gmra.mrb[4].mxu0 %vm2323_vm12, %v2187_v19  ;;  %v6056_v46 = vld [vmem:[#allocation3 + $0x80] sm:$0xff]  ;;  %v1714_v11 = vsel %vm1692_vm4, %v1639_v43, %v6821_v39  ;;  %v1532_v29 = vsel %vm699_vm2, %v7227_v32, %v1531_v48 }
 0x18b   : > { %v1167_v22 = vpop.permute.xlu1 %1166  ;;  %v1641_v37 = vsel %vm324_vm1, %v6056_v46, %v6700_v47 }
 0x18c   : > { %v7193_v42 = vpop.permute.xlu0 %864  ;;  %v1907_v52 = vsel %vm1887_vm7, %v1842_v49, %v1167_v22  ;;  %v1716_v24 = vsel %vm1692_vm4, %v1641_v37, %v6827_v62  ;;  %v7308_v37 = vrot.slane %v7264_v3, 1 }
 0x18d   : > { %1586 = vrot.lane.b32.xlu1 %v1529_v16, %s6261_s14  ;;  %v1781_v9 = vsel %vm1757_vm6, %v1716_v24, %v7171_v53  ;;  %v1386_v53 = vshll.u32 %v7264_v3, 16  ;;  %v1779_v39 = vsel %vm1757_vm6, %v1714_v11, %v7193_v42  ;;  %v465_v24 = vld [vmem:[#allocation3 + $0x138] sm:$0x80] }
 0x18e   : > { %1580 = vrot.lane.b32.xlu0 %v7094_v54, %s6261_s14  ;;  %v7214_v54 = vor.u32 %v989_v25, %v7207_v14  ;;  %v1846_v16 = vsel %vm1822_vm5, %v1781_v9, %v7183_v56  ;;  %v7321_v11 = vld [vmem:[#allocation3 + $0x158] sm:$0xff] }
 0x18f   : > { %v7199_v38 = vpop.permute.xlu1 %5990  ;;  %v7286_v12 = vrot.slane %v1386_v53, 1  ;;  %v438_v53 = vld [vmem:[#allocation3 + $0x148] sm:$0x1] }
 0x190   : > { %v7201_v40 = vpop.permute.xlu0 %1170  ;;  %v5992_v7 = vunpack.i.l.bf16 %v7199_v38  ;;  %v5993_v47 = vunpack.i.h.bf16 %v7199_v38 }
 0x191   : > { %886 = vrot.lane.b32.xlu1 %v7117_v59, %s6256_s29  ;;  %v1131_v59 = vrot.slane %v436_v8, 1  ;;  %v1911_v25 = vsel %vm1887_vm7, %v1846_v16, %v7201_v40 }
 0x192   : > { %1584 = vrot.lane.b32.xlu0 %v7176_v61, %s6261_s14  ;;  %v1840_v51 = vsel %vm1822_vm5, %v1775_v60, %v5992_v7  ;;  %v1844_v40 = vsel %vm1822_vm5, %v1779_v39, %v5993_v47 }
 0x193   : > { %v1263_v57 = vpop.permute.xlu1 %1262  ;;  %v1132_v15 = vsel %vm699_vm2, %v7176_v61, %v1131_v59 }
 0x194   : > { %v1165_v41 = vpop.permute.xlu0 %1164  ;;  %v1972_v17 = vsel %vm1952_vm8, %v1907_v52, %v1263_v57 }
 0x195   : > { %890 = vrot.lane.b32.xlu1 %v7191_v5, %s6256_s29  ;;  %v1905_v57 = vsel %vm1887_vm7, %v1840_v51, %v1165_v41  ;;  %v1534_v51 = vrot.slane %v486_v30, 1 }
 0x196   : > { %1062 = vrot.lane.b32.xlu0 %v1377_v34, %s6257_s30  ;;  %v416_v34 = vld [vmem:[#allocation3 + $0x120] sm:$0x80] }
 0x197   : > { %v1267_v20 = vpop.permute.xlu1 %1266  ;;  %v1535_v47 = vsel %vm699_vm2, %v7308_v37, %v1534_v51  ;;  %v7393_v51 = vld [vmem:[#allocation3 + $0x170] sm:$0xff] }
 0x198   : > { %v1439_v58 = vpop.permute.xlu0 %1438  ;;  %v1976_v56 = vsel %vm1952_vm8, %v1911_v25, %v1267_v20 }
 0x199   : > { %884 = vrot.lane.b32.xlu1 %v414_v4, %s6256_s29  ;;  %v2037_v35 = vsel %vm2017_vm9, %v1972_v17, %v1439_v58 }
 0x19a   : > { %1066 = vrot.lane.b32.xlu0 %v7214_v54, %s6257_s30 }
 0x19b   : > { %v1169_v6 = vpop.permute.xlu1 %1168 }
 0x19c   : > { %v1261_v18 = vpop.permute.xlu0 %1260  ;;  %v1909_v58 = vsel %vm1887_vm7, %v1844_v40, %v1169_v6 }
 0x19d   : > { %1190 = vrot.lane.b32.xlu1 %v1132_v15, %s6258_s5  ;;  %v1970_v38 = vsel %vm1952_vm8, %v1905_v57, %v1261_v18  ;;  %v1003_v57 = vshrl.u32 %v7321_v11, 16 }
 0x19e   : > { %888 = vrot.lane.b32.xlu0 %v416_v34, %s6256_s29 }
 0x19f   : > { %v1443_v1 = vpop.permute.xlu1 %1442 }
 0x1a0   : > { %v1567_v13 = vpop.permute.xlu0 %1566  ;;  %v2041_v41 = vsel %vm2017_vm9, %v1976_v56, %v1443_v1  ;;  %v418_v56 = vld [vmem:[#allocation3 + $0x138] sm:$0x80] }
 0x1a1   : > { %v2102_v45 = vsel %vm2082_vm10, %v2037_v35, %v1567_v13  ;;  %6020 = vrot.lane.b32.xlu1 %v6019_v21, %s6257_s30 }
 0x1a2   : > { %1194 = vrot.lane.b32.xlu0 %v1135_v50, %s6258_s5  ;;  %v2191_v22 = vshrl.u32 %v2102_v45, 16  ;;  %v2194_v34 = vshll.u32 %v2102_v45, 16  ;;  %v6024_v45 = vpack.i.bf16 %v7286_v12, %v7207_v14  ;;  %v1000_v14 = vshll.u32 %v7321_v11, 16 }
 0x1a3   : > { %v1265_v19 = vpop.permute.xlu1 %1264 }
 0x1a4   : > { %v5996_v62 = vpop.permute.xlu0 %5995  ;;  %v2193_v26 = vrot.slane %v2191_v22, 7  ;;  %v1974_v15 = vsel %vm1952_vm8, %v1909_v58, %v1265_v19  ;;  %v7337_v25 = vrot.slane %v1000_v14, 1  ;;  %v5947_v58 = vunpack.i.l.bf16 %v6684_v36 }
 0x1a5   : > { %v5997_v8 = vunpack.i.l.bf16 %v5996_v62  ;;  %1286 = vrot.lane.b32.xlu1 %v7191_v5, %s6259_s6  ;;  %v1389_v5 = vshrl.u32 %v7264_v3, 16  ;;  %v5998_v42 = vunpack.i.h.bf16 %v5996_v62 }
 0x1a6   : > { %1188 = vrot.lane.b32.xlu0 %v7176_v61, %s6258_s5  ;;  %v2196_v18 = vor.u32 %v2194_v34, %v2193_v26  ;;  %v6029_v34 = vpack.i.bf16 %v7337_v25, %v7286_v12 }
 0x1a7   : > { %v2035_v4 = vsel %vm2017_vm9, %v1970_v38, %v5997_v8  ;;  %v1571_v59 = vpop.permute.xlu1 %1570  ;;  %v2039_v7 = vsel %vm2017_vm9, %v1974_v15, %v5998_v42  ;;  %v1391_v63 = vor.u32 %v1389_v5, %v7286_v12  ;;  %v7357_v42 = vrot.slane %v7321_v11, 1  ;;  %v358_v15 = vld [vmem:[#allocation3 + $0x90] sm:$0x80]  ;;  %v360_v12 = vld [vmem:[#allocation3 + $0xa8] sm:$0x80] }
 0x1a8   : > { %v1565_v27 = vpop.permute.xlu0 %1564  ;;  %v2106_v20 = vsel %vm2082_vm10, %v2041_v41, %v1571_v59  ;;  %v439_v41 = vld [vmem:[#allocation3 + $0x160] sm:$0x1]  ;;  %v1644_v48 = vsel %vm324_vm1, %v358_v15, %v5947_v58 }
 0x1a9   : > { %v2100_v61 = vsel %vm2082_vm10, %v2035_v4, %v1565_v27  ;;  %v2201_v44 = vshrl.u32 %v2106_v20, 16  ;;  %1290 = vrot.lane.b32.xlu1 %v7264_v3, %s6259_s6  ;;  %v2204_v17 = vshll.u32 %v2106_v20, 16  ;;  %v6057_v4 = vld [vmem:[#allocation3 + $0x98] sm:$0xff]  ;;  %v420_v20 = vld [vmem:[#allocation3 + $0x150] sm:$0x80]  ;;  %v1140_v28 = vrot.slane %v439_v41, 1 }
 0x1aa   : > { %v2188_v31 = vshrl.u32 %v2100_v61, 16  ;;  %1462 = vrot.lane.b32.xlu0 %v7214_v54, %s6260_s9  ;;  %v1646_v59 = vsel %vm324_vm1, %v6057_v4, %v6710_v33 }
 0x1ab   : > { %v7292_v6 = vpop.permute.xlu1 %870  ;;  %v2203_v21 = vrot.slane %v2201_v44, 7  ;;  %v1720_v26 = vsel %vm1692_vm4, %v1646_v59, %v6834_v0 }
 0x1ac   : > { %v2190_v49 = vrot.slane %v2188_v31, 7  ;;  %v1569_v52 = vpop.permute.xlu0 %1568  ;;  %v1785_v33 = vsel %vm1757_vm6, %v1720_v26, %v7292_v6 }
 0x1ad   : > { %v2104_v10 = vsel %vm2082_vm10, %v2039_v7, %v1569_v52  ;;  %1192 = vrot.lane.b32.xlu1 %v7227_v32, %s6258_s5  ;;  %v2206_v35 = vor.u32 %v2204_v17, %v2203_v21  ;;  %v1718_v21 = vsel %vm1692_vm4, %v1644_v48, %v6829_v23 }
 0x1ae   : > { %v2198_v1 = vshrl.u32 %v2104_v10, 16  ;;  %1284 = vrot.lane.b32.xlu0 %v463_v2, %s6259_s6  ;;  %v2197_v54 = vsel %vm2147_vm11, %v2190_v49, %v2196_v18  ;;  %v5948_v2 = vunpack.i.h.bf16 %v6684_v36  ;;  %v1141_v49 = vsel %vm699_vm2, %v7357_v42, %v1140_v28  ;;  %v6058_v10 = vld [vmem:[#allocation3 + $0xb0] sm:$0xff] }
 0x1af   : > { %5793 = vmatprep.mubr.msk.bf16.mxu0 %vm2323_vm12, %v2197_v54  ;;  %v7302_v50 = vpop.permute.xlu1 %874 }
 0x1b0   : > { %v2200_v13 = vrot.slane %v2198_v1, 7  ;;  %v1047_v46 = vpop.permute.xlu0 %1046  ;;  %v9626_v1 = vld [vmem:[#allocation18_spill] sm:$0xff]  ;;  %v1649_v23 = vsel %vm324_vm1, %v360_v12, %v5948_v2 }
 0x1b1   : > { %1466 = vrot.lane.b32.xlu1 %v1391_v63, %s6260_s9  ;;  %v1850_v44 = vsel %vm1822_vm5, %v1785_v33, %v1047_v46 }
 0x1b2   : > { %1590 = vrot.lane.b32.xlu0 %v1532_v29, %s6261_s14  ;;  %v2207_v60 = vsel %vm2147_vm11, %v2200_v13, %v2206_v35  ;;  %v9627_v13 = vld [vmem:[#allocation17_spill] sm:$0xff] }
 0x1b3   : > { %5794 = vmatmul.mubr.msk.bf16.gmra.mrb[8].mxu0 %vm2323_vm12, %v2207_v60  ;;  %v869_v43 = vpop.permute.xlu1 %868  ;;  %v1722_v46 = vsel %vm1692_vm4, %v1649_v23, %v9627_v13  ;;  %v7450_v23 = vld [vmem:[#allocation3 + $0x188] sm:$0xff] }
 0x1b4   : > { %v7315_v9 = vpop.permute.xlu0 %1050  ;;  %v1783_v36 = vsel %vm1757_vm6, %v1718_v21, %v869_v43 }
 0x1b5   : > { %1288 = vrot.lane.b32.xlu1 %v465_v24, %s6259_s6 }
 0x1b6   : > { %6025 = vrot.lane.b32.xlu0 %v6024_v45, %s6260_s9 }
 0x1b7   : > { %v1175_v19 = vpop.permute.xlu1 %1174 }
 0x1b8   : > { %v7323_v16 = vpop.permute.xlu0 %872  ;;  %v1915_v0 = vsel %vm1887_vm7, %v1850_v44, %v1175_v19 }
 0x1b9   : > { %1594 = vrot.lane.b32.xlu1 %v1535_v47, %s6261_s14  ;;  %v1787_v14 = vsel %vm1757_vm6, %v1722_v46, %v7323_v16  ;;  %v1017_v46 = vshrl.u32 %v7450_v23, 16 }
 0x1ba   : > { %1588 = vrot.lane.b32.xlu0 %v7227_v32, %s6261_s14  ;;  %v7344_v32 = vor.u32 %v1003_v57, %v7337_v25 }
 0x1bb   : > { %v7329_v22 = vpop.permute.xlu1 %6000 }
 0x1bc   : > { %v7331_v62 = vpop.permute.xlu0 %1178  ;;  %v6002_v31 = vunpack.i.l.bf16 %v7329_v22 }
 0x1bd   : > { %894 = vrot.lane.b32.xlu1 %v7264_v3, %s6256_s29  ;;  %v1137_v3 = vrot.slane %v438_v53, 1 }
 0x1be   : > { %1592 = vrot.lane.b32.xlu0 %v7308_v37, %s6261_s14  ;;  %v1848_v29 = vsel %vm1822_vm5, %v1783_v36, %v6002_v31 }
 0x1bf   : > { %v1271_v8 = vpop.permute.xlu1 %1270  ;;  %v1138_v5 = vsel %vm699_vm2, %v7308_v37, %v1137_v3 }
 0x1c0   : > { %v1173_v39 = vpop.permute.xlu0 %1172  ;;  %v1980_v6 = vsel %vm1952_vm8, %v1915_v0, %v1271_v8 }
 0x1c1   : > { %898 = vrot.lane.b32.xlu1 %v7321_v11, %s6256_s29  ;;  %v1913_v47 = vsel %vm1887_vm7, %v1848_v29, %v1173_v39 }
 0x1c2   : > { %1070 = vrot.lane.b32.xlu0 %v1391_v63, %s6257_s30  ;;  %v1651_v63 = vsel %vm324_vm1, %v6058_v10, %v6715_v55  ;;  %v6003_v55 = vunpack.i.h.bf16 %v7329_v22 }
 0x1c3   : > { %v1275_v38 = vpop.permute.xlu1 %1274  ;;  %v1724_v54 = vsel %vm1692_vm4, %v1651_v63, %v9626_v1  ;;  %v469_v63 = vld [vmem:[#allocation3 + $0x168] sm:$0x80] }
 0x1c4   : > { %v1447_v40 = vpop.permute.xlu0 %1446  ;;  %v1789_v30 = vsel %vm1757_vm6, %v1724_v54, %v7302_v50  ;;  %v1400_v50 = vshll.u32 %v7393_v51, 16 }
 0x1c5   : > { %892 = vrot.lane.b32.xlu1 %v418_v56, %s6256_s29  ;;  %v2045_v52 = vsel %vm2017_vm9, %v1980_v6, %v1447_v40  ;;  %v1854_v60 = vsel %vm1822_vm5, %v1789_v30, %v7315_v9  ;;  %v487_v40 = vld [vmem:[#allocation3 + $0x160] sm:$0x1] }
 0x1c6   : > { %1074 = vrot.lane.b32.xlu0 %v7344_v32, %s6257_s30  ;;  %v1919_v43 = vsel %vm1887_vm7, %v1854_v60, %v7331_v62  ;;  %v1852_v62 = vsel %vm1822_vm5, %v1787_v14, %v6003_v55  ;;  %v7415_v59 = vrot.slane %v1400_v50, 1  ;;  %v441_v50 = vld [vmem:[#allocation3 + $0x190] sm:$0x1]  ;;  %v6059_v14 = vld [vmem:[#allocation3 + $0xc8] sm:$0xff] }
 0x1c7   : > { %v1177_v27 = vpop.permute.xlu1 %1176  ;;  %v1984_v9 = vsel %vm1952_vm8, %v1919_v43, %v1275_v38  ;;  %v422_v43 = vld [vmem:[#allocation3 + $0x168] sm:$0x80] }
 0x1c8   : > { %v1269_v61 = vpop.permute.xlu0 %1268  ;;  %v1917_v39 = vsel %vm1887_vm7, %v1852_v62, %v1177_v27  ;;  %v467_v27 = vld [vmem:[#allocation3 + $0x150] sm:$0x80]  ;;  %v6034_v10 = vpack.i.bf16 %v7415_v59, %v7337_v25  ;;  %v1014_v25 = vshll.u32 %v7450_v23, 16 }
 0x1c9   : > { %1198 = vrot.lane.b32.xlu1 %v1138_v5, %s6258_s5  ;;  %v1978_v22 = vsel %vm1952_vm8, %v1913_v47, %v1269_v61 }
 0x1ca   : > { %896 = vrot.lane.b32.xlu0 %v420_v20, %s6256_s29  ;;  %v1537_v20 = vrot.slane %v487_v40, 1  ;;  %v7466_v13 = vrot.slane %v1014_v25, 1 }
 0x1cb   : > { %v1451_v18 = vpop.permute.xlu1 %1450 }
 0x1cc   : > { %v1575_v7 = vpop.permute.xlu0 %1574  ;;  %v2049_v57 = vsel %vm2017_vm9, %v1984_v9, %v1451_v18  ;;  %v1538_v6 = vsel %vm699_vm2, %v7357_v42, %v1537_v20  ;;  %v488_v18 = vld [vmem:[#allocation3 + $0x178] sm:$0x1]  ;;  %v9628_v9 = vld [vmem:[#allocation6_spill] sm:$0xff] }
 0x1cd   : > { %v2110_v17 = vsel %vm2082_vm10, %v2045_v52, %v1575_v7  ;;  %6030 = vrot.lane.b32.xlu1 %v6029_v34, %s6257_s30  ;;  %v7437_v52 = vrot.slane %v7393_v51, 1  ;;  %v1540_v36 = vrot.slane %v488_v18, 1  ;;  %v9633_v18 = vld [vmem:[#allocation22_spill] sm:$0xff] }
 0x1ce   : > { %1202 = vrot.lane.b32.xlu0 %v1141_v49, %s6258_s5  ;;  %v2211_v45 = vshrl.u32 %v2110_v17, 16  ;;  %v2214_v5 = vshll.u32 %v2110_v17, 16 }
 0x1cf   : > { %v1273_v35 = vpop.permute.xlu1 %1272  ;;  %v1541_v54 = vsel %vm699_vm2, %v7437_v52, %v1540_v36  ;;  %v9634_v36 = vld [vmem:[#allocation21_spill] sm:$0xff] }
 0x1d0   : > { %v6006_v24 = vpop.permute.xlu0 %6005  ;;  %v2213_v56 = vrot.slane %v2211_v45, 7  ;;  %v1982_v41 = vsel %vm1952_vm8, %v1917_v39, %v1273_v35  ;;  %v440_v45 = vld [vmem:[#allocation3 + $0x178] sm:$0x1]  ;;  %v7486_v39 = vrot.slane %v7450_v23, 1 }
 0x1d1   : > { %v6007_v19 = vunpack.i.l.bf16 %v6006_v24  ;;  %1294 = vrot.lane.b32.xlu1 %v7321_v11, %s6259_s6  ;;  %v1403_v11 = vshrl.u32 %v7393_v51, 16  ;;  %v6008_v16 = vunpack.i.h.bf16 %v6006_v24 }
 0x1d2   : > { %1196 = vrot.lane.b32.xlu0 %v7308_v37, %s6258_s5  ;;  %v2216_v28 = vor.u32 %v2214_v5, %v2213_v56 }
 0x1d3   : > { %v2043_v8 = vsel %vm2017_vm9, %v1978_v22, %v6007_v19  ;;  %v1579_v53 = vpop.permute.xlu1 %1578  ;;  %v2047_v44 = vsel %vm2017_vm9, %v1982_v41, %v6008_v16  ;;  %v1405_v0 = vor.u32 %v1403_v11, %v7415_v59  ;;  %v1656_v22 = vsel %vm324_vm1, %v6059_v14, %v9628_v9  ;;  %v424_v16 = vld [vmem:[#allocation3 + $0x180] sm:$0x80] }
 0x1d4   : > { %v1573_v3 = vpop.permute.xlu0 %1572  ;;  %v2114_v38 = vsel %vm2082_vm10, %v2049_v57, %v1579_v53  ;;  %v9629_v57 = vld [vmem:[#allocation5_spill] sm:$0xff]  ;;  %v9630_v53 = vld [vmem:[#allocation20_spill] sm:$0xff] }
 0x1d5   : > { %v2108_v37 = vsel %vm2082_vm10, %v2043_v8, %v1573_v3  ;;  %v2221_v4 = vshrl.u32 %v2114_v38, 16  ;;  %1298 = vrot.lane.b32.xlu1 %v7393_v51, %s6259_s6  ;;  %v2224_v31 = vshll.u32 %v2114_v38, 16  ;;  %v5952_v8 = vunpack.i.l.bf16 %v9629_v57  ;;  %v362_v38 = vld [vmem:[#allocation3 + $0xc0] sm:$0x80] }
 0x1d6   : > { %v2208_v58 = vshrl.u32 %v2108_v37, 16  ;;  %1470 = vrot.lane.b32.xlu0 %v7344_v32, %s6260_s9  ;;  %v1728_v11 = vsel %vm1692_vm4, %v1656_v22, %v9630_v53  ;;  %v1146_v3 = vrot.slane %v441_v50, 1 }
 0x1d7   : > { %v7421_v26 = vpop.permute.xlu1 %878  ;;  %v2223_v33 = vrot.slane %v2221_v4, 7  ;;  %v6039_v4 = vpack.i.bf16 %v7466_v13, %v7415_v59  ;;  %v1654_v20 = vsel %vm324_vm1, %v362_v38, %v5952_v8  ;;  %v364_v59 = vld [vmem:[#allocation3 + $0xd8] sm:$0x80] }
 0x1d8   : > { %v2210_v15 = vrot.slane %v2208_v58, 7  ;;  %v1577_v61 = vpop.permute.xlu0 %1576  ;;  %v1793_v40 = vsel %vm1757_vm6, %v1728_v11, %v7421_v26 }
 0x1d9   : > { %v2112_v34 = vsel %vm2082_vm10, %v2047_v44, %v1577_v61  ;;  %1200 = vrot.lane.b32.xlu1 %v7357_v42, %s6258_s5  ;;  %v2226_v49 = vor.u32 %v2224_v31, %v2223_v33  ;;  %v9631_v33 = vld [vmem:[#allocation19_spill] sm:$0xff] }
 0x1da   : > { %v2218_v2 = vshrl.u32 %v2112_v34, 16  ;;  %1292 = vrot.lane.b32.xlu0 %v467_v27, %s6259_s6  ;;  %v2217_v32 = vsel %vm2147_vm11, %v2210_v15, %v2216_v28  ;;  %v5953_v27 = vunpack.i.h.bf16 %v9629_v57  ;;  %v1147_v15 = vsel %vm699_vm2, %v7486_v39, %v1146_v3  ;;  %v9632_v31 = vld [vmem:[#allocation7_spill] sm:$0xff]  ;;  %v471_v3 = vld [vmem:[#allocation3 + $0x180] sm:$0x80] }
 0x1db   : > { %5797 = vmatprep.mubr.msk.bf16.mxu0 %vm2323_vm12, %v2217_v32  ;;  %v7431_v48 = vpop.permute.xlu1 %882  ;;  %v1726_v61 = vsel %vm1692_vm4, %v1654_v20, %v9631_v33  ;;  %v490_v33 = vld [vmem:[#allocation3 + $0x1a8] sm:$0x1] }
 0x1dc   : > { %v2220_v21 = vrot.slane %v2218_v2, 7  ;;  %v1055_v12 = vpop.permute.xlu0 %1054 }
 0x1dd   : > { %1474 = vrot.lane.b32.xlu1 %v1405_v0, %s6260_s9  ;;  %v1858_v37 = vsel %vm1822_vm5, %v1793_v40, %v1055_v12  ;;  %v1659_v12 = vsel %vm324_vm1, %v364_v59, %v5953_v27 }
 0x1de   : > { %1598 = vrot.lane.b32.xlu0 %v1538_v6, %s6261_s14  ;;  %v2227_v7 = vsel %vm2147_vm11, %v2220_v21, %v2226_v49 }
 0x1df   : > { %5798 = vmatmul.mubr.msk.bf16.gmra.mrb[12].mxu0 %vm2323_vm12, %v2227_v7  ;;  %v877_v17 = vpop.permute.xlu1 %876 }
 0x1e0   : > { %v7444_v1 = vpop.permute.xlu0 %1058  ;;  %v1791_v32 = vsel %vm1757_vm6, %v1726_v61, %v877_v17  ;;  %v1730_v17 = vsel %vm1692_vm4, %v1659_v12, %v9634_v36 }
 0x1e1   : > { %1296 = vrot.lane.b32.xlu1 %v469_v63, %s6259_s6 }
 0x1e2   : > { %6035 = vrot.lane.b32.xlu0 %v6034_v10, %s6260_s9 }
 0x1e3   : > { %v1183_v29 = vpop.permute.xlu1 %1182 }
 0x1e4   : > { %v7452_v30 = vpop.permute.xlu0 %880  ;;  %v1923_v5 = vsel %vm1887_vm7, %v1858_v37, %v1183_v29 }
 0x1e5   : > { %1602 = vrot.lane.b32.xlu1 %v1541_v54, %s6261_s14 }
 0x1e6   : > { %1596 = vrot.lane.b32.xlu0 %v7357_v42, %s6261_s14  ;;  %v7473_v42 = vor.u32 %v1017_v46, %v7466_v13  ;;  %v7522_v46 = vld [vmem:[#allocation3 + $0x1a0] sm:$0xff] }
 0x1e7   : > { %v7458_v55 = vpop.permute.xlu1 %6010 }
 0x1e8   : > { %v7460_v35 = vpop.permute.xlu0 %1186  ;;  %v6012_v58 = vunpack.i.l.bf16 %v7458_v55  ;;  %v6013_v10 = vunpack.i.h.bf16 %v7458_v55  ;;  %v1795_v55 = vsel %vm1757_vm6, %v1730_v17, %v7452_v30 }
 0x1e9   : > { %902 = vrot.lane.b32.xlu1 %v7393_v51, %s6256_s29  ;;  %v1143_v51 = vrot.slane %v440_v45, 1 }
 0x1ea   : > { %1600 = vrot.lane.b32.xlu0 %v7437_v52, %s6261_s14  ;;  %v1856_v21 = vsel %vm1822_vm5, %v1791_v32, %v6012_v58  ;;  %v1546_v32 = vrot.slane %v490_v33, 1 }
 0x1eb   : > { %v1279_v60 = vpop.permute.xlu1 %1278  ;;  %v1144_v62 = vsel %vm699_vm2, %v7437_v52, %v1143_v51 }
 0x1ec   : > { %v1181_v24 = vpop.permute.xlu0 %1180  ;;  %v1988_v26 = vsel %vm1952_vm8, %v1923_v5, %v1279_v60 }
 0x1ed   : > { %906 = vrot.lane.b32.xlu1 %v7450_v23, %s6256_s29  ;;  %v1921_v45 = vsel %vm1887_vm7, %v1856_v21, %v1181_v24 }
 0x1ee   : > { %1078 = vrot.lane.b32.xlu0 %v1405_v0, %s6257_s30  ;;  %v6060_v0 = vld [vmem:[#allocation3 + $0xe0] sm:$0xff] }
 0x1ef   : > { %v1283_v47 = vpop.permute.xlu1 %1282  ;;  %v1661_v2 = vsel %vm324_vm1, %v6060_v0, %v9632_v31 }
 0x1f0   : > { %v1455_v19 = vpop.permute.xlu0 %1454  ;;  %v1732_v49 = vsel %vm1692_vm4, %v1661_v2, %v9633_v18  ;;  %v473_v2 = vld [vmem:[#allocation3 + $0x198] sm:$0x80] }
 0x1f1   : > { %900 = vrot.lane.b32.xlu1 %v422_v43, %s6256_s29  ;;  %v2053_v44 = vsel %vm2017_vm9, %v1988_v26, %v1455_v19  ;;  %v1797_v7 = vsel %vm1757_vm6, %v1732_v49, %v7431_v48  ;;  %v1414_v48 = vshll.u32 %v7522_v46, 16 }
 0x1f2   : > { %1082 = vrot.lane.b32.xlu0 %v7473_v42, %s6257_s30  ;;  %v1862_v54 = vsel %vm1822_vm5, %v1797_v7, %v7444_v1 }
 0x1f3   : > { %v1185_v56 = vpop.permute.xlu1 %1184  ;;  %v1927_v60 = vsel %vm1887_vm7, %v1862_v54, %v7460_v35  ;;  %v1860_v35 = vsel %vm1822_vm5, %v1795_v55, %v6013_v10  ;;  %v1416_v53 = vrot.slane %v1414_v48, 1  ;;  %v6061_v54 = vld [vmem:[#allocation3 + $0xf8] sm:$0xff]  ;;  %v366_v55 = vld [vmem:[#allocation3 + $0xf0] sm:$0x80] }
 0x1f4   : > { %v1277_v41 = vpop.permute.xlu0 %1276  ;;  %v1992_v1 = vsel %vm1952_vm8, %v1927_v60, %v1283_v47  ;;  %v1925_v14 = vsel %vm1887_vm7, %v1860_v35, %v1185_v56 }
 0x1f5   : > { %1206 = vrot.lane.b32.xlu1 %v1144_v62, %s6258_s5  ;;  %v1986_v51 = vsel %vm1952_vm8, %v1921_v45, %v1277_v41  ;;  %v489_v62 = vld [vmem:[#allocation3 + $0x190] sm:$0x1]  ;;  %v6044_v31 = vpack.i.bf16 %v1416_v53, %v7466_v13 }
 0x1f6   : > { %904 = vrot.lane.b32.xlu0 %v424_v16, %s6256_s29  ;;  %v1543_v38 = vrot.slane %v489_v62, 1  ;;  %v9637_v45 = vld [vmem:[#allocation24_spill] sm:$0xff] }
 0x1f7   : > { %v1459_v28 = vpop.permute.xlu1 %1458  ;;  %v6062_v62 = vld [vmem:[#allocation3 + $0x110] sm:$0xff] }
 0x1f8   : > { %v1583_v34 = vpop.permute.xlu0 %1582  ;;  %v2057_v24 = vsel %vm2017_vm9, %v1992_v1, %v1459_v28 }
 0x1f9   : > { %v2118_v6 = vsel %vm2082_vm10, %v2053_v44, %v1583_v34  ;;  %6040 = vrot.lane.b32.xlu1 %v6039_v4, %s6257_s30  ;;  %v1545_v34 = vrot.slane %v7522_v46, 1 }
 0x1fa   : > { %1210 = vrot.lane.b32.xlu0 %v1147_v15, %s6258_s5  ;;  %v2231_v29 = vshrl.u32 %v2118_v6, 16  ;;  %v2234_v11 = vshll.u32 %v2118_v6, 16  ;;  %v1544_v15 = vsel %vm699_vm2, %v7486_v39, %v1543_v38 }
 0x1fb   : > { %v1281_v63 = vpop.permute.xlu1 %1280  ;;  %v1547_v49 = vsel %vm699_vm2, %v1545_v34, %v1546_v32 }
 0x1fc   : > { %v6016_v25 = vpop.permute.xlu0 %6015  ;;  %v2233_v9 = vrot.slane %v2231_v29, 7  ;;  %v1990_v57 = vsel %vm1952_vm8, %v1925_v14, %v1281_v63  ;;  %v9635_v29 = vld [vmem:[#allocation9_spill] sm:$0xff] }
 0x1fd   : > { %v6017_v43 = vunpack.i.l.bf16 %v6016_v25  ;;  %1302 = vrot.lane.b32.xlu1 %v7450_v23, %s6259_s6  ;;  %v1417_v23 = vshrl.u32 %v7522_v46, 16  ;;  %v6018_v30 = vunpack.i.h.bf16 %v6016_v25  ;;  %v1666_v25 = vsel %vm324_vm1, %v6061_v54, %v9635_v29 }
 0x1fe   : > { %1204 = vrot.lane.b32.xlu0 %v7437_v52, %s6258_s5  ;;  %v2236_v40 = vor.u32 %v2234_v11, %v2233_v9  ;;  %v9638_v9 = vld [vmem:[#allocation23_spill] sm:$0xff] }
 0x1ff   : > { %v2051_v19 = vsel %vm2017_vm9, %v1986_v51, %v6017_v43  ;;  %v1587_v50 = vpop.permute.xlu1 %1586  ;;  %v2055_v5 = vsel %vm2017_vm9, %v1990_v57, %v6018_v30  ;;  %v1419_v27 = vor.u32 %v1417_v23, %v1416_v53  ;;  %v1736_v43 = vsel %vm1692_vm4, %v1666_v25, %v9637_v45  ;;  %v9639_v57 = vld [vmem:[#allocation10_spill] sm:$0xff] }
 0x200   : > { %v1581_v22 = vpop.permute.xlu0 %1580  ;;  %v2122_v47 = vsel %vm2082_vm10, %v2057_v24, %v1587_v50 }
 0x201   : > { %v2116_v52 = vsel %vm2082_vm10, %v2051_v19, %v1581_v22  ;;  %v2241_v8 = vshrl.u32 %v2122_v47, 16  ;;  %1306 = vrot.lane.b32.xlu1 %v7522_v46, %s6259_s6  ;;  %v2244_v20 = vshll.u32 %v2122_v47, 16  ;;  %v9636_v46 = vld [vmem:[#allocation8_spill] sm:$0xff] }
 0x202   : > { %v2228_v16 = vshrl.u32 %v2116_v52, 16  ;;  %1478 = vrot.lane.b32.xlu0 %v7473_v42, %s6260_s9  ;;  %v5957_v60 = vunpack.i.l.bf16 %v9636_v46  ;;  %v5958_v14 = vunpack.i.h.bf16 %v9636_v46  ;;  %v1671_v52 = vsel %vm324_vm1, %v6062_v62, %v9639_v57 }
 0x203   : > { %v887_v56 = vpop.permute.xlu1 %886  ;;  %v2243_v37 = vrot.slane %v2241_v8, 7  ;;  %v368_v8 = vld [vmem:[#allocation3 + $0x108] sm:$0x80] }
 0x204   : > { %v2230_v41 = vrot.slane %v2228_v16, 7  ;;  %v1585_v4 = vpop.permute.xlu0 %1584  ;;  %v1664_v19 = vsel %vm324_vm1, %v366_v55, %v5957_v60  ;;  %v9640_v16 = vld [vmem:[#allocation26_spill] sm:$0xff] }
 0x205   : > { %v2120_v58 = vsel %vm2082_vm10, %v2055_v5, %v1585_v4  ;;  %1208 = vrot.lane.b32.xlu1 %v7486_v39, %s6258_s5  ;;  %v2246_v61 = vor.u32 %v2244_v20, %v2243_v37  ;;  %v1734_v30 = vsel %vm1692_vm4, %v1664_v19, %v9638_v9  ;;  %v1669_v37 = vsel %vm324_vm1, %v368_v8, %v5958_v14 }
 0x206   : > { %v2238_v26 = vshrl.u32 %v2120_v58, 16  ;;  %1300 = vrot.lane.b32.xlu0 %v471_v3, %s6259_s6  ;;  %v2237_v42 = vsel %vm2147_vm11, %v2230_v41, %v2236_v40 }
 0x207   : > { %5801 = vmatprep.mubr.msk.bf16.mxu1 %vm2323_vm12, %v2237_v42  ;;  %v891_v28 = vpop.permute.xlu1 %890 }
 0x208   : > { %v2240_v59 = vrot.slane %v2238_v26, 7  ;;  %v1063_v44 = vpop.permute.xlu0 %1062 }
 0x209   : > { %1482 = vrot.lane.b32.xlu1 %v1419_v27, %s6260_s9  ;;  %v9641_v27 = vld [vmem:[#allocation25_spill] sm:$0xff] }
 0x20a   : > { %1606 = vrot.lane.b32.xlu0 %v1544_v15, %s6261_s14  ;;  %v2247_v0 = vsel %vm2147_vm11, %v2240_v59, %v2246_v61  ;;  %v1738_v20 = vsel %vm1692_vm4, %v1669_v37, %v9641_v27 }
 0x20b   : > { %5802 = vmatmul.mubr.msk.bf16.vlgmr.msra.gmra.mrb[0].mxu1 %vm2323_vm12, %v2247_v0  ;;  %v885_v6 = vpop.permute.xlu1 %884 }
 0x20c   : > { %v1067_v18 = vpop.permute.xlu0 %1066  ;;  %v1799_v53 = vsel %vm1757_vm6, %v1734_v30, %v885_v6 }
 0x20d   : > { %1304 = vrot.lane.b32.xlu1 %v473_v2, %s6259_s6 }
 0x20e   : > { %6045 = vrot.lane.b32.xlu0 %v6044_v31, %s6260_s9 }
 0x20f   : > { %v1191_v21 = vpop.permute.xlu1 %1190 }
 0x210   : > { %v889_v12 = vpop.permute.xlu0 %888 }
 0x211   : > { %1610 = vrot.lane.b32.xlu1 %v1547_v49, %s6261_s14  ;;  %v1803_v33 = vsel %vm1757_vm6, %v1738_v20, %v889_v12 }
 0x212   : > { %1604 = vrot.lane.b32.xlu0 %v7486_v39, %s6261_s14  ;;  %v1801_v39 = vsel %vm1757_vm6, %v1736_v43, %v887_v56  ;;  %v1740_v56 = vsel %vm1692_vm4, %v1671_v52, %v9640_v16 }
 0x213   : > { %v6021_v13 = vpop.permute.xlu1 %6020  ;;  %v1866_v51 = vsel %vm1822_vm5, %v1801_v39, %v1063_v44  ;;  %v1805_v38 = vsel %vm1757_vm6, %v1740_v56, %v891_v28 }
 0x214   : > { %v1195_v7 = vpop.permute.xlu0 %1194  ;;  %v1931_v35 = vsel %vm1887_vm7, %v1866_v51, %v1191_v21  ;;  %v6022_v24 = vunpack.i.l.bf16 %v6021_v13  ;;  %v6023_v40 = vunpack.i.h.bf16 %v6021_v13  ;;  %v1870_v4 = vsel %vm1822_vm5, %v1805_v38, %v1067_v18 }
 0x215   : > { %1608 = vrot.lane.b32.xlu1 %v1545_v34, %s6261_s14  ;;  %v1935_v26 = vsel %vm1887_vm7, %v1870_v4, %v1195_v7 }
 0x216   : > { %v1864_v3 = vsel %vm1822_vm5, %v1799_v53, %v6022_v24  ;;  %v1868_v59 = vsel %vm1822_vm5, %v1803_v33, %v6023_v40 }
 0x217   : > { %v1287_v10 = vpop.permute.xlu1 %1286 }
 0x218   : > { %v1189_v63 = vpop.permute.xlu0 %1188  ;;  %v1996_v50 = vsel %vm1952_vm8, %v1931_v35, %v1287_v10 }
 0x219   : > { %v1929_v42 = vsel %vm1887_vm7, %v1864_v3, %v1189_v63 }
 0x21b   : > { %v1291_v36 = vpop.permute.xlu1 %1290 }
 0x21c   : > { %v1463_v17 = vpop.permute.xlu0 %1462  ;;  %v2000_v28 = vsel %vm1952_vm8, %v1935_v26, %v1291_v36 }
 0x21d   : > { %v2061_v22 = vsel %vm2017_vm9, %v1996_v50, %v1463_v17 }
 0x21f   : > { %v1193_v48 = vpop.permute.xlu1 %1192 }
 0x220   : > { %v1285_v1 = vpop.permute.xlu0 %1284  ;;  %v1933_v31 = vsel %vm1887_vm7, %v1868_v59, %v1193_v48  ;;  %v9642_v59 = vld [vmem:[#allocation12_spill] sm:$0xff] }
 0x221   : > { %v1994_v61 = vsel %vm1952_vm8, %v1929_v42, %v1285_v1 }
 0x223   : > { %v1467_v23 = vpop.permute.xlu1 %1466 }
 0x224   : > { %v1591_v47 = vpop.permute.xlu0 %1590  ;;  %v2065_v44 = vsel %vm2017_vm9, %v2000_v28, %v1467_v23 }
 0x225   : > { %v2126_v11 = vsel %vm2082_vm10, %v2061_v22, %v1591_v47 }
 0x226   : > { %v2251_v5 = vshrl.u32 %v2126_v11, 16  ;;  %v2254_v13 = vshll.u32 %v2126_v11, 16 }
 0x227   : > { %v1289_v41 = vpop.permute.xlu1 %1288 }
 0x228   : > { %v6026_v58 = vpop.permute.xlu0 %6025  ;;  %v2253_v2 = vrot.slane %v2251_v5, 7  ;;  %v1998_v49 = vsel %vm1952_vm8, %v1933_v31, %v1289_v41  ;;  %v9644_v31 = vld [vmem:[#allocation28_spill] sm:$0xff] }
 0x229   : > { %v6027_v15 = vunpack.i.l.bf16 %v6026_v58  ;;  %v6028_v32 = vunpack.i.h.bf16 %v6026_v58 }
 0x22a   : > { %v2256_v63 = vor.u32 %v2254_v13, %v2253_v2 }
 0x22b   : > { %v2059_v34 = vsel %vm2017_vm9, %v1994_v61, %v6027_v15  ;;  %v1595_v0 = vpop.permute.xlu1 %1594  ;;  %v2063_v29 = vsel %vm2017_vm9, %v1998_v49, %v6028_v32  ;;  %v6063_v61 = vld [vmem:[#allocation3 + $0x128] sm:$0xff] }
 0x22c   : > { %v1589_v6 = vpop.permute.xlu0 %1588  ;;  %v2130_v18 = vsel %vm2082_vm10, %v2065_v44, %v1595_v0  ;;  %v1676_v44 = vsel %vm324_vm1, %v6063_v61, %v9642_v59 }
 0x22d   : > { %v2124_v21 = vsel %vm2082_vm10, %v2059_v34, %v1589_v6  ;;  %v2261_v12 = vshrl.u32 %v2130_v18, 16  ;;  %v2264_v46 = vshll.u32 %v2130_v18, 16  ;;  %v9643_v34 = vld [vmem:[#allocation11_spill] sm:$0xff]  ;;  %v1744_v2 = vsel %vm1692_vm4, %v1676_v44, %v9644_v31  ;;  %v370_v6 = vld [vmem:[#allocation3 + $0x120] sm:$0x80] }
 0x22e   : > { %v2248_v7 = vshrl.u32 %v2124_v21, 16  ;;  %v5962_v0 = vunpack.i.l.bf16 %v9643_v34 }
 0x22f   : > { %v895_v10 = vpop.permute.xlu1 %894  ;;  %v2263_v17 = vrot.slane %v2261_v12, 7 }
 0x230   : > { %v2250_v36 = vrot.slane %v2248_v7, 7  ;;  %v1593_v54 = vpop.permute.xlu0 %1592  ;;  %v1809_v18 = vsel %vm1757_vm6, %v1744_v2, %v895_v10  ;;  %v1674_v7 = vsel %vm324_vm1, %v370_v6, %v5962_v0  ;;  %v6064_v10 = vld [vmem:[#allocation3 + $0x140] sm:$0xff] }
 0x231   : > { %v2128_v25 = vsel %vm2082_vm10, %v2063_v29, %v1593_v54  ;;  %v2266_v48 = vor.u32 %v2264_v46, %v2263_v17  ;;  %v5963_v17 = vunpack.i.h.bf16 %v9643_v34  ;;  %v9645_v54 = vld [vmem:[#allocation27_spill] sm:$0xff] }
 0x232   : > { %v2258_v60 = vshrl.u32 %v2128_v25, 16  ;;  %v2257_v45 = vsel %vm2147_vm11, %v2250_v36, %v2256_v63  ;;  %v1742_v29 = vsel %vm1692_vm4, %v1674_v7, %v9645_v54 }
 0x233   : > { %5805 = vmatprep.mubr.msk.bf16.mxu1 %vm2323_vm12, %v2257_v45  ;;  %v7612_v43 = vpop.permute.xlu1 %898 }
 0x234   : > { %v2260_v55 = vrot.slane %v2258_v60, 7  ;;  %v1071_v39 = vpop.permute.xlu0 %1070  ;;  %v9646_v60 = vld [vmem:[#allocation13_spill] sm:$0xff] }
 0x235   : > { %v1874_v21 = vsel %vm1822_vm5, %v1809_v18, %v1071_v39  ;;  %v1681_v45 = vsel %vm324_vm1, %v6064_v10, %v9646_v60 }
 0x236   : > { %v2267_v1 = vsel %vm2147_vm11, %v2260_v55, %v2266_v48  ;;  %v372_v48 = vld [vmem:[#allocation3 + $0x138] sm:$0x80] }
 0x237   : > { %5806 = vmatmul.mubr.msk.bf16.gmra.mrb[4].mxu1 %vm2323_vm12, %v2267_v1  ;;  %v893_v51 = vpop.permute.xlu1 %892  ;;  %v9647_v1 = vld [vmem:[#allocation30_spill] sm:$0xff] }
 0x238   : > { %v7616_v35 = vpop.permute.xlu0 %1074  ;;  %v1807_v55 = vsel %vm1757_vm6, %v1742_v29, %v893_v51  ;;  %v9648_v51 = vld [vmem:[#allocation29_spill] sm:$0xff] }
 0x239   : > { %v5787_v24 = vpop.f32.mrb[0].mxu0 }
 0x23a   : > { %v2410_v19 = vpop.f32.mrb[1].mxu0  ;;  %v2648_v62 = vmul.f32 %v5787_v24, %v5787_v24  ;;  %v2576_v16 = vsel %vm324_vm1, %v5787_v24, 0.0 }
 0x23b   : > { %v1199_v50 = vpop.permute.xlu1 %1198  ;;  %v5788_v23 = vpop.f32.mrb[2].mxu0  ;;  %v2646_v14 = vmul.f32 %v2410_v19, %v2410_v19  ;;  %v2573_v57 = vsel %vm324_vm1, %v2410_v19, 0.0 }
 0x23c   : > { %v7619_v9 = vpop.permute.xlu0 %896  ;;  %v2538_v30 = vpack.c.bf16 %v5788_v23, %v5787_v24  ;;  %v2413_v22 = vpop.f32.mrb[3].mxu0  ;;  %v2649_v3 = vmul.f32 %v5788_v23, %v5788_v23  ;;  %v2681_v4 = vsel %vm324_vm1, %v2648_v62, 0.0  ;;  %v2578_v5 = vsel %vm324_vm1, %v5788_v23, 0.0 }
 0x23d   : > { %v2537_v47 = vpack.c.bf16 %v2413_v22, %v2410_v19  ;;  %v2574_v52 = vsel %vm324_vm1, %v2413_v22, 0.0  ;;  %v2647_v8 = vmul.f32 %v2413_v22, %v2413_v22  ;;  %v2678_v56 = vsel %vm324_vm1, %v2646_v14, 0.0 }
 0x23e   : > { %2557 = vst.msk [vmem:[%s7622_s23 + $0x8] sm:$0xff] %vm324_vm1, %v2538_v30  ;;  %v2575_v53 = vadd.f32 %v2574_v52, %v2573_v57  ;;  %v2683_v26 = vsel %vm324_vm1, %v2649_v3, 0.0  ;;  %v1939_v12 = vsel %vm1887_vm7, %v1874_v21, %v1199_v50  ;;  %v1748_v24 = vsel %vm1692_vm4, %v1681_v45, %v9647_v1 }
 0x23f   : > { %2556 = vst.msk [vmem:[%s7622_s23] sm:$0xff] %vm324_vm1, %v2537_v47  ;;  %v6031_v11 = vpop.permute.xlu1 %6030  ;;  %v2679_v38 = vsel %vm324_vm1, %v2647_v8, 0.0  ;;  %v1813_v50 = vsel %vm1757_vm6, %v1748_v24, %v7612_v43  ;;  %v1679_v30 = vsel %vm324_vm1, %v372_v48, %v5963_v17 }
 0x240   : > { %v1203_v40 = vpop.permute.xlu0 %1202  ;;  %v2577_v41 = vadd.f32 %v2576_v16, %v2575_v53  ;;  %v2680_v37 = vadd.f32 %v2679_v38, %v2678_v56  ;;  %v6032_v13 = vunpack.i.l.bf16 %v6031_v11  ;;  %v6033_v23 = vunpack.i.h.bf16 %v6031_v11 }
 0x241   : > { %v1878_v22 = vsel %vm1822_vm5, %v1813_v50, %v7616_v35  ;;  %v1746_v57 = vsel %vm1692_vm4, %v1679_v30, %v9648_v51 }
 0x242   : > { %v2682_v58 = vadd.f32 %v2681_v4, %v2680_v37  ;;  %v7634_v20 = vadd.f32 %v2578_v5, %v2577_v41  ;;  %v1872_v19 = vsel %vm1822_vm5, %v1807_v55, %v6032_v13  ;;  %v1943_v52 = vsel %vm1887_vm7, %v1878_v22, %v1203_v40 }
 0x243   : > { %v1295_v27 = vpop.permute.xlu1 %1294  ;;  %v1811_v43 = vsel %vm1757_vm6, %v1746_v57, %v7619_v9 }
 0x244   : > { %v1197_v42 = vpop.permute.xlu0 %1196  ;;  %v7637_v15 = vadd.f32 %v2683_v26, %v2682_v58  ;;  %v2004_v63 = vsel %vm1952_vm8, %v1939_v12, %v1295_v27  ;;  %v1876_v56 = vsel %vm1822_vm5, %v1811_v43, %v6033_v23 }
 0x245   : > { %v1937_v8 = vsel %vm1887_vm7, %v1872_v19, %v1197_v42 }
 0x247   : > { %v1299_v33 = vpop.permute.xlu1 %1298 }
 0x248   : > { %v1471_v28 = vpop.permute.xlu0 %1470  ;;  %v2008_v11 = vsel %vm1952_vm8, %v1943_v52, %v1299_v33 }
 0x249   : > { %v2069_v25 = vsel %vm2017_vm9, %v2004_v63, %v1471_v28 }
 0x24b   : > { %v1201_v32 = vpop.permute.xlu1 %1200 }
 0x24c   : > { %v1293_v49 = vpop.permute.xlu0 %1292  ;;  %v1941_v41 = vsel %vm1887_vm7, %v1876_v56, %v1201_v32 }
 0x24d   : > { %v2002_v16 = vsel %vm1952_vm8, %v1937_v8, %v1293_v49 }
 0x24f   : > { %v1475_v36 = vpop.permute.xlu1 %1474 }
 0x250   : > { %v1599_v46 = vpop.permute.xlu0 %1598  ;;  %v2073_v35 = vsel %vm2017_vm9, %v2008_v11, %v1475_v36 }
 0x251   : > { %v2134_v39 = vsel %vm2082_vm10, %v2069_v25, %v1599_v46 }
 0x252   : > { %v2271_v47 = vshrl.u32 %v2134_v39, 16  ;;  %v2274_v26 = vshll.u32 %v2134_v39, 16 }
 0x253   : > { %v1297_v14 = vpop.permute.xlu1 %1296 }
 0x254   : > { %v6036_v62 = vpop.permute.xlu0 %6035  ;;  %v2273_v40 = vrot.slane %v2271_v47, 7  ;;  %v2006_v9 = vsel %vm1952_vm8, %v1941_v41, %v1297_v14  ;;  %v6065_v41 = vld [vmem:[#allocation3 + $0x158] sm:$0xff] }
 0x255   : > { %v6037_v53 = vunpack.i.l.bf16 %v6036_v62  ;;  %v6038_v37 = vunpack.i.h.bf16 %v6036_v62 }
 0x256   : > { %v2276_v28 = vor.u32 %v2274_v26, %v2273_v40  ;;  %v9650_v40 = vld [vmem:[#allocation15_spill] sm:$0xff] }
 0x257   : > { %v2067_v3 = vsel %vm2017_vm9, %v2002_v16, %v6037_v53  ;;  %v1603_v38 = vpop.permute.xlu1 %1602  ;;  %v2071_v44 = vsel %vm2017_vm9, %v2006_v9, %v6038_v37  ;;  %v1686_v37 = vsel %vm324_vm1, %v6065_v41, %v9650_v40  ;;  %v9651_v9 = vld [vmem:[#allocation32_spill] sm:$0xff] }
 0x258   : > { %v1597_v4 = vpop.permute.xlu0 %1596  ;;  %v2138_v5 = vsel %vm2082_vm10, %v2073_v35, %v1603_v38  ;;  %v9649_v35 = vld [vmem:[#allocation14_spill] sm:$0xff] }
 0x259   : > { %v2132_v58 = vsel %vm2082_vm10, %v2067_v3, %v1597_v4  ;;  %v2281_v27 = vshrl.u32 %v2138_v5, 16  ;;  %v2284_v18 = vshll.u32 %v2138_v5, 16  ;;  %v5967_v3 = vunpack.i.l.bf16 %v9649_v35  ;;  %v374_v4 = vld [vmem:[#allocation3 + $0x150] sm:$0x80] }
 0x25a   : > { %v2268_v42 = vshrl.u32 %v2132_v58, 16  ;;  %v1752_v58 = vsel %vm1692_vm4, %v1686_v37, %v9651_v9 }
 0x25b   : > { %v7680_v33 = vpop.permute.xlu1 %902  ;;  %v2283_v34 = vrot.slane %v2281_v27, 7 }
 0x25c   : > { %v2270_v61 = vrot.slane %v2268_v42, 7  ;;  %v1601_v59 = vpop.permute.xlu0 %1600  ;;  %v1817_v27 = vsel %vm1757_vm6, %v1752_v58, %v7680_v33  ;;  %v5968_v42 = vunpack.i.h.bf16 %v9649_v35 }
 0x25d   : > { %v2136_v0 = vsel %vm2082_vm10, %v2071_v44, %v1601_v59  ;;  %v5791_v31 = vpop.f32.mrb[4].mxu0  ;;  %v2286_v54 = vor.u32 %v2284_v18, %v2283_v34  ;;  %v9652_v44 = vld [vmem:[#allocation31_spill] sm:$0xff] }
 0x25e   : > { %v2278_v2 = vshrl.u32 %v2136_v0, 16  ;;  %v2426_v32 = vpop.f32.mrb[5].mxu0  ;;  %v2277_v6 = vsel %vm2147_vm11, %v2270_v61, %v2276_v28  ;;  %v2652_v45 = vmul.f32 %v5791_v31, %v5791_v31  ;;  %v2584_v1 = vsel %vm324_vm1, %v5791_v31, 0.0  ;;  %v376_v0 = vld [vmem:[#allocation3 + $0x168] sm:$0x80] }
 0x25f   : > { %v2580_v49 = vsel %vm324_vm1, %v2426_v32, 0.0  ;;  %v2650_v21 = vmul.f32 %v2426_v32, %v2426_v32  ;;  %5809 = vmatprep.mubr.msk.bf16.mxu1 %vm2323_vm12, %v2277_v6  ;;  %v7687_v12 = vpop.permute.xlu1 %906  ;;  %v5792_v13 = vpop.f32.mrb[6].mxu0  ;;  %v1684_v28 = vsel %vm324_vm1, %v374_v4, %v5967_v3  ;;  %v9653_v6 = vld [vmem:[#allocation16_spill] sm:$0xff] }
 0x260   : > { %v2280_v7 = vrot.slane %v2278_v2, 7  ;;  %v2581_v63 = vadd.f32 %v2580_v49, %v7634_v20  ;;  %v1079_v36 = vpop.permute.xlu0 %1078  ;;  %v2429_v17 = vpop.f32.mrb[7].mxu0  ;;  %v2540_v25 = vpack.c.bf16 %v5792_v13, %v5791_v31  ;;  %v2653_v19 = vmul.f32 %v5792_v13, %v5792_v13 }
 0x261   : > { %v2685_v29 = vsel %vm324_vm1, %v2650_v21, 0.0  ;;  %v2539_v10 = vpack.c.bf16 %v2429_v17, %v2426_v32  ;;  %v2582_v60 = vsel %vm324_vm1, %v2429_v17, 0.0  ;;  %v2651_v55 = vmul.f32 %v2429_v17, %v2429_v17  ;;  %v6066_v32 = vld [vmem:[#allocation3 + $0x170] sm:$0xff]  ;;  %v9654_v21 = vld [vmem:[#allocation34_spill] sm:$0xff] }
 0x262   : > { %v2686_v46 = vadd.f32 %v2685_v29, %v7637_v15  ;;  %2559 = vst.msk [vmem:[%s7622_s23 + $0x18] sm:$0xff] %vm324_vm1, %v2540_v25  ;;  %v2583_v48 = vadd.f32 %v2582_v60, %v2581_v63  ;;  %v2287_v39 = vsel %vm2147_vm11, %v2280_v7, %v2286_v54  ;;  %v2586_v23 = vsel %vm324_vm1, %v5792_v13, 0.0 }
 0x263   : > { %v901_v20 = vpop.permute.xlu1 %900  ;;  %2558 = vst.msk [vmem:[%s7622_s23 + $0x10] sm:$0xff] %vm324_vm1, %v2539_v10  ;;  %5810 = vmatmul.mubr.msk.bf16.gmra.mrb[8].mxu1 %vm2323_vm12, %v2287_v39  ;;  %v2687_v50 = vsel %vm324_vm1, %v2651_v55, 0.0  ;;  %v2689_v30 = vsel %vm324_vm1, %v2652_v45, 0.0  ;;  %v2691_v57 = vsel %vm324_vm1, %v2653_v19, 0.0  ;;  %v1882_v61 = vsel %vm1822_vm5, %v1817_v27, %v1079_v36 }
 0x264   : > { %v1083_v24 = vpop.permute.xlu0 %1082  ;;  %v2585_v15 = vadd.f32 %v2584_v1, %v2583_v48  ;;  %v2688_v14 = vadd.f32 %v2687_v50, %v2686_v46  ;;  %v1750_v34 = vsel %vm1692_vm4, %v1684_v28, %v9652_v44  ;;  %v1691_v18 = vsel %vm324_vm1, %v6066_v32, %v9653_v6  ;;  %v9655_v46 = vld [vmem:[#allocation33_spill] sm:$0xff] }
 0x265   : > { %v1815_v33 = vsel %vm1757_vm6, %v1750_v34, %v901_v20  ;;  %v1756_v13 = vsel %vm1692_vm4, %v1691_v18, %v9654_v21  ;;  %v1689_v17 = vsel %vm324_vm1, %v376_v0, %v5968_v42 }
 0x266   : > { %v7703_v47 = vadd.f32 %v2586_v23, %v2585_v15  ;;  %v2690_v62 = vadd.f32 %v2689_v30, %v2688_v14  ;;  %v1821_v54 = vsel %vm1757_vm6, %v1756_v13, %v7687_v12  ;;  %v1754_v10 = vsel %vm1692_vm4, %v1689_v17, %v9655_v46 }
 0x267   : > { %v1207_v22 = vpop.permute.xlu1 %1206  ;;  %v1886_v60 = vsel %vm1822_vm5, %v1821_v54, %v1083_v24 }
 0x268   : > { %v905_v51 = vpop.permute.xlu0 %904  ;;  %v7706_v52 = vadd.f32 %v2691_v57, %v2690_v62  ;;  %v1947_v31 = vsel %vm1887_vm7, %v1882_v61, %v1207_v22 }
 0x269   : > { %v1819_v48 = vsel %vm1757_vm6, %v1754_v10, %v905_v51 }
 0x26b   : > { %v6041_v8 = vpop.permute.xlu1 %6040 }
 0x26c   : > { %v1211_v53 = vpop.permute.xlu0 %1210  ;;  %v6042_v26 = vunpack.i.l.bf16 %v6041_v8  ;;  %v6043_v7 = vunpack.i.h.bf16 %v6041_v8 }
 0x26d   : > { %v1951_v55 = vsel %vm1887_vm7, %v1886_v60, %v1211_v53 }
 0x26e   : > { %v1880_v63 = vsel %vm1822_vm5, %v1815_v33, %v6042_v26  ;;  %v1884_v19 = vsel %vm1822_vm5, %v1819_v48, %v6043_v7 }
 0x26f   : > { %v1303_v43 = vpop.permute.xlu1 %1302 }
 0x270   : > { %v1205_v11 = vpop.permute.xlu0 %1204  ;;  %v2012_v49 = vsel %vm1952_vm8, %v1947_v31, %v1303_v43 }
 0x271   : > { %v1945_v39 = vsel %vm1887_vm7, %v1880_v63, %v1205_v11 }
 0x273   : > { %v1307_v16 = vpop.permute.xlu1 %1306 }
 0x274   : > { %v1479_v56 = vpop.permute.xlu0 %1478  ;;  %v2016_v1 = vsel %vm1952_vm8, %v1951_v55, %v1307_v16 }
 0x275   : > { %v2077_v36 = vsel %vm2017_vm9, %v2012_v49, %v1479_v56 }
 0x277   : > { %v1209_v38 = vpop.permute.xlu1 %1208 }
 0x278   : > { %v1301_v5 = vpop.permute.xlu0 %1300  ;;  %v1949_v50 = vsel %vm1887_vm7, %v1884_v19, %v1209_v38 }
 0x279   : > { %v2010_v12 = vsel %vm1952_vm8, %v1945_v39, %v1301_v5 }
 0x27b   : > { %v1483_v59 = vpop.permute.xlu1 %1482 }
 0x27c   : > { %v1607_v2 = vpop.permute.xlu0 %1606  ;;  %v2081_v23 = vsel %vm2017_vm9, %v2016_v1, %v1483_v59 }
 0x27d   : > { %v2142_v29 = vsel %vm2082_vm10, %v2077_v36, %v1607_v2 }
 0x27e   : > { %v2291_v15 = vshrl.u32 %v2142_v29, 16  ;;  %v2294_v16 = vshll.u32 %v2142_v29, 16 }
 0x27f   : > { %v1305_v25 = vpop.permute.xlu1 %1304 }
 0x280   : > { %v6046_v45 = vpop.permute.xlu0 %6045  ;;  %v2014_v22 = vsel %vm1952_vm8, %v1949_v50, %v1305_v25  ;;  %v2293_v53 = vrot.slane %v2291_v15, 7 }
 0x281   : > { %v6047_v20 = vunpack.i.l.bf16 %v6046_v45  ;;  %v6048_v24 = vunpack.i.h.bf16 %v6046_v45 }
 0x282   : > { %v2296_v42 = vor.u32 %v2294_v16, %v2293_v53 }
 0x283   : > { %v2075_v14 = vsel %vm2017_vm9, %v2010_v12, %v6047_v20  ;;  %v1611_v30 = vpop.permute.xlu1 %1610  ;;  %v2079_v41 = vsel %vm2017_vm9, %v2014_v22, %v6048_v24 }
 0x284   : > { %v1605_v62 = vpop.permute.xlu0 %1604  ;;  %v2146_v51 = vsel %vm2082_vm10, %v2081_v23, %v1611_v30 }
 0x285   : > { %v2140_v57 = vsel %vm2082_vm10, %v2075_v14, %v1605_v62  ;;  %v2301_v8 = vshrl.u32 %v2146_v51, 16  ;;  %v2304_v35 = vshll.u32 %v2146_v51, 16 }
 0x286   : > { %v2288_v43 = vshrl.u32 %v2140_v57, 16  ;;  %v5795_v11 = vpop.f32.mrb[8].mxu0 }
 0x287   : > { %v2303_v56 = vrot.slane %v2301_v8, 7  ;;  %v2442_v3 = vpop.f32.mrb[9].mxu0  ;;  %v1609_v38 = vpop.permute.xlu1 %1608  ;;  %v2656_v2 = vmul.f32 %v5795_v11, %v5795_v11  ;;  %v2592_v18 = vsel %vm324_vm1, %v5795_v11, 0.0 }
 0x288   : > { %v2290_v40 = vrot.slane %v2288_v43, 7  ;;  %v2588_v37 = vsel %vm324_vm1, %v2442_v3, 0.0  ;;  %v2654_v4 = vmul.f32 %v2442_v3, %v2442_v3  ;;  %v2144_v5 = vsel %vm2082_vm10, %v2079_v41, %v1609_v38  ;;  %v5796_v9 = vpop.f32.mrb[10].mxu0 }
 0x289   : > { %v2589_v58 = vadd.f32 %v2588_v37, %v7703_v47  ;;  %v2298_v27 = vshrl.u32 %v2144_v5, 16  ;;  %v2445_v26 = vpop.f32.mrb[11].mxu0  ;;  %v2306_v28 = vor.u32 %v2304_v35, %v2303_v56  ;;  %v2542_v59 = vpack.c.bf16 %v5796_v9, %v5795_v11 }
 0x28a   : > { %v2693_v61 = vsel %vm324_vm1, %v2654_v4, 0.0  ;;  %v2541_v0 = vpack.c.bf16 %v2445_v26, %v2442_v3  ;;  %v2590_v31 = vsel %vm324_vm1, %v2445_v26, 0.0  ;;  %v2655_v6 = vmul.f32 %v2445_v26, %v2445_v26 }
 0x28b   : > { %v2694_v44 = vadd.f32 %v2693_v61, %v7706_v52  ;;  %v2300_v34 = vrot.slane %v2298_v27, 7  ;;  %2561 = vst.msk [vmem:[%s7622_s23 + $0x28] sm:$0xff] %vm324_vm1, %v2542_v59  ;;  %v2591_v32 = vadd.f32 %v2590_v31, %v2589_v58  ;;  %v2297_v47 = vsel %vm2147_vm11, %v2290_v40, %v2296_v42 }
 0x28c   : > { %2560 = vst.msk [vmem:[%s7622_s23 + $0x20] sm:$0xff] %vm324_vm1, %v2541_v0  ;;  %5813 = vmatprep.mubr.msk.bf16.mxu1 %vm2323_vm12, %v2297_v47  ;;  %v2657_v52 = vmul.f32 %v5796_v9, %v5796_v9  ;;  %v2695_v21 = vsel %vm324_vm1, %v2655_v6, 0.0  ;;  %v2594_v13 = vsel %vm324_vm1, %v5796_v9, 0.0  ;;  %v2697_v63 = vsel %vm324_vm1, %v2656_v2, 0.0 }
 0x28d   : > { %v2307_v33 = vsel %vm2147_vm11, %v2300_v34, %v2306_v28  ;;  %v2593_v49 = vadd.f32 %v2592_v18, %v2591_v32  ;;  %v2696_v7 = vadd.f32 %v2695_v21, %v2694_v44 }
 0x28e   : > { %5814 = vmatmul.mubr.msk.bf16.gmra.mrb[12].mxu1 %vm2323_vm12, %v2307_v33  ;;  %v2699_v54 = vsel %vm324_vm1, %v2657_v52, 0.0 }
 0x28f   : > { %v2595_v36 = vadd.f32 %v2594_v13, %v2593_v49  ;;  %v2698_v17 = vadd.f32 %v2697_v63, %v2696_v7 }
 0x291   : > { %v2700_v29 = vadd.f32 %v2699_v54, %v2698_v17 }
 0x2b2   : > { %v5799_v25 = vpop.f32.mrb[12].mxu0 }
 0x2b3   : > { %v2458_v46 = vpop.f32.mrb[13].mxu0  ;;  %v2660_v19 = vmul.f32 %v5799_v25, %v5799_v25  ;;  %v2600_v24 = vsel %vm324_vm1, %v5799_v25, 0.0 }
 0x2b4   : > { %v2596_v10 = vsel %vm324_vm1, %v2458_v46, 0.0  ;;  %v2658_v60 = vmul.f32 %v2458_v46, %v2458_v46  ;;  %v5800_v45 = vpop.f32.mrb[14].mxu0 }
 0x2b5   : > { %v2597_v48 = vadd.f32 %v2596_v10, %v2595_v36  ;;  %v2544_v55 = vpack.c.bf16 %v5800_v45, %v5799_v25  ;;  %v2461_v39 = vpop.f32.mrb[15].mxu0  ;;  %v2661_v14 = vmul.f32 %v5800_v45, %v5800_v45  ;;  %v2602_v62 = vsel %vm324_vm1, %v5800_v45, 0.0 }
 0x2b6   : > { %v2701_v20 = vsel %vm324_vm1, %v2658_v60, 0.0  ;;  %v2543_v1 = vpack.c.bf16 %v2461_v39, %v2458_v46  ;;  %v2598_v12 = vsel %vm324_vm1, %v2461_v39, 0.0  ;;  %v2659_v23 = vmul.f32 %v2461_v39, %v2461_v39 }
 0x2b7   : > { %v2702_v15 = vadd.f32 %v2701_v20, %v2700_v29  ;;  %2563 = vst.msk [vmem:[%s7622_s23 + $0x38] sm:$0xff] %vm324_vm1, %v2544_v55  ;;  %v2599_v50 = vadd.f32 %v2598_v12, %v2597_v48  ;;  %v2705_v57 = vsel %vm324_vm1, %v2660_v19, 0.0  ;;  %v2707_v43 = vsel %vm324_vm1, %v2661_v14, 0.0 }
 0x2b8   : > { %2562 = vst.msk [vmem:[%s7622_s23 + $0x30] sm:$0xff] %vm324_vm1, %v2543_v1  ;;  %v2703_v22 = vsel %vm324_vm1, %v2659_v23, 0.0 }
 0x2b9   : > { %v2601_v30 = vadd.f32 %v2600_v24, %v2599_v50  ;;  %v2704_v51 = vadd.f32 %v2703_v22, %v2702_v15 }
 0x2bb   : > { %v2603_v8 = vadd.f32 %v2602_v62, %v2601_v30  ;;  %v2706_v53 = vadd.f32 %v2705_v57, %v2704_v51 }
 0x2bd   : > { %v2708_v11 = vadd.f32 %v2707_v43, %v2706_v53 }
 0x2de   : > { %v5803_v16 = vpop.f32.mrb[0].mxu1 }
 0x2df   : > { %v2474_v56 = vpop.f32.mrb[1].mxu1  ;;  %v2664_v58 = vmul.f32 %v5803_v16, %v5803_v16  ;;  %v2608_v28 = vsel %vm324_vm1, %v5803_v16, 0.0 }
 0x2e0   : > { %v2604_v35 = vsel %vm324_vm1, %v2474_v56, 0.0  ;;  %v2662_v3 = vmul.f32 %v2474_v56, %v2474_v56  ;;  %v5804_v38 = vpop.f32.mrb[2].mxu1 }
 0x2e1   : > { %v2605_v41 = vadd.f32 %v2604_v35, %v2603_v8  ;;  %v2546_v40 = vpack.c.bf16 %v5804_v38, %v5803_v16  ;;  %v2477_v37 = vpop.f32.mrb[3].mxu1  ;;  %v2665_v61 = vmul.f32 %v5804_v38, %v5804_v38  ;;  %v2610_v34 = vsel %vm324_vm1, %v5804_v38, 0.0 }
 0x2e2   : > { %v2709_v4 = vsel %vm324_vm1, %v2662_v3, 0.0  ;;  %v2545_v5 = vpack.c.bf16 %v2477_v37, %v2474_v56  ;;  %v2606_v9 = vsel %vm324_vm1, %v2477_v37, 0.0  ;;  %v2663_v42 = vmul.f32 %v2477_v37, %v2477_v37 }
 0x2e3   : > { %v2710_v27 = vadd.f32 %v2709_v4, %v2708_v11  ;;  %2565 = vst.msk [vmem:[%s7622_s23 + $0x48] sm:$0xff] %vm324_vm1, %v2546_v40  ;;  %v2607_v26 = vadd.f32 %v2606_v9, %v2605_v41  ;;  %v2713_v31 = vsel %vm324_vm1, %v2664_v58, 0.0  ;;  %v2715_v6 = vsel %vm324_vm1, %v2665_v61, 0.0 }
 0x2e4   : > { %2564 = vst.msk [vmem:[%s7622_s23 + $0x40] sm:$0xff] %vm324_vm1, %v2545_v5  ;;  %v2711_v44 = vsel %vm324_vm1, %v2663_v42, 0.0 }
 0x2e5   : > { %v2609_v59 = vadd.f32 %v2608_v28, %v2607_v26  ;;  %v2712_v0 = vadd.f32 %v2711_v44, %v2710_v27 }
 0x2e7   : > { %v2611_v2 = vadd.f32 %v2610_v34, %v2609_v59  ;;  %v2714_v32 = vadd.f32 %v2713_v31, %v2712_v0 }
 0x2e9   : > { %v2716_v47 = vadd.f32 %v2715_v6, %v2714_v32 }
 0x30a   : > { %v5807_v18 = vpop.f32.mrb[4].mxu1 }
 0x30b   : > { %v2490_v33 = vpop.f32.mrb[5].mxu1  ;;  %v2668_v29 = vmul.f32 %v5807_v18, %v5807_v18  ;;  %v2616_v60 = vsel %vm324_vm1, %v5807_v18, 0.0 }
 0x30c   : > { %v2612_v52 = vsel %vm324_vm1, %v2490_v33, 0.0  ;;  %v2666_v49 = vmul.f32 %v2490_v33, %v2490_v33  ;;  %v5808_v21 = vpop.f32.mrb[6].mxu1 }
 0x30d   : > { %v2613_v13 = vadd.f32 %v2612_v52, %v2611_v2  ;;  %v2548_v7 = vpack.c.bf16 %v5808_v21, %v5807_v18  ;;  %v2493_v63 = vpop.f32.mrb[7].mxu1  ;;  %v2669_v45 = vmul.f32 %v5808_v21, %v5808_v21  ;;  %v2618_v39 = vsel %vm324_vm1, %v5808_v21, 0.0 }
 0x30e   : > { %v2717_v36 = vsel %vm324_vm1, %v2666_v49, 0.0  ;;  %v2547_v17 = vpack.c.bf16 %v2493_v63, %v2490_v33  ;;  %v2614_v54 = vsel %vm324_vm1, %v2493_v63, 0.0  ;;  %v2667_v10 = vmul.f32 %v2493_v63, %v2493_v63 }
 0x30f   : > { %v2718_v25 = vadd.f32 %v2717_v36, %v2716_v47  ;;  %2567 = vst.msk [vmem:[%s7622_s23 + $0x58] sm:$0xff] %vm324_vm1, %v2548_v7  ;;  %v2615_v46 = vadd.f32 %v2614_v54, %v2613_v13  ;;  %v2721_v1 = vsel %vm324_vm1, %v2668_v29, 0.0  ;;  %v2723_v15 = vsel %vm324_vm1, %v2669_v45, 0.0 }
 0x310   : > { %2566 = vst.msk [vmem:[%s7622_s23 + $0x50] sm:$0xff] %vm324_vm1, %v2547_v17  ;;  %v2719_v55 = vsel %vm324_vm1, %v2667_v10, 0.0 }
 0x311   : > { %v2617_v48 = vadd.f32 %v2616_v60, %v2615_v46  ;;  %v2720_v20 = vadd.f32 %v2719_v55, %v2718_v25 }
 0x313   : > { %v2619_v12 = vadd.f32 %v2618_v39, %v2617_v48  ;;  %v2722_v19 = vadd.f32 %v2721_v1, %v2720_v20 }
 0x315   : > { %v2724_v50 = vadd.f32 %v2723_v15, %v2722_v19 }
 0x336   : > { %v5811_v23 = vpop.f32.mrb[8].mxu1 }
 0x337   : > { %v2506_v24 = vpop.f32.mrb[9].mxu1  ;;  %v2672_v11 = vmul.f32 %v5811_v23, %v5811_v23  ;;  %v2624_v3 = vsel %vm324_vm1, %v5811_v23, 0.0 }
 0x338   : > { %v2620_v14 = vsel %vm324_vm1, %v2506_v24, 0.0  ;;  %v2670_v30 = vmul.f32 %v2506_v24, %v2506_v24  ;;  %v5812_v22 = vpop.f32.mrb[10].mxu1 }
 0x339   : > { %v2621_v62 = vadd.f32 %v2620_v14, %v2619_v12  ;;  %v2550_v51 = vpack.c.bf16 %v5812_v22, %v5811_v23  ;;  %v2509_v57 = vpop.f32.mrb[11].mxu1  ;;  %v2673_v38 = vmul.f32 %v5812_v22, %v5812_v22  ;;  %v2626_v37 = vsel %vm324_vm1, %v5812_v22, 0.0  ;;  %v2572_v12 = vld [vmem:[#allocation4] sm:$0x1] }
 0x33a   : > { %v2725_v8 = vsel %vm324_vm1, %v2670_v30, 0.0  ;;  %v2549_v53 = vpack.c.bf16 %v2509_v57, %v2506_v24  ;;  %v2622_v43 = vsel %vm324_vm1, %v2509_v57, 0.0  ;;  %v2671_v35 = vmul.f32 %v2509_v57, %v2509_v57  ;;  %v2645_v24 = vld [vmem:[#allocation4 + $0x1] sm:$0x1] }
 0x33b   : > { %v2726_v16 = vadd.f32 %v2725_v8, %v2724_v50  ;;  %2569 = vst.msk [vmem:[%s7622_s23 + $0x68] sm:$0xff] %vm324_vm1, %v2550_v51  ;;  %v2623_v56 = vadd.f32 %v2622_v43, %v2621_v62  ;;  %v2729_v5 = vsel %vm324_vm1, %v2672_v11, 0.0  ;;  %v2731_v27 = vsel %vm324_vm1, %v2673_v38, 0.0 }
 0x33c   : > { %2568 = vst.msk [vmem:[%s7622_s23 + $0x60] sm:$0xff] %vm324_vm1, %v2549_v53  ;;  %v2727_v40 = vsel %vm324_vm1, %v2671_v35, 0.0 }
 0x33d   : > { %v2625_v41 = vadd.f32 %v2624_v3, %v2623_v56  ;;  %v2728_v4 = vadd.f32 %v2727_v40, %v2726_v16 }
 0x33f   : > { %v2627_v9 = vadd.f32 %v2626_v37, %v2625_v41  ;;  %v2730_v58 = vadd.f32 %v2729_v5, %v2728_v4 }
 0x341   : > { %v2732_v26 = vadd.f32 %v2731_v27, %v2730_v58 }
 0x361   : > { %v5815_v42 = vpop.f32.mrb[12].mxu1 }
 0x362   : > { %v2522_v28 = vpop.f32.mrb[13].mxu1  ;;  %v2676_v47 = vmul.f32 %v5815_v42, %v5815_v42  ;;  %v2632_v49 = vsel %vm324_vm1, %v5815_v42, 0.0 }
 0x363   : > { %v2628_v61 = vsel %vm324_vm1, %v2522_v28, 0.0  ;;  %v2674_v59 = vmul.f32 %v2522_v28, %v2522_v28  ;;  %v5816_v44 = vpop.f32.mrb[14].mxu1 }
 0x364   : > { %v2629_v34 = vadd.f32 %v2628_v61, %v2627_v9  ;;  %v2552_v0 = vpack.c.bf16 %v5816_v44, %v5815_v42  ;;  %v2525_v31 = vpop.f32.mrb[15].mxu1  ;;  %v2677_v21 = vmul.f32 %v5816_v44, %v5816_v44  ;;  %v2634_v63 = vsel %vm324_vm1, %v5816_v44, 0.0 }
 0x365   : > { %v2733_v2 = vsel %vm324_vm1, %v2674_v59, 0.0  ;;  %v2551_v32 = vpack.c.bf16 %v2525_v31, %v2522_v28  ;;  %v2630_v6 = vsel %vm324_vm1, %v2525_v31, 0.0  ;;  %v2675_v52 = vmul.f32 %v2525_v31, %v2525_v31 }
 0x366   : > { %v2734_v18 = vadd.f32 %v2733_v2, %v2732_v26  ;;  %2571 = vst.msk [vmem:[%s7622_s23 + $0x78] sm:$0xff] %vm324_vm1, %v2552_v0  ;;  %v2631_v33 = vadd.f32 %v2630_v6, %v2629_v34  ;;  %v2737_v17 = vsel %vm324_vm1, %v2676_v47, 0.0  ;;  %v2739_v25 = vsel %vm324_vm1, %v2677_v21, 0.0 }
 0x367   : > { %2570 = vst.msk [vmem:[%s7622_s23 + $0x70] sm:$0xff] %vm324_vm1, %v2551_v32  ;;  %v2735_v7 = vsel %vm324_vm1, %v2675_v52, 0.0 }
 0x368   : > { %v2633_v13 = vadd.f32 %v2632_v49, %v2631_v33  ;;  %v2736_v36 = vadd.f32 %v2735_v7, %v2734_v18 }
 0x36a   : > { %v2635_v54 = vadd.f32 %v2634_v63, %v2633_v13  ;;  %v2738_v29 = vadd.f32 %v2737_v17, %v2736_v36 }
 0x36c   : > { %v2636_v46 = vrot.slane %v2635_v54, 4  ;;  %v2740_v10 = vadd.f32 %v2739_v25, %v2738_v29 }
 0x36e   : > { %v2637_v60 = vadd.f32 %v2636_v46, %v2635_v54  ;;  %v2741_v45 = vrot.slane %v2740_v10, 4 }
 0x370   : > { %v2638_v48 = vrot.slane %v2637_v60, 2  ;;  %v2742_v55 = vadd.f32 %v2741_v45, %v2740_v10 }
 0x372   : > { %v2639_v39 = vadd.f32 %v2638_v48, %v2637_v60  ;;  %v2743_v20 = vrot.slane %v2742_v55, 2 }
 0x374   : > { %v2640_v1 = vrot.slane %v2639_v39, 1  ;;  %v2744_v19 = vadd.f32 %v2743_v20, %v2742_v55 }
 0x376   : > { %v2641_v15 = vadd.f32 %v2640_v1, %v2639_v39  ;;  %v2745_v50 = vrot.slane %v2744_v19, 1 }
 0x378   : > { %v2642_v23 = vadd.f32 %v2641_v15, %v2572_v12  ;;  %v2746_v14 = vadd.f32 %v2745_v50, %v2744_v19 }
 0x37a   : > { %2644 = vst.msk [vmem:[#allocation4] sm:$0x1] %vm2643_vm13, %v2642_v23  ;;  %v2747_v30 = vadd.f32 %v2746_v14, %v2645_v24 }
 0x37c   : > { %2748 = vst.msk [vmem:[#allocation4 + $0x1] sm:$0x1] %vm2643_vm13, %v2747_v30 }
 0x37d PF: > { %p5705_p11 = scmp.ne.s32.totalorder %s6238_s16, 1 }
 0x37f   : > { %2752 = sbr.rel (%p5705_p11) target bundleno = 1782 (0x6f6), region = 48 }
 0x386   : > { %p5706_p12 = scmp.ne.s32.totalorder %s6234_s15, 0 }
 0x387   : > { %v2756_v22 = vld [vmem:[#allocation4] sm:$0x1] (!%p5706_p12)  ;;  %v2758_v62 = vld [vmem:[#allocation4 + $0x1] sm:$0x1] (!%p5706_p12)  ;;  %v2762_v11 = vld [vmem:[%s9586_s3] sm:$0x1] (!%p5706_p12) }
 0x388   : > { %2755 = sbr.rel (%p5706_p12) target bundleno = 930 (0x3a2), region = 52  ;;  %v2757_v51 = vmul.f32 (!%p5706_p12), 0.001953125, %v2756_v22  ;;  %v2759_v57 = vmul.f32 (!%p5706_p12), 0.001953125, %v2758_v62  ;;  %vm2766_vm14 = vcmask (!%p5706_p12), 24576   ;;  %v2768_v35 = vld [vmem:[%s9586_s3 + $0x1] sm:$0x1] (!%p5706_p12) }
 0x38a   : > { %v2760_v8 = vmul.f32 (!%p5706_p12), %v2757_v51, %v2757_v51 }
 0x38c   : > { %v2761_v53 = vsub.f32 (!%p5706_p12), %v2759_v57, %v2760_v8 }
 0x38e   : > { %v2763_v43 = vadd.f32 (!%p5706_p12), 1e-05, %v2761_v53 }
 0x390   : > { %6067 = vrsqrt.f32 %v2763_v43 }
 0x39a   : > { %v6068_v16 = vpop.eup %6067 }
 0x39b   : > { %v2765_v56 = vmul.f32 %v6068_v16, %v2762_v11 }
 0x39d   : > { %2767 = vst.msk [vmem:[#allocation4 + $0x4] sm:$0x1] %vm2766_vm14, %v2765_v56  ;;  %v2769_v3 = vmul.f32 %v2765_v56, %v2757_v51 }
 0x39f   : > { %v2770_v38 = vsub.f32 %v2768_v35, %v2769_v3 }
 0x3a1   : > { %2771 = vst.msk [vmem:[#allocation4 + $0x5] sm:$0x1] %vm2766_vm14, %v2770_v38 }
 0x3a2 PF: > { %v7836_v41 = vld [vmem:[#allocation3 + $0x8] sm:$0xff]  ;;  %s5740_s29 = sshll.u32 %s6234_s15, 7  ;;  %vm2946_vm15 = vcmask 31744   ;;  %s6262_s5 = smov 4   ;;  %vm3321_vm0 = vcmask 1046528   ;;  %vm4994_vm1 = vcmask 1041408  }
 0x3a3   : > { %v3114_v40 = vshll.u32 %v7836_v41, 16  ;;  %v3117_v37 = vshrl.u32 %v7836_v41, 16  ;;  %s7843_s30 = scalar_lea.vmem [#allocation2], %s5740_s29  ;;  %s6263_s6 = smov 8   ;;  %vm4314_vm2 = vcmask 64512   ;;  %vm4379_vm3 = vcmask 97280  }
 0x3a4   : > { %v7841_v4 = vld [vmem:[#allocation4 + $0x4] ss:$0 sm:$0xff]  ;;  %v2776_v5 = vld [vmem:[%s7843_s30 + $0x8] sm:$0xff]  ;;  %v2775_v58 = vld [vmem:[%s7843_s30] sm:$0xff]  ;;  %s6264_s7 = smov 12   ;;  %s6265_s8 = smov 16  }
 0x3a5   : > { %v2777_v9 = vld [vmem:[%s7843_s30 + $0x10] sm:$0xff]  ;;  %v7848_v27 = vrot.slane %v3114_v40, 1  ;;  %v2793_v26 = vunpack.c.l.bf16 %v2776_v5  ;;  %v2794_v42 = vunpack.c.h.bf16 %v2776_v5  ;;  %v2780_v61 = vld [vmem:[%s7843_s30 + $0x28] sm:$0xff]  ;;  %v2791_v34 = vunpack.c.l.bf16 %v2775_v58  ;;  %v2778_v48 = vld [vmem:[%s7843_s30 + $0x18] sm:$0xff]  ;;  %s6266_s9 = smov 20   ;;  %s6267_s10 = smov 24  }
 0x3a6   : > { %v2795_v28 = vunpack.c.l.bf16 %v2777_v9  ;;  %v2796_v59 = vunpack.c.h.bf16 %v2777_v9  ;;  %v2792_v0 = vunpack.c.h.bf16 %v2775_v58  ;;  %v2781_v31 = vld [vmem:[%s7843_s30 + $0x30] sm:$0xff]  ;;  %v2801_v2 = vunpack.c.l.bf16 %v2780_v61  ;;  %v2779_v23 = vld [vmem:[%s7843_s30 + $0x20] sm:$0xff]  ;;  %v2782_v62 = vld [vmem:[%s7843_s30 + $0x38] sm:$0xff]  ;;  %s6268_s13 = smov 28   ;;  %s6269_s25 = smov 32  }
 0x3a7   : > { %v3119_v32 = vor.u32 %v3117_v37, %v7848_v27  ;;  %v2830_v6 = vmul.f32 %v7841_v4, %v2793_v26  ;;  %v2831_v47 = vmul.f32 %v7841_v4, %v2794_v42  ;;  %v2828_v52 = vmul.f32 %v7841_v4, %v2791_v34  ;;  %v2783_v35 = vld [vmem:[%s7843_s30 + $0x40] sm:$0xff]  ;;  %s5730_s27 = sshll.u32 %s6234_s15, 8 }
 0x3a8   : > { %v7851_v44 = vld [vmem:[#allocation4 + $0x5] ss:$0 sm:$0xff]  ;;  %v2832_v18 = vmul.f32 %v7841_v4, %v2795_v28  ;;  %v2833_v33 = vmul.f32 %v7841_v4, %v2796_v59  ;;  %v2829_v49 = vmul.f32 %v7841_v4, %v2792_v0  ;;  %v2802_v21 = vunpack.c.h.bf16 %v2780_v61 }
 0x3a9   : > { %3227 = vrot.lane.b32.xlu0 %v3119_v32, %s6262_s5  ;;  %v2867_v13 = vadd.f32 %v7851_v44, %v2830_v6  ;;  %v2868_v7 = vadd.f32 %v7851_v44, %v2831_v47  ;;  %v2803_v36 = vunpack.c.l.bf16 %v2781_v31  ;;  %v2865_v54 = vadd.f32 %v7851_v44, %v2828_v52 }
 0x3aa   : > { %v2869_v63 = vadd.f32 %v7851_v44, %v2832_v18  ;;  %v2870_v17 = vadd.f32 %v7851_v44, %v2833_v33  ;;  %v2866_v29 = vadd.f32 %v7851_v44, %v2829_v49  ;;  %v2804_v25 = vunpack.c.h.bf16 %v2781_v31 }
 0x3ab   : > { %v2899_v46 = vmax.f32 %v2867_v13, 0.0  ;;  %v2900_v10 = vmax.f32 %v2868_v7, 0.0  ;;  %v2838_v45 = vmul.f32 %v7841_v4, %v2801_v2  ;;  %v2897_v39 = vmax.f32 %v2865_v54, 0.0 }
 0x3ac   : > { %v2901_v60 = vmax.f32 %v2869_v63, 0.0  ;;  %v2902_v55 = vmax.f32 %v2870_v17, 0.0  ;;  %v2898_v20 = vmax.f32 %v2866_v29, 0.0  ;;  %v2839_v1 = vmul.f32 %v7841_v4, %v2802_v21 }
 0x3ad   : > { %v2930_v12 = vpack.c.bf16 %v2900_v10, %v2899_v46  ;;  %v2840_v19 = vmul.f32 %v7841_v4, %v2803_v36  ;;  %v2841_v15 = vmul.f32 %v7841_v4, %v2804_v25  ;;  %v2875_v50 = vadd.f32 %v7851_v44, %v2838_v45 }
 0x3ae   : > { %v2931_v24 = vpack.c.bf16 %v2902_v55, %v2901_v60  ;;  %v2929_v14 = vpack.c.bf16 %v2898_v20, %v2897_v39  ;;  %v2876_v30 = vadd.f32 %v7851_v44, %v2839_v1  ;;  %v2797_v22 = vunpack.c.l.bf16 %v2778_v48  ;;  %v2784_v60 = vld [vmem:[%s7843_s30 + $0x48] sm:$0xff] }
 0x3af   : > { %2948 = vst.msk [vmem:[#allocation3 + $0x38] sm:$0xff] %vm2946_vm15, %v2930_v12  ;;  %v2877_v51 = vadd.f32 %v7851_v44, %v2840_v19  ;;  %v2878_v57 = vadd.f32 %v7851_v44, %v2841_v15  ;;  %v2907_v8 = vmax.f32 %v2875_v50, 0.0  ;;  %v2798_v53 = vunpack.c.h.bf16 %v2778_v48 }
 0x3b0   : > { %2949 = vst.msk [vmem:[#allocation3 + $0x50] sm:$0xff] %vm2946_vm15, %v2931_v24  ;;  %2947 = vst.msk [vmem:[#allocation3 + $0x20] sm:$0xff] %vm2946_vm15, %v2929_v14  ;;  %v2908_v43 = vmax.f32 %v2876_v30, 0.0  ;;  %v2799_v11 = vunpack.c.l.bf16 %v2779_v23  ;;  %v2800_v16 = vunpack.c.h.bf16 %v2779_v23  ;;  %v2834_v56 = vmul.f32 %v7841_v4, %v2797_v22 }
 0x3b1   : > { %v2909_v3 = vmax.f32 %v2877_v51, 0.0  ;;  %v2910_v38 = vmax.f32 %v2878_v57, 0.0  ;;  %v2835_v40 = vmul.f32 %v7841_v4, %v2798_v53  ;;  %v2805_v37 = vunpack.c.l.bf16 %v2782_v62 }
 0x3b2   : > { %v2934_v5 = vpack.c.bf16 %v2908_v43, %v2907_v8  ;;  %v2836_v9 = vmul.f32 %v7841_v4, %v2799_v11  ;;  %v2837_v58 = vmul.f32 %v7841_v4, %v2800_v16  ;;  %v2871_v26 = vadd.f32 %v7851_v44, %v2834_v56 }
 0x3b3   : > { %v2935_v42 = vpack.c.bf16 %v2910_v38, %v2909_v3  ;;  %v2872_v28 = vadd.f32 %v7851_v44, %v2835_v40  ;;  %v2806_v61 = vunpack.c.h.bf16 %v2782_v62  ;;  %v2807_v59 = vunpack.c.l.bf16 %v2783_v35  ;;  %v2785_v62 = vld [vmem:[%s7843_s30 + $0x50] sm:$0xff]  ;;  %v2786_v3 = vld [vmem:[%s7843_s30 + $0x58] sm:$0xff] }
 0x3b4   : > { %2952 = vst.msk [vmem:[#allocation3 + $0x98] sm:$0xff] %vm2946_vm15, %v2934_v5  ;;  %v2873_v34 = vadd.f32 %v7851_v44, %v2836_v9  ;;  %v2874_v0 = vadd.f32 %v7851_v44, %v2837_v58  ;;  %v2903_v31 = vmax.f32 %v2871_v26, 0.0  ;;  %v2808_v2 = vunpack.c.h.bf16 %v2783_v35 }
 0x3b5   : > { %2953 = vst.msk [vmem:[#allocation3 + $0xb0] sm:$0xff] %vm2946_vm15, %v2935_v42  ;;  %v2904_v32 = vmax.f32 %v2872_v28, 0.0  ;;  %v2842_v6 = vmul.f32 %v7841_v4, %v2805_v37  ;;  %v2843_v47 = vmul.f32 %v7841_v4, %v2806_v61  ;;  %v2844_v18 = vmul.f32 %v7841_v4, %v2807_v59  ;;  %v2787_v28 = vld [vmem:[%s7843_s30 + $0x60] sm:$0xff] }
 0x3b6   : > { %v7896_v33 = vld [vmem:[#allocation3 + $0x38] sm:$0xff]  ;;  %v2905_v52 = vmax.f32 %v2873_v34, 0.0  ;;  %v2906_v49 = vmax.f32 %v2874_v0, 0.0  ;;  %v2845_v21 = vmul.f32 %v7841_v4, %v2808_v2  ;;  %v2809_v23 = vunpack.c.l.bf16 %v2784_v60 }
 0x3b7   : > { %v7899_v13 = vld [vmem:[#allocation3 + $0x50] sm:$0xff]  ;;  %v3128_v7 = vshll.u32 %v7896_v33, 16  ;;  %v7902_v63 = vld [vmem:[#allocation3 + $0x20] sm:$0xff]  ;;  %v2932_v36 = vpack.c.bf16 %v2904_v32, %v2903_v31  ;;  %v2879_v17 = vadd.f32 %v7851_v44, %v2842_v6  ;;  %v2880_v54 = vadd.f32 %v7851_v44, %v2843_v47 }
 0x3b8   : > { %v3135_v29 = vshll.u32 %v7899_v13, 16  ;;  %v3121_v25 = vshll.u32 %v7902_v63, 16  ;;  %v2933_v46 = vpack.c.bf16 %v2906_v49, %v2905_v52  ;;  %v2881_v10 = vadd.f32 %v7851_v44, %v2844_v18 }
 0x3b9   : > { %v7910_v45 = vrot.slane %v3128_v7, 1  ;;  %2950 = vst.msk [vmem:[#allocation3 + $0x68] sm:$0xff] %vm2946_vm15, %v2932_v36  ;;  %v2882_v48 = vadd.f32 %v7851_v44, %v2845_v21  ;;  %v2911_v55 = vmax.f32 %v2879_v17, 0.0  ;;  %v2912_v39 = vmax.f32 %v2880_v54, 0.0 }
 0x3ba   : > { %v7914_v20 = vrot.slane %v3135_v29, 1  ;;  %v7916_v1 = vrot.slane %v3121_v25, 1  ;;  %2951 = vst.msk [vmem:[#allocation3 + $0x80] sm:$0xff] %vm2946_vm15, %v2933_v46  ;;  %v2913_v12 = vmax.f32 %v2881_v10, 0.0  ;;  %v3124_v8 = vshrl.u32 %v7902_v63, 16 }
 0x3bb   : > { %v7919_v19 = vld [vmem:[#allocation3 + $0x98] sm:$0xff]  ;;  %v2914_v15 = vmax.f32 %v2882_v48, 0.0  ;;  %v2936_v50 = vpack.c.bf16 %v2912_v39, %v2911_v55  ;;  %v3131_v53 = vshrl.u32 %v7896_v33, 16  ;;  %v2810_v43 = vunpack.c.h.bf16 %v2784_v60  ;;  %v2788_v48 = vld [vmem:[%s7843_s30 + $0x68] sm:$0xff] }
 0x3bc   : > { %v7923_v24 = vpack.i.bf16 %v7914_v20, %v7910_v45  ;;  %v6069_v14 = vpack.i.bf16 %v7916_v1, %v7848_v27  ;;  %v7927_v30 = vld [vmem:[#allocation3 + $0xb0] sm:$0xff]  ;;  %v3156_v22 = vshll.u32 %v7919_v19, 16  ;;  %v2846_v16 = vmul.f32 %v7841_v4, %v2809_v23 }
 0x3bd   : > { %v3163_v51 = vshll.u32 %v7927_v30, 16  ;;  %v2937_v57 = vpack.c.bf16 %v2914_v15, %v2913_v12  ;;  %2954 = vst.msk [vmem:[#allocation3 + $0xc8] sm:$0xff] %vm2946_vm15, %v2936_v50  ;;  %v2811_v56 = vunpack.c.l.bf16 %v2785_v62  ;;  %v2812_v35 = vunpack.c.h.bf16 %v2785_v62 }
 0x3be   : > { %6075 = vrot.lane.b32.xlu1 %v7923_v24, %s6262_s5  ;;  %6070 = vrot.lane.b32.xlu0 %v6069_v14, %s6262_s5  ;;  %v7938_v27 = vrot.slane %v3156_v22, 1  ;;  %v3138_v40 = vshrl.u32 %v7899_v13, 16  ;;  %v2847_v37 = vmul.f32 %v7841_v4, %v2810_v43  ;;  %v7955_v26 = vor.u32 %v3124_v8, %v7916_v1 }
 0x3bf   : > { %v7940_v11 = vrot.slane %v3163_v51, 1  ;;  %2955 = vst.msk [vmem:[#allocation3 + $0xe0] sm:$0xff] %vm2946_vm15, %v2937_v57  ;;  %v7958_v42 = vor.u32 %v3131_v53, %v7910_v45  ;;  %v2883_v59 = vadd.f32 %v7851_v44, %v2846_v16  ;;  %v2813_v0 = vunpack.c.l.bf16 %v2786_v3 }
 0x3c0   : > { %v7945_v38 = vld [vmem:[#allocation3 + $0x68] sm:$0xff]  ;;  %v2884_v34 = vadd.f32 %v7851_v44, %v2847_v37  ;;  %v2848_v2 = vmul.f32 %v7841_v4, %v2811_v56  ;;  %v2849_v32 = vmul.f32 %v7841_v4, %v2812_v35  ;;  %v2814_v6 = vunpack.c.h.bf16 %v2786_v3  ;;  %v2789_v35 = vld [vmem:[%s7843_s30 + $0x70] sm:$0xff] }
 0x3c1   : > { %v6084_v5 = vpack.i.bf16 %v7940_v11, %v7938_v27  ;;  %v7951_v9 = vld [vmem:[#allocation3 + $0x80] sm:$0xff]  ;;  %v3142_v58 = vshll.u32 %v7945_v38, 16  ;;  %v2915_v52 = vmax.f32 %v2883_v59, 0.0  ;;  %v2815_v21 = vunpack.c.l.bf16 %v2787_v28 }
 0x3c2   : > { %v3149_v61 = vshll.u32 %v7951_v9, 16  ;;  %v2916_v49 = vmax.f32 %v2884_v34, 0.0  ;;  %v7975_v36 = vor.u32 %v3138_v40, %v7914_v20  ;;  %v2885_v17 = vadd.f32 %v7851_v44, %v2848_v2 }
 0x3c3   : > { %6085 = vrot.lane.b32.xlu1 %v6084_v5, %s6262_s5  ;;  %v7965_v31 = vrot.slane %v3142_v58, 1  ;;  %v2816_v54 = vunpack.c.h.bf16 %v2787_v28  ;;  %v3166_v46 = vshrl.u32 %v7927_v30, 16  ;;  %v2886_v60 = vadd.f32 %v7851_v44, %v2849_v32 }
 0x3c4   : > { %v7969_v47 = vrot.slane %v3149_v61, 1  ;;  %v7971_v18 = vld [vmem:[#allocation3 + $0xc8] sm:$0xff]  ;;  %v2938_v10 = vpack.c.bf16 %v2916_v49, %v2915_v52  ;;  %v3145_v12 = vshrl.u32 %v7945_v38, 16  ;;  %v2917_v15 = vmax.f32 %v2885_v17, 0.0 }
 0x3c5   : > { %v3170_v7 = vshll.u32 %v7971_v18, 16  ;;  %v2918_v50 = vmax.f32 %v2886_v60, 0.0  ;;  %v2850_v23 = vmul.f32 %v7841_v4, %v2813_v0  ;;  %v2851_v14 = vmul.f32 %v7841_v4, %v2814_v6 }
 0x3c6   : > { %v7980_v29 = vpack.i.bf16 %v7969_v47, %v7965_v31  ;;  %v7982_v25 = vld [vmem:[#allocation3 + $0xe0] sm:$0xff]  ;;  %2956 = vst.msk [vmem:[#allocation3 + $0xf8] sm:$0xff] %vm2946_vm15, %v2938_v10  ;;  %v2852_v22 = vmul.f32 %v7841_v4, %v2815_v21  ;;  %v3152_v51 = vshrl.u32 %v7951_v9, 16  ;;  %v2853_v57 = vmul.f32 %v7841_v4, %v2816_v54 }
 0x3c7   : > { %v3172_v55 = vrot.slane %v3170_v7, 1  ;;  %v3177_v39 = vshll.u32 %v7982_v25, 16  ;;  %3231 = vrot.lane.b32.xlu1 %v7955_v26, %s6262_s5  ;;  %v2817_v8 = vunpack.c.l.bf16 %v2788_v48  ;;  %v2939_v53 = vpack.c.bf16 %v2918_v50, %v2917_v15 }
 0x3c8   : > { %6080 = vrot.lane.b32.xlu0 %v7980_v29, %s6262_s5  ;;  %v2887_v43 = vadd.f32 %v7851_v44, %v2850_v23  ;;  %v2888_v16 = vadd.f32 %v7851_v44, %v2851_v14  ;;  %v2889_v56 = vadd.f32 %v7851_v44, %v2852_v22  ;;  %v8009_v40 = vor.u32 %v3145_v12, %v7965_v31 }
 0x3c9   : > { %v7997_v62 = vrot.slane %v3177_v39, 1  ;;  %v2890_v37 = vadd.f32 %v7851_v44, %v2853_v57  ;;  %v2818_v5 = vunpack.c.h.bf16 %v2788_v48  ;;  %2957 = vst.msk [vmem:[#allocation3 + $0x110] sm:$0xff] %vm2946_vm15, %v2939_v53  ;;  %v2854_v59 = vmul.f32 %v7841_v4, %v2817_v8 }
 0x3ca   : > { %v2919_v58 = vmax.f32 %v2887_v43, 0.0  ;;  %v2920_v28 = vmax.f32 %v2888_v16, 0.0  ;;  %v2921_v61 = vmax.f32 %v2889_v56, 0.0  ;;  %v2819_v2 = vunpack.c.l.bf16 %v2789_v35 }
 0x3cb   : > { %v6089_v3 = vpack.i.bf16 %v7997_v62, %v3172_v55  ;;  %3239 = vrot.lane.b32.xlu1 %v7975_v36, %s6262_s5  ;;  %v2922_v34 = vmax.f32 %v2890_v37, 0.0  ;;  %v2855_v0 = vmul.f32 %v7841_v4, %v2818_v5  ;;  %v2820_v32 = vunpack.c.h.bf16 %v2789_v35 }
 0x3cc   : > { %v3168_v6 = vor.u32 %v3166_v46, %v7940_v11  ;;  %v3173_v52 = vshrl.u32 %v7971_v18, 16  ;;  %v2940_v49 = vpack.c.bf16 %v2920_v28, %v2919_v58  ;;  %v2891_v21 = vadd.f32 %v7851_v44, %v2854_v59 }
 0x3cd   : > { %6090 = vrot.lane.b32.xlu0 %v6089_v3, %s6262_s5  ;;  %v8021_v7 = vld [vmem:[#allocation3 + $0xf8] sm:$0xff]  ;;  %v2941_v17 = vpack.c.bf16 %v2922_v34, %v2921_v61  ;;  %v2892_v54 = vadd.f32 %v7851_v44, %v2855_v0  ;;  %v2856_v10 = vmul.f32 %v7841_v4, %v2819_v2  ;;  %v2857_v60 = vmul.f32 %v7841_v4, %v2820_v32 }
 0x3ce   : > { %v3159_v48 = vshrl.u32 %v7919_v19, 16  ;;  %v3184_v11 = vshll.u32 %v8021_v7, 16  ;;  %2958 = vst.msk [vmem:[#allocation3 + $0x128] sm:$0xff] %vm2946_vm15, %v2940_v49  ;;  %v2923_v46 = vmax.f32 %v2891_v21, 0.0  ;;  %v8032_v39 = vor.u32 %v3152_v51, %v7969_v47 }
 0x3cf   : > { %3243 = vrot.lane.b32.xlu1 %v8009_v40, %s6262_s5  ;;  %2959 = vst.msk [vmem:[#allocation3 + $0x140] sm:$0xff] %vm2946_vm15, %v2941_v17  ;;  %v2924_v12 = vmax.f32 %v2892_v54, 0.0  ;;  %v2893_v15 = vadd.f32 %v7851_v44, %v2856_v10  ;;  %v2894_v4 = vadd.f32 %v7851_v44, %v2857_v60  ;;  %v3175_v50 = vor.u32 %v3173_v52, %v3172_v55 }
 0x3d0   : > { %v8038_v23 = vld [vmem:[#allocation3 + $0x110] sm:$0xff]  ;;  %v3186_v8 = vrot.slane %v3184_v11, 1  ;;  %v3161_v51 = vor.u32 %v3159_v48, %v7938_v27  ;;  %v3180_v43 = vshrl.u32 %v7982_v25, 16  ;;  %v3187_v37 = vshrl.u32 %v8021_v7, 16 }
 0x3d1   : > { %3235 = vrot.lane.b32.xlu0 %v7958_v42, %s6262_s5  ;;  %v2942_v14 = vpack.c.bf16 %v2924_v12, %v2923_v46  ;;  %v2925_v22 = vmax.f32 %v2893_v15, 0.0  ;;  %v2926_v57 = vmax.f32 %v2894_v4, 0.0  ;;  %v3191_v53 = vshll.u32 %v8038_v23, 16  ;;  %v3000_v12 = vld [vmem:[#allocation3 + $0x10] sm:$0x1] }
 0x3d2   : > { %v3194_v56 = vshrl.u32 %v8038_v23, 16  ;;  %v3182_v27 = vor.u32 %v3180_v43, %v7997_v62  ;;  %v3189_v34 = vor.u32 %v3187_v37, %v3186_v8  ;;  %v6109_v48 = vpack.i.bf16 %v7910_v45, %v7916_v1  ;;  %v3004_v37 = vld [vmem:[#allocation3 + $0x70] sm:$0x1] }
 0x3d3   : > { %3255 = vrot.lane.b32.xlu1 %v3168_v6, %s6262_s5  ;;  %2960 = vst.msk [vmem:[#allocation3 + $0x158] sm:$0xff] %vm2946_vm15, %v2942_v14  ;;  %v2943_v44 = vpack.c.bf16 %v2926_v57, %v2925_v22  ;;  %v3193_v16 = vrot.slane %v3191_v53, 1  ;;  %v3323_v4 = vrot.slane %v3000_v12, 1  ;;  %v3001_v14 = vld [vmem:[#allocation3 + $0x28] sm:$0x1]  ;;  %v3322_v22 = vrot.slane %v7836_v41, 1 }
 0x3d4   : > { %v3002_v53 = vld [vmem:[#allocation3 + $0x40] sm:$0x1]  ;;  %v6119_v43 = vpack.i.bf16 %v7965_v31, %v7914_v20  ;;  %vm4444_vm4 = vcmask 130048   ;;  %vm4509_vm5 = vcmask 162816   ;;  %vm4574_vm6 = vcmask 195584  }
 0x3d5   : > { %3247 = vrot.lane.b32.xlu0 %v8032_v39, %s6262_s5  ;;  %v8047_v55 = vld [vmem:[#allocation3 + $0x128] sm:$0xff]  ;;  %2961 = vst.msk [vmem:[#allocation3 + $0x170] sm:$0xff] %vm2946_vm15, %v2943_v44  ;;  %v6094_v35 = vpack.i.bf16 %v3193_v16, %v3186_v8  ;;  %v3196_v28 = vor.u32 %v3194_v56, %v3193_v16  ;;  %v3324_v57 = vsel %vm3321_vm0, %v3322_v22, %v3323_v4  ;;  %v3326_v8 = vrot.slane %v3001_v14, 1  ;;  %v3003_v16 = vld [vmem:[#allocation3 + $0x58] sm:$0x1] }
 0x3d6   : > { %v8051_v3 = vld [vmem:[#allocation3 + $0x140] sm:$0xff]  ;;  %v3198_v5 = vshll.u32 %v8047_v55, 16  ;;  %v3201_v61 = vshrl.u32 %v8047_v55, 16  ;;  %v3329_v44 = vrot.slane %v3002_v53, 1  ;;  %v8092_v56 = vrot.slane %v7896_v33, 1 }
 0x3d7   : > { %3259 = vrot.lane.b32.xlu1 %v3175_v50, %s6262_s5  ;;  %v3205_v58 = vshll.u32 %v8051_v3, 16  ;;  %v3208_v17 = vshrl.u32 %v8051_v3, 16  ;;  %v3010_v14 = vld [vmem:[#allocation3 + $0x100] sm:$0x1]  ;;  %vm4639_vm7 = vcmask 228352   ;;  %vm4704_vm8 = vcmask 261120  }
 0x3d8   : > { %v3200_v0 = vrot.slane %v3198_v5, 1  ;;  %v8100_v5 = vrot.slane %v7899_v13, 1  ;;  %vm4769_vm9 = vsmask.f32 256  ;;  %vm4945_vm10 = vcmask 293888  }
 0x3d9   : > { %3251 = vrot.lane.b32.xlu0 %v3161_v51, %s6262_s5  ;;  %v3207_v2 = vrot.slane %v3205_v58, 1  ;;  %v8083_v51 = vrot.slane %v7902_v63, 1  ;;  %vm5264_vm11 = vcmask 24576  }
 0x3da   : > { %v8060_v59 = vld [vmem:[#allocation3 + $0x158] sm:$0xff]  ;;  %v3203_v6 = vor.u32 %v3201_v61, %v3200_v0  ;;  %v3005_v61 = vld [vmem:[#allocation3 + $0x88] sm:$0x1] }
 0x3db   : > { %6095 = vrot.lane.b32.xlu1 %v6094_v35, %s6262_s5  ;;  %v3212_v62 = vshll.u32 %v8060_v59, 16  ;;  %v6099_v21 = vpack.i.bf16 %v3207_v2, %v3200_v0  ;;  %v3210_v11 = vor.u32 %v3208_v17, %v3207_v2  ;;  %v3215_v46 = vshrl.u32 %v8060_v59, 16 }
 0x3dc   : > { %v8064_v32 = vld [vmem:[#allocation3 + $0x170] sm:$0xff]  ;;  %v3327_v41 = vsel %vm3321_vm0, %v8083_v51, %v3326_v8  ;;  %v3330_v35 = vsel %vm3321_vm0, %v8092_v56, %v3329_v44  ;;  %v3338_v2 = vrot.slane %v3005_v61, 1  ;;  %v3340_v17 = vrot.slane %v7919_v19, 1  ;;  %v3011_v8 = vld [vmem:[#allocation3 + $0x118] sm:$0x1] }
 0x3dd   : > { %3263 = vrot.lane.b32.xlu0 %v3182_v27, %s6262_s5  ;;  %v3214_v52 = vrot.slane %v3212_v62, 1  ;;  %v3219_v49 = vshll.u32 %v8064_v32, 16  ;;  %v3222_v60 = vshrl.u32 %v8064_v32, 16  ;;  %v3332_v27 = vrot.slane %v3003_v16, 1  ;;  %v3006_v62 = vld [vmem:[#allocation3 + $0xa0] sm:$0x1] }
 0x3de   : > { %v3346_v19 = vrot.slane %v7971_v18, 1  ;;  %v3352_v18 = vrot.slane %v8021_v7, 1  ;;  %v3012_v44 = vld [vmem:[#allocation3 + $0x130] sm:$0x1]  ;;  %v3358_v7 = vrot.slane %v8047_v55, 1  ;;  %v3364_v55 = vrot.slane %v8060_v59, 1 }
 0x3df   : > { %3271 = vrot.lane.b32.xlu1 %v3196_v28, %s6262_s5  ;;  %v3221_v54 = vrot.slane %v3219_v49, 1  ;;  %v3217_v50 = vor.u32 %v3215_v46, %v3214_v52  ;;  %v3333_v58 = vsel %vm3321_vm0, %v8100_v5, %v3332_v27  ;;  %v3335_v28 = vrot.slane %v3004_v37, 1  ;;  %v3013_v27 = vld [vmem:[#allocation3 + $0x148] sm:$0x1]  ;;  %v3016_v59 = vld [vmem:[#allocation3 + $0x18] sm:$0x80] }
 0x3e0   : > { %v3341_v49 = vrot.slane %v3006_v62, 1 }
 0x3e1   : > { %3267 = vrot.lane.b32.xlu0 %v3189_v34, %s6262_s5  ;;  %v6104_v10 = vpack.i.bf16 %v3221_v54, %v3214_v52  ;;  %v3224_v15 = vor.u32 %v3222_v60, %v3221_v54  ;;  %v8108_v34 = vrot.slane %v7945_v38, 1  ;;  %v3008_v60 = vld [vmem:[#allocation3 + $0xd0] sm:$0x1] }
 0x3e2   : > { %v3342_v54 = vsel %vm3321_vm0, %v3340_v17, %v3341_v49  ;;  %v3347_v12 = vrot.slane %v3008_v60, 1  ;;  %v3367_v49 = vrot.slane %v8064_v32, 1  ;;  %v3018_v32 = vld [vmem:[#allocation3 + $0x30] sm:$0x80]  ;;  %v3020_v60 = vld [vmem:[#allocation3 + $0x48] sm:$0x80] }
 0x3e3   : > { %3275 = vrot.lane.b32.xlu1 %v3203_v6, %s6262_s5  ;;  %v3336_v0 = vsel %vm3321_vm0, %v8108_v34, %v3335_v28  ;;  %v8116_v6 = vrot.slane %v7951_v9, 1  ;;  %v3014_v28 = vld [vmem:[#allocation3 + $0x160] sm:$0x1] }
 0x3e4   : > { %v3348_v4 = vsel %vm3321_vm0, %v3346_v19, %v3347_v12 }
 0x3e5   : > { %6100 = vrot.lane.b32.xlu0 %v6099_v21, %s6262_s5  ;;  %v3339_v52 = vsel %vm3321_vm0, %v8116_v6, %v3338_v2  ;;  %v3007_v21 = vld [vmem:[#allocation3 + $0xb8] sm:$0x1] }
 0x3e6   : > { %v3015_v2 = vld [vmem:[#allocation3 + $0x178] sm:$0x1] }
 0x3e7   : > { %6105 = vrot.lane.b32.xlu1 %v6104_v10, %s6262_s5  ;;  %v3344_v10 = vrot.slane %v3007_v21, 1 }
 0x3e9   : > { %3279 = vrot.lane.b32.xlu0 %v3210_v11, %s6262_s5  ;;  %v3343_v11 = vrot.slane %v7927_v30, 1  ;;  %v3349_v30 = vrot.slane %v7982_v25, 1  ;;  %v3355_v25 = vrot.slane %v8038_v23, 1  ;;  %v3361_v23 = vrot.slane %v8051_v3, 1 }
 0x3eb   : > { %3287 = vrot.lane.b32.xlu1 %v3224_v15, %s6262_s5  ;;  %v3345_v46 = vsel %vm3321_vm0, %v3343_v11, %v3344_v10  ;;  %v3009_v15 = vld [vmem:[#allocation3 + $0xe8] sm:$0x1] }
 0x3ed   : > { %3283 = vrot.lane.b32.xlu0 %v3217_v50, %s6262_s5  ;;  %v3350_v50 = vrot.slane %v3009_v15, 1  ;;  %v3024_v15 = vld [vmem:[#allocation3 + $0x78] sm:$0x80] }
 0x3ef   : > { %3372 = vrot.lane.b32.xlu1 %v3324_v57, %s6263_s6  ;;  %v3353_v57 = vrot.slane %v3010_v14, 1 }
 0x3f1   : > { %3370 = vrot.lane.b32.xlu0 %v3322_v22, %s6263_s6  ;;  %v3351_v22 = vsel %vm3321_vm0, %v3349_v30, %v3350_v50  ;;  %v3354_v53 = vsel %vm3321_vm0, %v3352_v18, %v3353_v57 }
 0x3f3   : > { %3376 = vrot.lane.b32.xlu1 %v3327_v41, %s6263_s6  ;;  %v3356_v41 = vrot.slane %v3011_v8, 1 }
 0x3f5   : > { %3374 = vrot.lane.b32.xlu0 %v8083_v51, %s6263_s6  ;;  %v3357_v16 = vsel %vm3321_vm0, %v3355_v25, %v3356_v41 }
 0x3f7   : > { %3380 = vrot.lane.b32.xlu1 %v3330_v35, %s6263_s6  ;;  %v3359_v35 = vrot.slane %v3012_v44, 1 }
 0x3f9   : > { %3378 = vrot.lane.b32.xlu0 %v8092_v56, %s6263_s6  ;;  %v3360_v37 = vsel %vm3321_vm0, %v3358_v7, %v3359_v35  ;;  %v3098_v35 = vld [vmem:[#allocation3 + $0x58] sm:$0x1] }
 0x3fb   : > { %3384 = vrot.lane.b32.xlu1 %v3333_v58, %s6263_s6  ;;  %v3362_v58 = vrot.slane %v3013_v27, 1 }
 0x3fd   : > { %3382 = vrot.lane.b32.xlu0 %v8100_v5, %s6263_s6  ;;  %v3363_v61 = vsel %vm3321_vm0, %v3361_v23, %v3362_v58  ;;  %v4126_v58 = vrot.slane %v3098_v35, 1 }
 0x3ff   : > { %3388 = vrot.lane.b32.xlu1 %v3336_v0, %s6263_s6  ;;  %v3365_v0 = vrot.slane %v3014_v28, 1  ;;  %v6190_v28 = vld [vmem:[%s9585_s2 + $0x8] sm:$0xff]  }
 0x401   : > { %3386 = vrot.lane.b32.xlu0 %v8108_v34, %s6263_s6  ;;  %v3366_v62 = vsel %vm3321_vm0, %v3364_v55, %v3365_v0  ;;  %v4127_v0 = vsel %vm3321_vm0, %v8100_v5, %v4126_v58 }
 0x403   : > { %3392 = vrot.lane.b32.xlu1 %v3339_v52, %s6263_s6  ;;  %v3368_v52 = vrot.slane %v3015_v2, 1  ;;  %v6191_v2 = vld [vmem:[%s9585_s2 + $0x10] ss:$0 sps:$4 sm:$0x33]  }
 0x405   : > { %3390 = vrot.lane.b32.xlu0 %v8116_v6, %s6263_s6  ;;  %v3369_v3 = vsel %vm3321_vm0, %v3367_v49, %v3368_v52 }
 0x407   : > { %3396 = vrot.lane.b32.xlu1 %v3342_v54, %s6263_s6 }
 0x409   : > { %3394 = vrot.lane.b32.xlu0 %v3340_v17, %s6263_s6 }
 0x40b   : > { %3400 = vrot.lane.b32.xlu1 %v3345_v46, %s6263_s6  ;;  %v3022_v46 = vld [vmem:[#allocation3 + $0x60] sm:$0x80] }
 0x40d   : > { %3398 = vrot.lane.b32.xlu0 %v3343_v11, %s6263_s6 }
 0x40f   : > { %3404 = vrot.lane.b32.xlu1 %v3348_v4, %s6263_s6  ;;  %v3048_v4 = vld [vmem:[#allocation3 + $0x28] sm:$0x1] }
 0x410   : > { %v3723_v14 = vrot.slane %v3048_v4, 1 }
 0x411   : > { %3402 = vrot.lane.b32.xlu0 %v3346_v19, %s6263_s6 }
 0x412   : > { %v3724_v8 = vsel %vm3321_vm0, %v8083_v51, %v3723_v14 }
 0x413   : > { %3408 = vrot.lane.b32.xlu1 %v3351_v22, %s6263_s6  ;;  %v3049_v22 = vld [vmem:[#allocation3 + $0x40] sm:$0x1] }
 0x415   : > { %3406 = vrot.lane.b32.xlu0 %v3349_v30, %s6263_s6 }
 0x417   : > { %3412 = vrot.lane.b32.xlu1 %v3354_v53, %s6263_s6 }
 0x419   : > { %3410 = vrot.lane.b32.xlu0 %v3352_v18, %s6263_s6  ;;  %v3726_v18 = vrot.slane %v3049_v22, 1 }
 0x41b   : > { %3416 = vrot.lane.b32.xlu1 %v3357_v16, %s6263_s6  ;;  %v8166_v21 = vpop.permute.xlu0 %3227  ;;  %v6189_v16 = vld [vmem:[%s9585_s2] sm:$0xff]  }
 0x41c   : > { %5817 = vmatprep.subr.bf16.mxu0 %v6189_v16  ;;  %5861 = vmatprep.subr.bf16.mxu1 %v6189_v16 }
 0x41d   : > { %3414 = vrot.lane.b32.xlu0 %v3355_v25, %s6263_s6  ;;  %5818 = vmatpush3.bf16.msra.mxu0 %v6189_v16 }
 0x41e   : > { %5864 = vmatpush3.bf16.msra.mxu1 %v6189_v16  ;;  %5819 = vmatprep.subr.bf16.mxu0 %v6190_v28  ;;  %v3069_v16 = vld [vmem:[#allocation3 + $0x60] sm:$0x80] }
 0x41f   : > { %3420 = vrot.lane.b32.xlu1 %v3360_v37, %s6263_s6  ;;  %v3067_v37 = vld [vmem:[#allocation3 + $0x48] sm:$0x80]  ;;  %5862 = vmatprep.subr.bf16.mxu1 %v6190_v28 }
 0x421   : > { %3418 = vrot.lane.b32.xlu0 %v3358_v7, %s6263_s6  ;;  %5820 = vmatpush3.bf16.msra.mxu0 %v6190_v28 }
 0x422   : > { %5865 = vmatpush3.bf16.msra.mxu1 %v6190_v28  ;;  %5869 = vmatprep.subr.msk.bf16.mxu0 %vm4994_vm1, %v6191_v2 }
 0x423   : > { %3424 = vrot.lane.b32.xlu1 %v3363_v61, %s6263_s6  ;;  %5870 = vmatprep.subr.msk.bf16.mxu1 %vm4994_vm1, %v6191_v2 }
 0x425   : > { %3422 = vrot.lane.b32.xlu0 %v3361_v23, %s6263_s6 }
 0x427   : > { %3428 = vrot.lane.b32.xlu1 %v3366_v62, %s6263_s6  ;;  %v4996_v62 = vsel %vm4994_vm1, %v6191_v2, 0 }
 0x428   : > { %5822 = vmatpush3.bf16.msra.mxu0 %v4996_v62  ;;  %5866 = vmatpush3.bf16.msra.mxu1 %v4996_v62 }
 0x429   : > { %3426 = vrot.lane.b32.xlu0 %v3364_v55, %s6263_s6 }
 0x42b   : > { %3432 = vrot.lane.b32.xlu1 %v3369_v3, %s6263_s6 }
 0x42d   : > { %3430 = vrot.lane.b32.xlu0 %v3367_v49, %s6263_s6 }
 0x42f   : > { %3468 = vrot.lane.b32.xlu1 %v7902_v63, %s6264_s7 }
 0x430   : > { %v8170_v17 = vpop.permute.xlu1 %6075  ;;  %v8175_v54 = vpop.permute.xlu0 %6070 }
 0x431   : > { %3466 = vrot.lane.b32.xlu0 %v3016_v59, %s6264_s7  ;;  %v3050_v59 = vld [vmem:[#allocation3 + $0x58] sm:$0x1] }
 0x433   : > { %3472 = vrot.lane.b32.xlu1 %v7896_v33, %s6264_s7 }
 0x435   : > { %3470 = vrot.lane.b32.xlu0 %v3018_v32, %s6264_s7  ;;  %v8178_v10 = vpop.permute.xlu1 %6085 }
 0x437   : > { %3476 = vrot.lane.b32.xlu1 %v7899_v13, %s6264_s7 }
 0x439   : > { %3474 = vrot.lane.b32.xlu0 %v3020_v60, %s6264_s7  ;;  %v8183_v63 = vpop.permute.xlu1 %3231  ;;  %v3729_v60 = vrot.slane %v3050_v59, 1  ;;  %v3052_v59 = vld [vmem:[#allocation3 + $0x88] sm:$0x1] }
 0x43a   : > { %v8185_v11 = vpop.permute.xlu0 %6080 }
 0x43b   : > { %3480 = vrot.lane.b32.xlu1 %v7945_v38, %s6264_s7  ;;  %v3730_v4 = vsel %vm3321_vm0, %v8100_v5, %v3729_v60 }
 0x43d   : > { %3478 = vrot.lane.b32.xlu0 %v3022_v46, %s6264_s7  ;;  %v8190_v12 = vpop.permute.xlu1 %3239 }
 0x43f   : > { %v8192_v19 = vpop.permute.xlu0 %6090  ;;  %3484 = vrot.lane.b32.xlu1 %v7951_v9, %s6264_s7 }
 0x440   : > { %9656 = vst [vmem:[#allocation35_spill] sm:$0xff] %v8192_v19 }
 0x441   : > { %3482 = vrot.lane.b32.xlu0 %v3024_v15, %s6264_s7  ;;  %v8197_v50 = vpop.permute.xlu1 %3243 }
 0x443   : > { %v8199_v30 = vpop.permute.xlu0 %3235  ;;  %3648 = vrot.lane.b32.xlu1 %v7958_v42, %s6265_s8 }
 0x445   : > { %3644 = vrot.lane.b32.xlu0 %v7955_v26, %s6265_s8  ;;  %v8205_v57 = vpop.permute.xlu1 %3255  ;;  %v3727_v26 = vsel %vm3321_vm0, %v8092_v56, %v3726_v18 }
 0x447   : > { %v8209_v53 = vpop.permute.xlu0 %3247  ;;  %6110 = vrot.lane.b32.xlu1 %v6109_v48, %s6265_s8 }
 0x449   : > { %3772 = vrot.lane.b32.xlu0 %v3724_v8, %s6266_s9  ;;  %v8216_v41 = vpop.permute.xlu1 %3259 }
 0x44a   : > { %9657 = vst [vmem:[#allocation36_spill] sm:$0xff] %v8216_v41 }
 0x44b   : > { %v8220_v44 = vpop.permute.xlu0 %3251  ;;  %3868 = vrot.lane.b32.xlu1 %v7896_v33, %s6267_s10  ;;  %v3097_v33 = vld [vmem:[#allocation3 + $0x40] sm:$0x1] }
 0x44c   : > { %v4123_v27 = vrot.slane %v3097_v33, 1  ;;  %v3100_v33 = vld [vmem:[#allocation3 + $0x88] sm:$0x1] }
 0x44d   : > { %3776 = vrot.lane.b32.xlu0 %v3727_v26, %s6266_s9  ;;  %v8225_v25 = vpop.permute.xlu1 %6095 }
 0x44e   : > { %9658 = vst [vmem:[#allocation37_spill] sm:$0xff] %v8225_v25  ;;  %v4124_v23 = vsel %vm3321_vm0, %v8092_v56, %v4123_v27  ;;  %v3030_v25 = vld [vmem:[#allocation3 + $0xc0] sm:$0x80] }
 0x44f   : > { %v8227_v45 = vpop.permute.xlu0 %3263  ;;  %3872 = vrot.lane.b32.xlu1 %v7899_v13, %s6267_s10 }
 0x450   : > { %9659 = vst [vmem:[#allocation38_spill] sm:$0xff] %v8227_v45 }
 0x451   : > { %3770 = vrot.lane.b32.xlu0 %v8083_v51, %s6266_s9  ;;  %v8233_v1 = vpop.permute.xlu1 %3271  ;;  %v3065_v51 = vld [vmem:[#allocation3 + $0x30] sm:$0x80] }
 0x452   : > { %9660 = vst [vmem:[#allocation39_spill] sm:$0xff] %v8233_v1 }
 0x453   : > { %v8235_v48 = vpop.permute.xlu0 %3267  ;;  %3774 = vrot.lane.b32.xlu1 %v8092_v56, %s6266_s9 }
 0x454   : > { %9661 = vst [vmem:[#allocation40_spill] sm:$0xff] %v8235_v48 }
 0x455   : > { %4044 = vrot.lane.b32.xlu0 %v7958_v42, %s6268_s13  ;;  %v8244_v13 = vpop.permute.xlu1 %3275 }
 0x456   : > { %9662 = vst [vmem:[#allocation41_spill] sm:$0xff] %v8244_v13 }
 0x457   : > { %v8246_v7 = vpop.permute.xlu0 %6100  ;;  %4048 = vrot.lane.b32.xlu1 %v7975_v36, %s6268_s13 }
 0x458   : > { %9663 = vst [vmem:[#allocation42_spill] sm:$0xff] %v8246_v7 }
 0x459   : > { %3866 = vrot.lane.b32.xlu0 %v3065_v51, %s6267_s10  ;;  %v8254_v42 = vpop.permute.xlu1 %6105  ;;  %v4132_v51 = vrot.slane %v3100_v33, 1 }
 0x45a   : > { %9664 = vst [vmem:[#allocation43_spill] sm:$0xff] %v8254_v42 }
 0x45b   : > { %v8258_v61 = vpop.permute.xlu0 %3279  ;;  %3870 = vrot.lane.b32.xlu1 %v3067_v37, %s6267_s10  ;;  %v4133_v58 = vsel %vm3321_vm0, %v8116_v6, %v4132_v51 }
 0x45c   : > { %9665 = vst [vmem:[#allocation44_spill] sm:$0xff] %v8258_v61 }
 0x45d   : > { %4172 = vrot.lane.b32.xlu0 %v4124_v23, %s6269_s25  ;;  %v8267_v55 = vpop.permute.xlu1 %3287  ;;  %v3027_v23 = vld [vmem:[#allocation3 + $0x98] sm:$0xff] }
 0x45e   : > { %9666 = vst [vmem:[#allocation45_spill] sm:$0xff] %v8267_v55  ;;  %v3566_v62 = vshll.u32 %v3027_v23, 16 }
 0x45f   : > { %v8269_v52 = vpop.permute.xlu0 %3283  ;;  %4176 = vrot.lane.b32.xlu1 %v4127_v0, %s6269_s25 }
 0x460   : > { %9667 = vst [vmem:[#allocation46_spill] sm:$0xff] %v8269_v52 }
 0x461   : > { %6115 = vrot.lane.b32.xlu0 %v7923_v24, %s6268_s13  ;;  %v8274_v49 = vpop.permute.xlu1 %3372  ;;  %v3051_v24 = vld [vmem:[#allocation3 + $0x70] sm:$0x1] }
 0x462   : > { %v3732_v14 = vrot.slane %v3051_v24, 1  ;;  %v3735_v24 = vrot.slane %v3052_v59, 1 }
 0x463   : > { %v8276_v3 = vpop.permute.xlu0 %3370  ;;  %4174 = vrot.lane.b32.xlu1 %v8100_v5, %s6269_s25 }
 0x465   : > { %4170 = vrot.lane.b32.xlu0 %v8092_v56, %s6269_s25  ;;  %v8282_v32 = vpop.permute.xlu1 %3376 }
 0x467   : > { %v8284_v46 = vpop.permute.xlu0 %3374  ;;  %3656 = vrot.lane.b32.xlu1 %v8009_v40, %s6265_s8 }
 0x469   : > { %3652 = vrot.lane.b32.xlu0 %v7975_v36, %s6265_s8  ;;  %v8290_v15 = vpop.permute.xlu1 %3380  ;;  %v3733_v36 = vsel %vm3321_vm0, %v8108_v34, %v3732_v14  ;;  %v3569_v14 = vshrl.u32 %v3027_v23, 16 }
 0x46b   : > { %v8294_v22 = vpop.permute.xlu0 %3378  ;;  %6120 = vrot.lane.b32.xlu1 %v6119_v43, %s6265_s8 }
 0x46d   : > { %3780 = vrot.lane.b32.xlu0 %v3730_v4, %s6266_s9  ;;  %v8301_v56 = vpop.permute.xlu1 %3384  ;;  %v3568_v4 = vrot.slane %v3566_v62, 1 }
 0x46f   : > { %v8305_v8 = vpop.permute.xlu0 %3382  ;;  %3876 = vrot.lane.b32.xlu1 %v7945_v38, %s6267_s10  ;;  %v3099_v38 = vld [vmem:[#allocation3 + $0x70] sm:$0x1]  ;;  %v3571_v33 = vor.u32 %v3569_v14, %v3568_v4 }
 0x470   : > { %v4129_v35 = vrot.slane %v3099_v38, 1  ;;  %v3076_v14 = vld [vmem:[#allocation3 + $0xb0] sm:$0xff] }
 0x471   : > { %3784 = vrot.lane.b32.xlu0 %v3733_v36, %s6266_s9  ;;  %v8310_v18 = vpop.permute.xlu1 %3388 }
 0x472   : > { %v4130_v37 = vsel %vm3321_vm0, %v8108_v34, %v4129_v35 }
 0x473   : > { %v8312_v26 = vpop.permute.xlu0 %3386  ;;  %3880 = vrot.lane.b32.xlu1 %v7951_v9, %s6267_s10 }
 0x475   : > { %3778 = vrot.lane.b32.xlu0 %v8100_v5, %s6266_s9  ;;  %v8318_v20 = vpop.permute.xlu1 %3392  ;;  %v3071_v5 = vld [vmem:[#allocation3 + $0x78] sm:$0x80] }
 0x477   : > { %v8320_v31 = vpop.permute.xlu0 %3390  ;;  %3782 = vrot.lane.b32.xlu1 %v8108_v34, %s6266_s9 }
 0x479   : > { %4052 = vrot.lane.b32.xlu0 %v8009_v40, %s6268_s13  ;;  %v8326_v43 = vpop.permute.xlu1 %3396 }
 0x47b   : > { %v8328_v9 = vpop.permute.xlu0 %3394  ;;  %4056 = vrot.lane.b32.xlu1 %v8032_v39, %s6268_s13 }
 0x47c   : > { %9668 = vst [vmem:[#allocation47_spill] sm:$0xff] %v8328_v9 }
 0x47d   : > { %3874 = vrot.lane.b32.xlu0 %v3069_v16, %s6267_s10  ;;  %v8333_v27 = vpop.permute.xlu1 %3400 }
 0x47f   : > { %v8337_v40 = vpop.permute.xlu0 %3398  ;;  %3878 = vrot.lane.b32.xlu1 %v3071_v5, %s6267_s10  ;;  %v6129_v5 = vpack.i.bf16 %v3568_v4, %v7969_v47  ;;  %v3966_v47 = vshll.u32 %v3076_v14, 16 }
 0x480   : > { %9669 = vst [vmem:[#allocation48_spill] sm:$0xff] %v8337_v40 }
 0x481   : > { %4180 = vrot.lane.b32.xlu0 %v4130_v37, %s6269_s25  ;;  %v8343_v28 = vpop.permute.xlu1 %3404  ;;  %v3026_v37 = vld [vmem:[#allocation3 + $0x90] sm:$0x80]  ;;  %v8391_v42 = vrot.slane %v3966_v47, 1  ;;  %v3102_v47 = vld [vmem:[#allocation3 + $0xb8] sm:$0x1] }
 0x482   : > { %9670 = vst [vmem:[#allocation49_spill] sm:$0xff] %v8343_v28 }
 0x483   : > { %v8345_v0 = vpop.permute.xlu0 %3402  ;;  %4184 = vrot.lane.b32.xlu1 %v4133_v58, %s6269_s25 }
 0x484   : > { %9671 = vst [vmem:[#allocation50_spill] sm:$0xff] %v8345_v0  ;;  %v6072_v0 = vunpack.i.l.bf16 %v8175_v54 }
 0x485   : > { %6125 = vrot.lane.b32.xlu0 %v7980_v29, %s6268_s13  ;;  %v8350_v2 = vpop.permute.xlu1 %3408  ;;  %v3736_v29 = vsel %vm3321_vm0, %v8116_v6, %v3735_v24 }
 0x486   : > { %9672 = vst [vmem:[#allocation51_spill] sm:$0xff] %v8350_v2  ;;  %v2970_v2 = vld [vmem:[#allocation3 + $0x18] sm:$0x80] }
 0x487   : > { %v8352_v60 = vpop.permute.xlu0 %3406  ;;  %4182 = vrot.lane.b32.xlu1 %v8116_v6, %s6269_s25 }
 0x488   : > { %9673 = vst [vmem:[#allocation52_spill] sm:$0xff] %v8352_v60 }
 0x489   : > { %4178 = vrot.lane.b32.xlu0 %v8108_v34, %s6269_s25  ;;  %v8358_v36 = vpop.permute.xlu1 %3412  ;;  %v3053_v34 = vld [vmem:[#allocation3 + $0xa0] sm:$0x1] }
 0x48a   : > { %9674 = vst [vmem:[#allocation53_spill] sm:$0xff] %v8358_v36  ;;  %v3738_v58 = vrot.slane %v3053_v34, 1 }
 0x48b   : > { %v8360_v38 = vpop.permute.xlu0 %3410  ;;  %3660 = vrot.lane.b32.xlu1 %v8032_v39, %s6265_s8  ;;  %v3737_v39 = vrot.slane %v3027_v23, 1 }
 0x48c   : > { %9675 = vst [vmem:[#allocation54_spill] sm:$0xff] %v8360_v38 }
 0x48d   : > { %3488 = vrot.lane.b32.xlu0 %v3027_v23, %s6264_s7  ;;  %v8367_v16 = vpop.permute.xlu1 %3416  ;;  %v3739_v24 = vsel %vm3321_vm0, %v3737_v39, %v3738_v58 }
 0x48e   : > { %9676 = vst [vmem:[#allocation55_spill] sm:$0xff] %v8367_v16 }
 0x48f   : > { %v8369_v35 = vpop.permute.xlu0 %3414  ;;  %3788 = vrot.lane.b32.xlu1 %v3736_v29, %s6266_s9 }
 0x490   : > { %9677 = vst [vmem:[#allocation56_spill] sm:$0xff] %v8369_v35 }
 0x491   : > { %3664 = vrot.lane.b32.xlu0 %v3571_v33, %s6265_s8  ;;  %v8374_v51 = vpop.permute.xlu1 %3420 }
 0x492   : > { %9678 = vst [vmem:[#allocation57_spill] sm:$0xff] %v8374_v51 }
 0x493   : > { %v8376_v62 = vpop.permute.xlu0 %3418  ;;  %6130 = vrot.lane.b32.xlu1 %v6129_v5, %s6265_s8  ;;  %v3969_v5 = vshrl.u32 %v3076_v14, 16 }
 0x494   : > { %9679 = vst [vmem:[#allocation58_spill] sm:$0xff] %v8376_v62 }
 0x495   : > { %3486 = vrot.lane.b32.xlu0 %v3026_v37, %s6264_s7  ;;  %v8380_v59 = vpop.permute.xlu1 %3424 }
 0x496   : > { %9680 = vst [vmem:[#allocation59_spill] sm:$0xff] %v8380_v59  ;;  %v6134_v59 = vpack.i.bf16 %v8391_v42, %v3568_v4 }
 0x497   : > { %v8383_v29 = vpop.permute.xlu0 %3422  ;;  %3884 = vrot.lane.b32.xlu1 %v3027_v23, %s6267_s10  ;;  %v3101_v23 = vld [vmem:[#allocation3 + $0xa0] sm:$0x1] }
 0x498   : > { %9681 = vst [vmem:[#allocation60_spill] sm:$0xff] %v8383_v29  ;;  %v4135_v52 = vrot.slane %v3101_v23, 1 }
 0x499   : > { %3792 = vrot.lane.b32.xlu0 %v3739_v24, %s6266_s9  ;;  %v8387_v55 = vpop.permute.xlu1 %3428  ;;  %v3971_v24 = vor.u32 %v3969_v5, %v8391_v42 }
 0x49a   : > { %9682 = vst [vmem:[#allocation61_spill] sm:$0xff] %v8387_v55  ;;  %v3073_v55 = vld [vmem:[#allocation3 + $0x90] sm:$0x80]  ;;  %v4136_v5 = vsel %vm3321_vm0, %v3737_v39, %v4135_v52  ;;  %v3031_v52 = vld [vmem:[#allocation3 + $0xc8] sm:$0xff] }
 0x49b   : > { %v8389_v34 = vpop.permute.xlu0 %3426  ;;  %3888 = vrot.lane.b32.xlu1 %v3076_v14, %s6267_s10  ;;  %v3580_v4 = vshll.u32 %v3031_v52, 16  ;;  %v3583_v13 = vshrl.u32 %v3031_v52, 16 }
 0x49c   : > { %9683 = vst [vmem:[#allocation62_spill] sm:$0xff] %v8389_v34 }
 0x49d   : > { %3786 = vrot.lane.b32.xlu0 %v8116_v6, %s6266_s9  ;;  %v8396_v37 = vpop.permute.xlu1 %3432  ;;  %v8408_v6 = vrot.slane %v3076_v14, 1 }
 0x49e   : > { %9684 = vst [vmem:[#allocation63_spill] sm:$0xff] %v8396_v37  ;;  %v3075_v37 = vld [vmem:[#allocation3 + $0xa8] sm:$0x80] }
 0x49f   : > { %v8398_v58 = vpop.permute.xlu0 %3430  ;;  %3790 = vrot.lane.b32.xlu1 %v3737_v39, %s6266_s9 }
 0x4a0   : > { %9685 = vst [vmem:[#allocation64_spill] sm:$0xff] %v8398_v58  ;;  %v4138_v58 = vrot.slane %v3102_v47, 1 }
 0x4a1   : > { %4060 = vrot.lane.b32.xlu0 %v3571_v33, %s6268_s13  ;;  %v8403_v34 = vpop.permute.xlu1 %3468 }
 0x4a2   : > { %v4139_v23 = vsel %vm3321_vm0, %v8408_v6, %v4138_v58  ;;  %v3054_v58 = vld [vmem:[#allocation3 + $0xb8] sm:$0x1] }
 0x4a3   : > { %v8405_v29 = vpop.permute.xlu0 %3466  ;;  %4064 = vrot.lane.b32.xlu1 %v3971_v24, %s6268_s13  ;;  %v3741_v7 = vrot.slane %v3054_v58, 1 }
 0x4a5   : > { %3882 = vrot.lane.b32.xlu0 %v3073_v55, %s6267_s10  ;;  %v8411_v62 = vpop.permute.xlu1 %3472 }
 0x4a7   : > { %v8414_v33 = vpop.permute.xlu0 %3470  ;;  %3886 = vrot.lane.b32.xlu1 %v3075_v37, %s6267_s10 }
 0x4a9   : > { %4188 = vrot.lane.b32.xlu0 %v4136_v5, %s6269_s25  ;;  %v8421_v61 = vpop.permute.xlu1 %3476 }
 0x4ab   : > { %v8423_v47 = vpop.permute.xlu0 %3474  ;;  %4192 = vrot.lane.b32.xlu1 %v4139_v23, %s6269_s25  ;;  %v3028_v23 = vld [vmem:[#allocation3 + $0xa8] sm:$0x80] }
 0x4ad   : > { %6135 = vrot.lane.b32.xlu0 %v6134_v59, %s6268_s13  ;;  %v8427_v55 = vpop.permute.xlu1 %3480  ;;  %v8440_v59 = vrot.slane %v3580_v4, 1  ;;  %v3055_v4 = vld [vmem:[#allocation3 + $0xd0] sm:$0x1] }
 0x4af   : > { %v8429_v51 = vpop.permute.xlu0 %3478  ;;  %3492 = vrot.lane.b32.xlu1 %v3076_v14, %s6264_s7  ;;  %v3585_v38 = vor.u32 %v3583_v13, %v8440_v59  ;;  %v6139_v1 = vpack.i.bf16 %v8440_v59, %v8391_v42 }
 0x4b1   : > { %4186 = vrot.lane.b32.xlu0 %v3737_v39, %s6269_s25  ;;  %v8433_v37 = vpop.permute.xlu1 %3484  ;;  %v3742_v39 = vsel %vm3321_vm0, %v8408_v6, %v3741_v7  ;;  %v3744_v7 = vrot.slane %v3055_v4, 1 }
 0x4b3   : > { %v8435_v5 = vpop.permute.xlu0 %3482  ;;  %3496 = vrot.lane.b32.xlu1 %v3031_v52, %s6264_s7 }
 0x4b5   : > { %4190 = vrot.lane.b32.xlu0 %v8408_v6, %s6269_s25  ;;  %v8442_v35 = vpop.permute.xlu1 %3648 }
 0x4b7   : > { %v3645_v14 = vpop.permute.xlu0 %3644  ;;  %3490 = vrot.lane.b32.xlu1 %v3028_v23, %s6264_s7  ;;  %v8455_v23 = vrot.slane %v3031_v52, 1 }
 0x4b9   : > { %3668 = vrot.lane.b32.xlu0 %v3971_v24, %s6265_s8  ;;  %v8449_v16 = vpop.permute.xlu1 %6110  ;;  %v3745_v24 = vsel %vm3321_vm0, %v8455_v23, %v3744_v7 }
 0x4bb   : > { %v3773_v58 = vpop.permute.xlu0 %3772  ;;  %3796 = vrot.lane.b32.xlu1 %v3742_v39, %s6266_s9  ;;  %v8461_v39 = vld [vmem:[#allocation3 + $0xe0] sm:$0xff] }
 0x4bc   : > { %v3980_v42 = vshll.u32 %v8461_v39, 16  ;;  %v3983_v7 = vshrl.u32 %v8461_v39, 16 }
 0x4bd   : > { %3672 = vrot.lane.b32.xlu0 %v3585_v38, %s6265_s8  ;;  %v3869_v36 = vpop.permute.xlu1 %3868 }
 0x4be   : > { %v8470_v28 = vrot.slane %v3980_v42, 1  ;;  %v6193_v42 = vld [vmem:[#allocation3 + $0x20] sm:$0xff] }
 0x4bf   : > { %v3777_v48 = vpop.permute.xlu0 %3776  ;;  %6140 = vrot.lane.b32.xlu1 %v6139_v1, %s6265_s8  ;;  %v6073_v1 = vunpack.i.h.bf16 %v8175_v54  ;;  %v4243_v19 = vsel %vm2946_vm15, %v6193_v42, %v8183_v63  ;;  %v3104_v63 = vld [vmem:[#allocation3 + $0xe8] sm:$0x1] }
 0x4c1   : > { %3494 = vrot.lane.b32.xlu0 %v3030_v25, %s6264_s7  ;;  %v3873_v13 = vpop.permute.xlu1 %3872  ;;  %v2968_v25 = vld [vmem:[#allocation3] sm:$0x80]  ;;  %v4241_v40 = vsel %vm2946_vm15, %v2970_v2, %v6073_v1  ;;  %v4322_v2 = vsel %vm4314_vm2, %v4243_v19, %v8282_v32  ;;  %v6113_v1 = vunpack.i.h.bf16 %v8449_v16 }
 0x4c3   : > { %v8463_v60 = vpop.permute.xlu0 %3770  ;;  %3892 = vrot.lane.b32.xlu1 %v3031_v52, %s6267_s10  ;;  %v6192_v52 = vld [vmem:[#allocation3 + $0x8] sm:$0xff] }
 0x4c4   : > { %v4238_v41 = vsel %vm2946_vm15, %v6192_v52, %v8166_v21 }
 0x4c5   : > { %3800 = vrot.lane.b32.xlu0 %v3745_v24, %s6266_s9  ;;  %v3775_v4 = vpop.permute.xlu1 %3774  ;;  %v4236_v24 = vsel %vm2946_vm15, %v2968_v25, %v6072_v0  ;;  %v4318_v9 = vsel %vm4314_vm2, %v4238_v41, %v8274_v49  ;;  %v8490_v25 = vor.u32 %v3983_v7, %v8470_v28  ;;  %v8496_v49 = vrot.slane %v8461_v39, 1 }
 0x4c6   : > { %v4383_v21 = vsel %vm4379_vm3, %v4318_v9, %v8403_v34  ;;  %v4387_v9 = vsel %vm4379_vm3, %v4322_v2, %v8411_v62  ;;  %v6112_v7 = vunpack.i.l.bf16 %v8449_v16  ;;  %v4316_v62 = vsel %vm4314_vm2, %v4236_v24, %v8276_v3  ;;  %v3079_v24 = vld [vmem:[#allocation3 + $0xd8] sm:$0x80] }
 0x4c7   : > { %v4045_v45 = vpop.permute.xlu0 %4044  ;;  %3896 = vrot.lane.b32.xlu1 %v8461_v39, %s6267_s10  ;;  %v4448_v41 = vsel %vm4444_vm4, %v4383_v21, %v3645_v14  ;;  %v4452_v19 = vsel %vm4444_vm4, %v4387_v9, %v8442_v35  ;;  %v3077_v14 = vld [vmem:[#allocation3 + $0xc0] sm:$0x80]  ;;  %v4144_v21 = vrot.slane %v3104_v63, 1 }
 0x4c8   : > { %v4513_v34 = vsel %vm4509_vm5, %v4448_v41, %v3773_v58  ;;  %v4320_v58 = vsel %vm4314_vm2, %v4241_v40, %v8284_v46  ;;  %v4517_v2 = vsel %vm4509_vm5, %v4452_v19, %v3777_v48  ;;  %v2790_v19 = vld [vmem:[%s7843_s30 + $0x78] sm:$0xff]  ;;  %s9110_s30 = scalar_lea.vmem %s9587_s4, %s5730_s27 }
 0x4c9   : > { %3794 = vrot.lane.b32.xlu0 %v8408_v6, %s6266_s9  ;;  %v4049_v54 = vpop.permute.xlu1 %4048  ;;  %v3103_v6 = vld [vmem:[#allocation3 + $0xd0] sm:$0x1]  ;;  %v4578_v32 = vsel %vm4574_vm6, %v4513_v34, %v3869_v36  ;;  %v4381_v36 = vsel %vm4379_vm3, %v4316_v62, %v8405_v29  ;;  %v4385_v35 = vsel %vm4379_vm3, %v4320_v58, %v8414_v33 }
 0x4ca   : > { %v4141_v42 = vrot.slane %v3103_v6, 1  ;;  %v4643_v16 = vsel %vm4639_vm7, %v4578_v32, %v4045_v45  ;;  %v4582_v6 = vsel %vm4574_vm6, %v4517_v2, %v3873_v13  ;;  %v4446_v46 = vsel %vm4444_vm4, %v4381_v36, %v6112_v7 }
 0x4cb   : > { %v3867_v0 = vpop.permute.xlu0 %3866  ;;  %3798 = vrot.lane.b32.xlu1 %v8455_v23, %s6266_s9  ;;  %v4450_v48 = vsel %vm4444_vm4, %v4385_v35, %v6113_v1  ;;  %v4647_v45 = vsel %vm4639_vm7, %v4582_v6, %v4049_v54  ;;  %v4511_v54 = vsel %vm4509_vm5, %v4446_v46, %v8463_v60  ;;  %v2822_v2 = vunpack.c.h.bf16 %v2790_v19 }
 0x4cc   : > { %v4515_v29 = vsel %vm4509_vm5, %v4450_v48, %v3775_v4  ;;  %v4142_v33 = vsel %vm3321_vm0, %v8455_v23, %v4141_v42  ;;  %v4145_v4 = vsel %vm3321_vm0, %v8496_v49, %v4144_v21  ;;  %v4576_v32 = vsel %vm4574_vm6, %v4511_v54, %v3867_v0  ;;  %v6194_v0 = vld [vmem:[#allocation4 + $0x4] ss:$0 sm:$0xff] }
 0x4cd   : > { %4068 = vrot.lane.b32.xlu0 %v3585_v38, %s6268_s13  ;;  %v3871_v52 = vpop.permute.xlu1 %3870  ;;  %v2821_v42 = vunpack.c.l.bf16 %v2790_v19 }
 0x4ce   : > { %v4580_v9 = vsel %vm4574_vm6, %v4515_v29, %v3871_v52 }
 0x4cf   : > { %v4173_v38 = vpop.permute.xlu0 %4172  ;;  %4072 = vrot.lane.b32.xlu1 %v8490_v25, %s6268_s13  ;;  %v2858_v36 = vmul.f32 %v6194_v0, %v2821_v42 }
 0x4d0   : > { %v4708_v3 = vsel %vm4704_vm8, %v4643_v16, %v4173_v38 }
 0x4d1   : > { %3890 = vrot.lane.b32.xlu0 %v3077_v14, %s6267_s10  ;;  %v4177_v40 = vpop.permute.xlu1 %4176  ;;  %v4773_v63 = vshrl.u32 %v4708_v3, 16  ;;  %v6144_v14 = vpack.i.bf16 %v8470_v28, %v8440_v59  ;;  %v4776_v46 = vshll.u32 %v4708_v3, 16 }
 0x4d2   : > { %v4712_v13 = vsel %vm4704_vm8, %v4647_v45, %v4177_v40  ;;  %v6195_v40 = vld [vmem:[#allocation4 + $0x5] ss:$0 sm:$0xff] }
 0x4d3   : > { %v6116_v41 = vpop.permute.xlu0 %6115  ;;  %v4783_v34 = vshrl.u32 %v4712_v13, 16  ;;  %3894 = vrot.lane.b32.xlu1 %v3079_v24, %s6267_s10  ;;  %v4775_v16 = vrot.slane %v4773_v63, 7  ;;  %v4786_v6 = vshll.u32 %v4712_v13, 16  ;;  %v2859_v24 = vmul.f32 %v6194_v0, %v2822_v2 }
 0x4d4   : > { %v6118_v1 = vunpack.i.h.bf16 %v6116_v41  ;;  %v6117_v7 = vunpack.i.l.bf16 %v6116_v41  ;;  %v2895_v29 = vadd.f32 %v6195_v40, %v2858_v36  ;;  %v3035_v41 = vld [vmem:[#allocation3 + $0xf8] sm:$0xff]  ;;  %v3057_v36 = vld [vmem:[#allocation3 + $0x100] sm:$0x1] }
 0x4d5   : > { %4196 = vrot.lane.b32.xlu0 %v4142_v33, %s6269_s25  ;;  %v4175_v52 = vpop.permute.xlu1 %4174  ;;  %v4785_v58 = vrot.slane %v4783_v34, 7  ;;  %v4778_v34 = vor.u32 %v4776_v46, %v4775_v16 }
 0x4d6   : > { %v4641_v62 = vsel %vm4639_vm7, %v4576_v32, %v6117_v7  ;;  %v4645_v60 = vsel %vm4639_vm7, %v4580_v9, %v6118_v1  ;;  %v2896_v9 = vadd.f32 %v6195_v40, %v2859_v24  ;;  %v2927_v3 = vmax.f32 %v2895_v29, 0.0  ;;  %v3034_v24 = vld [vmem:[#allocation3 + $0xf0] sm:$0x80]  ;;  %v6196_v29 = vld [vmem:[#allocation3 + $0x38] sm:$0xff] }
 0x4d7   : > { %v4171_v38 = vpop.permute.xlu0 %4170  ;;  %v4710_v21 = vsel %vm4704_vm8, %v4645_v60, %v4175_v52  ;;  %4200 = vrot.lane.b32.xlu1 %v4145_v4, %s6269_s25  ;;  %v4788_v33 = vor.u32 %v4786_v6, %v4785_v58  ;;  %v3594_v32 = vshll.u32 %v3035_v41, 16  ;;  %v3597_v58 = vshrl.u32 %v3035_v41, 16 }
 0x4d8   : > { %v4706_v35 = vsel %vm4704_vm8, %v4641_v62, %v4171_v38  ;;  %v4780_v59 = vshrl.u32 %v4710_v21, 16  ;;  %v2928_v7 = vmax.f32 %v2896_v9, 0.0  ;;  %v6077_v40 = vunpack.i.l.bf16 %v8170_v17 }
 0x4d9   : > { %v4770_v48 = vshrl.u32 %v4706_v35, 16  ;;  %6145 = vrot.lane.b32.xlu0 %v6144_v14, %s6268_s13  ;;  %v8546_v45 = vpop.permute.xlu1 %3656  ;;  %v3056_v14 = vld [vmem:[#allocation3 + $0xe8] sm:$0x1] }
 0x4da   : > { %v4782_v63 = vrot.slane %v4780_v59, 7  ;;  %v2944_v52 = vpack.c.bf16 %v2928_v7, %v2927_v3  ;;  %v3747_v62 = vrot.slane %v3056_v14, 1  ;;  %v8579_v59 = vrot.slane %v3035_v41, 1  ;;  %v8591_v3 = vld [vmem:[#allocation3 + $0x110] sm:$0xff] }
 0x4db   : > { %v4772_v54 = vrot.slane %v4770_v48, 7  ;;  %v3653_v1 = vpop.permute.xlu0 %3652  ;;  %3500 = vrot.lane.b32.xlu1 %v8461_v39, %s6264_s7  ;;  %v3032_v39 = vld [vmem:[#allocation3 + $0xd8] sm:$0x80]  ;;  %v6078_v48 = vunpack.i.h.bf16 %v8170_v17 }
 0x4dc   : > { %v4789_v13 = vsel %vm4769_vm9, %v4782_v63, %v4788_v33  ;;  %2962 = vst.msk [vmem:[#allocation3 + $0x188] sm:$0xff] %vm2946_vm15, %v2944_v52  ;;  %v3748_v16 = vsel %vm3321_vm0, %v8496_v49, %v3747_v62  ;;  %v4248_v33 = vsel %vm2946_vm15, %v6196_v29, %v8199_v30  ;;  %v2974_v63 = vld [vmem:[#allocation3 + $0x48] sm:$0x80] }
 0x4dd   : > { %4194 = vrot.lane.b32.xlu0 %v8455_v23, %s6269_s25  ;;  %v4779_v4 = vsel %vm4769_vm9, %v4772_v54, %v4778_v34  ;;  %v8554_v19 = vpop.permute.xlu1 %6120  ;;  %v8562_v23 = vrot.slane %v3594_v32, 1  ;;  %v4326_v34 = vsel %vm4314_vm2, %v4248_v33, %v8290_v15  ;;  %v4251_v15 = vsel %vm2946_vm15, %v2974_v63, %v6078_v48  ;;  %v3105_v33 = vld [vmem:[#allocation3 + $0x100] sm:$0x1] }
 0x4de   : > { %5823 = vmatprep.mubr.msk.bf16.mxu0 %vm4945_vm10, %v4779_v4  ;;  %v4391_v30 = vsel %vm4379_vm3, %v4326_v34, %v8421_v61  ;;  %v3994_v4 = vshll.u32 %v8591_v3, 16  ;;  %v6123_v61 = vunpack.i.h.bf16 %v8554_v19 }
 0x4df   : > { %v3781_v42 = vpop.permute.xlu0 %3780  ;;  %5824 = vmatmul.mubr.msk.bf16.vlgmr.msra.gmra.mrb[0].mxu0 %vm4945_vm10, %v4789_v13  ;;  %3504 = vrot.lane.b32.xlu1 %v3035_v41, %s6264_s7  ;;  %v8570_v38 = vor.u32 %v3597_v58, %v8562_v23  ;;  %v6149_v35 = vpack.i.bf16 %v8562_v23, %v8470_v28  ;;  %v2972_v28 = vld [vmem:[#allocation3 + $0x30] sm:$0x80]  ;;  %v4456_v52 = vsel %vm4444_vm4, %v4391_v30, %v3653_v1 }
 0x4e0   : > { %v6197_v13 = vld [vmem:[#allocation3 + $0x50] sm:$0xff]  ;;  %v4246_v32 = vsel %vm2946_vm15, %v2972_v28, %v6077_v40 }
 0x4e1   : > { %4198 = vrot.lane.b32.xlu0 %v8496_v49, %s6269_s25  ;;  %v3877_v60 = vpop.permute.xlu1 %3876  ;;  %v4253_v17 = vsel %vm2946_vm15, %v6197_v13, %v8190_v12  ;;  %v4324_v58 = vsel %vm4314_vm2, %v4246_v32, %v8294_v22  ;;  %v3081_v30 = vld [vmem:[#allocation3 + $0xf0] sm:$0x80]  ;;  %v4147_v32 = vrot.slane %v3105_v33, 1 }
 0x4e2   : > { %v4330_v14 = vsel %vm4314_vm2, %v4253_v17, %v8301_v56  ;;  %v4328_v56 = vsel %vm4314_vm2, %v4251_v15, %v8305_v8  ;;  %v4389_v22 = vsel %vm4379_vm3, %v4324_v58, %v8423_v47 }
 0x4e3   : > { %v3785_v2 = vpop.permute.xlu0 %3784  ;;  %3498 = vrot.lane.b32.xlu1 %v3032_v39, %s6264_s7  ;;  %v4395_v12 = vsel %vm4379_vm3, %v4330_v14, %v8427_v55  ;;  %v4521_v39 = vsel %vm4509_vm5, %v4456_v52, %v3781_v42  ;;  %v4393_v8 = vsel %vm4379_vm3, %v4328_v56, %v8429_v51  ;;  %v8651_v14 = vrot.slane %v8591_v3, 1 }
 0x4e4   : > { %v4460_v1 = vsel %vm4444_vm4, %v4395_v12, %v8546_v45  ;;  %v4586_v55 = vsel %vm4574_vm6, %v4521_v39, %v3877_v60  ;;  %v3083_v39 = vld [vmem:[#allocation3 + $0x108] sm:$0x80] }
 0x4e5   : > { %3676 = vrot.lane.b32.xlu0 %v8490_v25, %s6265_s8  ;;  %v3881_v21 = vpop.permute.xlu1 %3880  ;;  %v3750_v25 = vrot.slane %v3057_v36, 1  ;;  %v4525_v42 = vsel %vm4509_vm5, %v4460_v1, %v3785_v2 }
 0x4e6   : > { %v4590_v45 = vsel %vm4574_vm6, %v4525_v42, %v3881_v21 }
 0x4e7   : > { %v8572_v0 = vpop.permute.xlu0 %3778  ;;  %3804 = vrot.lane.b32.xlu1 %v3748_v16, %s6266_s9  ;;  %v3751_v54 = vsel %vm3321_vm0, %v8579_v59, %v3750_v25 }
 0x4e9   : > { %3680 = vrot.lane.b32.xlu0 %v8570_v38, %s6265_s8  ;;  %v3783_v6 = vpop.permute.xlu1 %3782 }
 0x4eb   : > { %v4053_v46 = vpop.permute.xlu0 %4052  ;;  %6150 = vrot.lane.b32.xlu1 %v6149_v35, %s6265_s8  ;;  %v3997_v35 = vshrl.u32 %v8591_v3, 16 }
 0x4ec   : > { %v4651_v16 = vsel %vm4639_vm7, %v4586_v55, %v4053_v46  ;;  %v4148_v55 = vsel %vm3321_vm0, %v8579_v59, %v4147_v32 }
 0x4ed   : > { %3502 = vrot.lane.b32.xlu0 %v3034_v24, %s6264_s7  ;;  %v4057_v9 = vpop.permute.xlu1 %4056  ;;  %v4458_v24 = vsel %vm4444_vm4, %v4393_v8, %v6123_v61 }
 0x4ee   : > { %v4655_v25 = vsel %vm4639_vm7, %v4590_v45, %v4057_v9  ;;  %v4523_v48 = vsel %vm4509_vm5, %v4458_v24, %v3783_v6 }
 0x4ef   : > { %v3875_v7 = vpop.permute.xlu0 %3874  ;;  %3900 = vrot.lane.b32.xlu1 %v3035_v41, %s6267_s10  ;;  %v6122_v41 = vunpack.i.l.bf16 %v8554_v19  ;;  %v8619_v19 = vrot.slane %v3994_v4, 1 }
 0x4f1   : > { %3808 = vrot.lane.b32.xlu0 %v3751_v54, %s6266_s9  ;;  %v3879_v62 = vpop.permute.xlu1 %3878  ;;  %v4454_v2 = vsel %vm4444_vm4, %v4389_v22, %v6122_v41  ;;  %v8641_v28 = vor.u32 %v3997_v35, %v8619_v19  ;;  %v3106_v54 = vld [vmem:[#allocation3 + $0x118] sm:$0x1]  ;;  %v6154_v45 = vpack.i.bf16 %v8619_v19, %v8562_v23 }
 0x4f2   : > { %v4588_v21 = vsel %vm4574_vm6, %v4523_v48, %v3879_v62  ;;  %v4150_v61 = vrot.slane %v3106_v54, 1 }
 0x4f3   : > { %v4181_v36 = vpop.permute.xlu0 %4180  ;;  %3904 = vrot.lane.b32.xlu1 %v8591_v3, %s6267_s10 }
 0x4f4   : > { %v4716_v60 = vsel %vm4704_vm8, %v4651_v16, %v4181_v36  ;;  %v4151_v22 = vsel %vm3321_vm0, %v8651_v14, %v4150_v61 }
 0x4f5   : > { %3802 = vrot.lane.b32.xlu0 %v8496_v49, %s6266_s9  ;;  %v4185_v46 = vpop.permute.xlu1 %4184  ;;  %v4793_v40 = vshrl.u32 %v4716_v60, 16  ;;  %v4519_v49 = vsel %vm4509_vm5, %v4454_v2, %v8572_v0  ;;  %v4796_v41 = vshll.u32 %v4716_v60, 16 }
 0x4f6   : > { %v4720_v47 = vsel %vm4704_vm8, %v4655_v25, %v4185_v46  ;;  %v4584_v6 = vsel %vm4574_vm6, %v4519_v49, %v3875_v7  ;;  %v3039_v25 = vld [vmem:[#allocation3 + $0x128] sm:$0xff] }
 0x4f7   : > { %v6126_v51 = vpop.permute.xlu0 %6125  ;;  %v4803_v29 = vshrl.u32 %v4720_v47, 16  ;;  %3806 = vrot.lane.b32.xlu1 %v8579_v59, %s6266_s9  ;;  %v4795_v15 = vrot.slane %v4793_v40, 7  ;;  %v4806_v7 = vshll.u32 %v4720_v47, 16  ;;  %v3608_v48 = vshll.u32 %v3039_v25, 16  ;;  %v3058_v47 = vld [vmem:[#allocation3 + $0x118] sm:$0x1] }
 0x4f8   : > { %v6128_v63 = vunpack.i.h.bf16 %v6126_v51  ;;  %v6127_v9 = vunpack.i.l.bf16 %v6126_v51  ;;  %v3036_v51 = vld [vmem:[#allocation3 + $0x108] sm:$0x80]  ;;  %v3611_v33 = vshrl.u32 %v3039_v25, 16 }
 0x4f9   : > { %4076 = vrot.lane.b32.xlu0 %v8570_v38, %s6268_s13  ;;  %v4183_v34 = vpop.permute.xlu1 %4182  ;;  %v4805_v17 = vrot.slane %v4803_v29, 7  ;;  %v4798_v42 = vor.u32 %v4796_v41, %v4795_v15  ;;  %v8687_v29 = vrot.slane %v3608_v48, 1  ;;  %v8709_v15 = vrot.slane %v3039_v25, 1 }
 0x4fa   : > { %v4649_v13 = vsel %vm4639_vm7, %v4584_v6, %v6127_v9  ;;  %v4653_v4 = vsel %vm4639_vm7, %v4588_v21, %v6128_v63  ;;  %v3753_v21 = vrot.slane %v3058_v47, 1 }
 0x4fb   : > { %v4179_v0 = vpop.permute.xlu0 %4178  ;;  %v4718_v52 = vsel %vm4704_vm8, %v4653_v4, %v4183_v34  ;;  %4080 = vrot.lane.b32.xlu1 %v8641_v28, %s6268_s13  ;;  %v4808_v56 = vor.u32 %v4806_v7, %v4805_v17  ;;  %v3059_v34 = vld [vmem:[#allocation3 + $0x130] sm:$0x1]  ;;  %v6159_v54 = vpack.i.bf16 %v8687_v29, %v8619_v19  ;;  %v6198_v17 = vld [vmem:[#allocation3 + $0x68] sm:$0xff]  ;;  %v2976_v4 = vld [vmem:[#allocation3 + $0x60] sm:$0x80] }
 0x4fc   : > { %v4714_v38 = vsel %vm4704_vm8, %v4649_v13, %v4179_v0  ;;  %v4800_v12 = vshrl.u32 %v4718_v52, 16  ;;  %v6082_v13 = vunpack.i.l.bf16 %v8185_v11  ;;  %v3038_v0 = vld [vmem:[#allocation3 + $0x120] sm:$0x80]  ;;  %v3756_v52 = vrot.slane %v3059_v34, 1 }
 0x4fd   : > { %v4790_v62 = vshrl.u32 %v4714_v38, 16  ;;  %3898 = vrot.lane.b32.xlu0 %v3081_v30, %s6267_s10  ;;  %v3661_v58 = vpop.permute.xlu1 %3660  ;;  %v4258_v30 = vsel %vm2946_vm15, %v6198_v17, %v8197_v50  ;;  %v6199_v7 = vld [vmem:[#allocation3 + $0x80] sm:$0xff] }
 0x4fe   : > { %v4802_v1 = vrot.slane %v4800_v12, 7  ;;  %v4334_v32 = vsel %vm4314_vm2, %v4258_v30, %v8310_v18  ;;  %v4263_v12 = vsel %vm2946_vm15, %v6199_v7, %v8209_v53 }
 0x4ff   : > { %v4792_v16 = vrot.slane %v4790_v62, 7  ;;  %v8660_v36 = vpop.permute.xlu0 %3488  ;;  %3902 = vrot.lane.b32.xlu1 %v3083_v39, %s6267_s10  ;;  %v4399_v19 = vsel %vm4379_vm3, %v4334_v32, %v8433_v37  ;;  %v4256_v39 = vsel %vm2946_vm15, %v2976_v4, %v6082_v13  ;;  %v8721_v62 = vld [vmem:[#allocation3 + $0x140] sm:$0xff]  ;;  %v4338_v37 = vsel %vm4314_vm2, %v4263_v12, %v8318_v20  ;;  %v2978_v20 = vld [vmem:[#allocation3 + $0x78] sm:$0x80] }
 0x500   : > { %v4809_v35 = vsel %vm4769_vm9, %v4802_v1, %v4808_v56  ;;  %v4464_v50 = vsel %vm4444_vm4, %v4399_v19, %v3661_v58  ;;  %v3757_v56 = vsel %vm3321_vm0, %v8709_v15, %v3756_v52  ;;  %v4008_v53 = vshll.u32 %v8721_v62, 16  ;;  %v3085_v19 = vld [vmem:[#allocation3 + $0x120] sm:$0x80] }
 0x501   : > { %4204 = vrot.lane.b32.xlu0 %v4148_v55, %s6269_s25  ;;  %v4799_v8 = vsel %vm4769_vm9, %v4792_v16, %v4798_v42  ;;  %v3789_v60 = vpop.permute.xlu1 %3788  ;;  %v6083_v1 = vunpack.i.h.bf16 %v8185_v11  ;;  %v4332_v55 = vsel %vm4314_vm2, %v4256_v39, %v8312_v26  ;;  %v4403_v42 = vsel %vm4379_vm3, %v4338_v37, %v8660_v36 }
 0x502   : > { %5827 = vmatprep.mubr.msk.bf16.mxu0 %vm4945_vm10, %v4799_v8  ;;  %v4529_v18 = vsel %vm4509_vm5, %v4464_v50, %v3789_v60 }
 0x503   : > { %v8671_v2 = vpop.permute.xlu0 %3664  ;;  %5828 = vmatmul.mubr.msk.bf16.gmra.mrb[4].mxu0 %vm4945_vm10, %v4809_v35  ;;  %4208 = vrot.lane.b32.xlu1 %v4151_v22, %s6269_s25  ;;  %v4397_v22 = vsel %vm4379_vm3, %v4332_v55, %v8435_v5  ;;  %v4011_v5 = vshrl.u32 %v8721_v62, 16  ;;  %v4261_v48 = vsel %vm2946_vm15, %v2978_v20, %v6083_v1 }
 0x504   : > { %v4468_v8 = vsel %vm4444_vm4, %v4403_v42, %v8671_v2 }
 0x505   : > { %6155 = vrot.lane.b32.xlu0 %v6154_v45, %s6268_s13  ;;  %v8676_v24 = vpop.permute.xlu1 %6130 }
 0x506   : > { %v6132_v61 = vunpack.i.l.bf16 %v8676_v24  ;;  %v6133_v60 = vunpack.i.h.bf16 %v8676_v24 }
 0x507   : > { %v8678_v46 = vpop.permute.xlu0 %3486  ;;  %3508 = vrot.lane.b32.xlu1 %v8591_v3, %s6264_s7  ;;  %v8695_v3 = vor.u32 %v3611_v33, %v8687_v29 }
 0x508   : > { %v4462_v26 = vsel %vm4444_vm4, %v4397_v22, %v6132_v61  ;;  %v8783_v61 = vrot.slane %v8721_v62, 1 }
 0x509   : > { %4202 = vrot.lane.b32.xlu0 %v8579_v59, %s6269_s25  ;;  %v3885_v23 = vpop.permute.xlu1 %3884  ;;  %v3754_v59 = vsel %vm3321_vm0, %v8651_v14, %v3753_v21 }
 0x50a   : > { %v4594_v58 = vsel %vm4574_vm6, %v4529_v18, %v3885_v23  ;;  %v8746_v23 = vrot.slane %v4008_v53, 1 }
 0x50b   : > { %v3793_v40 = vpop.permute.xlu0 %3792  ;;  %3512 = vrot.lane.b32.xlu1 %v3039_v25, %s6264_s7 }
 0x50c   : > { %v4533_v45 = vsel %vm4509_vm5, %v4468_v8, %v3793_v40  ;;  %v4336_v40 = vsel %vm4314_vm2, %v4261_v48, %v8320_v31  ;;  %v8767_v31 = vor.u32 %v4011_v5, %v8746_v23  ;;  %v6164_v8 = vpack.i.bf16 %v8746_v23, %v8687_v29  ;;  %v3060_v5 = vld [vmem:[#allocation3 + $0x148] sm:$0x1] }
 0x50d   : > { %4206 = vrot.lane.b32.xlu0 %v8651_v14, %s6269_s25  ;;  %v3889_v49 = vpop.permute.xlu1 %3888 }
 0x50f   : > { %v3787_v63 = vpop.permute.xlu0 %3786  ;;  %3506 = vrot.lane.b32.xlu1 %v3036_v51, %s6264_s7 }
 0x510   : > { %v4527_v24 = vsel %vm4509_vm5, %v4462_v26, %v3787_v63 }
 0x511   : > { %3684 = vrot.lane.b32.xlu0 %v8641_v28, %s6265_s8  ;;  %v8697_v9 = vpop.permute.xlu1 %3790 }
 0x513   : > { %v4061_v6 = vpop.permute.xlu0 %4060  ;;  %3812 = vrot.lane.b32.xlu1 %v3754_v59, %s6266_s9 }
 0x514   : > { %v4659_v16 = vsel %vm4639_vm7, %v4594_v58, %v4061_v6 }
 0x515   : > { %3688 = vrot.lane.b32.xlu0 %v8695_v3, %s6265_s8  ;;  %v4065_v28 = vpop.permute.xlu1 %4064 }
 0x517   : > { %v3883_v38 = vpop.permute.xlu0 %3882  ;;  %6160 = vrot.lane.b32.xlu1 %v6159_v54, %s6265_s8 }
 0x518   : > { %v4592_v59 = vsel %vm4574_vm6, %v4527_v24, %v3883_v38 }
 0x519   : > { %3510 = vrot.lane.b32.xlu0 %v3038_v0, %s6264_s7  ;;  %v3887_v41 = vpop.permute.xlu1 %3886 }
 0x51b   : > { %v4189_v35 = vpop.permute.xlu0 %4188  ;;  %3908 = vrot.lane.b32.xlu1 %v3039_v25, %s6267_s10  ;;  %v4598_v25 = vsel %vm4574_vm6, %v4533_v45, %v3889_v49  ;;  %v4401_v49 = vsel %vm4379_vm3, %v4336_v40, %v8678_v46 }
 0x51c   : > { %v4724_v11 = vsel %vm4704_vm8, %v4659_v16, %v4189_v35  ;;  %v4663_v47 = vsel %vm4639_vm7, %v4598_v25, %v4065_v28  ;;  %v4466_v34 = vsel %vm4444_vm4, %v4401_v49, %v6133_v60 }
 0x51d   : > { %3816 = vrot.lane.b32.xlu0 %v3757_v56, %s6266_s9  ;;  %v4193_v36 = vpop.permute.xlu1 %4192  ;;  %v4813_v2 = vshrl.u32 %v4724_v11, 16  ;;  %v4531_v63 = vsel %vm4509_vm5, %v4466_v34, %v8697_v9  ;;  %v4816_v32 = vshll.u32 %v4724_v11, 16  ;;  %v3108_v9 = vld [vmem:[#allocation3 + $0x148] sm:$0x1] }
 0x51e   : > { %v4728_v33 = vsel %vm4704_vm8, %v4663_v47, %v4193_v36  ;;  %v4596_v28 = vsel %vm4574_vm6, %v4531_v63, %v3887_v41  ;;  %v4156_v37 = vrot.slane %v3108_v9, 1  ;;  %v3043_v36 = vld [vmem:[#allocation3 + $0x158] sm:$0xff]  ;;  %v3759_v47 = vrot.slane %v3060_v5, 1 }
 0x51f   : > { %v6136_v51 = vpop.permute.xlu0 %6135  ;;  %3912 = vrot.lane.b32.xlu1 %v8721_v62, %s6267_s10  ;;  %v4815_v13 = vrot.slane %v4813_v2, 7  ;;  %v4823_v30 = vshrl.u32 %v4728_v33, 16  ;;  %v4826_v58 = vshll.u32 %v4728_v33, 16  ;;  %v3622_v25 = vshll.u32 %v3043_v36, 16  ;;  %v3040_v2 = vld [vmem:[#allocation3 + $0x138] sm:$0x80] }
 0x520   : > { %v6137_v21 = vunpack.i.l.bf16 %v6136_v51  ;;  %v6138_v17 = vunpack.i.h.bf16 %v6136_v51  ;;  %v4157_v20 = vsel %vm3321_vm0, %v8783_v61, %v4156_v37  ;;  %v3625_v40 = vshrl.u32 %v3043_v36, 16  ;;  %v6200_v63 = vld [vmem:[#allocation3 + $0x98] sm:$0xff] }
 0x521   : > { %3810 = vrot.lane.b32.xlu0 %v8651_v14, %s6266_s9  ;;  %v8762_v6 = vpop.permute.xlu1 %3492  ;;  %v3107_v14 = vld [vmem:[#allocation3 + $0x130] sm:$0x1]  ;;  %v4818_v50 = vor.u32 %v4816_v32, %v4815_v13  ;;  %v4825_v12 = vrot.slane %v4823_v30, 7  ;;  %v8816_v51 = vrot.slane %v3622_v25, 1  ;;  %v4268_v13 = vsel %vm2946_vm15, %v6200_v63, %v8220_v44 }
 0x522   : > { %v4657_v54 = vsel %vm4639_vm7, %v4592_v59, %v6137_v21  ;;  %v4153_v38 = vrot.slane %v3107_v14, 1  ;;  %v4661_v18 = vsel %vm4639_vm7, %v4596_v28, %v6138_v17  ;;  %v3061_v59 = vld [vmem:[#allocation3 + $0x160] sm:$0x1]  ;;  %v2980_v17 = vld [vmem:[#allocation3 + $0x90] sm:$0x80]  ;;  %v8838_v30 = vrot.slane %v3043_v36, 1 }
 0x523   : > { %v4187_v46 = vpop.permute.xlu0 %4186  ;;  %3814 = vrot.lane.b32.xlu1 %v8709_v15, %s6266_s9  ;;  %v4828_v42 = vor.u32 %v4826_v58, %v4825_v12  ;;  %v6169_v34 = vpack.i.bf16 %v8816_v51, %v8746_v23  ;;  %v3042_v14 = vld [vmem:[#allocation3 + $0x150] sm:$0x80]  ;;  %v3762_v28 = vrot.slane %v3061_v59, 1 }
 0x524   : > { %v4722_v4 = vsel %vm4704_vm8, %v4657_v54, %v4187_v46  ;;  %v4154_v55 = vsel %vm3321_vm0, %v8709_v15, %v4153_v38  ;;  %v6087_v54 = vunpack.i.l.bf16 %v8178_v10  ;;  %v4342_v46 = vsel %vm4314_vm2, %v4268_v13, %v8326_v43  ;;  %v6201_v32 = vld [vmem:[#allocation3 + $0xb0] sm:$0xff] }
 0x525   : > { %v4810_v0 = vshrl.u32 %v4722_v4, 16  ;;  %4084 = vrot.lane.b32.xlu0 %v8695_v3, %s6268_s13  ;;  %v8777_v52 = vpop.permute.xlu1 %3496  ;;  %v3087_v3 = vld [vmem:[#allocation3 + $0x138] sm:$0x80]  ;;  %v4407_v23 = vsel %vm4379_vm3, %v4342_v46, %v8762_v6  ;;  %v3763_v12 = vsel %vm3321_vm0, %v8838_v30, %v3762_v28  ;;  %v3089_v46 = vld [vmem:[#allocation3 + $0x150] sm:$0x80] }
 0x526   : > { %v4266_v9 = vsel %vm2946_vm15, %v2980_v17, %v6087_v54 }
 0x527   : > { %v4812_v7 = vrot.slane %v4810_v0, 7  ;;  %v4191_v39 = vpop.permute.xlu0 %4190  ;;  %4088 = vrot.lane.b32.xlu1 %v8767_v31, %s6268_s13  ;;  %v4273_v0 = vsel %vm2946_vm15, %v6201_v32, %v8205_v57 }
 0x528   : > { %v4726_v41 = vsel %vm4704_vm8, %v4661_v18, %v4191_v39  ;;  %v4346_v6 = vsel %vm4314_vm2, %v4273_v0, %v8333_v27  ;;  %v6088_v39 = vunpack.i.h.bf16 %v8178_v10  ;;  %v9686_v18 = vld [vmem:[#allocation47_spill] sm:$0xff]  ;;  %v2982_v27 = vld [vmem:[#allocation3 + $0xa8] sm:$0x80] }
 0x529   : > { %v4820_v56 = vshrl.u32 %v4726_v41, 16  ;;  %3906 = vrot.lane.b32.xlu0 %v3085_v19, %s6267_s10  ;;  %v4819_v53 = vsel %vm4769_vm9, %v4812_v7, %v4818_v50  ;;  %v8788_v1 = vpop.permute.xlu1 %3490  ;;  %v8850_v50 = vld [vmem:[#allocation3 + $0x170] sm:$0xff]  ;;  %v4340_v41 = vsel %vm4314_vm2, %v4266_v9, %v9686_v18 }
 0x52a   : > { %5831 = vmatprep.mubr.msk.bf16.mxu0 %vm4945_vm10, %v4819_v53  ;;  %v4022_v57 = vshll.u32 %v8850_v50, 16  ;;  %v4405_v53 = vsel %vm4379_vm3, %v4340_v41, %v8788_v1  ;;  %v8912_v0 = vrot.slane %v8850_v50, 1 }
 0x52b   : > { %v4822_v16 = vrot.slane %v4820_v56, 7  ;;  %v3669_v35 = vpop.permute.xlu0 %3668  ;;  %3910 = vrot.lane.b32.xlu1 %v3087_v3, %s6267_s10  ;;  %v4411_v3 = vsel %vm4379_vm3, %v4346_v6, %v8777_v52 }
 0x52c   : > { %v4472_v44 = vsel %vm4444_vm4, %v4407_v23, %v3669_v35 }
 0x52d   : > { %4212 = vrot.lane.b32.xlu0 %v4154_v55, %s6269_s25  ;;  %v4829_v22 = vsel %vm4769_vm9, %v4822_v16, %v4828_v42  ;;  %v3797_v11 = vpop.permute.xlu1 %3796 }
 0x52e   : > { %5832 = vmatmul.mubr.msk.bf16.gmra.mrb[8].mxu0 %vm4945_vm10, %v4829_v22  ;;  %v4537_v43 = vsel %vm4509_vm5, %v4472_v44, %v3797_v11  ;;  %v4025_v22 = vshrl.u32 %v8850_v50, 16 }
 0x52f   : > { %v8801_v45 = vpop.permute.xlu0 %3672  ;;  %4216 = vrot.lane.b32.xlu1 %v4157_v20, %s6269_s25  ;;  %v8875_v20 = vrot.slane %v4022_v57, 1 }
 0x530   : > { %v4476_v56 = vsel %vm4444_vm4, %v4411_v3, %v8801_v45 }
 0x531   : > { %6165 = vrot.lane.b32.xlu0 %v6164_v8, %s6268_s13  ;;  %v8805_v26 = vpop.permute.xlu1 %6140  ;;  %v4271_v8 = vsel %vm2946_vm15, %v2982_v27, %v6088_v39 }
 0x532   : > { %v6142_v19 = vunpack.i.l.bf16 %v8805_v26  ;;  %v6143_v16 = vunpack.i.h.bf16 %v8805_v26 }
 0x533   : > { %v8807_v60 = vpop.permute.xlu0 %3494  ;;  %3516 = vrot.lane.b32.xlu1 %v8721_v62, %s6264_s7  ;;  %v8824_v62 = vor.u32 %v3625_v40, %v8816_v51 }
 0x534   : > { %v4470_v42 = vsel %vm4444_vm4, %v4405_v53, %v6142_v19  ;;  %v3047_v53 = vld [vmem:[#allocation3 + $0x188] sm:$0xff] }
 0x535   : > { %4210 = vrot.lane.b32.xlu0 %v8709_v15, %s6269_s25  ;;  %v3893_v29 = vpop.permute.xlu1 %3892  ;;  %v3760_v15 = vsel %vm3321_vm0, %v8783_v61, %v3759_v47 }
 0x536   : > { %v4602_v7 = vsel %vm4574_vm6, %v4537_v43, %v3893_v29 }
 0x537   : > { %v3801_v48 = vpop.permute.xlu0 %3800  ;;  %3520 = vrot.lane.b32.xlu1 %v3043_v36, %s6264_s7 }
 0x538   : > { %v4541_v55 = vsel %vm4509_vm5, %v4476_v56, %v3801_v48 }
 0x539   : > { %4214 = vrot.lane.b32.xlu0 %v8783_v61, %s6269_s25  ;;  %v3897_v24 = vpop.permute.xlu1 %3896 }
 0x53a   : > { %v4606_v35 = vsel %vm4574_vm6, %v4541_v55, %v3897_v24  ;;  %v3636_v55 = vshll.u32 %v3047_v53, 16 }
 0x53b   : > { %v3795_v21 = vpop.permute.xlu0 %3794  ;;  %3514 = vrot.lane.b32.xlu1 %v3040_v2, %s6264_s7 }
 0x53c   : > { %v4535_v26 = vsel %vm4509_vm5, %v4470_v42, %v3795_v21  ;;  %v3062_v42 = vld [vmem:[#allocation3 + $0x178] sm:$0x1] }
 0x53d   : > { %3692 = vrot.lane.b32.xlu0 %v8767_v31, %s6265_s8  ;;  %v8826_v33 = vpop.permute.xlu1 %3798 }
 0x53f   : > { %v4069_v49 = vpop.permute.xlu0 %4068  ;;  %3820 = vrot.lane.b32.xlu1 %v3760_v15, %s6266_s9  ;;  %v8896_v15 = vor.u32 %v4025_v22, %v8875_v20  ;;  %v8945_v22 = vrot.slane %v3636_v55, 1 }
 0x540   : > { %v4667_v37 = vsel %vm4639_vm7, %v4602_v7, %v4069_v49 }
 0x541   : > { %3696 = vrot.lane.b32.xlu0 %v8824_v62, %s6265_s8  ;;  %v4073_v31 = vpop.permute.xlu1 %4072 }
 0x542   : > { %v4671_v11 = vsel %vm4639_vm7, %v4606_v35, %v4073_v31  ;;  %v3765_v35 = vrot.slane %v3062_v42, 1 }
 0x543   : > { %v3891_v4 = vpop.permute.xlu0 %3890  ;;  %6170 = vrot.lane.b32.xlu1 %v6169_v34, %s6265_s8 }
 0x544   : > { %v4600_v2 = vsel %vm4574_vm6, %v4535_v26, %v3891_v4  ;;  %v6179_v26 = vpack.i.bf16 %v8945_v22, %v8875_v20 }
 0x545   : > { %3518 = vrot.lane.b32.xlu0 %v3042_v14, %s6264_s7  ;;  %v3895_v38 = vpop.permute.xlu1 %3894 }
 0x547   : > { %v4197_v58 = vpop.permute.xlu0 %4196  ;;  %3916 = vrot.lane.b32.xlu1 %v3043_v36, %s6267_s10  ;;  %v9687_v36 = vld [vmem:[#allocation48_spill] sm:$0xff] }
 0x548   : > { %v4732_v10 = vsel %vm4704_vm8, %v4667_v37, %v4197_v58  ;;  %v4344_v29 = vsel %vm4314_vm2, %v4271_v8, %v9687_v36  ;;  %v6174_v37 = vpack.i.bf16 %v8875_v20, %v8816_v51  ;;  %v3639_v8 = vshrl.u32 %v3047_v53, 16 }
 0x549   : > { %3824 = vrot.lane.b32.xlu0 %v3763_v12, %s6266_s9  ;;  %v4201_v52 = vpop.permute.xlu1 %4200  ;;  %v4833_v1 = vshrl.u32 %v4732_v10, 16  ;;  %v4409_v48 = vsel %vm4379_vm3, %v4344_v29, %v8807_v60  ;;  %v4836_v13 = vshll.u32 %v4732_v10, 16  ;;  %v3063_v29 = vld [vmem:[#allocation3 + $0x190] sm:$0x1] }
 0x54a   : > { %v4736_v5 = vsel %vm4704_vm8, %v4671_v11, %v4201_v52  ;;  %v4474_v40 = vsel %vm4444_vm4, %v4409_v48, %v6143_v16  ;;  %v3044_v16 = vld [vmem:[#allocation3 + $0x168] sm:$0x80] }
 0x54b   : > { %v6146_v45 = vpop.permute.xlu0 %6145  ;;  %3920 = vrot.lane.b32.xlu1 %v8850_v50, %s6267_s10  ;;  %v4539_v21 = vsel %vm4509_vm5, %v4474_v40, %v8826_v33  ;;  %v4835_v49 = vrot.slane %v4833_v1, 7  ;;  %v4843_v34 = vshrl.u32 %v4736_v5, 16  ;;  %v3110_v33 = vld [vmem:[#allocation3 + $0x178] sm:$0x1]  ;;  %v4846_v19 = vshll.u32 %v4736_v5, 16  ;;  %v6202_v48 = vld [vmem:[#allocation3 + $0xc8] sm:$0xff] }
 0x54c   : > { %v6147_v25 = vunpack.i.l.bf16 %v6146_v45  ;;  %v6148_v59 = vunpack.i.h.bf16 %v6146_v45  ;;  %v4604_v54 = vsel %vm4574_vm6, %v4539_v21, %v3895_v38  ;;  %v4162_v43 = vrot.slane %v3110_v33, 1  ;;  %v9690_v21 = vld [vmem:[#allocation49_spill] sm:$0xff] }
 0x54d   : > { %3818 = vrot.lane.b32.xlu0 %v8783_v61, %s6266_s9  ;;  %v8891_v47 = vpop.permute.xlu1 %3500  ;;  %v3109_v61 = vld [vmem:[#allocation3 + $0x160] sm:$0x1]  ;;  %v4838_v28 = vor.u32 %v4836_v13, %v4835_v49  ;;  %v4845_v4 = vrot.slane %v4843_v34, 7  ;;  %v3768_v34 = vrot.slane %v3063_v29, 1  ;;  %v9691_v13 = vld [vmem:[#allocation38_spill] sm:$0xff] }
 0x54e   : > { %v4665_v24 = vsel %vm4639_vm7, %v4600_v2, %v6147_v25  ;;  %v4159_v14 = vrot.slane %v3109_v61, 1  ;;  %v4669_v32 = vsel %vm4639_vm7, %v4604_v54, %v6148_v59  ;;  %v4163_v41 = vsel %vm3321_vm0, %v8912_v0, %v4162_v43  ;;  %v9688_v25 = vld [vmem:[#allocation35_spill] sm:$0xff]  ;;  %v9689_v2 = vld [vmem:[#allocation36_spill] sm:$0xff]  ;;  %v9693_v43 = vld [vmem:[#allocation50_spill] sm:$0xff] }
 0x54f   : > { %v4195_v60 = vpop.permute.xlu0 %4194  ;;  %3822 = vrot.lane.b32.xlu1 %v8838_v30, %s6266_s9  ;;  %v4848_v57 = vor.u32 %v4846_v19, %v4845_v4  ;;  %v6092_v5 = vunpack.i.l.bf16 %v9688_v25  ;;  %v4278_v40 = vsel %vm2946_vm15, %v6202_v48, %v9689_v2  ;;  %v8967_v59 = vrot.slane %v3047_v53, 1 }
 0x550   : > { %v4730_v63 = vsel %vm4704_vm8, %v4665_v24, %v4195_v60  ;;  %v4160_v12 = vsel %vm3321_vm0, %v8838_v30, %v4159_v14  ;;  %v4350_v49 = vsel %vm4314_vm2, %v4278_v40, %v9690_v21  ;;  %v3046_v60 = vld [vmem:[#allocation3 + $0x180] sm:$0x80] }
 0x551   : > { %v4830_v31 = vshrl.u32 %v4730_v63, 16  ;;  %4092 = vrot.lane.b32.xlu0 %v8824_v62, %s6268_s13  ;;  %v8906_v17 = vpop.permute.xlu1 %3504  ;;  %v3091_v62 = vld [vmem:[#allocation3 + $0x168] sm:$0x80]  ;;  %v4415_v20 = vsel %vm4379_vm3, %v4350_v49, %v8891_v47  ;;  %v6203_v63 = vld [vmem:[#allocation3 + $0xe0] sm:$0xff]  ;;  %v9692_v47 = vld [vmem:[#allocation51_spill] sm:$0xff] }
 0x553   : > { %v4832_v23 = vrot.slane %v4830_v31, 7  ;;  %v4199_v44 = vpop.permute.xlu0 %4198  ;;  %4096 = vrot.lane.b32.xlu1 %v8896_v15, %s6268_s13  ;;  %v4283_v31 = vsel %vm2946_vm15, %v6203_v63, %v9691_v13 }
 0x554   : > { %v4734_v9 = vsel %vm4704_vm8, %v4669_v32, %v4199_v44  ;;  %v4354_v4 = vsel %vm4314_vm2, %v4283_v31, %v9692_v47  ;;  %v3769_v32 = vsel %vm3321_vm0, %v8967_v59, %v3768_v34  ;;  %v3093_v34 = vld [vmem:[#allocation3 + $0x180] sm:$0x80] }
 0x555   : > { %v4840_v38 = vshrl.u32 %v4734_v9, 16  ;;  %3914 = vrot.lane.b32.xlu0 %v3089_v46, %s6267_s10  ;;  %v4839_v6 = vsel %vm4769_vm9, %v4832_v23, %v4838_v28  ;;  %v8917_v7 = vpop.permute.xlu1 %3498  ;;  %v8979_v23 = vld [vmem:[#allocation3 + $0x1a0] sm:$0xff] }
 0x556   : > { %5835 = vmatprep.mubr.msk.bf16.mxu0 %vm4945_vm10, %v4839_v6  ;;  %v4036_v9 = vshll.u32 %v8979_v23, 16 }
 0x557   : > { %v4842_v39 = vrot.slane %v4840_v38, 7  ;;  %v3677_v18 = vpop.permute.xlu0 %3676  ;;  %3918 = vrot.lane.b32.xlu1 %v3091_v62, %s6267_s10  ;;  %v6093_v62 = vunpack.i.h.bf16 %v9688_v25  ;;  %v4419_v38 = vsel %vm4379_vm3, %v4354_v4, %v8906_v17 }
 0x558   : > { %v4480_v54 = vsel %vm4444_vm4, %v4415_v20, %v3677_v18 }
 0x559   : > { %4220 = vrot.lane.b32.xlu0 %v4160_v12, %s6269_s25  ;;  %v4849_v3 = vsel %vm4769_vm9, %v4842_v39, %v4848_v57  ;;  %v3805_v58 = vpop.permute.xlu1 %3804  ;;  %v2986_v57 = vld [vmem:[#allocation3 + $0xd8] sm:$0x80] }
 0x55a   : > { %5836 = vmatmul.mubr.msk.bf16.gmra.mrb[12].mxu0 %vm4945_vm10, %v4849_v3  ;;  %v4545_v46 = vsel %vm4509_vm5, %v4480_v54, %v3805_v58  ;;  %v4281_v55 = vsel %vm2946_vm15, %v2986_v57, %v6093_v62 }
 0x55b   : > { %v8930_v27 = vpop.permute.xlu0 %3680  ;;  %4224 = vrot.lane.b32.xlu1 %v4163_v41, %s6269_s25 }
 0x55c   : > { %v4484_v39 = vsel %vm4444_vm4, %v4419_v38, %v8930_v27  ;;  %v4039_v27 = vshrl.u32 %v8979_v23, 16 }
 0x55d   : > { %6175 = vrot.lane.b32.xlu0 %v6174_v37, %s6268_s13  ;;  %v8934_v56 = vpop.permute.xlu1 %6150 }
 0x55e   : > { %v6152_v14 = vunpack.i.l.bf16 %v8934_v56  ;;  %v6153_v58 = vunpack.i.h.bf16 %v8934_v56 }
 0x55f   : > { %v8936_v10 = vpop.permute.xlu0 %3502  ;;  %3524 = vrot.lane.b32.xlu1 %v8850_v50, %s6264_s7  ;;  %v8953_v50 = vor.u32 %v3639_v8, %v8945_v22 }
 0x561   : > { %4218 = vrot.lane.b32.xlu0 %v8838_v30, %s6269_s25  ;;  %v3901_v51 = vpop.permute.xlu1 %3900  ;;  %v3766_v30 = vsel %vm3321_vm0, %v8912_v0, %v3765_v35 }
 0x562   : > { %v4610_v44 = vsel %vm4574_vm6, %v4545_v46, %v3901_v51  ;;  %v9004_v51 = vrot.slane %v4036_v9, 1 }
 0x563   : > { %v3809_v52 = vpop.permute.xlu0 %3808  ;;  %3528 = vrot.lane.b32.xlu1 %v3047_v53, %s6264_s7 }
 0x564   : > { %v4549_v3 = vsel %vm4509_vm5, %v4484_v39, %v3809_v52  ;;  %v9694_v52 = vld [vmem:[#allocation52_spill] sm:$0xff]  ;;  %v6184_v38 = vpack.i.bf16 %v9004_v51, %v8945_v22 }
 0x565   : > { %4222 = vrot.lane.b32.xlu0 %v8912_v0, %s6269_s25  ;;  %v3905_v1 = vpop.permute.xlu1 %3904  ;;  %v4352_v35 = vsel %vm4314_vm2, %v4281_v55, %v9694_v52  ;;  %v9696_v55 = vld [vmem:[#allocation37_spill] sm:$0xff]  ;;  %v2988_v52 = vld [vmem:[#allocation3 + $0xf0] sm:$0x80] }
 0x567   : > { %v3803_v11 = vpop.permute.xlu0 %3802  ;;  %3522 = vrot.lane.b32.xlu1 %v3044_v16, %s6264_s7 }
 0x569   : > { %3700 = vrot.lane.b32.xlu0 %v8896_v15, %s6265_s8  ;;  %v8955_v45 = vpop.permute.xlu1 %3806  ;;  %v2984_v15 = vld [vmem:[#allocation3 + $0xc0] sm:$0x80] }
 0x56a   : > { %v4276_v33 = vsel %vm2946_vm15, %v2984_v15, %v6092_v5  ;;  %v4041_v5 = vor.u32 %v4039_v27, %v9004_v51 }
 0x56b   : > { %v4077_v36 = vpop.permute.xlu0 %4076  ;;  %3828 = vrot.lane.b32.xlu1 %v3766_v30, %s6266_s9  ;;  %v4348_v19 = vsel %vm4314_vm2, %v4276_v33, %v9693_v43  ;;  %v4417_v30 = vsel %vm4379_vm3, %v4352_v35, %v8936_v10  ;;  %v4167_v33 = vrot.slane %v8979_v23, 1 }
 0x56c   : > { %v4675_v6 = vsel %vm4639_vm7, %v4610_v44, %v4077_v36  ;;  %v4413_v18 = vsel %vm4379_vm3, %v4348_v19, %v8917_v7 }
 0x56d   : > { %3704 = vrot.lane.b32.xlu0 %v8953_v50, %s6265_s8  ;;  %v4081_v24 = vpop.permute.xlu1 %4080  ;;  %v4478_v37 = vsel %vm4444_vm4, %v4413_v18, %v6152_v14  ;;  %v3095_v14 = vld [vmem:[#allocation3 + $0x198] sm:$0x80] }
 0x56e   : > { %v4543_v56 = vsel %vm4509_vm5, %v4478_v37, %v3803_v11 }
 0x56f   : > { %v3899_v61 = vpop.permute.xlu0 %3898  ;;  %6180 = vrot.lane.b32.xlu1 %v6179_v26, %s6265_s8  ;;  %v4482_v26 = vsel %vm4444_vm4, %v4417_v30, %v6153_v58  ;;  %v6204_v58 = vld [vmem:[#allocation3 + $0xf8] sm:$0xff] }
 0x570   : > { %v4608_v36 = vsel %vm4574_vm6, %v4543_v56, %v3899_v61  ;;  %v4547_v11 = vsel %vm4509_vm5, %v4482_v26, %v8955_v45  ;;  %v3112_v45 = vld [vmem:[#allocation3 + $0x1a8] sm:$0x1] }
 0x571   : > { %3526 = vrot.lane.b32.xlu0 %v3046_v60, %s6264_s7  ;;  %v3903_v28 = vpop.permute.xlu1 %3902 }
 0x573   : > { %v4205_v12 = vpop.permute.xlu0 %4204  ;;  %3924 = vrot.lane.b32.xlu1 %v3047_v53, %s6267_s10  ;;  %v4614_v53 = vsel %vm4574_vm6, %v4549_v3, %v3905_v1 }
 0x574   : > { %v4740_v41 = vsel %vm4704_vm8, %v4675_v6, %v4205_v12  ;;  %v4679_v42 = vsel %vm4639_vm7, %v4614_v53, %v4081_v24  ;;  %v3111_v24 = vld [vmem:[#allocation3 + $0x190] sm:$0x1]  ;;  %v9695_v53 = vld [vmem:[#allocation40_spill] sm:$0xff] }
 0x575   : > { %3832 = vrot.lane.b32.xlu0 %v3769_v32, %s6266_s9  ;;  %v4209_v17 = vpop.permute.xlu1 %4208  ;;  %v4853_v7 = vshrl.u32 %v4740_v41, 16  ;;  %v4856_v21 = vshll.u32 %v4740_v41, 16  ;;  %v4165_v20 = vrot.slane %v3111_v24, 1  ;;  %v4288_v51 = vsel %vm2946_vm15, %v6204_v58, %v9695_v53 }
 0x576   : > { %v4744_v1 = vsel %vm4704_vm8, %v4679_v42, %v4209_v17  ;;  %v9697_v42 = vld [vmem:[#allocation53_spill] sm:$0xff] }
 0x577   : > { %v6156_v16 = vpop.permute.xlu0 %6155  ;;  %3928 = vrot.lane.b32.xlu1 %v8979_v23, %s6267_s10  ;;  %v4855_v48 = vrot.slane %v4853_v7, 7  ;;  %v4863_v10 = vshrl.u32 %v4744_v1, 16  ;;  %v4166_v32 = vsel %vm3321_vm0, %v8967_v59, %v4165_v20  ;;  %v6097_v7 = vunpack.i.l.bf16 %v9696_v55 }
 0x578   : > { %v6157_v8 = vunpack.i.l.bf16 %v6156_v16  ;;  %v6158_v2 = vunpack.i.h.bf16 %v6156_v16  ;;  %v4358_v16 = vsel %vm4314_vm2, %v4288_v51, %v9697_v42 }
 0x579   : > { %3826 = vrot.lane.b32.xlu0 %v8912_v0, %s6266_s9  ;;  %v9020_v29 = vpop.permute.xlu1 %3508  ;;  %v4612_v0 = vsel %vm4574_vm6, %v4547_v11, %v3903_v28  ;;  %v4858_v61 = vor.u32 %v4856_v21, %v4855_v48  ;;  %v4865_v63 = vrot.slane %v4863_v10, 7  ;;  %v4168_v28 = vrot.slane %v3112_v45, 1  ;;  %v9699_v11 = vld [vmem:[#allocation55_spill] sm:$0xff]  ;;  %v2990_v21 = vld [vmem:[#allocation3 + $0x108] sm:$0x80] }
 0x57a   : > { %v4673_v25 = vsel %vm4639_vm7, %v4608_v36, %v6157_v8  ;;  %v4677_v31 = vsel %vm4639_vm7, %v4612_v0, %v6158_v2  ;;  %v6205_v8 = vld [vmem:[#allocation3 + $0x110] sm:$0xff] }
 0x57b   : > { %v4203_v40 = vpop.permute.xlu0 %4202  ;;  %3830 = vrot.lane.b32.xlu1 %v8967_v59, %s6266_s9  ;;  %v4169_v23 = vsel %vm3321_vm0, %v4167_v33, %v4168_v28 }
 0x57c   : > { %v4738_v15 = vsel %vm4704_vm8, %v4673_v25, %v4203_v40  ;;  %v9700_v40 = vld [vmem:[#allocation54_spill] sm:$0xff] }
 0x57d   : > { %v4850_v49 = vshrl.u32 %v4738_v15, 16  ;;  %4100 = vrot.lane.b32.xlu0 %v8953_v50, %s6268_s13  ;;  %v9033_v60 = vpop.permute.xlu1 %3512  ;;  %v4866_v50 = vshll.u32 %v4744_v1, 16  ;;  %v9698_v1 = vld [vmem:[#allocation39_spill] sm:$0xff] }
 0x57e   : > { %v4293_v30 = vsel %vm2946_vm15, %v6205_v8, %v9698_v1 }
 0x57f   : > { %v4852_v54 = vrot.slane %v4850_v49, 7  ;;  %v4207_v13 = vpop.permute.xlu0 %4206  ;;  %4104 = vrot.lane.b32.xlu1 %v4041_v5, %s6268_s13  ;;  %v4868_v9 = vor.u32 %v4866_v50, %v4865_v63  ;;  %v4286_v5 = vsel %vm2946_vm15, %v2988_v52, %v6097_v7  ;;  %v4362_v48 = vsel %vm4314_vm2, %v4293_v30, %v9699_v11 }
 0x580   : > { %v4742_v46 = vsel %vm4704_vm8, %v4677_v31, %v4207_v13  ;;  %v4356_v10 = vsel %vm4314_vm2, %v4286_v5, %v9700_v40  ;;  %v4427_v24 = vsel %vm4379_vm3, %v4362_v48, %v9033_v60 }
 0x581   : > { %v4860_v47 = vshrl.u32 %v4742_v46, 16  ;;  %3922 = vrot.lane.b32.xlu0 %v3093_v34, %s6267_s10  ;;  %v4859_v4 = vsel %vm4769_vm9, %v4852_v54, %v4858_v61  ;;  %v3507_v44 = vpop.permute.xlu1 %3506 }
 0x582   : > { %5839 = vmatprep.mubr.msk.bf16.mxu1 %vm4945_vm10, %v4859_v4  ;;  %v4421_v45 = vsel %vm4379_vm3, %v4356_v10, %v3507_v44 }
 0x583   : > { %v4862_v62 = vrot.slane %v4860_v47, 7  ;;  %v3685_v43 = vpop.permute.xlu0 %3684  ;;  %3926 = vrot.lane.b32.xlu1 %v3095_v14, %s6267_s10  ;;  %v9701_v14 = vld [vmem:[#allocation56_spill] sm:$0xff] }
 0x585   : > { %4228 = vrot.lane.b32.xlu0 %v4166_v32, %s6269_s25  ;;  %v4869_v19 = vsel %vm4769_vm9, %v4862_v62, %v4868_v9  ;;  %v3813_v6 = vpop.permute.xlu1 %3812 }
 0x586   : > { %5840 = vmatmul.mubr.msk.bf16.vlgmr.msra.gmra.mrb[0].mxu1 %vm4945_vm10, %v4869_v19 }
 0x587   : > { %v3689_v12 = vpop.permute.xlu0 %3688  ;;  %4232 = vrot.lane.b32.xlu1 %v4169_v23, %s6269_s25 }
 0x588   : > { %v4492_v49 = vsel %vm4444_vm4, %v4427_v24, %v3689_v12 }
 0x589   : > { %6185 = vrot.lane.b32.xlu0 %v6184_v38, %s6268_s13  ;;  %v6161_v57 = vpop.permute.xlu1 %6160 }
 0x58a   : > { %v6162_v26 = vunpack.i.l.bf16 %v6161_v57  ;;  %v6163_v63 = vunpack.i.h.bf16 %v6161_v57 }
 0x58b   : > { %v3511_v39 = vpop.permute.xlu0 %3510  ;;  %4230 = vrot.lane.b32.xlu1 %v4167_v33, %s6269_s25 }
 0x58c   : > { %v4486_v61 = vsel %vm4444_vm4, %v4421_v45, %v6162_v26 }
 0x58d   : > { %4226 = vrot.lane.b32.xlu0 %v8967_v59, %s6269_s25  ;;  %v3909_v18 = vpop.permute.xlu1 %3908  ;;  %v4423_v59 = vsel %vm4379_vm3, %v4358_v16, %v9020_v29  ;;  %v6098_v29 = vunpack.i.h.bf16 %v9696_v55 }
 0x58e   : > { %v4488_v56 = vsel %vm4444_vm4, %v4423_v59, %v3685_v43 }
 0x58f   : > { %v3817_v41 = vpop.permute.xlu0 %3816  ;;  %v4553_v36 = vsel %vm4509_vm5, %v4488_v56, %v3813_v6  ;;  %v4291_v60 = vsel %vm2946_vm15, %v2990_v21, %v6098_v29 }
 0x590   : > { %v4618_v2 = vsel %vm4574_vm6, %v4553_v36, %v3909_v18  ;;  %v4557_v20 = vsel %vm4509_vm5, %v4492_v49, %v3817_v41  ;;  %v4360_v28 = vsel %vm4314_vm2, %v4291_v60, %v9701_v14 }
 0x591   : > { %v3913_v3 = vpop.permute.xlu1 %3912  ;;  %v4425_v44 = vsel %vm4379_vm3, %v4360_v28, %v3511_v39 }
 0x592   : > { %v4622_v13 = vsel %vm4574_vm6, %v4557_v20, %v3913_v3  ;;  %v4490_v62 = vsel %vm4444_vm4, %v4425_v44, %v6163_v63 }
 0x593   : > { %v3811_v37 = vpop.permute.xlu0 %3810 }
 0x594   : > { %v4551_v50 = vsel %vm4509_vm5, %v4486_v61, %v3811_v37 }
 0x595   : > { %v3815_v22 = vpop.permute.xlu1 %3814 }
 0x596   : > { %v4555_v23 = vsel %vm4509_vm5, %v4490_v62, %v3815_v22 }
 0x597   : > { %v4085_v17 = vpop.permute.xlu0 %4084 }
 0x598   : > { %v4683_v0 = vsel %vm4639_vm7, %v4618_v2, %v4085_v17 }
 0x599   : > { %v4089_v27 = vpop.permute.xlu1 %4088 }
 0x59a   : > { %v4687_v33 = vsel %vm4639_vm7, %v4622_v13, %v4089_v27 }
 0x59b   : > { %v3907_v35 = vpop.permute.xlu0 %3906 }
 0x59c   : > { %v4616_v32 = vsel %vm4574_vm6, %v4551_v50, %v3907_v35  ;;  %v6206_v50 = vld [vmem:[#allocation3 + $0x128] sm:$0xff] }
 0x59d   : > { %v3911_v25 = vpop.permute.xlu1 %3910 }
 0x59e   : > { %v4620_v57 = vsel %vm4574_vm6, %v4555_v23, %v3911_v25 }
 0x59f   : > { %v4213_v15 = vpop.permute.xlu0 %4212 }
 0x5a0   : > { %v4748_v34 = vsel %vm4704_vm8, %v4683_v0, %v4213_v15 }
 0x5a1   : > { %v4217_v54 = vpop.permute.xlu1 %4216  ;;  %v4873_v31 = vshrl.u32 %v4748_v34, 16  ;;  %v4876_v39 = vshll.u32 %v4748_v34, 16 }
 0x5a2   : > { %v4752_v4 = vsel %vm4704_vm8, %v4687_v33, %v4217_v54 }
 0x5a3   : > { %v6166_v46 = vpop.permute.xlu0 %6165  ;;  %v4875_v19 = vrot.slane %v4873_v31, 7  ;;  %v4883_v12 = vshrl.u32 %v4752_v4, 16  ;;  %v4886_v27 = vshll.u32 %v4752_v4, 16 }
 0x5a4   : > { %v6167_v47 = vunpack.i.l.bf16 %v6166_v46  ;;  %v6168_v38 = vunpack.i.h.bf16 %v6166_v46 }
 0x5a5   : > { %v9091_v9 = vpop.permute.xlu1 %3516  ;;  %v4878_v37 = vor.u32 %v4876_v39, %v4875_v19  ;;  %v4885_v58 = vrot.slane %v4883_v12, 7  ;;  %v2992_v19 = vld [vmem:[#allocation3 + $0x120] sm:$0x80] }
 0x5a6   : > { %v4681_v43 = vsel %vm4639_vm7, %v4616_v32, %v6167_v47  ;;  %v4685_v51 = vsel %vm4639_vm7, %v4620_v57, %v6168_v38  ;;  %v9702_v47 = vld [vmem:[#allocation41_spill] sm:$0xff]  ;;  %v9703_v32 = vld [vmem:[#allocation42_spill] sm:$0xff]  ;;  %v6207_v12 = vld [vmem:[#allocation3 + $0x140] sm:$0xff] }
 0x5a7   : > { %v4211_v6 = vpop.permute.xlu0 %4210  ;;  %v4888_v16 = vor.u32 %v4886_v27, %v4885_v58  ;;  %v4298_v4 = vsel %vm2946_vm15, %v6206_v50, %v9702_v47  ;;  %v6102_v62 = vunpack.i.l.bf16 %v9703_v32  ;;  %v9705_v57 = vld [vmem:[#allocation44_spill] sm:$0xff]  ;;  %v6103_v27 = vunpack.i.h.bf16 %v9703_v32 }
 0x5a8   : > { %v4746_v18 = vsel %vm4704_vm8, %v4681_v43, %v4211_v6  ;;  %v9704_v43 = vld [vmem:[#allocation57_spill] sm:$0xff] }
 0x5a9   : > { %v4870_v41 = vshrl.u32 %v4746_v18, 16  ;;  %v9098_v3 = vpop.permute.xlu1 %3520  ;;  %v4366_v23 = vsel %vm4314_vm2, %v4298_v4, %v9704_v43  ;;  %v4303_v18 = vsel %vm2946_vm15, %v6207_v12, %v9705_v57 }
 0x5aa   : > { %v4431_v38 = vsel %vm4379_vm3, %v4366_v23, %v9091_v9 }
 0x5ab   : > { %v4872_v17 = vrot.slane %v4870_v41, 7  ;;  %v4215_v53 = vpop.permute.xlu0 %4214  ;;  %v9706_v41 = vld [vmem:[#allocation59_spill] sm:$0xff] }
 0x5ac   : > { %v4750_v22 = vsel %vm4704_vm8, %v4685_v51, %v4215_v53  ;;  %v4296_v51 = vsel %vm2946_vm15, %v2992_v19, %v6102_v62 }
 0x5ad   : > { %v4880_v55 = vshrl.u32 %v4750_v22, 16  ;;  %v4879_v7 = vsel %vm4769_vm9, %v4872_v17, %v4878_v37  ;;  %v9103_v42 = vpop.permute.xlu1 %3514  ;;  %v4370_v37 = vsel %vm4314_vm2, %v4303_v18, %v9706_v41 }
 0x5ae   : > { %5843 = vmatprep.mubr.msk.bf16.mxu1 %vm4945_vm10, %v4879_v7  ;;  %v4435_v9 = vsel %vm4379_vm3, %v4370_v37, %v9098_v3 }
 0x5af   : > { %v4882_v52 = vrot.slane %v4880_v55, 7  ;;  %v3693_v59 = vpop.permute.xlu0 %3692  ;;  %v9707_v55 = vld [vmem:[#allocation58_spill] sm:$0xff] }
 0x5b0   : > { %v4496_v39 = vsel %vm4444_vm4, %v4431_v38, %v3693_v59  ;;  %v4364_v7 = vsel %vm4314_vm2, %v4296_v51, %v9707_v55 }
 0x5b1   : > { %v4889_v35 = vsel %vm4769_vm9, %v4882_v52, %v4888_v16  ;;  %v3821_v56 = vpop.permute.xlu1 %3820 }
 0x5b2   : > { %5844 = vmatmul.mubr.msk.bf16.gmra.mrb[4].mxu1 %vm4945_vm10, %v4889_v35  ;;  %v5825_v8 = vpop.f32.mrb[0].mxu0  ;;  %v4561_v17 = vsel %vm4509_vm5, %v4496_v39, %v3821_v56  ;;  %v2994_v35 = vld [vmem:[#allocation3 + $0x138] sm:$0x80]  ;;  %v4429_v56 = vsel %vm4379_vm3, %v4364_v7, %v9103_v42  ;;  %v9708_v42 = vld [vmem:[#allocation60_spill] sm:$0xff] }
 0x5b3   : > { %v3697_v1 = vpop.permute.xlu0 %3696  ;;  %5163 = vst.msk [vmem:[%s9110_s30 + $0x10] sm:$0xff] %vm2946_vm15, %v5825_v8  ;;  %v5032_v30 = vpop.f32.mrb[1].mxu0  ;;  %v5269_v11 = vmul.f32 %v5825_v8, %v5825_v8  ;;  %v5197_v24 = vsel %vm2946_vm15, %v5825_v8, 0.0 }
 0x5b4   : > { %5161 = vst.msk [vmem:[%s9110_s30] sm:$0xff] %vm2946_vm15, %v5032_v30  ;;  %v5267_v36 = vmul.f32 %v5032_v30, %v5032_v30  ;;  %v5826_v26 = vpop.f32.mrb[2].mxu0  ;;  %v5194_v48 = vsel %vm2946_vm15, %v5032_v30, 0.0  ;;  %v4500_v16 = vsel %vm4444_vm4, %v4435_v9, %v3697_v1 }
 0x5b5   : > { %5164 = vst.msk [vmem:[%s9110_s30 + $0x18] sm:$0xff] %vm2946_vm15, %v5826_v26  ;;  %v5035_v25 = vpop.f32.mrb[3].mxu0  ;;  %v9120_v5 = vpop.permute.xlu1 %6170  ;;  %v5270_v15 = vmul.f32 %v5826_v26, %v5826_v26  ;;  %v5302_v20 = vsel %vm2946_vm15, %v5269_v11, 0.0  ;;  %v5199_v61 = vsel %vm2946_vm15, %v5826_v26, 0.0  ;;  %v4301_v11 = vsel %vm2946_vm15, %v2994_v35, %v6103_v27 }
 0x5b6   : > { %5162 = vst.msk [vmem:[%s9110_s30 + $0x8] sm:$0xff] %vm2946_vm15, %v5035_v25  ;;  %v5195_v2 = vsel %vm2946_vm15, %v5035_v25, 0.0  ;;  %v5268_v29 = vmul.f32 %v5035_v25, %v5035_v25  ;;  %v5299_v0 = vsel %vm2946_vm15, %v5267_v36, 0.0  ;;  %v6172_v58 = vunpack.i.l.bf16 %v9120_v5 }
 0x5b7   : > { %v3519_v40 = vpop.permute.xlu0 %3518  ;;  %v5196_v10 = vadd.f32 %v5195_v2, %v5194_v48  ;;  %v5304_v60 = vsel %vm2946_vm15, %v5270_v15, 0.0  ;;  %v6173_v25 = vunpack.i.h.bf16 %v9120_v5 }
 0x5b8   : > { %v5300_v21 = vsel %vm2946_vm15, %v5268_v29, 0.0  ;;  %v4494_v30 = vsel %vm4444_vm4, %v4429_v56, %v6172_v58 }
 0x5b9   : > { %v5198_v49 = vadd.f32 %v5197_v24, %v5196_v10  ;;  %v5301_v45 = vadd.f32 %v5300_v21, %v5299_v0  ;;  %v3917_v34 = vpop.permute.xlu1 %3916  ;;  %v4368_v10 = vsel %vm4314_vm2, %v4301_v11, %v9708_v42 }
 0x5ba   : > { %v4626_v22 = vsel %vm4574_vm6, %v4561_v17, %v3917_v34  ;;  %v4433_v15 = vsel %vm4379_vm3, %v4368_v10, %v3519_v40 }
 0x5bb   : > { %v5303_v54 = vadd.f32 %v5302_v20, %v5301_v45  ;;  %v3825_v63 = vpop.permute.xlu0 %3824  ;;  %v9131_v13 = vadd.f32 %v5199_v61, %v5198_v49  ;;  %v4498_v5 = vsel %vm4444_vm4, %v4433_v15, %v6173_v25  ;;  %v9709_v15 = vld [vmem:[#allocation46_spill] sm:$0xff] }
 0x5bc   : > { %v4565_v8 = vsel %vm4509_vm5, %v4500_v16, %v3825_v63 }
 0x5bd   : > { %v3921_v31 = vpop.permute.xlu1 %3920  ;;  %v9134_v33 = vadd.f32 %v5304_v60, %v5303_v54 }
 0x5be   : > { %v4630_v36 = vsel %vm4574_vm6, %v4565_v8, %v3921_v31 }
 0x5bf   : > { %v3819_v46 = vpop.permute.xlu0 %3818 }
 0x5c0   : > { %v4559_v24 = vsel %vm4509_vm5, %v4494_v30, %v3819_v46 }
 0x5c1   : > { %v3823_v14 = vpop.permute.xlu1 %3822 }
 0x5c2   : > { %v4563_v20 = vsel %vm4509_vm5, %v4498_v5, %v3823_v14 }
 0x5c3   : > { %v4093_v28 = vpop.permute.xlu0 %4092 }
 0x5c4   : > { %v4691_v52 = vsel %vm4639_vm7, %v4626_v22, %v4093_v28 }
 0x5c5   : > { %v4097_v44 = vpop.permute.xlu1 %4096 }
 0x5c6   : > { %v4695_v1 = vsel %vm4639_vm7, %v4630_v36, %v4097_v44 }
 0x5c7   : > { %v3915_v6 = vpop.permute.xlu0 %3914 }
 0x5c8   : > { %v4624_v21 = vsel %vm4574_vm6, %v4559_v24, %v3915_v6 }
 0x5c9   : > { %v3919_v53 = vpop.permute.xlu1 %3918 }
 0x5ca   : > { %v4628_v60 = vsel %vm4574_vm6, %v4563_v20, %v3919_v53 }
 0x5cb   : > { %v4221_v59 = vpop.permute.xlu0 %4220 }
 0x5cc   : > { %v4756_v3 = vsel %vm4704_vm8, %v4691_v52, %v4221_v59 }
 0x5cd   : > { %v4225_v26 = vpop.permute.xlu1 %4224  ;;  %v4893_v48 = vshrl.u32 %v4756_v3, 16  ;;  %v4896_v31 = vshll.u32 %v4756_v3, 16 }
 0x5ce   : > { %v4760_v29 = vsel %vm4704_vm8, %v4695_v1, %v4225_v26 }
 0x5cf   : > { %v6176_v2 = vpop.permute.xlu0 %6175  ;;  %v4903_v34 = vshrl.u32 %v4760_v29, 16  ;;  %v4895_v61 = vrot.slane %v4893_v48, 7  ;;  %v4906_v43 = vshll.u32 %v4760_v29, 16 }
 0x5d0   : > { %v6177_v0 = vunpack.i.l.bf16 %v6176_v2  ;;  %v6178_v54 = vunpack.i.h.bf16 %v6176_v2 }
 0x5d1   : > { %v9174_v49 = vpop.permute.xlu1 %3524  ;;  %v4905_v50 = vrot.slane %v4903_v34, 7  ;;  %v4898_v4 = vor.u32 %v4896_v31, %v4895_v61  ;;  %v9711_v61 = vld [vmem:[#allocation61_spill] sm:$0xff]  ;;  %v2996_v31 = vld [vmem:[#allocation3 + $0x150] sm:$0x80] }
 0x5d2   : > { %v4689_v45 = vsel %vm4639_vm7, %v4624_v21, %v6177_v0  ;;  %v4693_v14 = vsel %vm4639_vm7, %v4628_v60, %v6178_v54  ;;  %v6208_v0 = vld [vmem:[#allocation3 + $0x158] sm:$0xff]  ;;  %v9712_v60 = vld [vmem:[#allocation45_spill] sm:$0xff] }
 0x5d3   : > { %v4219_v63 = vpop.permute.xlu0 %4218  ;;  %v4908_v37 = vor.u32 %v4906_v43, %v4905_v50  ;;  %v4308_v21 = vsel %vm2946_vm15, %v6208_v0, %v9709_v15 }
 0x5d4   : > { %v4754_v40 = vsel %vm4704_vm8, %v4689_v45, %v4219_v63  ;;  %v9710_v45 = vld [vmem:[#allocation43_spill] sm:$0xff]  ;;  %v4374_v54 = vsel %vm4314_vm2, %v4308_v21, %v9711_v61  ;;  %v6209_v63 = vld [vmem:[#allocation3 + $0x170] sm:$0xff] }
 0x5d5   : > { %v4890_v46 = vshrl.u32 %v4754_v40, 16  ;;  %v9181_v28 = vpop.permute.xlu1 %3528  ;;  %v6108_v34 = vunpack.i.h.bf16 %v9710_v45  ;;  %v6107_v20 = vunpack.i.l.bf16 %v9710_v45  ;;  %v4313_v40 = vsel %vm2946_vm15, %v6209_v63, %v9712_v60 }
 0x5d6   : > { %v5829_v47 = vpop.f32.mrb[4].mxu0  ;;  %v4439_v50 = vsel %vm4379_vm3, %v4374_v54, %v9174_v49 }
 0x5d7   : > { %v4892_v44 = vrot.slane %v4890_v46, 7  ;;  %v4223_v32 = vpop.permute.xlu0 %4222  ;;  %5167 = vst.msk [vmem:[%s9110_s30 + $0x30] sm:$0xff] %vm2946_vm15, %v5829_v47  ;;  %v5048_v62 = vpop.f32.mrb[5].mxu0  ;;  %v5273_v17 = vmul.f32 %v5829_v47, %v5829_v47  ;;  %v5205_v55 = vsel %vm2946_vm15, %v5829_v47, 0.0  ;;  %v2998_v46 = vld [vmem:[#allocation3 + $0x168] sm:$0x80] }
 0x5d8   : > { %v4758_v23 = vsel %vm4704_vm8, %v4693_v14, %v4223_v32  ;;  %5165 = vst.msk [vmem:[%s9110_s30 + $0x20] sm:$0xff] %vm2946_vm15, %v5048_v62  ;;  %v5201_v19 = vsel %vm2946_vm15, %v5048_v62, 0.0  ;;  %v5271_v38 = vmul.f32 %v5048_v62, %v5048_v62  ;;  %v5830_v6 = vpop.f32.mrb[6].mxu0 }
 0x5d9   : > { %v4900_v12 = vshrl.u32 %v4758_v23, 16  ;;  %v5202_v57 = vadd.f32 %v5201_v19, %v9131_v13  ;;  %v4899_v18 = vsel %vm4769_vm9, %v4892_v44, %v4898_v4  ;;  %5168 = vst.msk [vmem:[%s9110_s30 + $0x38] sm:$0xff] %vm2946_vm15, %v5830_v6  ;;  %v5051_v39 = vpop.f32.mrb[7].mxu0  ;;  %v9194_v41 = vpop.permute.xlu1 %3522  ;;  %v5274_v7 = vmul.f32 %v5830_v6, %v5830_v6  ;;  %v9713_v4 = vld [vmem:[#allocation63_spill] sm:$0xff] }
 0x5da   : > { %v5306_v58 = vsel %vm2946_vm15, %v5271_v38, 0.0  ;;  %5847 = vmatprep.mubr.msk.bf16.mxu1 %vm4945_vm10, %v4899_v18  ;;  %5166 = vst.msk [vmem:[%s9110_s30 + $0x28] sm:$0xff] %vm2946_vm15, %v5051_v39  ;;  %v5203_v53 = vsel %vm2946_vm15, %v5051_v39, 0.0  ;;  %v5272_v27 = vmul.f32 %v5051_v39, %v5051_v39  ;;  %v5207_v56 = vsel %vm2946_vm15, %v5830_v6, 0.0  ;;  %v9715_v39 = vld [vmem:[#allocation64_spill] sm:$0xff] }
 0x5db   : > { %v4902_v51 = vrot.slane %v4900_v12, 7  ;;  %v5307_v13 = vadd.f32 %v5306_v58, %v9134_v33  ;;  %v3701_v9 = vpop.permute.xlu0 %3700  ;;  %v5204_v22 = vadd.f32 %v5203_v53, %v5202_v57  ;;  %v5310_v3 = vsel %vm2946_vm15, %v5273_v17, 0.0  ;;  %v9714_v57 = vld [vmem:[#allocation62_spill] sm:$0xff] }
 0x5dc   : > { %v5308_v52 = vsel %vm2946_vm15, %v5272_v27, 0.0  ;;  %v5312_v26 = vsel %vm2946_vm15, %v5274_v7, 0.0  ;;  %v4378_v44 = vsel %vm4314_vm2, %v4313_v40, %v9713_v4  ;;  %v4504_v32 = vsel %vm4444_vm4, %v4439_v50, %v3701_v9 }
 0x5dd   : > { %v5206_v16 = vadd.f32 %v5205_v55, %v5204_v22  ;;  %v4909_v59 = vsel %vm4769_vm9, %v4902_v51, %v4908_v37  ;;  %v3829_v35 = vpop.permute.xlu1 %3828  ;;  %v5309_v8 = vadd.f32 %v5308_v52, %v5307_v13  ;;  %v4443_v14 = vsel %vm4379_vm3, %v4378_v44, %v9181_v28 }
 0x5de   : > { %5848 = vmatmul.mubr.msk.bf16.gmra.mrb[8].mxu1 %vm4945_vm10, %v4909_v59  ;;  %v4569_v62 = vsel %vm4509_vm5, %v4504_v32, %v3829_v35  ;;  %v4306_v38 = vsel %vm2946_vm15, %v2996_v31, %v6107_v20  ;;  %v4311_v6 = vsel %vm2946_vm15, %v2998_v46, %v6108_v34 }
 0x5df   : > { %v3705_v33 = vpop.permute.xlu0 %3704  ;;  %v9208_v30 = vadd.f32 %v5207_v56, %v5206_v16  ;;  %v5311_v36 = vadd.f32 %v5310_v3, %v5309_v8  ;;  %v4372_v18 = vsel %vm4314_vm2, %v4306_v38, %v9714_v57  ;;  %v4376_v37 = vsel %vm4314_vm2, %v4311_v6, %v9715_v39 }
 0x5e0   : > { %v4508_v49 = vsel %vm4444_vm4, %v4443_v14, %v3705_v33  ;;  %v4437_v53 = vsel %vm4379_vm3, %v4372_v18, %v9194_v41 }
 0x5e1   : > { %v6181_v25 = vpop.permute.xlu1 %6180  ;;  %v9211_v1 = vadd.f32 %v5312_v26, %v5311_v36 }
 0x5e2   : > { %v6183_v43 = vunpack.i.h.bf16 %v6181_v25  ;;  %v6182_v23 = vunpack.i.l.bf16 %v6181_v25 }
 0x5e3   : > { %v3527_v11 = vpop.permute.xlu0 %3526 }
 0x5e4   : > { %v4441_v51 = vsel %vm4379_vm3, %v4376_v37, %v3527_v11  ;;  %v4502_v22 = vsel %vm4444_vm4, %v4437_v53, %v6182_v23 }
 0x5e5   : > { %v3925_v48 = vpop.permute.xlu1 %3924  ;;  %v4506_v27 = vsel %vm4444_vm4, %v4441_v51, %v6183_v43 }
 0x5e6   : > { %v4634_v12 = vsel %vm4574_vm6, %v4569_v62, %v3925_v48 }
 0x5e7   : > { %v3833_v2 = vpop.permute.xlu0 %3832 }
 0x5e8   : > { %v4573_v28 = vsel %vm4509_vm5, %v4508_v49, %v3833_v2 }
 0x5e9   : > { %v3929_v29 = vpop.permute.xlu1 %3928 }
 0x5ea   : > { %v4638_v13 = vsel %vm4574_vm6, %v4573_v28, %v3929_v29 }
 0x5eb   : > { %v3827_v42 = vpop.permute.xlu0 %3826 }
 0x5ec   : > { %v4567_v56 = vsel %vm4509_vm5, %v4502_v22, %v3827_v42 }
 0x5ed   : > { %v3831_v10 = vpop.permute.xlu1 %3830 }
 0x5ee   : > { %v4571_v16 = vsel %vm4509_vm5, %v4506_v27, %v3831_v10 }
 0x5ef   : > { %v4101_v24 = vpop.permute.xlu0 %4100 }
 0x5f0   : > { %v4699_v17 = vsel %vm4639_vm7, %v4634_v12, %v4101_v24 }
 0x5f1   : > { %v4105_v5 = vpop.permute.xlu1 %4104 }
 0x5f2   : > { %v4703_v55 = vsel %vm4639_vm7, %v4638_v13, %v4105_v5 }
 0x5f3   : > { %v3923_v47 = vpop.permute.xlu0 %3922 }
 0x5f4   : > { %v4632_v36 = vsel %vm4574_vm6, %v4567_v56, %v3923_v47 }
 0x5f5   : > { %v3927_v19 = vpop.permute.xlu1 %3926 }
 0x5f6   : > { %v4636_v41 = vsel %vm4574_vm6, %v4571_v16, %v3927_v19 }
 0x5f7   : > { %v4229_v58 = vpop.permute.xlu0 %4228 }
 0x5f8   : > { %v4764_v9 = vsel %vm4704_vm8, %v4699_v17, %v4229_v58 }
 0x5f9   : > { %v4233_v7 = vpop.permute.xlu1 %4232  ;;  %v4913_v59 = vshrl.u32 %v4764_v9, 16  ;;  %v4916_v0 = vshll.u32 %v4764_v9, 16 }
 0x5fa   : > { %v4768_v52 = vsel %vm4704_vm8, %v4703_v55, %v4233_v7 }
 0x5fb   : > { %v6186_v35 = vpop.permute.xlu0 %6185  ;;  %v4923_v33 = vshrl.u32 %v4768_v52, 16  ;;  %v4915_v48 = vrot.slane %v4913_v59, 7  ;;  %v4926_v5 = vshll.u32 %v4768_v52, 16 }
 0x5fc   : > { %v6188_v8 = vunpack.i.h.bf16 %v6186_v35  ;;  %v6187_v3 = vunpack.i.l.bf16 %v6186_v35 }
 0x5fd   : > { %v4231_v26 = vpop.permute.xlu1 %4230  ;;  %v4925_v24 = vrot.slane %v4923_v33, 7  ;;  %v4918_v20 = vor.u32 %v4916_v0, %v4915_v48 }
 0x5fe   : > { %v4697_v25 = vsel %vm4639_vm7, %v4632_v36, %v6187_v3  ;;  %v4701_v11 = vsel %vm4639_vm7, %v4636_v41, %v6188_v8 }
 0x5ff   : > { %v4227_v2 = vpop.permute.xlu0 %4226  ;;  %v4766_v29 = vsel %vm4704_vm8, %v4701_v11, %v4231_v26  ;;  %v4928_v40 = vor.u32 %v4926_v5, %v4925_v24 }
 0x600   : > { %v4762_v10 = vsel %vm4704_vm8, %v4697_v25, %v4227_v2  ;;  %v4920_v42 = vshrl.u32 %v4766_v29, 16 }
 0x601   : > { %v4910_v15 = vshrl.u32 %v4762_v10, 16  ;;  %v5833_v21 = vpop.f32.mrb[8].mxu0 }
 0x602   : > { %5171 = vst.msk [vmem:[%s9110_s30 + $0x50] sm:$0xff] %vm2946_vm15, %v5833_v21  ;;  %v5064_v45 = vpop.f32.mrb[9].mxu0  ;;  %v4922_v34 = vrot.slane %v4920_v42, 7  ;;  %v5277_v31 = vmul.f32 %v5833_v21, %v5833_v21  ;;  %v5213_v43 = vsel %vm2946_vm15, %v5833_v21, 0.0 }
 0x603   : > { %v4912_v61 = vrot.slane %v4910_v15, 7  ;;  %5169 = vst.msk [vmem:[%s9110_s30 + $0x40] sm:$0xff] %vm2946_vm15, %v5064_v45  ;;  %v5209_v54 = vsel %vm2946_vm15, %v5064_v45, 0.0  ;;  %v5275_v63 = vmul.f32 %v5064_v45, %v5064_v45  ;;  %v5834_v60 = vpop.f32.mrb[10].mxu0 }
 0x604   : > { %v5210_v46 = vadd.f32 %v5209_v54, %v9208_v30  ;;  %5172 = vst.msk [vmem:[%s9110_s30 + $0x58] sm:$0xff] %vm2946_vm15, %v5834_v60  ;;  %v5067_v50 = vpop.f32.mrb[11].mxu0  ;;  %v4929_v30 = vsel %vm4769_vm9, %v4922_v34, %v4928_v40  ;;  %v5278_v23 = vmul.f32 %v5834_v60, %v5834_v60  ;;  %v5318_v49 = vsel %vm2946_vm15, %v5277_v31, 0.0 }
 0x605   : > { %v5314_v47 = vsel %vm2946_vm15, %v5275_v63, 0.0  ;;  %5170 = vst.msk [vmem:[%s9110_s30 + $0x48] sm:$0xff] %vm2946_vm15, %v5067_v50  ;;  %v5211_v4 = vsel %vm2946_vm15, %v5067_v50, 0.0  ;;  %v5276_v44 = vmul.f32 %v5067_v50, %v5067_v50  ;;  %v4919_v32 = vsel %vm4769_vm9, %v4912_v61, %v4918_v20 }
 0x606   : > { %v5315_v14 = vadd.f32 %v5314_v47, %v9211_v1  ;;  %v5212_v62 = vadd.f32 %v5211_v4, %v5210_v46  ;;  %5851 = vmatprep.mubr.msk.bf16.mxu1 %vm4945_vm10, %v4919_v32  ;;  %v5215_v1 = vsel %vm2946_vm15, %v5834_v60, 0.0  ;;  %v5320_v18 = vsel %vm2946_vm15, %v5278_v23, 0.0 }
 0x607   : > { %v5316_v19 = vsel %vm2946_vm15, %v5276_v44, 0.0  ;;  %5852 = vmatmul.mubr.msk.bf16.gmra.mrb[12].mxu1 %vm4945_vm10, %v4929_v30 }
 0x608   : > { %v5214_v38 = vadd.f32 %v5213_v43, %v5212_v62  ;;  %v5317_v6 = vadd.f32 %v5316_v19, %v5315_v14 }
 0x60a   : > { %v5319_v12 = vadd.f32 %v5318_v49, %v5317_v6  ;;  %v5216_v57 = vadd.f32 %v5215_v1, %v5214_v38 }
 0x60c   : > { %v5321_v39 = vadd.f32 %v5320_v18, %v5319_v12 }
 0x62d   : > { %v5837_v37 = vpop.f32.mrb[12].mxu0 }
 0x62e   : > { %5175 = vst.msk [vmem:[%s9110_s30 + $0x70] sm:$0xff] %vm2946_vm15, %v5837_v37  ;;  %v5080_v28 = vpop.f32.mrb[13].mxu0  ;;  %v5281_v9 = vmul.f32 %v5837_v37, %v5837_v37  ;;  %v5221_v52 = vsel %vm2946_vm15, %v5837_v37, 0.0 }
 0x62f   : > { %5173 = vst.msk [vmem:[%s9110_s30 + $0x60] sm:$0xff] %vm2946_vm15, %v5080_v28  ;;  %v5217_v17 = vsel %vm2946_vm15, %v5080_v28, 0.0  ;;  %v5279_v58 = vmul.f32 %v5080_v28, %v5080_v28  ;;  %v5838_v53 = vpop.f32.mrb[14].mxu0 }
 0x630   : > { %v5218_v51 = vadd.f32 %v5217_v17, %v5216_v57  ;;  %5176 = vst.msk [vmem:[%s9110_s30 + $0x78] sm:$0xff] %vm2946_vm15, %v5838_v53  ;;  %v5083_v13 = vpop.f32.mrb[15].mxu0  ;;  %v5282_v59 = vmul.f32 %v5838_v53, %v5838_v53  ;;  %v5326_v8 = vsel %vm2946_vm15, %v5281_v9, 0.0  ;;  %v5223_v3 = vsel %vm2946_vm15, %v5838_v53, 0.0 }
 0x631   : > { %v5322_v22 = vsel %vm2946_vm15, %v5279_v58, 0.0  ;;  %5174 = vst.msk [vmem:[%s9110_s30 + $0x68] sm:$0xff] %vm2946_vm15, %v5083_v13  ;;  %v5219_v27 = vsel %vm2946_vm15, %v5083_v13, 0.0  ;;  %v5280_v55 = vmul.f32 %v5083_v13, %v5083_v13 }
 0x632   : > { %v5323_v7 = vadd.f32 %v5322_v22, %v5321_v39  ;;  %v5220_v16 = vadd.f32 %v5219_v27, %v5218_v51  ;;  %v5328_v26 = vsel %vm2946_vm15, %v5282_v59, 0.0 }
 0x633   : > { %v5324_v35 = vsel %vm2946_vm15, %v5280_v55, 0.0 }
 0x634   : > { %v5222_v41 = vadd.f32 %v5221_v52, %v5220_v16  ;;  %v5325_v56 = vadd.f32 %v5324_v35, %v5323_v7 }
 0x636   : > { %v5327_v33 = vadd.f32 %v5326_v8, %v5325_v56  ;;  %v5224_v36 = vadd.f32 %v5223_v3, %v5222_v41 }
 0x638   : > { %v5329_v25 = vadd.f32 %v5328_v26, %v5327_v33 }
 0x659   : > { %v5841_v11 = vpop.f32.mrb[0].mxu1 }
 0x65a   : > { %5179 = vst.msk [vmem:[%s9110_s30 + $0x90] sm:$0xff] %vm2946_vm15, %v5841_v11  ;;  %v5096_v48 = vpop.f32.mrb[1].mxu1  ;;  %v5285_v0 = vmul.f32 %v5841_v11, %v5841_v11  ;;  %v5229_v20 = vsel %vm2946_vm15, %v5841_v11, 0.0 }
 0x65b   : > { %5177 = vst.msk [vmem:[%s9110_s30 + $0x80] sm:$0xff] %vm2946_vm15, %v5096_v48  ;;  %v5225_v2 = vsel %vm2946_vm15, %v5096_v48, 0.0  ;;  %v5283_v29 = vmul.f32 %v5096_v48, %v5096_v48  ;;  %v5842_v10 = vpop.f32.mrb[2].mxu1 }
 0x65c   : > { %v5226_v24 = vadd.f32 %v5225_v2, %v5224_v36  ;;  %5180 = vst.msk [vmem:[%s9110_s30 + $0x98] sm:$0xff] %vm2946_vm15, %v5842_v10  ;;  %v5099_v42 = vpop.f32.mrb[3].mxu1  ;;  %v5286_v61 = vmul.f32 %v5842_v10, %v5842_v10  ;;  %v5334_v40 = vsel %vm2946_vm15, %v5285_v0, 0.0  ;;  %v5231_v31 = vsel %vm2946_vm15, %v5842_v10, 0.0 }
 0x65d   : > { %v5330_v15 = vsel %vm2946_vm15, %v5283_v29, 0.0  ;;  %5178 = vst.msk [vmem:[%s9110_s30 + $0x88] sm:$0xff] %vm2946_vm15, %v5099_v42  ;;  %v5227_v21 = vsel %vm2946_vm15, %v5099_v42, 0.0  ;;  %v5284_v5 = vmul.f32 %v5099_v42, %v5099_v42 }
 0x65e   : > { %v5331_v45 = vadd.f32 %v5330_v15, %v5329_v25  ;;  %v5228_v34 = vadd.f32 %v5227_v21, %v5226_v24  ;;  %v5336_v47 = vsel %vm2946_vm15, %v5286_v61, 0.0 }
 0x65f   : > { %v5332_v54 = vsel %vm2946_vm15, %v5284_v5, 0.0 }
 0x660   : > { %v5230_v63 = vadd.f32 %v5229_v20, %v5228_v34  ;;  %v5333_v60 = vadd.f32 %v5332_v54, %v5331_v45 }
 0x662   : > { %v5335_v46 = vadd.f32 %v5334_v40, %v5333_v60  ;;  %v5232_v50 = vadd.f32 %v5231_v31, %v5230_v63 }
 0x664   : > { %v5337_v4 = vadd.f32 %v5336_v47, %v5335_v46 }
 0x685   : > { %v5845_v44 = vpop.f32.mrb[4].mxu1 }
 0x686   : > { %5183 = vst.msk [vmem:[%s9110_s30 + $0xb0] sm:$0xff] %vm2946_vm15, %v5845_v44  ;;  %v5112_v32 = vpop.f32.mrb[5].mxu1  ;;  %v5289_v19 = vmul.f32 %v5845_v44, %v5845_v44  ;;  %v5237_v57 = vsel %vm2946_vm15, %v5845_v44, 0.0 }
 0x687   : > { %5181 = vst.msk [vmem:[%s9110_s30 + $0xa0] sm:$0xff] %vm2946_vm15, %v5112_v32  ;;  %v5233_v14 = vsel %vm2946_vm15, %v5112_v32, 0.0  ;;  %v5287_v62 = vmul.f32 %v5112_v32, %v5112_v32  ;;  %v5846_v30 = vpop.f32.mrb[6].mxu1 }
 0x688   : > { %v5234_v43 = vadd.f32 %v5233_v14, %v5232_v50  ;;  %5184 = vst.msk [vmem:[%s9110_s30 + $0xb8] sm:$0xff] %vm2946_vm15, %v5846_v30  ;;  %v5115_v23 = vpop.f32.mrb[7].mxu1  ;;  %v5290_v18 = vmul.f32 %v5846_v30, %v5846_v30  ;;  %v5342_v17 = vsel %vm2946_vm15, %v5289_v19, 0.0  ;;  %v5239_v58 = vsel %vm2946_vm15, %v5846_v30, 0.0 }
 0x689   : > { %v5338_v38 = vsel %vm2946_vm15, %v5287_v62, 0.0  ;;  %5182 = vst.msk [vmem:[%s9110_s30 + $0xa8] sm:$0xff] %vm2946_vm15, %v5115_v23  ;;  %v5235_v6 = vsel %vm2946_vm15, %v5115_v23, 0.0  ;;  %v5288_v49 = vmul.f32 %v5115_v23, %v5115_v23 }
 0x68a   : > { %v5339_v1 = vadd.f32 %v5338_v38, %v5337_v4  ;;  %v5236_v12 = vadd.f32 %v5235_v6, %v5234_v43  ;;  %v5344_v13 = vsel %vm2946_vm15, %v5290_v18, 0.0 }
 0x68b   : > { %v5340_v39 = vsel %vm2946_vm15, %v5288_v49, 0.0 }
 0x68c   : > { %v5238_v37 = vadd.f32 %v5237_v57, %v5236_v12  ;;  %v5341_v28 = vadd.f32 %v5340_v39, %v5339_v1 }
 0x68e   : > { %v5343_v53 = vadd.f32 %v5342_v17, %v5341_v28  ;;  %v5240_v51 = vadd.f32 %v5239_v58, %v5238_v37  ;;  %v5193_v28 = vld [vmem:[#allocation4 + $0x2] sm:$0x1] }
 0x690   : > { %v5345_v9 = vadd.f32 %v5344_v13, %v5343_v53  ;;  %v5266_v53 = vld [vmem:[#allocation4 + $0x3] sm:$0x1] }
 0x6b1   : > { %v5849_v22 = vpop.f32.mrb[8].mxu1 }
 0x6b2   : > { %5187 = vst.msk [vmem:[%s9110_s30 + $0xd0] sm:$0xff] %vm2946_vm15, %v5849_v22  ;;  %v5128_v27 = vpop.f32.mrb[9].mxu1  ;;  %v5293_v35 = vmul.f32 %v5849_v22, %v5849_v22  ;;  %v5245_v36 = vsel %vm2946_vm15, %v5849_v22, 0.0 }
 0x6b3   : > { %5185 = vst.msk [vmem:[%s9110_s30 + $0xc0] sm:$0xff] %vm2946_vm15, %v5128_v27  ;;  %v5241_v55 = vsel %vm2946_vm15, %v5128_v27, 0.0  ;;  %v5291_v7 = vmul.f32 %v5128_v27, %v5128_v27  ;;  %v5850_v16 = vpop.f32.mrb[10].mxu1 }
 0x6b4   : > { %v5242_v52 = vadd.f32 %v5241_v55, %v5240_v51  ;;  %5188 = vst.msk [vmem:[%s9110_s30 + $0xd8] sm:$0xff] %vm2946_vm15, %v5850_v16  ;;  %v5131_v59 = vpop.f32.mrb[11].mxu1  ;;  %v5294_v26 = vmul.f32 %v5850_v16, %v5850_v16  ;;  %v5350_v2 = vsel %vm2946_vm15, %v5293_v35, 0.0  ;;  %v5247_v29 = vsel %vm2946_vm15, %v5850_v16, 0.0 }
 0x6b5   : > { %v5346_v41 = vsel %vm2946_vm15, %v5291_v7, 0.0  ;;  %5186 = vst.msk [vmem:[%s9110_s30 + $0xc8] sm:$0xff] %vm2946_vm15, %v5131_v59  ;;  %v5243_v56 = vsel %vm2946_vm15, %v5131_v59, 0.0  ;;  %v5292_v8 = vmul.f32 %v5131_v59, %v5131_v59 }
 0x6b6   : > { %v5347_v3 = vadd.f32 %v5346_v41, %v5345_v9  ;;  %v5244_v33 = vadd.f32 %v5243_v56, %v5242_v52  ;;  %v5352_v42 = vsel %vm2946_vm15, %v5294_v26, 0.0 }
 0x6b7   : > { %v5348_v25 = vsel %vm2946_vm15, %v5292_v8, 0.0 }
 0x6b8   : > { %v5246_v11 = vadd.f32 %v5245_v36, %v5244_v33  ;;  %v5349_v48 = vadd.f32 %v5348_v25, %v5347_v3 }
 0x6ba   : > { %v5351_v10 = vadd.f32 %v5350_v2, %v5349_v48  ;;  %v5248_v24 = vadd.f32 %v5247_v29, %v5246_v11 }
 0x6bc   : > { %v5353_v0 = vadd.f32 %v5352_v42, %v5351_v10 }
 0x6da   : > { %v5853_v15 = vpop.f32.mrb[12].mxu1 }
 0x6db   : > { %5191 = vst.msk [vmem:[%s9110_s30 + $0xf0] sm:$0xff] %vm2946_vm15, %v5853_v15  ;;  %v5144_v21 = vpop.f32.mrb[13].mxu1  ;;  %v5297_v54 = vmul.f32 %v5853_v15, %v5853_v15  ;;  %v5253_v50 = vsel %vm2946_vm15, %v5853_v15, 0.0 }
 0x6dc   : > { %5189 = vst.msk [vmem:[%s9110_s30 + $0xe0] sm:$0xff] %vm2946_vm15, %v5144_v21  ;;  %v5249_v5 = vsel %vm2946_vm15, %v5144_v21, 0.0  ;;  %v5295_v45 = vmul.f32 %v5144_v21, %v5144_v21  ;;  %v5854_v34 = vpop.f32.mrb[14].mxu1 }
 0x6dd   : > { %v5250_v20 = vadd.f32 %v5249_v5, %v5248_v24  ;;  %5192 = vst.msk [vmem:[%s9110_s30 + $0xf8] sm:$0xff] %vm2946_vm15, %v5854_v34  ;;  %v5147_v61 = vpop.f32.mrb[15].mxu1  ;;  %v5298_v47 = vmul.f32 %v5854_v34, %v5854_v34  ;;  %v5358_v14 = vsel %vm2946_vm15, %v5297_v54, 0.0  ;;  %v5255_v62 = vsel %vm2946_vm15, %v5854_v34, 0.0 }
 0x6de   : > { %v5354_v63 = vsel %vm2946_vm15, %v5295_v45, 0.0  ;;  %5190 = vst.msk [vmem:[%s9110_s30 + $0xe8] sm:$0xff] %vm2946_vm15, %v5147_v61  ;;  %v5251_v60 = vsel %vm2946_vm15, %v5147_v61, 0.0  ;;  %v5296_v40 = vmul.f32 %v5147_v61, %v5147_v61 }
 0x6df   : > { %v5355_v31 = vadd.f32 %v5354_v63, %v5353_v0  ;;  %v5252_v46 = vadd.f32 %v5251_v60, %v5250_v20  ;;  %v5360_v23 = vsel %vm2946_vm15, %v5298_v47, 0.0 }
 0x6e0   : > { %v5356_v4 = vsel %vm2946_vm15, %v5296_v40, 0.0 }
 0x6e1   : > { %v5254_v44 = vadd.f32 %v5253_v50, %v5252_v46  ;;  %v5357_v32 = vadd.f32 %v5356_v4, %v5355_v31 }
 0x6e3   : > { %v5256_v30 = vadd.f32 %v5255_v62, %v5254_v44  ;;  %v5359_v43 = vadd.f32 %v5358_v14, %v5357_v32 }
 0x6e5   : > { %v5257_v19 = vrot.slane %v5256_v30, 4  ;;  %v5361_v38 = vadd.f32 %v5360_v23, %v5359_v43 }
 0x6e7   : > { %v5258_v6 = vadd.f32 %v5257_v19, %v5256_v30  ;;  %v5362_v49 = vrot.slane %v5361_v38, 4 }
 0x6e9   : > { %v5259_v1 = vrot.slane %v5258_v6, 2  ;;  %v5363_v12 = vadd.f32 %v5362_v49, %v5361_v38 }
 0x6eb   : > { %v5260_v57 = vadd.f32 %v5259_v1, %v5258_v6  ;;  %v5364_v18 = vrot.slane %v5363_v12, 2 }
 0x6ed   : > { %v5261_v39 = vrot.slane %v5260_v57, 1  ;;  %v5365_v37 = vadd.f32 %v5364_v18, %v5363_v12 }
 0x6ef   : > { %v5262_v17 = vadd.f32 %v5261_v39, %v5260_v57  ;;  %v5366_v58 = vrot.slane %v5365_v37, 1 }
 0x6f1   : > { %v5263_v51 = vadd.f32 %v5262_v17, %v5193_v28  ;;  %v5367_v13 = vadd.f32 %v5366_v58, %v5365_v37 }
 0x6f3   : > { %5265 = vst.msk [vmem:[#allocation4 + $0x2] sm:$0x1] %vm5264_vm11, %v5263_v51  ;;  %v5368_v9 = vadd.f32 %v5367_v13, %v5266_v53 }
 0x6f5   : > { %5369 = vst.msk [vmem:[#allocation4 + $0x3] sm:$0x1] %vm5264_vm11, %v5368_v9 }
 0x6f6 PF: > { %p5731_p13 = scmp.ne.s32.totalorder %s6238_s16, 2 }
 0x6f7   : > { %p5732_p0 = scmp.ne.s32.totalorder (!%p5731_p13), %s6234_s15, 0 }
 0x6f8   : > { %5373 = sbr.rel (%p5731_p13) target bundleno = 1860 (0x744), region = 56 }
 0x6ff   : > { %5376 = sbr.rel (%p5732_p0) target bundleno = 1818 (0x71a), region = 60  ;;  %v5377_v22 = vld [vmem:[#allocation4 + $0x2] sm:$0x1] (!%p5732_p0)  ;;  %v5379_v27 = vld [vmem:[#allocation4 + $0x3] sm:$0x1] (!%p5732_p0)  ;;  %vm5387_vm12 = vcmask (!%p5732_p0), 24576  }
 0x700   : > { %v5378_v55 = vmul.f32 (!%p5732_p0), 0.001953125, %v5377_v22  ;;  %v5380_v7 = vmul.f32 (!%p5732_p0), 0.001953125, %v5379_v27  ;;  %v5383_v35 = vld [vmem:[%s9586_s3 + $0x2] sm:$0x1] (!%p5732_p0)  ;;  %v5389_v8 = vld [vmem:[%s9586_s3 + $0x3] sm:$0x1] (!%p5732_p0) }
 0x702   : > { %v5381_v16 = vmul.f32 (!%p5732_p0), %v5378_v55, %v5378_v55 }
 0x704   : > { %v5382_v52 = vsub.f32 (!%p5732_p0), %v5380_v7, %v5381_v16 }
 0x706   : > { %v5384_v59 = vadd.f32 1e-05, %v5382_v52 }
 0x708   : > { %6210 = vrsqrt.f32 %v5384_v59 }
 0x712   : > { %v6211_v41 = vpop.eup %6210 }
 0x713   : > { %v5386_v56 = vmul.f32 %v6211_v41, %v5383_v35 }
 0x715   : > { %5388 = vst.msk [vmem:[#allocation4 + $0x6] sm:$0x1] %vm5387_vm12, %v5386_v56  ;;  %v5390_v3 = vmul.f32 %v5386_v56, %v5378_v55 }
 0x717   : > { %v5391_v33 = vsub.f32 %v5389_v8, %v5390_v3 }
 0x719   : > { %5392 = vst.msk [vmem:[#allocation4 + $0x7] sm:$0x1] %vm5387_vm12, %v5391_v33 }
 0x71a PF: > { %s5733_s8 = sshll.u32 %s6234_s15, 8  ;;  %v5501_v11 = vld [vmem:[%s6336_s26] sm:$0xff]  ;;  %v5502_v24 = vld [vmem:[%s6336_s26 + $0x8] sm:$0xff]  ;;  %vm5597_vm13 = vcmask 31744   ;;  %v5503_v21 = vld [vmem:[%s6336_s26 + $0x10] sm:$0xff] }
 0x71b   : > { %s9372_s11 = scalar_lea.vmem %s9587_s4, %s5733_s8  ;;  %v5504_v60 = vld [vmem:[%s6336_s26 + $0x18] sm:$0xff]  ;;  %v5505_v40 = vld [vmem:[%s6336_s26 + $0x20] sm:$0xff]  ;;  %v5506_v4 = vld [vmem:[%s6336_s26 + $0x28] sm:$0xff] }
 0x71c   : > { %v9367_v36 = vld [vmem:[#allocation4 + $0x6] ss:$0 sm:$0xff]  ;;  %v5395_v25 = vld [vmem:[%s9372_s11] sm:$0xff]  ;;  %v5396_v48 = vld [vmem:[%s9372_s11 + $0x8] sm:$0xff] }
 0x71d   : > { %v5397_v2 = vld [vmem:[%s9372_s11 + $0x10] sm:$0xff]  ;;  %v5432_v29 = vmul.f32 %v9367_v36, %v5395_v25  ;;  %v5433_v10 = vmul.f32 %v9367_v36, %v5396_v48  ;;  %v5398_v0 = vld [vmem:[%s9372_s11 + $0x18] sm:$0xff]  ;;  %v5399_v15 = vld [vmem:[%s9372_s11 + $0x20] sm:$0xff] }
 0x71e   : > { %v5434_v42 = vmul.f32 %v9367_v36, %v5397_v2  ;;  %v5435_v5 = vmul.f32 %v9367_v36, %v5398_v0  ;;  %v5436_v45 = vmul.f32 %v9367_v36, %v5399_v15  ;;  %v5400_v34 = vld [vmem:[%s9372_s11 + $0x28] sm:$0xff]  ;;  %v5401_v20 = vld [vmem:[%s9372_s11 + $0x30] sm:$0xff]  ;;  %v5402_v46 = vld [vmem:[%s9372_s11 + $0x38] sm:$0xff] }
 0x71f   : > { %v5437_v31 = vmul.f32 %v9367_v36, %v5400_v34  ;;  %v5438_v44 = vmul.f32 %v9367_v36, %v5401_v20  ;;  %v5439_v32 = vmul.f32 %v9367_v36, %v5402_v46  ;;  %v5507_v23 = vld [vmem:[%s6336_s26 + $0x30] sm:$0xff]  ;;  %v5508_v19 = vld [vmem:[%s6336_s26 + $0x38] sm:$0xff]  ;;  %v5403_v12 = vld [vmem:[%s9372_s11 + $0x40] sm:$0xff] }
 0x720   : > { %v9374_v26 = vld [vmem:[#allocation4 + $0x7] ss:$0 sm:$0xff]  ;;  %v5404_v57 = vld [vmem:[%s9372_s11 + $0x48] sm:$0xff]  ;;  %v5406_v58 = vld [vmem:[%s9372_s11 + $0x58] sm:$0xff]  ;;  %v5440_v7 = vmul.f32 %v9367_v36, %v5403_v12 }
 0x721   : > { %v5469_v61 = vadd.f32 %v9374_v26, %v5432_v29  ;;  %v5470_v54 = vadd.f32 %v9374_v26, %v5433_v10  ;;  %v5471_v63 = vadd.f32 %v9374_v26, %v5434_v42  ;;  %v5472_v50 = vadd.f32 %v9374_v26, %v5435_v5  ;;  %v5405_v18 = vld [vmem:[%s9372_s11 + $0x50] sm:$0xff]  ;;  %v5407_v53 = vld [vmem:[%s9372_s11 + $0x60] sm:$0xff]  ;;  %v5408_v27 = vld [vmem:[%s9372_s11 + $0x68] sm:$0xff] }
 0x722   : > { %v5473_v47 = vadd.f32 %v9374_v26, %v5436_v45  ;;  %v5474_v43 = vadd.f32 %v9374_v26, %v5437_v31  ;;  %v5475_v49 = vadd.f32 %v9374_v26, %v5438_v44  ;;  %v5476_v1 = vadd.f32 %v9374_v26, %v5439_v32  ;;  %v5409_v59 = vld [vmem:[%s9372_s11 + $0x70] sm:$0xff]  ;;  %v5410_v35 = vld [vmem:[%s9372_s11 + $0x78] sm:$0xff]  ;;  %v5509_v8 = vld [vmem:[%s6336_s26 + $0x40] sm:$0xff] }
 0x723   : > { %v5533_v14 = vadd.f32 %v5501_v11, %v5469_v61  ;;  %v5534_v62 = vadd.f32 %v5502_v24, %v5470_v54  ;;  %v5535_v30 = vadd.f32 %v5503_v21, %v5471_v63  ;;  %v5536_v38 = vadd.f32 %v5504_v60, %v5472_v50  ;;  %v5510_v3 = vld [vmem:[%s6336_s26 + $0x48] sm:$0xff]  ;;  %v5511_v33 = vld [vmem:[%s6336_s26 + $0x50] sm:$0xff]  ;;  %v5512_v10 = vld [vmem:[%s6336_s26 + $0x58] sm:$0xff] }
 0x724   : > { %v5537_v6 = vadd.f32 %v5505_v40, %v5473_v47  ;;  %v5538_v17 = vadd.f32 %v5506_v4, %v5474_v43  ;;  %v5539_v9 = vadd.f32 %v5507_v23, %v5475_v49  ;;  %v5540_v22 = vadd.f32 %v5508_v19, %v5476_v1  ;;  %v5513_v24 = vld [vmem:[%s6336_s26 + $0x60] sm:$0xff]  ;;  %v5514_v21 = vld [vmem:[%s6336_s26 + $0x68] sm:$0xff]  ;;  %v5515_v63 = vld [vmem:[%s6336_s26 + $0x70] sm:$0xff] }
 0x725   : > { %v5565_v39 = vmax.f32 %v5533_v14, 0.0  ;;  %v5566_v37 = vmax.f32 %v5534_v62, 0.0  ;;  %v5567_v28 = vmax.f32 %v5535_v30, 0.0  ;;  %v5568_v51 = vmax.f32 %v5536_v38, 0.0  ;;  %v5516_v60 = vld [vmem:[%s6336_s26 + $0x78] sm:$0xff]  ;;  %v5411_v47 = vld [vmem:[%s9372_s11 + $0x80] sm:$0xff] }
 0x726   : > { %v5569_v13 = vmax.f32 %v5537_v6, 0.0  ;;  %v5570_v55 = vmax.f32 %v5538_v17, 0.0  ;;  %v5441_v16 = vmul.f32 %v9367_v36, %v5404_v57  ;;  %v5442_v52 = vmul.f32 %v9367_v36, %v5405_v18  ;;  %v5412_v4 = vld [vmem:[%s9372_s11 + $0x88] sm:$0xff]  ;;  %v5413_v44 = vld [vmem:[%s9372_s11 + $0x90] sm:$0xff]  ;;  %v5414_v43 = vld [vmem:[%s9372_s11 + $0x98] sm:$0xff] }
 0x727   : > { %5598 = vst.msk [vmem:[%s9372_s11] sm:$0xff] %vm5597_vm13, %v5565_v39  ;;  %5599 = vst.msk [vmem:[%s9372_s11 + $0x8] sm:$0xff] %vm5597_vm13, %v5566_v37  ;;  %v5571_v41 = vmax.f32 %v5539_v9, 0.0  ;;  %v5572_v56 = vmax.f32 %v5540_v22, 0.0  ;;  %v5443_v25 = vmul.f32 %v9367_v36, %v5406_v58  ;;  %v5444_v11 = vmul.f32 %v9367_v36, %v5407_v53  ;;  %v5415_v23 = vld [vmem:[%s9372_s11 + $0xa0] sm:$0xff]  ;;  %v5416_v1 = vld [vmem:[%s9372_s11 + $0xa8] sm:$0xff] }
 0x728   : > { %5600 = vst.msk [vmem:[%s9372_s11 + $0x10] sm:$0xff] %vm5597_vm13, %v5567_v28  ;;  %5601 = vst.msk [vmem:[%s9372_s11 + $0x18] sm:$0xff] %vm5597_vm13, %v5568_v51  ;;  %v5477_v48 = vadd.f32 %v9374_v26, %v5440_v7  ;;  %v5478_v2 = vadd.f32 %v9374_v26, %v5441_v16  ;;  %v5479_v29 = vadd.f32 %v9374_v26, %v5442_v52  ;;  %v5417_v37 = vld [vmem:[%s9372_s11 + $0xb0] sm:$0xff]  ;;  %v5418_v28 = vld [vmem:[%s9372_s11 + $0xb8] sm:$0xff] }
 0x729   : > { %5602 = vst.msk [vmem:[%s9372_s11 + $0x20] sm:$0xff] %vm5597_vm13, %v5569_v13  ;;  %5603 = vst.msk [vmem:[%s9372_s11 + $0x28] sm:$0xff] %vm5597_vm13, %v5570_v55  ;;  %v5445_v42 = vmul.f32 %v9367_v36, %v5408_v27  ;;  %v5480_v0 = vadd.f32 %v9374_v26, %v5443_v25  ;;  %v5481_v15 = vadd.f32 %v9374_v26, %v5444_v11  ;;  %v5517_v53 = vld [vmem:[%s6336_s26 + $0x80] sm:$0xff]  ;;  %v5518_v51 = vld [vmem:[%s6336_s26 + $0x88] sm:$0xff] }
 0x72a   : > { %5604 = vst.msk [vmem:[%s9372_s11 + $0x30] sm:$0xff] %vm5597_vm13, %v5571_v41  ;;  %5605 = vst.msk [vmem:[%s9372_s11 + $0x38] sm:$0xff] %vm5597_vm13, %v5572_v56  ;;  %v5446_v5 = vmul.f32 %v9367_v36, %v5409_v59  ;;  %v5447_v45 = vmul.f32 %v9367_v36, %v5410_v35  ;;  %v5541_v34 = vadd.f32 %v5509_v8, %v5477_v48  ;;  %v5519_v13 = vld [vmem:[%s6336_s26 + $0x90] sm:$0xff]  ;;  %v5520_v16 = vld [vmem:[%s6336_s26 + $0x98] sm:$0xff] }
 0x72b   : > { %v5542_v20 = vadd.f32 %v5510_v3, %v5478_v2  ;;  %v5543_v61 = vadd.f32 %v5511_v33, %v5479_v29  ;;  %v5482_v54 = vadd.f32 %v9374_v26, %v5445_v42  ;;  %v5544_v40 = vadd.f32 %v5512_v10, %v5480_v0  ;;  %v5521_v52 = vld [vmem:[%s6336_s26 + $0xa0] sm:$0xff]  ;;  %v5522_v56 = vld [vmem:[%s6336_s26 + $0xa8] sm:$0xff]  ;;  %v5523_v2 = vld [vmem:[%s6336_s26 + $0xb0] sm:$0xff] }
 0x72c   : > { %v5545_v31 = vadd.f32 %v5513_v24, %v5481_v15  ;;  %v5483_v46 = vadd.f32 %v9374_v26, %v5446_v5  ;;  %v5484_v50 = vadd.f32 %v9374_v26, %v5447_v45  ;;  %v5573_v32 = vmax.f32 %v5541_v34, 0.0  ;;  %v5524_v29 = vld [vmem:[%s6336_s26 + $0xb8] sm:$0xff]  ;;  %v5419_v15 = vld [vmem:[%s9372_s11 + $0xc0] sm:$0xff]  ;;  %v5421_v5 = vld [vmem:[%s9372_s11 + $0xd0] sm:$0xff] }
 0x72d   : > { %v5574_v14 = vmax.f32 %v5542_v20, 0.0  ;;  %v5575_v62 = vmax.f32 %v5543_v61, 0.0  ;;  %v5546_v30 = vadd.f32 %v5514_v21, %v5482_v54  ;;  %v5576_v19 = vmax.f32 %v5544_v40, 0.0  ;;  %v5420_v21 = vld [vmem:[%s9372_s11 + $0xc8] sm:$0xff]  ;;  %v5422_v54 = vld [vmem:[%s9372_s11 + $0xd8] sm:$0xff] }
 0x72e   : > { %v5577_v38 = vmax.f32 %v5545_v31, 0.0  ;;  %v5547_v6 = vadd.f32 %v5515_v63, %v5483_v46  ;;  %v5548_v49 = vadd.f32 %v5516_v60, %v5484_v50  ;;  %5606 = vst.msk [vmem:[%s9372_s11 + $0x40] sm:$0xff] %vm5597_vm13, %v5573_v32  ;;  %v5448_v57 = vmul.f32 %v9367_v36, %v5411_v47  ;;  %v5423_v63 = vld [vmem:[%s9372_s11 + $0xe0] sm:$0xff]  ;;  %v5424_v50 = vld [vmem:[%s9372_s11 + $0xe8] sm:$0xff] }
 0x72f   : > { %5607 = vst.msk [vmem:[%s9372_s11 + $0x48] sm:$0xff] %vm5597_vm13, %v5574_v14  ;;  %5608 = vst.msk [vmem:[%s9372_s11 + $0x50] sm:$0xff] %vm5597_vm13, %v5575_v62  ;;  %v5578_v12 = vmax.f32 %v5546_v30, 0.0  ;;  %v5449_v18 = vmul.f32 %v9367_v36, %v5412_v4  ;;  %v5450_v39 = vmul.f32 %v9367_v36, %v5413_v44  ;;  %v5451_v9 = vmul.f32 %v9367_v36, %v5414_v43  ;;  %v5425_v14 = vld [vmem:[%s9372_s11 + $0xf0] sm:$0xff]  ;;  %v5426_v62 = vld [vmem:[%s9372_s11 + $0xf8] sm:$0xff] }
 0x730   : > { %5609 = vst.msk [vmem:[%s9372_s11 + $0x58] sm:$0xff] %vm5597_vm13, %v5576_v19  ;;  %5610 = vst.msk [vmem:[%s9372_s11 + $0x60] sm:$0xff] %vm5597_vm13, %v5577_v38  ;;  %v5579_v17 = vmax.f32 %v5547_v6, 0.0  ;;  %v5580_v58 = vmax.f32 %v5548_v49, 0.0  ;;  %v5452_v22 = vmul.f32 %v9367_v36, %v5415_v23  ;;  %v5485_v27 = vadd.f32 %v9374_v26, %v5448_v57  ;;  %v5525_v23 = vld [vmem:[%s6336_s26 + $0xc0] sm:$0xff]  ;;  %v5526_v19 = vld [vmem:[%s6336_s26 + $0xc8] sm:$0xff] }
 0x731   : > { %5611 = vst.msk [vmem:[%s9372_s11 + $0x68] sm:$0xff] %vm5597_vm13, %v5578_v12  ;;  %v5486_v55 = vadd.f32 %v9374_v26, %v5449_v18  ;;  %v5487_v7 = vadd.f32 %v9374_v26, %v5450_v39  ;;  %v5453_v59 = vmul.f32 %v9367_v36, %v5416_v1  ;;  %v5488_v35 = vadd.f32 %v9374_v26, %v5451_v9  ;;  %v5527_v38 = vld [vmem:[%s6336_s26 + $0xd0] sm:$0xff]  ;;  %v5528_v18 = vld [vmem:[%s6336_s26 + $0xd8] sm:$0xff]  ;;  %v5529_v39 = vld [vmem:[%s6336_s26 + $0xe0] sm:$0xff] }
 0x732   : > { %5612 = vst.msk [vmem:[%s9372_s11 + $0x70] sm:$0xff] %vm5597_vm13, %v5579_v17  ;;  %5613 = vst.msk [vmem:[%s9372_s11 + $0x78] sm:$0xff] %vm5597_vm13, %v5580_v58  ;;  %v5489_v41 = vadd.f32 %v9374_v26, %v5452_v22  ;;  %v5454_v8 = vmul.f32 %v9367_v36, %v5417_v37  ;;  %v5455_v3 = vmul.f32 %v9367_v36, %v5418_v28  ;;  %v5530_v58 = vld [vmem:[%s6336_s26 + $0xe8] sm:$0xff] }
 0x733   : > { %v5549_v33 = vadd.f32 %v5517_v53, %v5485_v27  ;;  %v5550_v25 = vadd.f32 %v5518_v51, %v5486_v55  ;;  %v5551_v11 = vadd.f32 %v5519_v13, %v5487_v7  ;;  %v5490_v48 = vadd.f32 %v9374_v26, %v5453_v59  ;;  %v5531_v55 = vld [vmem:[%s6336_s26 + $0xf0] sm:$0xff]  ;;  %v5532_v7 = vld [vmem:[%s6336_s26 + $0xf8] sm:$0xff] }
 0x734   : > { %v5552_v10 = vadd.f32 %v5520_v16, %v5488_v35  ;;  %v5553_v24 = vadd.f32 %v5521_v52, %v5489_v41  ;;  %v5491_v42 = vadd.f32 %v9374_v26, %v5454_v8  ;;  %v5492_v0 = vadd.f32 %v9374_v26, %v5455_v3 }
 0x735   : > { %v5581_v45 = vmax.f32 %v5549_v33, 0.0  ;;  %v5582_v34 = vmax.f32 %v5550_v25, 0.0  ;;  %v5583_v20 = vmax.f32 %v5551_v11, 0.0  ;;  %v5554_v61 = vadd.f32 %v5522_v56, %v5490_v48 }
 0x736   : > { %v5584_v60 = vmax.f32 %v5552_v10, 0.0  ;;  %v5585_v40 = vmax.f32 %v5553_v24, 0.0  ;;  %v5555_v31 = vadd.f32 %v5523_v2, %v5491_v42  ;;  %v5556_v46 = vadd.f32 %v5524_v29, %v5492_v0 }
 0x737   : > { %5614 = vst.msk [vmem:[%s9372_s11 + $0x80] sm:$0xff] %vm5597_vm13, %v5581_v45  ;;  %5615 = vst.msk [vmem:[%s9372_s11 + $0x88] sm:$0xff] %vm5597_vm13, %v5582_v34  ;;  %v5586_v47 = vmax.f32 %v5554_v61, 0.0  ;;  %v5456_v4 = vmul.f32 %v9367_v36, %v5419_v15  ;;  %v5457_v44 = vmul.f32 %v9367_v36, %v5420_v21  ;;  %v5458_v32 = vmul.f32 %v9367_v36, %v5421_v5 }
 0x738   : > { %5616 = vst.msk [vmem:[%s9372_s11 + $0x90] sm:$0xff] %vm5597_vm13, %v5583_v20  ;;  %5617 = vst.msk [vmem:[%s9372_s11 + $0x98] sm:$0xff] %vm5597_vm13, %v5584_v60  ;;  %v5587_v30 = vmax.f32 %v5555_v31, 0.0  ;;  %v5588_v43 = vmax.f32 %v5556_v46, 0.0  ;;  %v5459_v6 = vmul.f32 %v9367_v36, %v5422_v54  ;;  %v5460_v49 = vmul.f32 %v9367_v36, %v5423_v63 }
 0x739   : > { %5618 = vst.msk [vmem:[%s9372_s11 + $0xa0] sm:$0xff] %vm5597_vm13, %v5585_v40  ;;  %5619 = vst.msk [vmem:[%s9372_s11 + $0xa8] sm:$0xff] %vm5597_vm13, %v5586_v47  ;;  %v5493_v1 = vadd.f32 %v9374_v26, %v5456_v4  ;;  %v5494_v12 = vadd.f32 %v9374_v26, %v5457_v44  ;;  %v5495_v57 = vadd.f32 %v9374_v26, %v5458_v32 }
 0x73a   : > { %v5461_v37 = vmul.f32 %v9367_v36, %v5424_v50  ;;  %5620 = vst.msk [vmem:[%s9372_s11 + $0xb0] sm:$0xff] %vm5597_vm13, %v5587_v30  ;;  %5621 = vst.msk [vmem:[%s9372_s11 + $0xb8] sm:$0xff] %vm5597_vm13, %v5588_v43  ;;  %v5496_v28 = vadd.f32 %v9374_v26, %v5459_v6  ;;  %v5497_v17 = vadd.f32 %v9374_v26, %v5460_v49 }
 0x73b   : > { %v5462_v53 = vmul.f32 %v9367_v36, %v5425_v14  ;;  %v5463_v51 = vmul.f32 %v9367_v36, %v5426_v62  ;;  %v5557_v13 = vadd.f32 %v5525_v23, %v5493_v1  ;;  %v5558_v9 = vadd.f32 %v5526_v19, %v5494_v12 }
 0x73c   : > { %v5559_v22 = vadd.f32 %v5527_v38, %v5495_v57  ;;  %v5498_v27 = vadd.f32 %v9374_v26, %v5461_v37  ;;  %v5560_v16 = vadd.f32 %v5528_v18, %v5496_v28  ;;  %v5561_v52 = vadd.f32 %v5529_v39, %v5497_v17 }
 0x73d   : > { %v5499_v59 = vadd.f32 %v9374_v26, %v5462_v53  ;;  %v5500_v35 = vadd.f32 %v9374_v26, %v5463_v51  ;;  %v5589_v41 = vmax.f32 %v5557_v13, 0.0  ;;  %v5590_v36 = vmax.f32 %v5558_v9, 0.0 }
 0x73e   : > { %v5591_v56 = vmax.f32 %v5559_v22, 0.0  ;;  %v5562_v8 = vadd.f32 %v5530_v58, %v5498_v27  ;;  %v5592_v3 = vmax.f32 %v5560_v16, 0.0  ;;  %v5593_v33 = vmax.f32 %v5561_v52, 0.0 }
 0x73f   : > { %v5563_v25 = vadd.f32 %v5531_v55, %v5499_v59  ;;  %v5564_v11 = vadd.f32 %v5532_v7, %v5500_v35  ;;  %5622 = vst.msk [vmem:[%s9372_s11 + $0xc0] sm:$0xff] %vm5597_vm13, %v5589_v41  ;;  %5623 = vst.msk [vmem:[%s9372_s11 + $0xc8] sm:$0xff] %vm5597_vm13, %v5590_v36 }
 0x740   : > { %5624 = vst.msk [vmem:[%s9372_s11 + $0xd0] sm:$0xff] %vm5597_vm13, %v5591_v56  ;;  %v5594_v48 = vmax.f32 %v5562_v8, 0.0  ;;  %5625 = vst.msk [vmem:[%s9372_s11 + $0xd8] sm:$0xff] %vm5597_vm13, %v5592_v3 }
 0x741   : > { %5626 = vst.msk [vmem:[%s9372_s11 + $0xe0] sm:$0xff] %vm5597_vm13, %v5593_v33  ;;  %v5595_v26 = vmax.f32 %v5563_v25, 0.0  ;;  %v5596_v2 = vmax.f32 %v5564_v11, 0.0 }
 0x742   : > { %5627 = vst.msk [vmem:[%s9372_s11 + $0xe8] sm:$0xff] %vm5597_vm13, %v5594_v48 }
 0x743   : > { %5628 = vst.msk [vmem:[%s9372_s11 + $0xf0] sm:$0xff] %vm5597_vm13, %v5595_v26  ;;  %5629 = vst.msk [vmem:[%s9372_s11 + $0xf8] sm:$0xff] %vm5597_vm13, %v5596_v2 }
 0x744 PF: > { %s14_s19 = sadd.s32 1, %s6250_s19   ;;  %s9716_s15 = smov %s6242_s17 }
 0x745   : > { %p11_p1 = scmp.ge.s32.totalorder %s14_s19, 8   ;;  %s9717_s16 = smov %s6246_s18 }
 0x746   : > { %s9718_s17 = smov %s9721_s20  ;;  %s9719_s18 = smov %s9725_s21 }
 0x747   :  { %13 = sbr.rel (!%p11_p1) target bundleno = 3 (0x3), region = 94 }

</bundles_post_ra>
